<compile_context>
chip_gen: v6e
topology: v6e:2x2x1
jax: 0.10.0
libtpu: 0.0.40
codegen_flags: <defaults>
</compile_context>

<pallas_src>
import jax
import jax.numpy as jnp
from jax.experimental import pallas as pl
from jax.experimental.pallas import tpu as pltpu

IMG_DIM = 2048
TXT_DIM = 768
CAT_DIM = IMG_DIM + TXT_DIM   # 2816
HID_DIM = 1024
NUM_ANSWERS = 128             # lane-friendly demo value


def _vqa_head_kernel(xi_ref, xt_ref, w1i_ref, w1t_ref, b1_ref, w2_ref, b2_ref,
                     out_ref):
    """One M block of: out = dropout_eval(cat(xi, xt) @ W1 + b1) @ W2 + b2."""
    # fc1 over the concatenated features == sum of two dots (no concat needed).
    h = jnp.dot(xi_ref[...], w1i_ref[...], preferred_element_type=jnp.float32)
    h = h + jnp.dot(xt_ref[...], w1t_ref[...], preferred_element_type=jnp.float32)
    h = h + b1_ref[...]                               # fc1 bias in f32
    # dropout(p=0.5) in eval/inference mode == identity
    out = jnp.dot(h.astype(w2_ref.dtype), w2_ref[...],
                  preferred_element_type=jnp.float32)
    out_ref[...] = (out + b2_ref[...]).astype(out_ref.dtype)


def vqa_head(image_features, question_features, w1_img, w1_txt, b1, w2, b2,
             *, bm_max=256):
    """image_features: (B, 2048) bf16, question_features: (B, 768) bf16,
    w1_img: (2048, 1024) bf16, w1_txt: (768, 1024) bf16, w2: (1024, A) bf16,
    b1: (1024,) f32, b2: (A,) f32  ->  logits (B, A) f32."""
    B = image_features.shape[0]
    A = w2.shape[1]

    if B <= bm_max:
        bm, nm, b_pad = B, 1, B
    else:
        bm = bm_max
        nm = pl.cdiv(B, bm)
        b_pad = nm * bm
        if b_pad != B:                                # zero-pad ragged batch
            pad = b_pad - B
            image_features = jnp.pad(image_features, ((0, pad), (0, 0)))
            question_features = jnp.pad(question_features, ((0, pad), (0, 0)))

    b1_2d = b1.reshape(1, HID_DIM).astype(jnp.float32)
    b2_2d = b2.reshape(1, A).astype(jnp.float32)

    out = pl.pallas_call(
        _vqa_head_kernel,
        out_shape=jax.ShapeDtypeStruct((b_pad, A), jnp.float32),
        grid_spec=pltpu.PrefetchScalarGridSpec(
            num_scalar_prefetch=0,
            grid=(nm,),                                              # M only
            in_specs=[
                pl.BlockSpec((bm, IMG_DIM), lambda m: (m, 0)),       # x_img (streamed)
                pl.BlockSpec((bm, TXT_DIM), lambda m: (m, 0)),       # x_txt (streamed)
                pl.BlockSpec((IMG_DIM, HID_DIM), lambda m: (0, 0)),  # W1_img (resident)
                pl.BlockSpec((TXT_DIM, HID_DIM), lambda m: (0, 0)),  # W1_txt (resident)
                pl.BlockSpec((1, HID_DIM), lambda m: (0, 0)),        # b1     (resident)
                pl.BlockSpec((HID_DIM, A), lambda m: (0, 0)),        # W2     (resident)
                pl.BlockSpec((1, A), lambda m: (0, 0)),              # b2     (resident)
            ],
            out_specs=pl.BlockSpec((bm, A), lambda m: (m, 0)),
        ),
        compiler_params=pltpu.CompilerParams(
            dimension_semantics=("parallel",),        # megacore splits M blocks
            vmem_limit_bytes=32 * 1024 * 1024,        # fits v7x (64 MiB physical)
        ),
    )(image_features, question_features, w1_img, w1_txt, b1_2d, w2, b2_2d)

    return out[:B] if b_pad != B else out


# ----------------------------------------------------------------------------
# Deterministic stand-in backbones (plain-JAX glue, NOT the kernel hot path).
# ----------------------------------------------------------------------------
def image_backbone_standin(images, proj):
    # TODO(synk): stands in for torchvision resnet50 (fc=Identity) -> (B, 2048).
    pooled = jnp.mean(images, axis=(2, 3))            # (B, 3) global-average-pool
    return pooled @ proj                              # (B, 2048)


def text_backbone_standin(input_ids, attention_mask, embed_table):
    # TODO(synk): stands in for BertModel('bert-base-uncased') CLS-token output.
    del attention_mask
    cls_ids = input_ids[:, 0]                         # (B,)
    return embed_table[cls_ids]                       # (B, 768)


if __name__ == "__main__":
    key = jax.random.PRNGKey(0)
    k_img, k_ids, k_proj, k_emb, k_w1, k_b1, k_w2, k_b2 = jax.random.split(key, 8)

    # Small example inputs consistent with the module's forward signature.
    B, H, W, L, VOCAB = 2, 16, 16, 8, 64
    images = jax.random.normal(k_img, (B, 3, H, W), dtype=jnp.float32)        # NCHW
    input_ids = jax.random.randint(k_ids, (B, L), 0, VOCAB, dtype=jnp.int32)
    attention_mask = jnp.ones((B, L), dtype=jnp.int32)

    # Deterministic parameters.  Weights cast to bf16 / split ONCE at "load time".
    img_proj = jax.random.normal(k_proj, (3, IMG_DIM), dtype=jnp.float32) * 0.1
    embed_table = jax.random.normal(k_emb, (VOCAB, TXT_DIM), dtype=jnp.float32) * 0.1
    w1 = (jax.random.normal(k_w1, (CAT_DIM, HID_DIM), dtype=jnp.float32) * 0.02
          ).astype(jnp.bfloat16)
    w1_img, w1_txt = w1[:IMG_DIM], w1[IMG_DIM:]       # (2048,1024) / (768,1024)
    b1 = jax.random.normal(k_b1, (HID_DIM,), dtype=jnp.float32) * 0.02
    w2 = (jax.random.normal(k_w2, (HID_DIM, NUM_ANSWERS), dtype=jnp.float32) * 0.02
          ).astype(jnp.bfloat16)
    b2 = jax.random.normal(k_b2, (NUM_ANSWERS,), dtype=jnp.float32) * 0.02

    # Forward pass (backbone glue in JAX, fused cat->fc1->dropout->fc2 in Pallas).
    image_features = image_backbone_standin(images, img_proj)                 # (B, 2048)
    question_features = text_backbone_standin(input_ids, attention_mask,
                                              embed_table)                    # (B, 768)
    logits = vqa_head(image_features.astype(jnp.bfloat16),
                      question_features.astype(jnp.bfloat16),
                      w1_img, w1_txt, b1, w2, b2)                             # (B, 128)
    logits = jax.block_until_ready(logits)

    # Reference check: same math (bf16 matmul inputs, f32 accumulation) in XLA.
    combined = jnp.concatenate([image_features, question_features], axis=1)   # (B, 2816)
    h_ref = jnp.dot(combined.astype(jnp.bfloat16), w1,
                    preferred_element_type=jnp.float32) + b1
    ref = jnp.dot(h_ref.astype(jnp.bfloat16), w2,
                  preferred_element_type=jnp.float32) + b2
    assert logits.shape == (B, NUM_ANSWERS)
    assert jnp.allclose(logits, ref, atol=5e-3, rtol=5e-3)

    print("KERNEL_OK")
</pallas_src>

<mosaic_0001>
module attributes {stable_mosaic.version = 11 : i64} {
  func.func @_vqa_head_kernel(%arg0: i32, %arg1: memref<2x2048xbf16, #tpu.memory_space<vmem>>, %arg2: memref<2x768xbf16, #tpu.memory_space<vmem>>, %arg3: memref<2048x1024xbf16, #tpu.memory_space<vmem>>, %arg4: memref<768x1024xbf16, #tpu.memory_space<vmem>>, %arg5: memref<1x1024xf32, #tpu.memory_space<vmem>>, %arg6: memref<1024x128xbf16, #tpu.memory_space<vmem>>, %arg7: memref<1x128xf32, #tpu.memory_space<vmem>>, %arg8: memref<2x128xf32, #tpu.memory_space<vmem>>) attributes {dimension_semantics = [#tpu.dimension_semantics<parallel>], iteration_bounds = array<i64: 1>, scalar_prefetch = 0 : i64, scratch_operands = 0 : i64, tpu.core_type = #tpu.core_type<tc>, window_params = [{transform_indices = @transform_0, window_bounds = array<i64: 2, 2048>}, {transform_indices = @transform_1, window_bounds = array<i64: 2, 768>}, {pipeline_mode = #tpu.pipeline_mode<synchronous>, transform_indices = @transform_2, window_bounds = array<i64: 2048, 1024>}, {pipeline_mode = #tpu.pipeline_mode<synchronous>, transform_indices = @transform_3, window_bounds = array<i64: 768, 1024>}, {pipeline_mode = #tpu.pipeline_mode<synchronous>, transform_indices = @transform_4, window_bounds = array<i64: 1, 1024>}, {pipeline_mode = #tpu.pipeline_mode<synchronous>, transform_indices = @transform_5, window_bounds = array<i64: 1024, 128>}, {pipeline_mode = #tpu.pipeline_mode<synchronous>, transform_indices = @transform_6, window_bounds = array<i64: 1, 128>}, {transform_indices = @transform_7, window_bounds = array<i64: 2, 128>}]} {
    %c0 = arith.constant 0 : index
    %c0_0 = arith.constant 0 : index
    %0 = vector.load %arg1[%c0, %c0_0] : memref<2x2048xbf16, #tpu.memory_space<vmem>>, vector<2x2048xbf16>
    %c0_1 = arith.constant 0 : index
    %c0_2 = arith.constant 0 : index
    %1 = vector.load %arg3[%c0_1, %c0_2] : memref<2048x1024xbf16, #tpu.memory_space<vmem>>, vector<2048x1024xbf16>
    %cst = arith.constant dense<0.000000e+00> : vector<2x1024xf32>
    %2 = tpu.matmul %0, %1, %cst {dimension_numbers = #tpu.dot_dimension_numbers<[1], [0], [0], [1], [0, 0, 1, 1], [], []>} : vector<2x2048xbf16>, vector<2048x1024xbf16>, vector<2x1024xf32> -> vector<2x1024xf32>
    %c0_3 = arith.constant 0 : index
    %c0_4 = arith.constant 0 : index
    %3 = vector.load %arg2[%c0_3, %c0_4] : memref<2x768xbf16, #tpu.memory_space<vmem>>, vector<2x768xbf16>
    %c0_5 = arith.constant 0 : index
    %c0_6 = arith.constant 0 : index
    %4 = vector.load %arg4[%c0_5, %c0_6] : memref<768x1024xbf16, #tpu.memory_space<vmem>>, vector<768x1024xbf16>
    %cst_7 = arith.constant dense<0.000000e+00> : vector<2x1024xf32>
    %5 = tpu.matmul %3, %4, %cst_7 {dimension_numbers = #tpu.dot_dimension_numbers<[1], [0], [0], [1], [0, 0, 1, 1], [], []>} : vector<2x768xbf16>, vector<768x1024xbf16>, vector<2x1024xf32> -> vector<2x1024xf32>
    %6 = arith.addf %2, %5 : vector<2x1024xf32>
    %c0_8 = arith.constant 0 : index
    %c0_9 = arith.constant 0 : index
    %7 = vector.load %arg5[%c0_8, %c0_9] : memref<1x1024xf32, #tpu.memory_space<vmem>>, vector<1x1024xf32>
    %8 = vector.broadcast %7 : vector<1x1024xf32> to vector<2x1024xf32>
    %9 = arith.addf %6, %8 : vector<2x1024xf32>
    %10 = arith.truncf %9 : vector<2x1024xf32> to vector<2x1024xbf16>
    %c0_10 = arith.constant 0 : index
    %c0_11 = arith.constant 0 : index
    %11 = vector.load %arg6[%c0_10, %c0_11] : memref<1024x128xbf16, #tpu.memory_space<vmem>>, vector<1024x128xbf16>
    %cst_12 = arith.constant dense<0.000000e+00> : vector<2x128xf32>
    %12 = tpu.matmul %10, %11, %cst_12 {dimension_numbers = #tpu.dot_dimension_numbers<[1], [0], [0], [1], [0, 0, 1, 1], [], []>} : vector<2x1024xbf16>, vector<1024x128xbf16>, vector<2x128xf32> -> vector<2x128xf32>
    %c0_13 = arith.constant 0 : index
    %c0_14 = arith.constant 0 : index
    %13 = vector.load %arg7[%c0_13, %c0_14] : memref<1x128xf32, #tpu.memory_space<vmem>>, vector<1x128xf32>
    %14 = vector.broadcast %13 : vector<1x128xf32> to vector<2x128xf32>
    %15 = arith.addf %12, %14 : vector<2x128xf32>
    %c0_15 = arith.constant 0 : index
    %c0_16 = arith.constant 0 : index
    %16 = vector.load %arg8[%c0_15, %c0_16] : memref<2x128xf32, #tpu.memory_space<vmem>>, vector<2x128xf32>
    tpu.vector_store %arg8[%c0_15, %c0_16], %15 {strides = array<i32>} : memref<2x128xf32, #tpu.memory_space<vmem>>, vector<2x128xf32>,
    return
  }
  func.func @transform_0(%arg0: i32) -> (i32, i32) {
    %c0_i32 = arith.constant 0 : i32
    %c0_i32_0 = arith.constant 0 : i32
    return %arg0, %c0_i32 : i32, i32
  }
  func.func @transform_1(%arg0: i32) -> (i32, i32) {
    %c0_i32 = arith.constant 0 : i32
    %c0_i32_0 = arith.constant 0 : i32
    return %arg0, %c0_i32 : i32, i32
  }
  func.func @transform_2(%arg0: i32) -> (i32, i32) {
    %c0_i32 = arith.constant 0 : i32
    %c0_i32_0 = arith.constant 0 : i32
    %c0_i32_1 = arith.constant 0 : i32
    return %c0_i32, %c0_i32_0 : i32, i32
  }
  func.func @transform_3(%arg0: i32) -> (i32, i32) {
    %c0_i32 = arith.constant 0 : i32
    %c0_i32_0 = arith.constant 0 : i32
    %c0_i32_1 = arith.constant 0 : i32
    return %c0_i32, %c0_i32_0 : i32, i32
  }
  func.func @transform_4(%arg0: i32) -> (i32, i32) {
    %c0_i32 = arith.constant 0 : i32
    %c0_i32_0 = arith.constant 0 : i32
    %c0_i32_1 = arith.constant 0 : i32
    return %c0_i32, %c0_i32_0 : i32, i32
  }
  func.func @transform_5(%arg0: i32) -> (i32, i32) {
    %c0_i32 = arith.constant 0 : i32
    %c0_i32_0 = arith.constant 0 : i32
    %c0_i32_1 = arith.constant 0 : i32
    return %c0_i32, %c0_i32_0 : i32, i32
  }
  func.func @transform_6(%arg0: i32) -> (i32, i32) {
    %c0_i32 = arith.constant 0 : i32
    %c0_i32_0 = arith.constant 0 : i32
    %c0_i32_1 = arith.constant 0 : i32
    return %c0_i32, %c0_i32_0 : i32, i32
  }
  func.func @transform_7(%arg0: i32) -> (i32, i32) {
    %c0_i32 = arith.constant 0 : i32
    %c0_i32_0 = arith.constant 0 : i32
    return %arg0, %c0_i32 : i32, i32
  }
}

</mosaic_0001>

<bundles_post_ra>
// kernel: tpu_custom_call.1
= control target key start
LH: loop header
LB: loop body
LE: loop exit
PB: predicated region body
PF: predicated region fallthrough
CT: control target
= control target key end

     0   :  { %12 = vsyncpa [#allocation3], 0  ;;  %s13554_s0 = inlined_call_operand.hbm [shape: bf16[2,2048], index: 0, kind: input, shape index: {}]   ;;  %s13555_s1 = inlined_call_operand.hbm [shape: bf16[2,768], index: 1, kind: input, shape index: {}]   ;;  %s13556_s2 = inlined_call_operand.hbm [shape: bf16[2048,1024], index: 2, kind: input, shape index: {}]   ;;  %s13557_s3 = inlined_call_operand.hbm [shape: bf16[768,1024], index: 3, kind: input, shape index: {}]   ;;  %s13558_s4 = inlined_call_operand.hbm [shape: f32[1,1024], index: 4, kind: input, shape index: {}]   ;;  %s13559_s5 = inlined_call_operand.hbm [shape: bf16[1024,128], index: 5, kind: input, shape index: {}]   ;;  %s13560_s6 = inlined_call_operand.hbm [shape: f32[1,128], index: 6, kind: input, shape index: {}]   ;;  %s13561_s7 = inlined_call_operand.hbm [shape: f32[2,128], index: 7, kind: output, shape index: {}]  }
   0x1   :  { %13 = vsyncpa [#allocation6], 0 }
   0x2   :  { %14 = vsyncpa [#allocation9], 0 }
   0x3   :  { %15 = vsyncpa [#allocation12], 0 }
   0x4   :  { %16 = vsyncpa [#allocation4], 0  ;;  %s13107_s24 = smov [#allocation5]  }
   0x5   :  { %s33_s25 = sshll.u32 %s13107_s24, 4  ;;  %s34_s25 = int_to_ptr.vmem [resolvable:$true] %s33_s25 }
   0x6   :  { %s12945_s26 = scalar_lea.vmem %s34_s25, 96  ;;  %p12950_p1 = scmp.lt.s32.totalorder %s34_s25, %s34_s25 }
   0x7   :  { %p12946_p0 = scmp.ne.s32.totalorder %s34_s25, %s12945_s26  ;;  %p12951_p2 = scmp.lt.s32.totalorder %s12945_s26, %s12945_s26 }
   0x9   :  { %p12952_p3 = por %p12951_p2, %p12950_p1 }
   0xb   :  { %p12953_p4 = pnand %p12952_p3, %p12946_p0 }
   0xd   :  { %12956 = shalt.err (!%p12953_p4)
}
   0xe   :  { %36 = dma.hbm_to_vmem [thread:$0]  %s13555_s1, 96, %s34_s25, [#allocation6]  }
   0xf   :  { %s13108_s29 = smov [#allocation8]   ;;  %s13109_s8 = smov [#allocation11]  }
  0x10   :  { %s54_s30 = sshll.u32 %s13108_s29, 4  ;;  %s76_s9 = sshll.u32 %s13109_s8, 4  ;;  %s55_s30 = int_to_ptr.vmem [resolvable:$true] %s54_s30  ;;  %s77_s9 = int_to_ptr.vmem [resolvable:$true] %s76_s9 }
  0x11   :  { %s12965_s10 = scalar_lea.vmem %s55_s30, 49152  ;;  %p12970_p6 = scmp.lt.s32.totalorder %s55_s30, %s55_s30 }
  0x12   :  { %p12966_p5 = scmp.ne.s32.totalorder %s55_s30, %s12965_s10  ;;  %p12971_p7 = scmp.lt.s32.totalorder %s12965_s10, %s12965_s10 }
  0x14   :  { %p12972_p8 = por %p12971_p7, %p12970_p6 }
  0x16   :  { %p12973_p9 = pnand %p12972_p8, %p12966_p5 }
  0x18   :  { %12976 = shalt.err (!%p12973_p9)
}
  0x19   :  { %s13110_s11 = smov 512   ;;  %s13111_s12 = smov 32  }
  0x1a   :  { %60 = dma.hbm_to_vmem [thread:$0]  %s13557_s3, 49152, %s55_s30, [#allocation9], %s13110_s11, %s13110_s11, %s13111_s12  }
  0x1b   :  { %s12985_s1 = scalar_lea.vmem %s77_s9, 8192  ;;  %p12990_p11 = scmp.lt.s32.totalorder %s77_s9, %s77_s9 }
  0x1c   :  { %p12986_p10 = scmp.ne.s32.totalorder %s77_s9, %s12985_s1  ;;  %p12991_p12 = scmp.lt.s32.totalorder %s12985_s1, %s12985_s1 }
  0x1e   :  { %p12992_p13 = por %p12991_p12, %p12990_p11 }
  0x20   :  { %p12993_p0 = pnand %p12992_p13, %p12986_p10 }
  0x22   :  { %12996 = shalt.err (!%p12993_p0)
}
  0x23   :  { %s13112_s15 = smov 64   ;;  %s13113_s16 = smov 4  }
  0x24   :  { %82 = dma.hbm_to_vmem [thread:$0]  %s13559_s5, 8192, %s77_s9, [#allocation12], %s13112_s15, %s13112_s15, %s13113_s16  }
  0x25   :  { %s13114_s19 = smov [#allocation2]   ;;  %s13115_s21 = smov [#allocation7]  }
  0x26   :  { %s23_s20 = sshll.u32 %s13114_s19, 4  ;;  %s42_s22 = sshll.u32 %s13115_s21, 4  ;;  %s24_s20 = int_to_ptr.vmem [resolvable:$true] %s23_s20  ;;  %s43_s22 = int_to_ptr.vmem [resolvable:$true] %s42_s22 }
  0x27   :  { %s13005_s3 = scalar_lea.vmem %s24_s20, 256  ;;  %p13010_p2 = scmp.lt.s32.totalorder %s24_s20, %s24_s20 }
  0x28   :  { %p13006_p1 = scmp.ne.s32.totalorder %s24_s20, %s13005_s3  ;;  %p13011_p3 = scmp.lt.s32.totalorder %s13005_s3, %s13005_s3 }
  0x2a   :  { %p13012_p4 = por %p13011_p3, %p13010_p2 }
  0x2c   :  { %p13013_p5 = pnand %p13012_p4, %p13006_p1 }
  0x2e   :  { %13016 = shalt.err (!%p13013_p5)
}
  0x2f   :  { %26 = dma.hbm_to_vmem [thread:$0]  %s13554_s0, 256, %s24_s20, [#allocation3]  }
  0x30   :  { %s13025_s25 = scalar_lea.vmem %s43_s22, 131072  ;;  %p13030_p7 = scmp.lt.s32.totalorder %s43_s22, %s43_s22 }
  0x31   :  { %p13026_p6 = scmp.ne.s32.totalorder %s43_s22, %s13025_s25  ;;  %p13031_p8 = scmp.lt.s32.totalorder %s13025_s25, %s13025_s25 }
  0x33   :  { %p13032_p9 = por %p13031_p8, %p13030_p7 }
  0x35   :  { %p13033_p10 = pnand %p13032_p9, %p13026_p6 }
  0x37   :  { %13036 = shalt.err (!%p13033_p10)
}
  0x38   :  { %48 = dma.hbm_to_vmem [thread:$0]  %s13556_s2, 131072, %s43_s22, [#allocation6], %s13110_s11, %s13110_s11, %s13111_s12  }
  0x39   :  { %s13116_s27 = smov [#allocation10]   ;;  %s13117_s29 = smov [#allocation13]  }
  0x3a   :  { %s67_s28 = sshll.u32 %s13116_s27, 4  ;;  %s89_s0 = sshll.u32 %s13117_s29, 4  ;;  %s68_s28 = int_to_ptr.vmem [resolvable:$true] %s67_s28  ;;  %s90_s0 = int_to_ptr.vmem [resolvable:$true] %s89_s0 }
  0x3b   :  { %s13045_s30 = scalar_lea.vmem %s68_s28, 128  ;;  %p13050_p12 = scmp.lt.s32.totalorder %s68_s28, %s68_s28 }
  0x3c   :  { %p13046_p11 = scmp.ne.s32.totalorder %s68_s28, %s13045_s30  ;;  %p13051_p13 = scmp.lt.s32.totalorder %s13045_s30, %s13045_s30 }
  0x3e   :  { %p13052_p0 = por %p13051_p13, %p13050_p12 }
  0x40   :  { %p13053_p1 = pnand %p13052_p0, %p13046_p11 }
  0x42   :  { %13056 = shalt.err (!%p13053_p1)
}
  0x43   :  { %70 = dma.hbm_to_vmem [thread:$0]  %s13558_s4, 128, %s68_s28, [#allocation9]  }
  0x44   :  { %s13065_s10 = scalar_lea.vmem %s90_s0, 16  ;;  %s13069_s2 = scalar_lea.vmem %s90_s0, 32 }
  0x45   :  { %p13066_p2 = scmp.ne.s32.totalorder %s90_s0, %s13065_s10  ;;  %p13070_p3 = scmp.lt.s32.totalorder %s90_s0, %s90_s0 }
  0x46   :  { %p13071_p4 = scmp.lt.s32.totalorder %s13069_s2, %s13065_s10 }
  0x48   :  { %p13072_p5 = por %p13071_p4, %p13070_p3 }
  0x4a   :  { %p13073_p6 = pnand %p13072_p5, %p13066_p2 }
  0x4c   :  { %13076 = shalt.err (!%p13073_p6)
}
  0x4d   :  { %92 = dma.hbm_to_vmem [thread:$0]  %s13560_s6, 16, %s90_s0, [#allocation12]  }
  0x4e   :  { %13097 = dma.done.wait [#allocation3], 256  }
  0x4f   :  { %13098 = vsyncadd [#allocation3], 4294967040 }
  0x50   :  { %13099 = dma.done.wait [#allocation6], 131168  }
  0x51   :  { %13100 = vsyncadd [#allocation6], 4294836128 }
  0x52   :  { %13101 = dma.done.wait [#allocation9], 49280  }
  0x53   :  { %13102 = vsyncadd [#allocation9], 4294918016 }
  0x54   :  { %13103 = dma.done.wait [#allocation12], 8208  }
  0x55   :  { %13104 = vsyncadd [#allocation12], 4294959088  ;;  %v1198_v0 = vld [vmem:[#allocation8 + $0x1c0] sm:$0xff]  ;;  %v13118_v32 = vmov 1966171168   ;;  %v1531_v34 = vlaneseq  ;;  %s13119_s4 = smov [#allocation14]  }
  0x56   :  { %v1202_v1 = vld [vmem:[#allocation8 + $0x1e0] sm:$0xff]  ;;  %v1529_v33 = vunpack.c.l.s4 %v13118_v32  ;;  %v13192_v59 = vld [vmem:[#allocation5] sm:$0x3f]  ;;  %s11284_s6 = sshll.u32 %s13119_s4, 4  ;;  %s11285_s6 = int_to_ptr.vmem [resolvable:$true] %s11284_s6 }
  0x57   :  { %v1326_v2 = vld [vmem:[#allocation8 + $0x5c0] sm:$0xff]  ;;  %v11353_v3 = vcombine.high %v1198_v0, %v1202_v1  ;;  %v11352_v5 = vcombine.low %v1198_v0, %v1202_v1  ;;  %v13187_v44 = vshrl.u32 %v1531_v34, 7  ;;  %s13077_s13 = scalar_lea.vmem %s11285_s6, 32  ;;  %p13082_p8 = scmp.lt.s32.totalorder %s11285_s6, %s11285_s6 }
  0x58   :  { %v1330_v4 = vld [vmem:[#allocation8 + $0x5e0] sm:$0xff]  ;;  %v1530_v43 = vunpack.c.0.s8 %v1529_v33  ;;  %p13078_p7 = scmp.ne.s32.totalorder %s11285_s6, %s13077_s13  ;;  %p13083_p9 = scmp.lt.s32.totalorder %s13077_s13, %s13077_s13 }
  0x59   :  { %v1190_v6 = vld [vmem:[#allocation8 + $0x180] sm:$0xff]  ;;  %v11481_v8 = vcombine.high %v1326_v2, %v1330_v4  ;;  %v11480_v9 = vcombine.low %v1326_v2, %v1330_v4  ;;  %3500 = vmatprep.subr.bf16.mxu0 %v11353_v3 }
  0x5a   :  { %v1194_v7 = vld [vmem:[#allocation8 + $0x1a0] sm:$0xff]  ;;  %3501 = vmatpush1.bf16.msra.mxu0 %v11352_v5  ;;  %v13190_v53 = vsub.s32 %v1530_v43, %v13187_v44  ;;  %p13084_p10 = por %p13083_p9, %p13082_p8 }
  0x5b   :  { %v11345_v10 = vcombine.high %v1190_v6, %v1194_v7  ;;  %v1318_v11 = vld [vmem:[#allocation8 + $0x580] sm:$0xff]  ;;  %3541 = vmatprep.subr.bf16.mxu1 %v11481_v8  ;;  %v11344_v18 = vcombine.low %v1190_v6, %v1194_v7 }
  0x5c   :  { %v1322_v12 = vld [vmem:[#allocation8 + $0x5a0] sm:$0xff]  ;;  %3542 = vmatpush1.bf16.msra.mxu1 %v11480_v9  ;;  %v13196_v63 = vrot.slane %v13192_v59, %v13190_v53  ;;  %p13085_p11 = pnand %p13084_p10, %p13078_p7 }
  0x5d   :  { %v1182_v13 = vld [vmem:[#allocation8 + $0x140] sm:$0xff]  ;;  %v11473_v14 = vcombine.high %v1318_v11, %v1322_v12  ;;  %3502 = vmatprep.subr.bf16.mxu0 %v11345_v10  ;;  %v11472_v19 = vcombine.low %v1318_v11, %v1322_v12 }
  0x5e   :  { %v1186_v15 = vld [vmem:[#allocation8 + $0x160] sm:$0xff]  ;;  %3503 = vmatpush1.bf16.msra.mxu0 %v11344_v18  ;;  %v1542_v3 = vcombine.high %v13196_v63, %v13196_v63 }
  0x5f   :  { %v1310_v16 = vld [vmem:[#allocation8 + $0x540] sm:$0xff]  ;;  %v11337_v20 = vcombine.high %v1182_v13, %v1186_v15  ;;  %3543 = vmatprep.subr.bf16.mxu1 %v11473_v14  ;;  %v11336_v26 = vcombine.low %v1182_v13, %v1186_v15 }
  0x60   :  { %v1314_v17 = vld [vmem:[#allocation8 + $0x560] sm:$0xff]  ;;  %3544 = vmatpush1.bf16.msra.mxu1 %v11472_v19  ;;  %v13201_v9 = vrot.slane %v1542_v3, %v13190_v53 }
  0x61   :  { %v11465_v21 = vcombine.high %v1310_v16, %v1314_v17  ;;  %v1174_v22 = vld [vmem:[#allocation8 + $0x100] sm:$0xff]  ;;  %3504 = vmatprep.subr.bf16.mxu0 %v11337_v20  ;;  %v11464_v27 = vcombine.low %v1310_v16, %v1314_v17 }
  0x62   :  { %v1178_v23 = vld [vmem:[#allocation8 + $0x120] sm:$0xff]  ;;  %3505 = vmatpush1.bf16.msra.mxu0 %v11336_v26  ;;  %3532 = vmatprep.mubr.bf16.mxu0 %v13201_v9  ;;  %v13206_v13 = vcombine.high %v13201_v9, %v13201_v9 }
  0x63   :  { %v1302_v24 = vld [vmem:[#allocation8 + $0x500] sm:$0xff]  ;;  %v11329_v28 = vcombine.high %v1174_v22, %v1178_v23  ;;  %3545 = vmatprep.subr.bf16.mxu1 %v11465_v21  ;;  %v11328_v37 = vcombine.low %v1174_v22, %v1178_v23 }
  0x64   :  { %v1306_v25 = vld [vmem:[#allocation8 + $0x520] sm:$0xff]  ;;  %3546 = vmatpush1.bf16.msra.mxu1 %v11464_v27  ;;  %3573 = vmatprep.mubr.bf16.mxu1 %v13206_v13 }
  0x65   :  { %v11457_v29 = vcombine.high %v1302_v24, %v1306_v25  ;;  %v1166_v30 = vld [vmem:[#allocation8 + $0xc0] sm:$0xff]  ;;  %3506 = vmatprep.subr.bf16.mxu0 %v11329_v28  ;;  %v11456_v38 = vcombine.low %v1302_v24, %v1306_v25 }
  0x66   :  { %v1170_v31 = vld [vmem:[#allocation8 + $0xe0] sm:$0xff]  ;;  %3507 = vmatpush1.bf16.msra.mxu0 %v11328_v37 }
  0x67   :  { %v1294_v35 = vld [vmem:[#allocation8 + $0x4c0] sm:$0xff]  ;;  %v11321_v39 = vcombine.high %v1166_v30, %v1170_v31  ;;  %3547 = vmatprep.subr.bf16.mxu1 %v11457_v29  ;;  %v11320_v47 = vcombine.low %v1166_v30, %v1170_v31 }
  0x68   :  { %v1298_v36 = vld [vmem:[#allocation8 + $0x4e0] sm:$0xff]  ;;  %3548 = vmatpush1.bf16.msra.mxu1 %v11456_v38 }
  0x69   :  { %v11449_v40 = vcombine.high %v1294_v35, %v1298_v36  ;;  %v1158_v41 = vld [vmem:[#allocation8 + $0x80] sm:$0xff]  ;;  %3508 = vmatprep.subr.bf16.mxu0 %v11321_v39  ;;  %v11448_v48 = vcombine.low %v1294_v35, %v1298_v36 }
  0x6a   :  { %v1162_v42 = vld [vmem:[#allocation8 + $0xa0] sm:$0xff]  ;;  %3509 = vmatpush1.bf16.msra.mxu0 %v11320_v47 }
  0x6b   :  { %v1286_v45 = vld [vmem:[#allocation8 + $0x480] sm:$0xff]  ;;  %v11313_v49 = vcombine.high %v1158_v41, %v1162_v42  ;;  %3549 = vmatprep.subr.bf16.mxu1 %v11449_v40  ;;  %v11312_v56 = vcombine.low %v1158_v41, %v1162_v42 }
  0x6c   :  { %v1290_v46 = vld [vmem:[#allocation8 + $0x4a0] sm:$0xff]  ;;  %3550 = vmatpush1.bf16.msra.mxu1 %v11448_v48 }
  0x6d   :  { %v11441_v50 = vcombine.high %v1286_v45, %v1290_v46  ;;  %v1150_v51 = vld [vmem:[#allocation8 + $0x40] sm:$0xff]  ;;  %3510 = vmatprep.subr.bf16.mxu0 %v11313_v49  ;;  %v11440_v57 = vcombine.low %v1286_v45, %v1290_v46 }
  0x6e   :  { %v1154_v52 = vld [vmem:[#allocation8 + $0x60] sm:$0xff]  ;;  %3511 = vmatpush1.bf16.msra.mxu0 %v11312_v56 }
  0x6f   :  { %v1278_v54 = vld [vmem:[#allocation8 + $0x440] sm:$0xff]  ;;  %v11305_v58 = vcombine.high %v1150_v51, %v1154_v52  ;;  %3551 = vmatprep.subr.bf16.mxu1 %v11441_v50  ;;  %v11304_v2 = vcombine.low %v1150_v51, %v1154_v52 }
  0x70   :  { %v1282_v55 = vld [vmem:[#allocation8 + $0x460] sm:$0xff]  ;;  %3552 = vmatpush1.bf16.msra.mxu1 %v11440_v57 }
  0x71   :  { %v11433_v60 = vcombine.high %v1278_v54, %v1282_v55  ;;  %v1142_v61 = vld [vmem:[#allocation8] sm:$0xff]  ;;  %3512 = vmatprep.subr.bf16.mxu0 %v11305_v58  ;;  %v11432_v4 = vcombine.low %v1278_v54, %v1282_v55 }
  0x72   :  { %v1146_v62 = vld [vmem:[#allocation8 + $0x20] sm:$0xff]  ;;  %3513 = vmatpush1.bf16.msra.mxu0 %v11304_v2 }
  0x73   :  { %v1270_v0 = vld [vmem:[#allocation8 + $0x400] sm:$0xff]  ;;  %v11297_v5 = vcombine.high %v1142_v61, %v1146_v62  ;;  %3553 = vmatprep.subr.bf16.mxu1 %v11433_v60  ;;  %v11296_v12 = vcombine.low %v1142_v61, %v1146_v62 }
  0x74   :  { %v1274_v1 = vld [vmem:[#allocation8 + $0x420] sm:$0xff]  ;;  %3554 = vmatpush1.bf16.msra.mxu1 %v11432_v4 }
  0x75   :  { %v11425_v6 = vcombine.high %v1270_v0, %v1274_v1  ;;  %v1262_v7 = vld [vmem:[#allocation8 + $0x3c0] sm:$0xff]  ;;  %3514 = vmatprep.subr.bf16.mxu0 %v11297_v5  ;;  %v11424_v14 = vcombine.low %v1270_v0, %v1274_v1 }
  0x76   :  { %v1266_v8 = vld [vmem:[#allocation8 + $0x3e0] sm:$0xff]  ;;  %3515 = vmatpush1.bf16.msra.mxu0 %v11296_v12 }
  0x77   :  { %v1390_v10 = vld [vmem:[#allocation8 + $0x7c0] sm:$0xff]  ;;  %v11417_v15 = vcombine.high %v1262_v7, %v1266_v8  ;;  %3555 = vmatprep.subr.bf16.mxu1 %v11425_v6  ;;  %v11416_v21 = vcombine.low %v1262_v7, %v1266_v8  ;;  %v1527_v7 = vcombine.high %v13192_v59, %v13192_v59  ;;  %v13216_v59 = vrot.slane %v13196_v63, %v13190_v53 }
  0x78   :  { %v1394_v11 = vld [vmem:[#allocation8 + $0x7e0] sm:$0xff]  ;;  %3556 = vmatpush1.bf16.msra.mxu1 %v11424_v14 }
  0x79   :  { %v11545_v16 = vcombine.high %v1390_v10, %v1394_v11  ;;  %v1254_v17 = vld [vmem:[#allocation8 + $0x380] sm:$0xff]  ;;  %3516 = vmatprep.subr.bf16.mxu0 %v11417_v15  ;;  %v11544_v22 = vcombine.low %v1390_v10, %v1394_v11 }
  0x7a   :  { %v1258_v18 = vld [vmem:[#allocation8 + $0x3a0] sm:$0xff]  ;;  %3517 = vmatpush2.bf16.msra.mxu0 %v11416_v21 }
  0x7b   :  { %v1382_v19 = vld [vmem:[#allocation8 + $0x780] sm:$0xff]  ;;  %v11409_v23 = vcombine.high %v1254_v17, %v1258_v18  ;;  %3557 = vmatprep.subr.bf16.mxu1 %v11545_v16  ;;  %v11408_v29 = vcombine.low %v1254_v17, %v1258_v18  ;;  %v13212_v18 = vrot.slane %v1527_v7, %v13190_v53 }
  0x7c   :  { %v1386_v20 = vld [vmem:[#allocation8 + $0x7a0] sm:$0xff]  ;;  %3558 = vmatpush2.bf16.msra.mxu1 %v11544_v22 }
  0x7d   :  { %v11537_v24 = vcombine.high %v1382_v19, %v1386_v20  ;;  %v1246_v25 = vld [vmem:[#allocation8 + $0x340] sm:$0xff]  ;;  %3518 = vmatprep.subr.bf16.mxu0 %v11409_v23  ;;  %v11536_v30 = vcombine.low %v1382_v19, %v1386_v20  ;;  %v1199_v19 = vld [vmem:[#allocation8 + $0x1c8] sm:$0xff] }
  0x7e   :  { %v1250_v26 = vld [vmem:[#allocation8 + $0x360] sm:$0xff]  ;;  %3519 = vmatpush2.bf16.msra.mxu0 %v11408_v29  ;;  %v1203_v20 = vld [vmem:[#allocation8 + $0x1e8] sm:$0xff] }
  0x7f   :  { %v1374_v27 = vld [vmem:[#allocation8 + $0x740] sm:$0xff]  ;;  %v11401_v31 = vcombine.high %v1246_v25, %v1250_v26  ;;  %3559 = vmatprep.subr.bf16.mxu1 %v11537_v24  ;;  %v11400_v37 = vcombine.low %v1246_v25, %v1250_v26  ;;  %v11355_v24 = vcombine.high %v1199_v19, %v1203_v20  ;;  %v1195_v29 = vld [vmem:[#allocation8 + $0x1a8] sm:$0xff] }
  0x80   :  { %v1378_v28 = vld [vmem:[#allocation8 + $0x760] sm:$0xff]  ;;  %3560 = vmatpush2.bf16.msra.mxu1 %v11536_v30  ;;  %v13222_v30 = vcombine.high %v13216_v59, %v13216_v59 }
  0x81   :  { %v11529_v32 = vcombine.high %v1374_v27, %v1378_v28  ;;  %v1238_v33 = vld [vmem:[#allocation8 + $0x300] sm:$0xff]  ;;  %3520 = vmatprep.subr.bf16.mxu0 %v11401_v31  ;;  %v11528_v38 = vcombine.low %v1374_v27, %v1378_v28  ;;  %v1543_v27 = vcombine.high %v13212_v18, %v13212_v18  ;;  %v1191_v28 = vld [vmem:[#allocation8 + $0x188] sm:$0xff]  ;;  %v11354_v31 = vcombine.low %v1199_v19, %v1203_v20 }
  0x82   :  { %v1242_v34 = vld [vmem:[#allocation8 + $0x320] sm:$0xff]  ;;  %3521 = vmatpush2.bf16.msra.mxu0 %v11400_v37  ;;  %v1187_v37 = vld [vmem:[#allocation8 + $0x168] sm:$0xff] }
  0x83   :  { %v1366_v35 = vld [vmem:[#allocation8 + $0x700] sm:$0xff]  ;;  %v11393_v39 = vcombine.high %v1238_v33, %v1242_v34  ;;  %3561 = vmatprep.subr.bf16.mxu1 %v11529_v32  ;;  %v11392_v46 = vcombine.low %v1238_v33, %v1242_v34  ;;  %v1143_v19 = vld [vmem:[#allocation8 + $0x8] sm:$0xff] }
  0x84   :  { %v1370_v36 = vld [vmem:[#allocation8 + $0x720] sm:$0xff]  ;;  %3562 = vmatpush2.bf16.msra.mxu1 %v11528_v38  ;;  %v13225_v38 = vrot.slane %v1543_v27, %v13190_v53  ;;  %v1263_v27 = vld [vmem:[#allocation8 + $0x3c8] sm:$0xff] }
  0x85   :  { %v11521_v40 = vcombine.high %v1366_v35, %v1370_v36  ;;  %v1230_v41 = vld [vmem:[#allocation8 + $0x2c0] sm:$0xff]  ;;  %3522 = vmatprep.subr.bf16.mxu0 %v11393_v39  ;;  %v11520_v47 = vcombine.low %v1366_v35, %v1370_v36  ;;  %v1183_v35 = vld [vmem:[#allocation8 + $0x148] sm:$0xff]  ;;  %v11347_v36 = vcombine.high %v1191_v28, %v1195_v29 }
  0x86   :  { %v1234_v42 = vld [vmem:[#allocation8 + $0x2e0] sm:$0xff]  ;;  %3523 = vmatpush2.bf16.msra.mxu0 %v11392_v46  ;;  %v11339_v46 = vcombine.high %v1183_v35, %v1187_v37 }
  0x87   :  { %v1358_v43 = vld [vmem:[#allocation8 + $0x6c0] sm:$0xff]  ;;  %v11385_v48 = vcombine.high %v1230_v41, %v1234_v42  ;;  %3563 = vmatprep.subr.bf16.mxu1 %v11521_v40  ;;  %v11384_v55 = vcombine.low %v1230_v41, %v1234_v42  ;;  %v11346_v40 = vcombine.low %v1191_v28, %v1195_v29  ;;  %v1267_v29 = vld [vmem:[#allocation8 + $0x3e8] sm:$0xff] }
  0x88   :  { %v1362_v45 = vld [vmem:[#allocation8 + $0x6e0] sm:$0xff]  ;;  %3564 = vmatpush2.bf16.msra.mxu1 %v11520_v47  ;;  %v1179_v47 = vld [vmem:[#allocation8 + $0x128] sm:$0xff] }
  0x89   :  { %v11513_v49 = vcombine.high %v1358_v43, %v1362_v45  ;;  %v1222_v50 = vld [vmem:[#allocation8 + $0x280] sm:$0xff]  ;;  %3524 = vmatprep.subr.bf16.mxu0 %v11385_v48  ;;  %v11512_v56 = vcombine.low %v1358_v43, %v1362_v45  ;;  %v1175_v45 = vld [vmem:[#allocation8 + $0x108] sm:$0xff] }
  0x8a   :  { %v1226_v51 = vld [vmem:[#allocation8 + $0x2a0] sm:$0xff]  ;;  %3525 = vmatpush2.bf16.msra.mxu0 %v11384_v55  ;;  %v11331_v55 = vcombine.high %v1175_v45, %v1179_v47 }
  0x8b   :  { %v1350_v52 = vld [vmem:[#allocation8 + $0x680] sm:$0xff]  ;;  %v11377_v57 = vcombine.high %v1222_v50, %v1226_v51  ;;  %3565 = vmatprep.subr.bf16.mxu1 %v11513_v49  ;;  %v11376_v1 = vcombine.low %v1222_v50, %v1226_v51  ;;  %v11338_v49 = vcombine.low %v1183_v35, %v1187_v37  ;;  %v1255_v35 = vld [vmem:[#allocation8 + $0x388] sm:$0xff] }
  0x8c   :  { %v1354_v54 = vld [vmem:[#allocation8 + $0x6a0] sm:$0xff]  ;;  %3566 = vmatpush2.bf16.msra.mxu1 %v11512_v56  ;;  %v1171_v56 = vld [vmem:[#allocation8 + $0xe8] sm:$0xff] }
  0x8d   :  { %v11505_v58 = vcombine.high %v1350_v52, %v1354_v54  ;;  %v1214_v60 = vld [vmem:[#allocation8 + $0x240] sm:$0xff]  ;;  %3526 = vmatprep.subr.bf16.mxu0 %v11377_v57  ;;  %v11504_v2 = vcombine.low %v1350_v52, %v1354_v54  ;;  %v1167_v54 = vld [vmem:[#allocation8 + $0xc8] sm:$0xff] }
  0x8e   :  { %v1218_v61 = vld [vmem:[#allocation8 + $0x260] sm:$0xff]  ;;  %3527 = vmatpush2.bf16.msra.mxu0 %v11376_v1  ;;  %v11323_v1 = vcombine.high %v1167_v54, %v1171_v56  ;;  %v1259_v37 = vld [vmem:[#allocation8 + $0x3a8] sm:$0xff] }
  0x8f   :  { %v1342_v62 = vld [vmem:[#allocation8 + $0x640] sm:$0xff]  ;;  %v11369_v3 = vcombine.high %v1214_v60, %v1218_v61  ;;  %3567 = vmatprep.subr.bf16.mxu1 %v11505_v58  ;;  %v11368_v11 = vcombine.low %v1214_v60, %v1218_v61  ;;  %v11330_v58 = vcombine.low %v1175_v45, %v1179_v47  ;;  %v1247_v45 = vld [vmem:[#allocation8 + $0x348] sm:$0xff] }
  0x90   :  { %v1346_v0 = vld [vmem:[#allocation8 + $0x660] sm:$0xff]  ;;  %3568 = vmatpush2.bf16.msra.mxu1 %v11504_v2  ;;  %v1163_v2 = vld [vmem:[#allocation8 + $0xa8] sm:$0xff] }
  0x91   :  { %v11497_v4 = vcombine.high %v1342_v62, %v1346_v0  ;;  %v1206_v5 = vld [vmem:[#allocation8 + $0x200] sm:$0xff]  ;;  %3528 = vmatprep.subr.bf16.mxu0 %v11369_v3  ;;  %v11496_v12 = vcombine.low %v1342_v62, %v1346_v0  ;;  %v1159_v0 = vld [vmem:[#allocation8 + $0x88] sm:$0xff] }
  0x92   :  { %v1210_v6 = vld [vmem:[#allocation8 + $0x220] sm:$0xff]  ;;  %3529 = vmatpush2.bf16.msra.mxu0 %v11368_v11  ;;  %v1155_v11 = vld [vmem:[#allocation8 + $0x68] sm:$0xff] }
  0x93   :  { %v1334_v8 = vld [vmem:[#allocation8 + $0x600] sm:$0xff]  ;;  %v11361_v14 = vcombine.high %v1206_v5, %v1210_v6  ;;  %3569 = vmatprep.subr.bf16.mxu1 %v11497_v4  ;;  %v11360_v21 = vcombine.low %v1206_v5, %v1210_v6  ;;  %v11322_v4 = vcombine.low %v1167_v54, %v1171_v56  ;;  %v1251_v47 = vld [vmem:[#allocation8 + $0x368] sm:$0xff] }
  0x94   :  { %v1338_v10 = vld [vmem:[#allocation8 + $0x620] sm:$0xff]  ;;  %3570 = vmatpush2.bf16.msra.mxu1 %v11496_v12  ;;  %v1239_v54 = vld [vmem:[#allocation8 + $0x308] sm:$0xff] }
  0x95   :  { %v11489_v15 = vcombine.high %v1334_v8, %v1338_v10  ;;  %v1454_v16 = vld [vmem:[#allocation8 + $0x9c0] sm:$0xff]  ;;  %3530 = vmatprep.subr.bf16.mxu0 %v11361_v14  ;;  %v11488_v22 = vcombine.low %v1334_v8, %v1338_v10  ;;  %v1151_v8 = vld [vmem:[#allocation8 + $0x48] sm:$0xff]  ;;  %v11315_v10 = vcombine.high %v1159_v0, %v1163_v2  ;;  %v11314_v14 = vcombine.low %v1159_v0, %v1163_v2 }
  0x96   :  { %v1458_v17 = vld [vmem:[#allocation8 + $0x9e0] sm:$0xff]  ;;  %3531 = vmatpush2.bf16.msra.mxu0 %v11360_v21  ;;  %v11307_v20 = vcombine.high %v1151_v8, %v1155_v11  ;;  %v1147_v21 = vld [vmem:[#allocation8 + $0x28] sm:$0xff] }
  0x97   :  { %v11609_v23 = vcombine.high %v1454_v16, %v1458_v17  ;;  %3571 = vmatprep.subr.bf16.mxu1 %v11489_v15  ;;  %v1446_v25 = vld [vmem:[#allocation8 + $0x980] sm:$0xff]  ;;  %v11608_v63 = vcombine.low %v1454_v16, %v1458_v17  ;;  %v11299_v28 = vcombine.high %v1143_v19, %v1147_v21  ;;  %v1243_v56 = vld [vmem:[#allocation8 + $0x328] sm:$0xff] }
  0x98   :  { %v1450_v26 = vld [vmem:[#allocation8 + $0x9a0] sm:$0xff]  ;;  %3572 = vmatpush2.bf16.msra.mxu1 %v11488_v22  ;;  %v1231_v0 = vld [vmem:[#allocation8 + $0x2c8] sm:$0xff] }
  0x99   :  { %3582 = vmatprep.subr.bf16.mxu0 %v11609_v23  ;;  %v11601_v32 = vcombine.high %v1446_v25, %v1450_v26  ;;  %v1438_v33 = vld [vmem:[#allocation8 + $0x940] sm:$0xff]  ;;  %3623 = vmatprep.subr.bf16.mxu1 %v11355_v24  ;;  %v11600_v39 = vcombine.low %v1446_v25, %v1450_v26  ;;  %v11306_v23 = vcombine.low %v1151_v8, %v1155_v11  ;;  %v1235_v2 = vld [vmem:[#allocation8 + $0x2e8] sm:$0xff] }
  0x9a   :  { %v1442_v34 = vld [vmem:[#allocation8 + $0x960] sm:$0xff]  ;;  %3533 = vmatmul.mubr.bf16.vlgmr.msra.gmra.mxu0 %v13216_v59  ;;  %v1223_v8 = vld [vmem:[#allocation8 + $0x288] sm:$0xff] }
  0x9b   :  { %3574 = vmatmul.mubr.bf16.vlgmr.msra.gmra.mxu1 %v13222_v30  ;;  %3583 = vmatpush1.bf16.msra.mxu0 %v11608_v63  ;;  %v11593_v41 = vcombine.high %v1438_v33, %v1442_v34  ;;  %v1430_v42 = vld [vmem:[#allocation8 + $0x900] sm:$0xff]  ;;  %v11592_v48 = vcombine.low %v1438_v33, %v1442_v34  ;;  %v1227_v11 = vld [vmem:[#allocation8 + $0x2a8] sm:$0xff] }
  0x9c   :  { %3624 = vmatpush1.bf16.msra.mxu1 %v11354_v31  ;;  %3584 = vmatprep.subr.bf16.mxu0 %v11601_v32  ;;  %v1434_v43 = vld [vmem:[#allocation8 + $0x920] sm:$0xff]  ;;  %v11298_v31 = vcombine.low %v1143_v19, %v1147_v21  ;;  %v1215_v19 = vld [vmem:[#allocation8 + $0x248] sm:$0xff] }
  0x9d   :  { %3625 = vmatprep.subr.bf16.mxu1 %v11347_v36  ;;  %3614 = vmatprep.mubr.bf16.mxu0 %v13225_v38  ;;  %v11585_v50 = vcombine.high %v1430_v42, %v1434_v43  ;;  %v1422_v51 = vld [vmem:[#allocation8 + $0x8c0] sm:$0xff]  ;;  %v11584_v57 = vcombine.low %v1430_v42, %v1434_v43  ;;  %v11419_v36 = vcombine.high %v1263_v27, %v1267_v29  ;;  %v1219_v21 = vld [vmem:[#allocation8 + $0x268] sm:$0xff] }
  0x9e   :  { %3655 = vmatprep.mubr.bf16.mxu1 %v13201_v9  ;;  %v1426_v52 = vld [vmem:[#allocation8 + $0x8e0] sm:$0xff] }
  0x9f   :  { %3585 = vmatpush1.bf16.msra.mxu0 %v11600_v39  ;;  %v11577_v60 = vcombine.high %v1422_v51, %v1426_v52  ;;  %v1414_v61 = vld [vmem:[#allocation8 + $0x880] sm:$0xff]  ;;  %v11576_v3 = vcombine.low %v1422_v51, %v1426_v52 }
  0xa0   :  { %3626 = vmatpush1.bf16.msra.mxu1 %v11346_v40  ;;  %3586 = vmatprep.subr.bf16.mxu0 %v11593_v41  ;;  %v1418_v62 = vld [vmem:[#allocation8 + $0x8a0] sm:$0xff]  ;;  %v11418_v40 = vcombine.low %v1263_v27, %v1267_v29  ;;  %v1207_v27 = vld [vmem:[#allocation8 + $0x208] sm:$0xff] }
  0xa1   :  { %3627 = vmatprep.subr.bf16.mxu1 %v11339_v46  ;;  %v11569_v5 = vcombine.high %v1414_v61, %v1418_v62  ;;  %v1406_v6 = vld [vmem:[#allocation8 + $0x840] sm:$0xff]  ;;  %v11568_v12 = vcombine.low %v1414_v61, %v1418_v62  ;;  %v11411_v46 = vcombine.high %v1255_v35, %v1259_v37  ;;  %v1211_v29 = vld [vmem:[#allocation8 + $0x228] sm:$0xff] }
  0xa2   :  { %v1410_v7 = vld [vmem:[#allocation8 + $0x860] sm:$0xff] }
  0xa3   :  { %3587 = vmatpush1.bf16.msra.mxu0 %v11592_v48  ;;  %v11561_v15 = vcombine.high %v1406_v6, %v1410_v7  ;;  %v1398_v16 = vld [vmem:[#allocation8 + $0x800] sm:$0xff]  ;;  %v11560_v22 = vcombine.low %v1406_v6, %v1410_v7 }
  0xa4   :  { %3628 = vmatpush1.bf16.msra.mxu1 %v11338_v49  ;;  %3588 = vmatprep.subr.bf16.mxu0 %v11585_v50  ;;  %v1402_v17 = vld [vmem:[#allocation8 + $0x820] sm:$0xff]  ;;  %v11410_v49 = vcombine.low %v1255_v35, %v1259_v37  ;;  %v1455_v35 = vld [vmem:[#allocation8 + $0x9c8] sm:$0xff] }
  0xa5   :  { %3629 = vmatprep.subr.bf16.mxu1 %v11331_v55  ;;  %v11553_v24 = vcombine.high %v1398_v16, %v1402_v17  ;;  %v1518_v25 = vld [vmem:[#allocation8 + $0xbc0] sm:$0xff]  ;;  %v11552_v63 = vcombine.low %v1398_v16, %v1402_v17  ;;  %v11403_v55 = vcombine.high %v1247_v45, %v1251_v47  ;;  %v1459_v37 = vld [vmem:[#allocation8 + $0x9e8] sm:$0xff] }
  0xa6   :  { %v1522_v26 = vld [vmem:[#allocation8 + $0xbe0] sm:$0xff] }
  0xa7   :  { %3589 = vmatpush1.bf16.msra.mxu0 %v11584_v57  ;;  %v11673_v32 = vcombine.high %v1518_v25, %v1522_v26  ;;  %v1510_v33 = vld [vmem:[#allocation8 + $0xb80] sm:$0xff]  ;;  %v11672_v39 = vcombine.low %v1518_v25, %v1522_v26 }
  0xa8   :  { %3630 = vmatpush1.bf16.msra.mxu1 %v11330_v58  ;;  %3590 = vmatprep.subr.bf16.mxu0 %v11577_v60  ;;  %v1514_v34 = vld [vmem:[#allocation8 + $0xba0] sm:$0xff]  ;;  %v11402_v58 = vcombine.low %v1247_v45, %v1251_v47  ;;  %v1447_v45 = vld [vmem:[#allocation8 + $0x988] sm:$0xff] }
  0xa9   :  { %3631 = vmatprep.subr.bf16.mxu1 %v11323_v1  ;;  %v11665_v41 = vcombine.high %v1510_v33, %v1514_v34  ;;  %v1502_v42 = vld [vmem:[#allocation8 + $0xb40] sm:$0xff]  ;;  %v11664_v48 = vcombine.low %v1510_v33, %v1514_v34  ;;  %v11395_v1 = vcombine.high %v1239_v54, %v1243_v56  ;;  %v1327_v33 = vld [vmem:[#allocation8 + $0x5c8] sm:$0xff] }
  0xaa   :  { %v1506_v43 = vld [vmem:[#allocation8 + $0xb60] sm:$0xff]  ;;  %v1331_v34 = vld [vmem:[#allocation8 + $0x5e8] sm:$0xff] }
  0xab   :  { %3591 = vmatpush1.bf16.msra.mxu0 %v11576_v3  ;;  %v11657_v50 = vcombine.high %v1502_v42, %v1506_v43  ;;  %v1494_v51 = vld [vmem:[#allocation8 + $0xb00] sm:$0xff]  ;;  %v11656_v57 = vcombine.low %v1502_v42, %v1506_v43  ;;  %v1319_v42 = vld [vmem:[#allocation8 + $0x588] sm:$0xff] }
  0xac   :  { %3632 = vmatpush1.bf16.msra.mxu1 %v11322_v4  ;;  %3592 = vmatprep.subr.bf16.mxu0 %v11569_v5  ;;  %v1498_v52 = vld [vmem:[#allocation8 + $0xb20] sm:$0xff]  ;;  %v11394_v4 = vcombine.low %v1239_v54, %v1243_v56  ;;  %v1323_v43 = vld [vmem:[#allocation8 + $0x5a8] sm:$0xff] }
  0xad   :  { %3633 = vmatprep.subr.bf16.mxu1 %v11315_v10  ;;  %v11649_v60 = vcombine.high %v1494_v51, %v1498_v52  ;;  %v1486_v61 = vld [vmem:[#allocation8 + $0xac0] sm:$0xff]  ;;  %v11648_v3 = vcombine.low %v1494_v51, %v1498_v52  ;;  %v11387_v10 = vcombine.high %v1231_v0, %v1235_v2  ;;  %v1451_v47 = vld [vmem:[#allocation8 + $0x9a8] sm:$0xff]  ;;  %v11475_v51 = vcombine.high %v1319_v42, %v1323_v43 }
  0xae   :  { %v1490_v62 = vld [vmem:[#allocation8 + $0xae0] sm:$0xff]  ;;  %v11603_v52 = vcombine.high %v1447_v45, %v1451_v47  ;;  %v1311_v54 = vld [vmem:[#allocation8 + $0x548] sm:$0xff] }
  0xaf   :  { %3593 = vmatpush1.bf16.msra.mxu0 %v11568_v12  ;;  %v11641_v5 = vcombine.high %v1486_v61, %v1490_v62  ;;  %v1478_v6 = vld [vmem:[#allocation8 + $0xa80] sm:$0xff]  ;;  %v11640_v12 = vcombine.low %v1486_v61, %v1490_v62  ;;  %v1439_v56 = vld [vmem:[#allocation8 + $0x948] sm:$0xff] }
  0xb0   :  { %3634 = vmatpush1.bf16.msra.mxu1 %v11314_v14  ;;  %3594 = vmatprep.subr.bf16.mxu0 %v11561_v15  ;;  %v1482_v7 = vld [vmem:[#allocation8 + $0xaa0] sm:$0xff]  ;;  %v11386_v14 = vcombine.low %v1231_v0, %v1235_v2  ;;  %v1303_v62 = vld [vmem:[#allocation8 + $0x508] sm:$0xff] }
  0xb1   :  { %3635 = vmatprep.subr.bf16.mxu1 %v11307_v20  ;;  %v11633_v15 = vcombine.high %v1478_v6, %v1482_v7  ;;  %v1470_v16 = vld [vmem:[#allocation8 + $0xa40] sm:$0xff]  ;;  %v11379_v20 = vcombine.high %v1223_v8, %v1227_v11  ;;  %v1307_v0 = vld [vmem:[#allocation8 + $0x528] sm:$0xff] }
  0xb2   :  { %v1474_v17 = vld [vmem:[#allocation8 + $0xa60] sm:$0xff]  ;;  %v1435_v2 = vld [vmem:[#allocation8 + $0x928] sm:$0xff] }
  0xb3   :  { %3595 = vmatpush1.bf16.msra.mxu0 %v11560_v22  ;;  %v11632_v22 = vcombine.low %v1478_v6, %v1482_v7  ;;  %v1462_v25 = vld [vmem:[#allocation8 + $0xa00] sm:$0xff]  ;;  %v1295_v7 = vld [vmem:[#allocation8 + $0x4c8] sm:$0xff] }
  0xb4   :  { %3636 = vmatpush1.bf16.msra.mxu1 %v11306_v23  ;;  %3596 = vmatprep.subr.bf16.mxu0 %v11553_v24  ;;  %v11378_v23 = vcombine.low %v1223_v8, %v1227_v11  ;;  %v11625_v24 = vcombine.high %v1470_v16, %v1474_v17  ;;  %v1466_v26 = vld [vmem:[#allocation8 + $0xa20] sm:$0xff]  ;;  %v1299_v8 = vld [vmem:[#allocation8 + $0x4e8] sm:$0xff] }
  0xb5   :  { %3637 = vmatprep.subr.bf16.mxu1 %v11299_v28  ;;  %v11371_v28 = vcombine.high %v1215_v19, %v1219_v21  ;;  %v1427_v11 = vld [vmem:[#allocation8 + $0x8e8] sm:$0xff] }
  0xb7   :  { %3597 = vmatpush1.bf16.msra.mxu0 %v11552_v63  ;;  %v11624_v63 = vcombine.low %v1470_v16, %v1474_v17  ;;  %v1287_v17 = vld [vmem:[#allocation8 + $0x488] sm:$0xff] }
  0xb8   :  { %3638 = vmatpush1.bf16.msra.mxu1 %v11298_v31  ;;  %3598 = vmatprep.subr.bf16.mxu0 %v11673_v32  ;;  %v11370_v31 = vcombine.low %v1215_v19, %v1219_v21  ;;  %v11617_v32 = vcombine.high %v1462_v25, %v1466_v26  ;;  %v1291_v19 = vld [vmem:[#allocation8 + $0x4a8] sm:$0xff] }
  0xb9   :  { %3639 = vmatprep.subr.bf16.mxu1 %v11419_v36  ;;  %v11363_v36 = vcombine.high %v1207_v27, %v1211_v29  ;;  %v1419_v21 = vld [vmem:[#allocation8 + $0x8a8] sm:$0xff] }
  0xbb   :  { %3599 = vmatpush2.bf16.msra.mxu0 %v11672_v39  ;;  %v11616_v39 = vcombine.low %v1462_v25, %v1466_v26  ;;  %v1279_v26 = vld [vmem:[#allocation8 + $0x448] sm:$0xff] }
  0xbc   :  { %3640 = vmatpush2.bf16.msra.mxu1 %v11418_v40  ;;  %3600 = vmatprep.subr.bf16.mxu0 %v11665_v41  ;;  %v11362_v40 = vcombine.low %v1207_v27, %v1211_v29  ;;  %v11483_v41 = vcombine.high %v1327_v33, %v1331_v34  ;;  %v1283_v27 = vld [vmem:[#allocation8 + $0x468] sm:$0xff] }
  0xbd   :  { %3641 = vmatprep.subr.bf16.mxu1 %v11411_v46  ;;  %v11611_v46 = vcombine.high %v1455_v35, %v1459_v37  ;;  %v1411_v29 = vld [vmem:[#allocation8 + $0x868] sm:$0xff] }
  0xbf   :  { %3601 = vmatpush2.bf16.msra.mxu0 %v11664_v48  ;;  %v13233_v48 = vrot.slane %v13212_v18, %v13190_v53  ;;  %v11602_v18 = vcombine.low %v1447_v45, %v1451_v47  ;;  %v1395_v45 = vld [vmem:[#allocation8 + $0x7e8] sm:$0xff] }
  0xc0   :  { %3642 = vmatpush2.bf16.msra.mxu1 %v11410_v49  ;;  %3602 = vmatprep.subr.bf16.mxu0 %v11657_v50  ;;  %v11482_v49 = vcombine.low %v1327_v33, %v1331_v34  ;;  %v11610_v50 = vcombine.low %v1455_v35, %v1459_v37  ;;  %v1271_v34 = vld [vmem:[#allocation8 + $0x408] sm:$0xff] }
  0xc1   :  { %3643 = vmatprep.subr.bf16.mxu1 %v11403_v55  ;;  %v1315_v55 = vld [vmem:[#allocation8 + $0x568] sm:$0xff] }
  0xc2   :  { %v1275_v35 = vld [vmem:[#allocation8 + $0x428] sm:$0xff] }
  0xc3   :  { %3603 = vmatpush2.bf16.msra.mxu0 %v11656_v57  ;;  %v1443_v57 = vld [vmem:[#allocation8 + $0x968] sm:$0xff] }
  0xc4   :  { %3644 = vmatpush2.bf16.msra.mxu1 %v11402_v58  ;;  %3604 = vmatprep.subr.bf16.mxu0 %v11649_v60  ;;  %v11474_v58 = vcombine.low %v1319_v42, %v1323_v43  ;;  %v11467_v60 = vcombine.high %v1311_v54, %v1315_v55  ;;  %v11595_v61 = vcombine.high %v1439_v56, %v1443_v57  ;;  %v1403_v37 = vld [vmem:[#allocation8 + $0x828] sm:$0xff] }
  0xc5   :  { %3645 = vmatprep.subr.bf16.mxu1 %v11395_v1  ;;  %v1431_v1 = vld [vmem:[#allocation8 + $0x908] sm:$0xff] }
  0xc6   :  { %v11587_v6 = vcombine.high %v1431_v1, %v1435_v2  ;;  %v1391_v43 = vld [vmem:[#allocation8 + $0x7c8] sm:$0xff] }
  0xc7   :  { %3605 = vmatpush2.bf16.msra.mxu0 %v11648_v3  ;;  %v11466_v3 = vcombine.low %v1311_v54, %v1315_v55  ;;  %v1523_v47 = vld [vmem:[#allocation8 + $0xbe8] sm:$0xff] }
  0xc8   :  { %3646 = vmatpush2.bf16.msra.mxu1 %v11394_v4  ;;  %3606 = vmatprep.subr.bf16.mxu0 %v11641_v5  ;;  %v11594_v4 = vcombine.low %v1439_v56, %v1443_v57  ;;  %v11459_v5 = vcombine.high %v1303_v62, %v1307_v0  ;;  %v1383_v54 = vld [vmem:[#allocation8 + $0x788] sm:$0xff] }
  0xc9   :  { %3647 = vmatprep.subr.bf16.mxu1 %v11387_v10  ;;  %v1423_v10 = vld [vmem:[#allocation8 + $0x8c8] sm:$0xff] }
  0xca   :  { %v11579_v16 = vcombine.high %v1423_v10, %v1427_v11  ;;  %v1387_v55 = vld [vmem:[#allocation8 + $0x7a8] sm:$0xff] }
  0xcb   :  { %3607 = vmatpush2.bf16.msra.mxu0 %v11640_v12  ;;  %v11458_v12 = vcombine.low %v1303_v62, %v1307_v0  ;;  %v1511_v56 = vld [vmem:[#allocation8 + $0xb88] sm:$0xff] }
  0xcc   :  { %3648 = vmatpush2.bf16.msra.mxu1 %v11386_v14  ;;  %3608 = vmatprep.subr.bf16.mxu0 %v11633_v15  ;;  %v11586_v14 = vcombine.low %v1431_v1, %v1435_v2  ;;  %v11451_v15 = vcombine.high %v1295_v7, %v1299_v8  ;;  %v1515_v57 = vld [vmem:[#allocation8 + $0xba8] sm:$0xff] }
  0xcd   :  { %3649 = vmatprep.subr.bf16.mxu1 %v11379_v20  ;;  %v1415_v20 = vld [vmem:[#allocation8 + $0x888] sm:$0xff] }
  0xce   :  { %v11571_v25 = vcombine.high %v1415_v20, %v1419_v21  ;;  %v1375_v62 = vld [vmem:[#allocation8 + $0x748] sm:$0xff] }
  0xcf   :  { %3609 = vmatpush2.bf16.msra.mxu0 %v11632_v22  ;;  %v11450_v22 = vcombine.low %v1295_v7, %v1299_v8  ;;  %v1379_v0 = vld [vmem:[#allocation8 + $0x768] sm:$0xff] }
  0xd0   :  { %3650 = vmatpush2.bf16.msra.mxu1 %v11378_v23  ;;  %3610 = vmatprep.subr.bf16.mxu0 %v11625_v24  ;;  %v11578_v23 = vcombine.low %v1423_v10, %v1427_v11  ;;  %v11443_v24 = vcombine.high %v1287_v17, %v1291_v19  ;;  %v1503_v1 = vld [vmem:[#allocation8 + $0xb48] sm:$0xff] }
  0xd1   :  { %3651 = vmatprep.subr.bf16.mxu1 %v11371_v28  ;;  %v1407_v28 = vld [vmem:[#allocation8 + $0x848] sm:$0xff] }
  0xd2   :  { %v11563_v33 = vcombine.high %v1407_v28, %v1411_v29  ;;  %v1507_v2 = vld [vmem:[#allocation8 + $0xb68] sm:$0xff] }
  0xd3   :  { %3611 = vmatpush2.bf16.msra.mxu0 %v11624_v63  ;;  %v11442_v63 = vcombine.low %v1287_v17, %v1291_v19  ;;  %v1367_v7 = vld [vmem:[#allocation8 + $0x708] sm:$0xff] }
  0xd4   :  { %3652 = vmatpush2.bf16.msra.mxu1 %v11370_v31  ;;  %3612 = vmatprep.subr.bf16.mxu0 %v11617_v32  ;;  %v11570_v31 = vcombine.low %v1415_v20, %v1419_v21  ;;  %v11435_v32 = vcombine.high %v1279_v26, %v1283_v27  ;;  %v1371_v8 = vld [vmem:[#allocation8 + $0x728] sm:$0xff] }
  0xd5   :  { %3653 = vmatprep.subr.bf16.mxu1 %v11363_v36  ;;  %v1399_v36 = vld [vmem:[#allocation8 + $0x808] sm:$0xff] }
  0xd6   :  { %v11555_v42 = vcombine.high %v1399_v36, %v1403_v37  ;;  %v1495_v10 = vld [vmem:[#allocation8 + $0xb08] sm:$0xff] }
  0xd7   :  { %3613 = vmatpush2.bf16.msra.mxu0 %v11616_v39  ;;  %v11434_v39 = vcombine.low %v1279_v26, %v1283_v27  ;;  %v1499_v11 = vld [vmem:[#allocation8 + $0xb28] sm:$0xff] }
  0xd8   :  { %3654 = vmatpush2.bf16.msra.mxu1 %v11362_v40  ;;  %3664 = vmatprep.subr.bf16.mxu0 %v11483_v41  ;;  %v11562_v40 = vcombine.low %v1407_v28, %v1411_v29  ;;  %v11427_v41 = vcombine.high %v1271_v34, %v1275_v35  ;;  %v1359_v17 = vld [vmem:[#allocation8 + $0x6c8] sm:$0xff] }
  0xd9   :  { %3705 = vmatprep.subr.bf16.mxu1 %v11611_v46  ;;  %v1519_v46 = vld [vmem:[#allocation8 + $0xbc8] sm:$0xff] }
  0xda   :  { %3615 = vmatmul.mubr.bf16.vlgmr.msra.gmra.mxu0 %v13233_v48  ;;  %v1363_v19 = vld [vmem:[#allocation8 + $0x6e8] sm:$0xff] }
  0xdb   :  { %3656 = vmatmul.mubr.bf16.vlgmr.msra.gmra.mxu1 %v13216_v59  ;;  %3665 = vmatpush1.bf16.msra.mxu0 %v11482_v49  ;;  %v11426_v49 = vcombine.low %v1271_v34, %v1275_v35  ;;  %v1487_v20 = vld [vmem:[#allocation8 + $0xac8] sm:$0xff] }
  0xdc   :  { %3706 = vmatpush1.bf16.msra.mxu1 %v11610_v50  ;;  %3666 = vmatprep.subr.bf16.mxu0 %v11475_v51  ;;  %v11554_v50 = vcombine.low %v1399_v36, %v1403_v37  ;;  %v11547_v51 = vcombine.high %v1391_v43, %v1395_v45  ;;  %v1491_v21 = vld [vmem:[#allocation8 + $0xae8] sm:$0xff] }
  0xdd   :  { %3707 = vmatprep.subr.bf16.mxu1 %v11603_v52  ;;  %3696 = vmatprep.mubr.bf16.mxu0 %v13206_v13  ;;  %v11675_v52 = vcombine.high %v1519_v46, %v1523_v47  ;;  %v1351_v26 = vld [vmem:[#allocation8 + $0x688] sm:$0xff] }
  0xde   :  { %3737 = vmatprep.mubr.bf16.mxu1 %v13225_v38  ;;  %v1355_v27 = vld [vmem:[#allocation8 + $0x6a8] sm:$0xff] }
  0xdf   :  { %3667 = vmatpush1.bf16.msra.mxu0 %v11474_v58  ;;  %v11546_v58 = vcombine.low %v1391_v43, %v1395_v45  ;;  %v1479_v28 = vld [vmem:[#allocation8 + $0xa88] sm:$0xff] }
  0xe0   :  { %3708 = vmatpush1.bf16.msra.mxu1 %v11602_v18  ;;  %3668 = vmatprep.subr.bf16.mxu0 %v11467_v60  ;;  %v11674_v18 = vcombine.low %v1519_v46, %v1523_v47  ;;  %v11539_v60 = vcombine.high %v1383_v54, %v1387_v55  ;;  %v1483_v29 = vld [vmem:[#allocation8 + $0xaa8] sm:$0xff] }
  0xe1   :  { %3709 = vmatprep.subr.bf16.mxu1 %v11595_v61  ;;  %v11667_v61 = vcombine.high %v1511_v56, %v1515_v57  ;;  %v1343_v34 = vld [vmem:[#allocation8 + $0x648] sm:$0xff] }
  0xe2   :  { %v1347_v35 = vld [vmem:[#allocation8 + $0x668] sm:$0xff] }
  0xe3   :  { %3669 = vmatpush1.bf16.msra.mxu0 %v11466_v3  ;;  %v11538_v3 = vcombine.low %v1383_v54, %v1387_v55  ;;  %v1471_v36 = vld [vmem:[#allocation8 + $0xa48] sm:$0xff]  ;;  %v1200_v54 = vld [vmem:[#allocation8 + $0x1d0] sm:$0xff] }
  0xe4   :  { %3710 = vmatpush1.bf16.msra.mxu1 %v11594_v4  ;;  %3670 = vmatprep.subr.bf16.mxu0 %v11459_v5  ;;  %v11666_v4 = vcombine.low %v1511_v56, %v1515_v57  ;;  %v11531_v5 = vcombine.high %v1375_v62, %v1379_v0  ;;  %v1475_v37 = vld [vmem:[#allocation8 + $0xa68] sm:$0xff]  ;;  %v1204_v55 = vld [vmem:[#allocation8 + $0x1f0] sm:$0xff] }
  0xe5   :  { %3711 = vmatprep.subr.bf16.mxu1 %v11587_v6  ;;  %v11659_v6 = vcombine.high %v1503_v1, %v1507_v2  ;;  %v1335_v43 = vld [vmem:[#allocation8 + $0x608] sm:$0xff]  ;;  %v1328_v56 = vld [vmem:[#allocation8 + $0x5d0] sm:$0xff] }
  0xe6   :  { %v1339_v45 = vld [vmem:[#allocation8 + $0x628] sm:$0xff]  ;;  %v1332_v57 = vld [vmem:[#allocation8 + $0x5f0] sm:$0xff] }
  0xe7   :  { %3671 = vmatpush1.bf16.msra.mxu0 %v11458_v12  ;;  %v11530_v12 = vcombine.low %v1375_v62, %v1379_v0  ;;  %v1463_v46 = vld [vmem:[#allocation8 + $0xa08] sm:$0xff]  ;;  %v1192_v62 = vld [vmem:[#allocation8 + $0x190] sm:$0xff] }
  0xe8   :  { %3712 = vmatpush1.bf16.msra.mxu1 %v11586_v14  ;;  %3672 = vmatprep.subr.bf16.mxu0 %v11451_v15  ;;  %v11658_v14 = vcombine.low %v1503_v1, %v1507_v2  ;;  %v11523_v15 = vcombine.high %v1367_v7, %v1371_v8  ;;  %v1467_v47 = vld [vmem:[#allocation8 + $0xa28] sm:$0xff]  ;;  %v1196_v0 = vld [vmem:[#allocation8 + $0x1b0] sm:$0xff] }
  0xe9   :  { %3713 = vmatprep.subr.bf16.mxu1 %v11579_v16  ;;  %v11651_v16 = vcombine.high %v1495_v10, %v1499_v11  ;;  %v1320_v1 = vld [vmem:[#allocation8 + $0x590] sm:$0xff] }
  0xea   :  { %v1324_v2 = vld [vmem:[#allocation8 + $0x5b0] sm:$0xff] }
  0xeb   :  { %3673 = vmatpush1.bf16.msra.mxu0 %v11450_v22  ;;  %v11522_v22 = vcombine.low %v1367_v7, %v1371_v8  ;;  %v1184_v7 = vld [vmem:[#allocation8 + $0x150] sm:$0xff] }
  0xec   :  { %3714 = vmatpush1.bf16.msra.mxu1 %v11578_v23  ;;  %3674 = vmatprep.subr.bf16.mxu0 %v11443_v24  ;;  %v11650_v23 = vcombine.low %v1495_v10, %v1499_v11  ;;  %v11515_v24 = vcombine.high %v1359_v17, %v1363_v19  ;;  %v1188_v8 = vld [vmem:[#allocation8 + $0x170] sm:$0xff] }
  0xed   :  { %3715 = vmatprep.subr.bf16.mxu1 %v11571_v25  ;;  %v11643_v25 = vcombine.high %v1487_v20, %v1491_v21  ;;  %v1312_v10 = vld [vmem:[#allocation8 + $0x550] sm:$0xff] }
  0xee   :  { %v1316_v11 = vld [vmem:[#allocation8 + $0x570] sm:$0xff] }
  0xef   :  { %3675 = vmatpush1.bf16.msra.mxu0 %v11442_v63  ;;  %v11514_v63 = vcombine.low %v1359_v17, %v1363_v19  ;;  %v1176_v17 = vld [vmem:[#allocation8 + $0x110] sm:$0xff] }
  0xf0   :  { %3716 = vmatpush1.bf16.msra.mxu1 %v11570_v31  ;;  %3676 = vmatprep.subr.bf16.mxu0 %v11435_v32  ;;  %v11642_v31 = vcombine.low %v1487_v20, %v1491_v21  ;;  %v11507_v32 = vcombine.high %v1351_v26, %v1355_v27  ;;  %v1180_v19 = vld [vmem:[#allocation8 + $0x130] sm:$0xff] }
  0xf1   :  { %3717 = vmatprep.subr.bf16.mxu1 %v11563_v33  ;;  %v11635_v33 = vcombine.high %v1479_v28, %v1483_v29  ;;  %v1304_v20 = vld [vmem:[#allocation8 + $0x510] sm:$0xff] }
  0xf2   :  { %v1308_v21 = vld [vmem:[#allocation8 + $0x530] sm:$0xff] }
  0xf3   :  { %3677 = vmatpush1.bf16.msra.mxu0 %v11434_v39  ;;  %v11506_v39 = vcombine.low %v1351_v26, %v1355_v27  ;;  %v1168_v26 = vld [vmem:[#allocation8 + $0xd0] sm:$0xff] }
  0xf4   :  { %3718 = vmatpush1.bf16.msra.mxu1 %v11562_v40  ;;  %3678 = vmatprep.subr.bf16.mxu0 %v11427_v41  ;;  %v11634_v40 = vcombine.low %v1479_v28, %v1483_v29  ;;  %v11499_v41 = vcombine.high %v1343_v34, %v1347_v35  ;;  %v1172_v27 = vld [vmem:[#allocation8 + $0xf0] sm:$0xff] }
  0xf5   :  { %3719 = vmatprep.subr.bf16.mxu1 %v11555_v42  ;;  %v11627_v42 = vcombine.high %v1471_v36, %v1475_v37  ;;  %v1296_v28 = vld [vmem:[#allocation8 + $0x4d0] sm:$0xff] }
  0xf6   :  { %v1300_v29 = vld [vmem:[#allocation8 + $0x4f0] sm:$0xff] }
  0xf7   :  { %3679 = vmatpush1.bf16.msra.mxu0 %v11426_v49  ;;  %v11498_v49 = vcombine.low %v1343_v34, %v1347_v35  ;;  %v1160_v34 = vld [vmem:[#allocation8 + $0x90] sm:$0xff] }
  0xf8   :  { %3720 = vmatpush1.bf16.msra.mxu1 %v11554_v50  ;;  %3680 = vmatprep.subr.bf16.mxu0 %v11547_v51  ;;  %v11626_v50 = vcombine.low %v1471_v36, %v1475_v37  ;;  %v11491_v51 = vcombine.high %v1335_v43, %v1339_v45  ;;  %v1164_v35 = vld [vmem:[#allocation8 + $0xb0] sm:$0xff] }
  0xf9   :  { %3721 = vmatprep.subr.bf16.mxu1 %v11675_v52  ;;  %v11619_v52 = vcombine.high %v1463_v46, %v1467_v47  ;;  %v1288_v36 = vld [vmem:[#allocation8 + $0x490] sm:$0xff] }
  0xfa   :  { %v1292_v37 = vld [vmem:[#allocation8 + $0x4b0] sm:$0xff] }
  0xfb   :  { %3681 = vmatpush2.bf16.msra.mxu0 %v11546_v58  ;;  %v11490_v58 = vcombine.low %v1335_v43, %v1339_v45  ;;  %v1152_v43 = vld [vmem:[#allocation8 + $0x50] sm:$0xff] }
  0xfc   :  { %3722 = vmatpush2.bf16.msra.mxu1 %v11674_v18  ;;  %3682 = vmatprep.subr.bf16.mxu0 %v11539_v60  ;;  %v11618_v18 = vcombine.low %v1463_v46, %v1467_v47  ;;  %v11357_v60 = vcombine.high %v1200_v54, %v1204_v55  ;;  %v1156_v45 = vld [vmem:[#allocation8 + $0x70] sm:$0xff] }
  0xfd   :  { %3723 = vmatprep.subr.bf16.mxu1 %v11667_v61  ;;  %v11485_v61 = vcombine.high %v1328_v56, %v1332_v57  ;;  %v1280_v46 = vld [vmem:[#allocation8 + $0x450] sm:$0xff] }
  0xfe   :  { %v1284_v47 = vld [vmem:[#allocation8 + $0x470] sm:$0xff] }
  0xff   :  { %3683 = vmatpush2.bf16.msra.mxu0 %v11538_v3  ;;  %v11356_v3 = vcombine.low %v1200_v54, %v1204_v55  ;;  %v1144_v54 = vld [vmem:[#allocation8 + $0x10] sm:$0xff] }
 0x100   :  { %3724 = vmatpush2.bf16.msra.mxu1 %v11666_v4  ;;  %3684 = vmatprep.subr.bf16.mxu0 %v11531_v5  ;;  %v11484_v4 = vcombine.low %v1328_v56, %v1332_v57  ;;  %v11349_v5 = vcombine.high %v1192_v62, %v1196_v0  ;;  %v1148_v55 = vld [vmem:[#allocation8 + $0x30] sm:$0xff] }
 0x101   :  { %3725 = vmatprep.subr.bf16.mxu1 %v11659_v6  ;;  %v11477_v6 = vcombine.high %v1320_v1, %v1324_v2  ;;  %v1272_v56 = vld [vmem:[#allocation8 + $0x410] sm:$0xff] }
 0x102   :  { %v1276_v57 = vld [vmem:[#allocation8 + $0x430] sm:$0xff] }
 0x103   :  { %3685 = vmatpush2.bf16.msra.mxu0 %v11530_v12  ;;  %v11348_v12 = vcombine.low %v1192_v62, %v1196_v0  ;;  %v1264_v62 = vld [vmem:[#allocation8 + $0x3d0] sm:$0xff] }
 0x104   :  { %3726 = vmatpush2.bf16.msra.mxu1 %v11658_v14  ;;  %3686 = vmatprep.subr.bf16.mxu0 %v11523_v15  ;;  %v11476_v14 = vcombine.low %v1320_v1, %v1324_v2  ;;  %v11341_v15 = vcombine.high %v1184_v7, %v1188_v8  ;;  %v1268_v0 = vld [vmem:[#allocation8 + $0x3f0] sm:$0xff] }
 0x105   :  { %3727 = vmatprep.subr.bf16.mxu1 %v11651_v16  ;;  %v11469_v16 = vcombine.high %v1312_v10, %v1316_v11  ;;  %v1392_v1 = vld [vmem:[#allocation8 + $0x7d0] sm:$0xff] }
 0x106   :  { %v1396_v2 = vld [vmem:[#allocation8 + $0x7f0] sm:$0xff] }
 0x107   :  { %3687 = vmatpush2.bf16.msra.mxu0 %v11522_v22  ;;  %v11340_v22 = vcombine.low %v1184_v7, %v1188_v8  ;;  %v1256_v7 = vld [vmem:[#allocation8 + $0x390] sm:$0xff] }
 0x108   :  { %3728 = vmatpush2.bf16.msra.mxu1 %v11650_v23  ;;  %3688 = vmatprep.subr.bf16.mxu0 %v11515_v24  ;;  %v11468_v23 = vcombine.low %v1312_v10, %v1316_v11  ;;  %v11333_v24 = vcombine.high %v1176_v17, %v1180_v19  ;;  %v1260_v8 = vld [vmem:[#allocation8 + $0x3b0] sm:$0xff] }
 0x109   :  { %3729 = vmatprep.subr.bf16.mxu1 %v11643_v25  ;;  %v11461_v25 = vcombine.high %v1304_v20, %v1308_v21  ;;  %v1384_v10 = vld [vmem:[#allocation8 + $0x790] sm:$0xff] }
 0x10a   :  { %v1388_v11 = vld [vmem:[#allocation8 + $0x7b0] sm:$0xff] }
 0x10b   :  { %3689 = vmatpush2.bf16.msra.mxu0 %v11514_v63  ;;  %v11332_v63 = vcombine.low %v1176_v17, %v1180_v19  ;;  %v1248_v17 = vld [vmem:[#allocation8 + $0x350] sm:$0xff] }
 0x10c   :  { %3730 = vmatpush2.bf16.msra.mxu1 %v11642_v31  ;;  %3690 = vmatprep.subr.bf16.mxu0 %v11507_v32  ;;  %v11460_v31 = vcombine.low %v1304_v20, %v1308_v21  ;;  %v11325_v32 = vcombine.high %v1168_v26, %v1172_v27  ;;  %v1252_v19 = vld [vmem:[#allocation8 + $0x370] sm:$0xff] }
 0x10d   :  { %3731 = vmatprep.subr.bf16.mxu1 %v11635_v33  ;;  %v11453_v33 = vcombine.high %v1296_v28, %v1300_v29  ;;  %v1376_v20 = vld [vmem:[#allocation8 + $0x750] sm:$0xff] }
 0x10e   :  { %v1380_v21 = vld [vmem:[#allocation8 + $0x770] sm:$0xff] }
 0x10f   :  { %3691 = vmatpush2.bf16.msra.mxu0 %v11506_v39  ;;  %v11324_v39 = vcombine.low %v1168_v26, %v1172_v27  ;;  %v1240_v26 = vld [vmem:[#allocation8 + $0x310] sm:$0xff] }
 0x110   :  { %3732 = vmatpush2.bf16.msra.mxu1 %v11634_v40  ;;  %3692 = vmatprep.subr.bf16.mxu0 %v11499_v41  ;;  %v11452_v40 = vcombine.low %v1296_v28, %v1300_v29  ;;  %v11317_v41 = vcombine.high %v1160_v34, %v1164_v35  ;;  %v1244_v27 = vld [vmem:[#allocation8 + $0x330] sm:$0xff] }
 0x111   :  { %3733 = vmatprep.subr.bf16.mxu1 %v11627_v42  ;;  %v11445_v42 = vcombine.high %v1288_v36, %v1292_v37  ;;  %v1368_v28 = vld [vmem:[#allocation8 + $0x710] sm:$0xff] }
 0x112   :  { %v1372_v29 = vld [vmem:[#allocation8 + $0x730] sm:$0xff] }
 0x113   :  { %3693 = vmatpush2.bf16.msra.mxu0 %v11498_v49  ;;  %v11316_v49 = vcombine.low %v1160_v34, %v1164_v35  ;;  %v1232_v34 = vld [vmem:[#allocation8 + $0x2d0] sm:$0xff] }
 0x114   :  { %3734 = vmatpush2.bf16.msra.mxu1 %v11626_v50  ;;  %3694 = vmatprep.subr.bf16.mxu0 %v11491_v51  ;;  %v11444_v50 = vcombine.low %v1288_v36, %v1292_v37  ;;  %v11309_v51 = vcombine.high %v1152_v43, %v1156_v45  ;;  %v1236_v35 = vld [vmem:[#allocation8 + $0x2f0] sm:$0xff] }
 0x115   :  { %3735 = vmatprep.subr.bf16.mxu1 %v11619_v52  ;;  %v11437_v52 = vcombine.high %v1280_v46, %v1284_v47  ;;  %v1360_v36 = vld [vmem:[#allocation8 + $0x6d0] sm:$0xff] }
 0x116   :  { %v1364_v37 = vld [vmem:[#allocation8 + $0x6f0] sm:$0xff] }
 0x117   :  { %3695 = vmatpush2.bf16.msra.mxu0 %v11490_v58  ;;  %v11308_v58 = vcombine.low %v1152_v43, %v1156_v45  ;;  %v1224_v43 = vld [vmem:[#allocation8 + $0x290] sm:$0xff] }
 0x118   :  { %3736 = vmatpush2.bf16.msra.mxu1 %v11618_v18  ;;  %3746 = vmatprep.subr.bf16.mxu0 %v11357_v60  ;;  %v11436_v18 = vcombine.low %v1280_v46, %v1284_v47  ;;  %v11301_v60 = vcombine.high %v1144_v54, %v1148_v55  ;;  %v1228_v45 = vld [vmem:[#allocation8 + $0x2b0] sm:$0xff] }
 0x119   :  { %3787 = vmatprep.subr.bf16.mxu1 %v11485_v61  ;;  %v11429_v61 = vcombine.high %v1272_v56, %v1276_v57  ;;  %v1352_v46 = vld [vmem:[#allocation8 + $0x690] sm:$0xff] }
 0x11a   :  { %3697 = vmatmul.mubr.bf16.vlgmr.msra.gmra.mxu0 %v13222_v30  ;;  %v1356_v47 = vld [vmem:[#allocation8 + $0x6b0] sm:$0xff] }
 0x11b   :  { %3738 = vmatmul.mubr.bf16.vlgmr.msra.gmra.mxu1 %v13233_v48  ;;  %3747 = vmatpush1.bf16.msra.mxu0 %v11356_v3  ;;  %v11300_v3 = vcombine.low %v1144_v54, %v1148_v55  ;;  %v1216_v54 = vld [vmem:[#allocation8 + $0x250] sm:$0xff] }
 0x11c   :  { %3788 = vmatpush1.bf16.msra.mxu1 %v11484_v4  ;;  %3748 = vmatprep.subr.bf16.mxu0 %v11349_v5  ;;  %v11428_v4 = vcombine.low %v1272_v56, %v1276_v57  ;;  %v11421_v5 = vcombine.high %v1264_v62, %v1268_v0  ;;  %v1220_v55 = vld [vmem:[#allocation8 + $0x270] sm:$0xff] }
 0x11d   :  { %3789 = vmatprep.subr.bf16.mxu1 %v11477_v6  ;;  %3778 = vmatprep.mubr.bf16.mxu0 %v13201_v9  ;;  %v11549_v6 = vcombine.high %v1392_v1, %v1396_v2  ;;  %v1344_v56 = vld [vmem:[#allocation8 + $0x650] sm:$0xff] }
 0x11e   :  { %3819 = vmatprep.mubr.bf16.mxu1 %v13206_v13  ;;  %v1348_v57 = vld [vmem:[#allocation8 + $0x670] sm:$0xff] }
 0x11f   :  { %3749 = vmatpush1.bf16.msra.mxu0 %v11348_v12  ;;  %v11420_v12 = vcombine.low %v1264_v62, %v1268_v0  ;;  %v1208_v62 = vld [vmem:[#allocation8 + $0x210] sm:$0xff] }
 0x120   :  { %3790 = vmatpush1.bf16.msra.mxu1 %v11476_v14  ;;  %3750 = vmatprep.subr.bf16.mxu0 %v11341_v15  ;;  %v11548_v14 = vcombine.low %v1392_v1, %v1396_v2  ;;  %v11413_v15 = vcombine.high %v1256_v7, %v1260_v8  ;;  %v1212_v0 = vld [vmem:[#allocation8 + $0x230] sm:$0xff] }
 0x121   :  { %3791 = vmatprep.subr.bf16.mxu1 %v11469_v16  ;;  %v11541_v16 = vcombine.high %v1384_v10, %v1388_v11  ;;  %v1336_v1 = vld [vmem:[#allocation8 + $0x610] sm:$0xff] }
 0x122   :  { %v1340_v2 = vld [vmem:[#allocation8 + $0x630] sm:$0xff] }
 0x123   :  { %3751 = vmatpush1.bf16.msra.mxu0 %v11340_v22  ;;  %v11412_v22 = vcombine.low %v1256_v7, %v1260_v8  ;;  %v1456_v7 = vld [vmem:[#allocation8 + $0x9d0] sm:$0xff] }
 0x124   :  { %3792 = vmatpush1.bf16.msra.mxu1 %v11468_v23  ;;  %3752 = vmatprep.subr.bf16.mxu0 %v11333_v24  ;;  %v11540_v23 = vcombine.low %v1384_v10, %v1388_v11  ;;  %v11405_v24 = vcombine.high %v1248_v17, %v1252_v19  ;;  %v1460_v8 = vld [vmem:[#allocation8 + $0x9f0] sm:$0xff]  ;;  %v1201_v10 = vld [vmem:[#allocation8 + $0x1d8] sm:$0xff] }
 0x125   :  { %3793 = vmatprep.subr.bf16.mxu1 %v11461_v25  ;;  %v11533_v25 = vcombine.high %v1376_v20, %v1380_v21  ;;  %v1205_v11 = vld [vmem:[#allocation8 + $0x1f8] sm:$0xff] }
 0x127   :  { %3753 = vmatpush1.bf16.msra.mxu0 %v11332_v63  ;;  %v11404_v63 = vcombine.low %v1248_v17, %v1252_v19  ;;  %v1448_v17 = vld [vmem:[#allocation8 + $0x990] sm:$0xff] }
 0x128   :  { %3794 = vmatpush1.bf16.msra.mxu1 %v11460_v31  ;;  %3754 = vmatprep.subr.bf16.mxu0 %v11325_v32  ;;  %v11532_v31 = vcombine.low %v1376_v20, %v1380_v21  ;;  %v11397_v32 = vcombine.high %v1240_v26, %v1244_v27  ;;  %v1452_v19 = vld [vmem:[#allocation8 + $0x9b0] sm:$0xff]  ;;  %v1193_v20 = vld [vmem:[#allocation8 + $0x198] sm:$0xff] }
 0x129   :  { %3795 = vmatprep.subr.bf16.mxu1 %v11453_v33  ;;  %v11525_v33 = vcombine.high %v1368_v28, %v1372_v29  ;;  %v1197_v21 = vld [vmem:[#allocation8 + $0x1b8] sm:$0xff] }
 0x12b   :  { %3755 = vmatpush1.bf16.msra.mxu0 %v11324_v39  ;;  %v11396_v39 = vcombine.low %v1240_v26, %v1244_v27  ;;  %v1440_v26 = vld [vmem:[#allocation8 + $0x950] sm:$0xff] }
 0x12c   :  { %3796 = vmatpush1.bf16.msra.mxu1 %v11452_v40  ;;  %3756 = vmatprep.subr.bf16.mxu0 %v11317_v41  ;;  %v11524_v40 = vcombine.low %v1368_v28, %v1372_v29  ;;  %v11389_v41 = vcombine.high %v1232_v34, %v1236_v35  ;;  %v1444_v27 = vld [vmem:[#allocation8 + $0x970] sm:$0xff]  ;;  %v1185_v29 = vld [vmem:[#allocation8 + $0x158] sm:$0xff] }
 0x12d   :  { %3797 = vmatprep.subr.bf16.mxu1 %v11445_v42  ;;  %v11517_v42 = vcombine.high %v1360_v36, %v1364_v37 }
 0x12f   :  { %3757 = vmatpush1.bf16.msra.mxu0 %v11316_v49  ;;  %v11388_v49 = vcombine.low %v1232_v34, %v1236_v35  ;;  %v11350_v35 = vcombine.low %v1193_v20, %v1197_v21 }
 0x130   :  { %3798 = vmatpush1.bf16.msra.mxu1 %v11444_v50  ;;  %3758 = vmatprep.subr.bf16.mxu0 %v11309_v51  ;;  %v11516_v50 = vcombine.low %v1360_v36, %v1364_v37  ;;  %v11381_v51 = vcombine.high %v1224_v43, %v1228_v45  ;;  %v11597_v36 = vcombine.high %v1440_v26, %v1444_v27 }
 0x131   :  { %3799 = vmatprep.subr.bf16.mxu1 %v11437_v52  ;;  %v11509_v52 = vcombine.high %v1352_v46, %v1356_v47 }
 0x133   :  { %3759 = vmatpush1.bf16.msra.mxu0 %v11308_v58  ;;  %v11380_v58 = vcombine.low %v1224_v43, %v1228_v45  ;;  %v1177_v45 = vld [vmem:[#allocation8 + $0x118] sm:$0xff] }
 0x134   :  { %3800 = vmatpush1.bf16.msra.mxu1 %v11436_v18  ;;  %3760 = vmatprep.subr.bf16.mxu0 %v11301_v60  ;;  %v11508_v18 = vcombine.low %v1352_v46, %v1356_v47  ;;  %v11373_v60 = vcombine.high %v1216_v54, %v1220_v55  ;;  %v1181_v46 = vld [vmem:[#allocation8 + $0x138] sm:$0xff] }
 0x135   :  { %3801 = vmatprep.subr.bf16.mxu1 %v11429_v61  ;;  %v11501_v61 = vcombine.high %v1344_v56, %v1348_v57 }
 0x137   :  { %3761 = vmatpush1.bf16.msra.mxu0 %v11300_v3  ;;  %v11372_v3 = vcombine.low %v1216_v54, %v1220_v55  ;;  %v11335_v55 = vcombine.high %v1177_v45, %v1181_v46 }
 0x138   :  { %3802 = vmatpush1.bf16.msra.mxu1 %v11428_v4  ;;  %3762 = vmatprep.subr.bf16.mxu0 %v11421_v5  ;;  %v11500_v4 = vcombine.low %v1344_v56, %v1348_v57  ;;  %v11365_v5 = vcombine.high %v1208_v62, %v1212_v0  ;;  %v1424_v56 = vld [vmem:[#allocation8 + $0x8d0] sm:$0xff] }
 0x139   :  { %3803 = vmatprep.subr.bf16.mxu1 %v11549_v6  ;;  %v11493_v6 = vcombine.high %v1336_v1, %v1340_v2  ;;  %v1428_v57 = vld [vmem:[#allocation8 + $0x8f0] sm:$0xff] }
 0x13b   :  { %3763 = vmatpush2.bf16.msra.mxu0 %v11420_v12  ;;  %v11364_v12 = vcombine.low %v1208_v62, %v1212_v0  ;;  %v1416_v0 = vld [vmem:[#allocation8 + $0x890] sm:$0xff] }
 0x13c   :  { %3804 = vmatpush2.bf16.msra.mxu1 %v11548_v14  ;;  %3764 = vmatprep.subr.bf16.mxu0 %v11413_v15  ;;  %v11492_v14 = vcombine.low %v1336_v1, %v1340_v2  ;;  %v11613_v15 = vcombine.high %v1456_v7, %v1460_v8  ;;  %v1420_v1 = vld [vmem:[#allocation8 + $0x8b0] sm:$0xff]  ;;  %v1161_v2 = vld [vmem:[#allocation8 + $0x98] sm:$0xff] }
 0x13d   :  { %3805 = vmatprep.subr.bf16.mxu1 %v11541_v16  ;;  %v11359_v16 = vcombine.high %v1201_v10, %v1205_v11 }
 0x13f   :  { %3765 = vmatpush2.bf16.msra.mxu0 %v11412_v22  ;;  %v11612_v22 = vcombine.low %v1456_v7, %v1460_v8  ;;  %v1408_v8 = vld [vmem:[#allocation8 + $0x850] sm:$0xff] }
 0x140   :  { %3806 = vmatpush2.bf16.msra.mxu1 %v11540_v23  ;;  %3766 = vmatprep.subr.bf16.mxu0 %v11405_v24  ;;  %v11358_v23 = vcombine.low %v1201_v10, %v1205_v11  ;;  %v11605_v24 = vcombine.high %v1448_v17, %v1452_v19  ;;  %v1412_v10 = vld [vmem:[#allocation8 + $0x870] sm:$0xff]  ;;  %v1153_v11 = vld [vmem:[#allocation8 + $0x58] sm:$0xff] }
 0x141   :  { %3807 = vmatprep.subr.bf16.mxu1 %v11533_v25  ;;  %v11351_v25 = vcombine.high %v1193_v20, %v1197_v21  ;;  %v1404_v20 = vld [vmem:[#allocation8 + $0x830] sm:$0xff]  ;;  %v1145_v21 = vld [vmem:[#allocation8 + $0x18] sm:$0xff] }
 0x143   :  { %3767 = vmatpush2.bf16.msra.mxu0 %v11404_v63  ;;  %v1189_v63 = vld [vmem:[#allocation8 + $0x178] sm:$0xff] }
 0x144   :  { %3808 = vmatpush2.bf16.msra.mxu1 %v11532_v31  ;;  %3768 = vmatprep.subr.bf16.mxu0 %v11397_v32  ;;  %v11604_v32 = vcombine.low %v1448_v17, %v1452_v19  ;;  %v1400_v19 = vld [vmem:[#allocation8 + $0x810] sm:$0xff] }
 0x145   :  { %3809 = vmatprep.subr.bf16.mxu1 %v11525_v33 }
 0x147   :  { %3769 = vmatpush2.bf16.msra.mxu0 %v11396_v39  ;;  %v11343_v39 = vcombine.high %v1185_v29, %v1189_v63 }
 0x148   :  { %3810 = vmatpush2.bf16.msra.mxu1 %v11524_v40  ;;  %3770 = vmatprep.subr.bf16.mxu0 %v11389_v41  ;;  %v1432_v40 = vld [vmem:[#allocation8 + $0x910] sm:$0xff] }
 0x149   :  { %3811 = vmatprep.subr.bf16.mxu1 %v11517_v42  ;;  %v1436_v41 = vld [vmem:[#allocation8 + $0x930] sm:$0xff] }
 0x14b   :  { %3771 = vmatpush2.bf16.msra.mxu0 %v11388_v49  ;;  %v11596_v49 = vcombine.low %v1440_v26, %v1444_v27  ;;  %v1520_v27 = vld [vmem:[#allocation8 + $0xbd0] sm:$0xff] }
 0x14c   :  { %3812 = vmatpush2.bf16.msra.mxu1 %v11516_v50  ;;  %3772 = vmatprep.subr.bf16.mxu0 %v11381_v51  ;;  %v11342_v51 = vcombine.low %v1185_v29, %v1189_v63  ;;  %v1265_v29 = vld [vmem:[#allocation8 + $0x3d8] sm:$0xff] }
 0x14d   :  { %3813 = vmatprep.subr.bf16.mxu1 %v11509_v52  ;;  %v11589_v52 = vcombine.high %v1432_v40, %v1436_v41  ;;  %v1269_v63 = vld [vmem:[#allocation8 + $0x3f8] sm:$0xff] }
 0x14f   :  { %3773 = vmatpush2.bf16.msra.mxu0 %v11380_v58  ;;  %v1169_v58 = vld [vmem:[#allocation8 + $0xd8] sm:$0xff] }
 0x150   :  { %3814 = vmatpush2.bf16.msra.mxu1 %v11508_v18  ;;  %3774 = vmatprep.subr.bf16.mxu0 %v11373_v60  ;;  %v1173_v18 = vld [vmem:[#allocation8 + $0xf8] sm:$0xff]  ;;  %v11588_v60 = vcombine.low %v1432_v40, %v1436_v41 }
 0x151   :  { %3815 = vmatprep.subr.bf16.mxu1 %v11501_v61  ;;  %v11581_v61 = vcombine.high %v1424_v56, %v1428_v57  ;;  %v11327_v62 = vcombine.high %v1169_v58, %v1173_v18  ;;  %v1261_v40 = vld [vmem:[#allocation8 + $0x3b8] sm:$0xff] }
 0x153   :  { %3775 = vmatpush2.bf16.msra.mxu0 %v11372_v3  ;;  %v1165_v3 = vld [vmem:[#allocation8 + $0xb8] sm:$0xff] }
 0x154   :  { %3816 = vmatpush2.bf16.msra.mxu1 %v11500_v4  ;;  %3776 = vmatprep.subr.bf16.mxu0 %v11365_v5  ;;  %v11580_v4 = vcombine.low %v1424_v56, %v1428_v57  ;;  %v11326_v5 = vcombine.low %v1169_v58, %v1173_v18  ;;  %v11319_v7 = vcombine.high %v1161_v2, %v1165_v3  ;;  %v1496_v57 = vld [vmem:[#allocation8 + $0xb10] sm:$0xff]  ;;  %v1241_v18 = vld [vmem:[#allocation8 + $0x318] sm:$0xff] }
 0x155   :  { %3817 = vmatprep.subr.bf16.mxu1 %v11493_v6  ;;  %v11573_v6 = vcombine.high %v1416_v0, %v1420_v1  ;;  %v1500_v58 = vld [vmem:[#allocation8 + $0xb30] sm:$0xff] }
 0x157   :  { %3777 = vmatpush2.bf16.msra.mxu0 %v11364_v12  ;;  %v1157_v12 = vld [vmem:[#allocation8 + $0x78] sm:$0xff] }
 0x158   :  { %3818 = vmatpush2.bf16.msra.mxu1 %v11492_v14  ;;  %3828 = vmatprep.subr.bf16.mxu0 %v11613_v15  ;;  %v11572_v14 = vcombine.low %v1416_v0, %v1420_v1  ;;  %v11318_v15 = vcombine.low %v1161_v2, %v1165_v3  ;;  %v11311_v17 = vcombine.high %v1153_v11, %v1157_v12  ;;  %v1488_v1 = vld [vmem:[#allocation8 + $0xad0] sm:$0xff]  ;;  %v1233_v3 = vld [vmem:[#allocation8 + $0x2d8] sm:$0xff] }
 0x159   :  { %3869 = vmatprep.subr.bf16.mxu1 %v11359_v16  ;;  %v11565_v16 = vcombine.high %v1408_v8, %v1412_v10  ;;  %v1492_v2 = vld [vmem:[#allocation8 + $0xaf0] sm:$0xff] }
 0x15a   :  { %v3534_v28 = vpop.f32.mrf.mxu0  ;;  %3779 = vmatmul.mubr.bf16.vlgmr.msra.gmra.mxu0 %v13216_v59 }
 0x15b   :  { %v3575_v31 = vpop.f32.mrf.mxu1  ;;  %3820 = vmatmul.mubr.bf16.vlgmr.msra.gmra.mxu1 %v13222_v30  ;;  %3829 = vmatpush1.bf16.msra.mxu0 %v11612_v22  ;;  %v1149_v22 = vld [vmem:[#allocation8 + $0x38] sm:$0xff] }
 0x15c   :  { %v13245_v33 = vadd.f32 %v3575_v31, %v3534_v28  ;;  %3870 = vmatpush1.bf16.msra.mxu1 %v11358_v23  ;;  %v3536_v34 = vpop.f32.mrf.mxu0  ;;  %3830 = vmatprep.subr.bf16.mxu0 %v11605_v24  ;;  %v11564_v23 = vcombine.low %v1408_v8, %v1412_v10  ;;  %v11310_v24 = vcombine.low %v1153_v11, %v1157_v12  ;;  %v1524_v28 = vld [vmem:[#allocation8 + $0xbf0] sm:$0xff]  ;;  %v1225_v12 = vld [vmem:[#allocation8 + $0x298] sm:$0xff] }
 0x15d   :  { %v3577_v37 = vpop.f32.mrf.mxu1  ;;  %3871 = vmatprep.subr.bf16.mxu1 %v11351_v25  ;;  %3860 = vmatprep.mubr.bf16.mxu0 %v13225_v38  ;;  %v11557_v25 = vcombine.high %v1400_v19, %v1404_v20  ;;  %v11303_v26 = vcombine.high %v1145_v21, %v1149_v22  ;;  %v11556_v31 = vcombine.low %v1400_v19, %v1404_v20  ;;  %v1480_v10 = vld [vmem:[#allocation8 + $0xa90] sm:$0xff] }
 0x15e   :  { %v13248_v42 = vadd.f32 %v3577_v37, %v3536_v34  ;;  %v3538_v43 = vpop.f32.mrf.mxu0  ;;  %3901 = vmatprep.mubr.bf16.mxu1 %v13201_v9  ;;  %v11334_v9 = vcombine.low %v1177_v45, %v1181_v46  ;;  %v11677_v34 = vcombine.high %v1520_v27, %v1524_v28  ;;  %v1516_v37 = vld [vmem:[#allocation8 + $0xbb0] sm:$0xff]  ;;  %v11676_v41 = vcombine.low %v1520_v27, %v1524_v28 }
 0x15f   :  { %v3579_v47 = vpop.f32.mrf.mxu1  ;;  %3831 = vmatpush1.bf16.msra.mxu0 %v11604_v32  ;;  %v11302_v32 = vcombine.low %v1145_v21, %v1149_v22  ;;  %v11422_v43 = vcombine.low %v1265_v29, %v1269_v63  ;;  %v1484_v11 = vld [vmem:[#allocation8 + $0xab0] sm:$0xff]  ;;  %v1217_v22 = vld [vmem:[#allocation8 + $0x258] sm:$0xff] }
 0x160   :  { %3872 = vmatpush1.bf16.msra.mxu1 %v11350_v35  ;;  %v3539_v50 = vpop.f32.mrf.mxu0  ;;  %3832 = vmatprep.subr.bf16.mxu0 %v11597_v36  ;;  %v11423_v35 = vcombine.high %v1265_v29, %v1269_v63  ;;  %v1512_v36 = vld [vmem:[#allocation8 + $0xb90] sm:$0xff]  ;;  %v1209_v63 = vld [vmem:[#allocation8 + $0x218] sm:$0xff] }
 0x161   :  { %v3580_v54 = vpop.f32.mrf.mxu1  ;;  %3873 = vmatprep.subr.bf16.mxu1 %v11343_v39  ;;  %v1257_v39 = vld [vmem:[#allocation8 + $0x398] sm:$0xff]  ;;  %v11669_v45 = vcombine.high %v1512_v36, %v1516_v37  ;;  %v1504_v47 = vld [vmem:[#allocation8 + $0xb50] sm:$0xff] }
 0x162   :  { %v11415_v46 = vcombine.high %v1257_v39, %v1261_v40  ;;  %v1249_v50 = vld [vmem:[#allocation8 + $0x358] sm:$0xff]  ;;  %v11414_v54 = vcombine.low %v1257_v39, %v1261_v40  ;;  %v1472_v20 = vld [vmem:[#allocation8 + $0xa50] sm:$0xff] }
 0x163   :  { %3833 = vmatpush1.bf16.msra.mxu0 %v11596_v49  ;;  %v1508_v49 = vld [vmem:[#allocation8 + $0xb70] sm:$0xff]  ;;  %v1333_v39 = vld [vmem:[#allocation8 + $0x5f8] sm:$0xff] }
 0x164   :  { %3874 = vmatpush1.bf16.msra.mxu1 %v11342_v51  ;;  %3834 = vmatprep.subr.bf16.mxu0 %v11589_v52  ;;  %v1253_v51 = vld [vmem:[#allocation8 + $0x378] sm:$0xff]  ;;  %v11668_v52 = vcombine.low %v1512_v36, %v1516_v37  ;;  %v1476_v21 = vld [vmem:[#allocation8 + $0xa70] sm:$0xff] }
 0x165   :  { %3875 = vmatprep.subr.bf16.mxu1 %v11335_v55  ;;  %v11661_v55 = vcombine.high %v1504_v47, %v1508_v49  ;;  %v11407_v56 = vcombine.high %v1249_v50, %v1253_v51  ;;  %v1464_v28 = vld [vmem:[#allocation8 + $0xa10] sm:$0xff]  ;;  %v1329_v37 = vld [vmem:[#allocation8 + $0x5d8] sm:$0xff] }
 0x166   :  { %v1468_v29 = vld [vmem:[#allocation8 + $0xa30] sm:$0xff]  ;;  %v1457_v40 = vld [vmem:[#allocation8 + $0x9d8] sm:$0xff] }
 0x167   :  { %3835 = vmatpush1.bf16.msra.mxu0 %v11588_v60  ;;  %v1245_v60 = vld [vmem:[#allocation8 + $0x338] sm:$0xff] }
 0x168   :  { %3876 = vmatpush1.bf16.msra.mxu1 %v11334_v9  ;;  %3836 = vmatprep.subr.bf16.mxu0 %v11581_v61  ;;  %v11660_v9 = vcombine.low %v1504_v47, %v1508_v49  ;;  %v11406_v61 = vcombine.low %v1249_v50, %v1253_v51  ;;  %v11399_v0 = vcombine.high %v1241_v18, %v1245_v60  ;;  %v1321_v49 = vld [vmem:[#allocation8 + $0x598] sm:$0xff] }
 0x169   :  { %3877 = vmatprep.subr.bf16.mxu1 %v11327_v62  ;;  %v11653_v62 = vcombine.high %v1496_v57, %v1500_v58  ;;  %v1325_v50 = vld [vmem:[#allocation8 + $0x5b8] sm:$0xff] }
 0x16a   :  { %v1449_v51 = vld [vmem:[#allocation8 + $0x998] sm:$0xff] }
 0x16b   :  { %3837 = vmatpush1.bf16.msra.mxu0 %v11580_v4  ;;  %v1237_v4 = vld [vmem:[#allocation8 + $0x2f8] sm:$0xff] }
 0x16c   :  { %3878 = vmatpush1.bf16.msra.mxu1 %v11326_v5  ;;  %3838 = vmatprep.subr.bf16.mxu0 %v11573_v6  ;;  %v11652_v5 = vcombine.low %v1496_v57, %v1500_v58  ;;  %v11398_v6 = vcombine.low %v1241_v18, %v1245_v60  ;;  %v11391_v8 = vcombine.high %v1233_v3, %v1237_v4  ;;  %v1313_v58 = vld [vmem:[#allocation8 + $0x558] sm:$0xff] }
 0x16d   :  { %3879 = vmatprep.subr.bf16.mxu1 %v11319_v7  ;;  %v11645_v7 = vcombine.high %v1488_v1, %v1492_v2  ;;  %v1317_v18 = vld [vmem:[#allocation8 + $0x578] sm:$0xff] }
 0x16f   :  { %3839 = vmatpush1.bf16.msra.mxu0 %v11572_v14  ;;  %v1229_v14 = vld [vmem:[#allocation8 + $0x2b8] sm:$0xff] }
 0x170   :  { %3880 = vmatpush1.bf16.msra.mxu1 %v11318_v15  ;;  %3840 = vmatprep.subr.bf16.mxu0 %v11565_v16  ;;  %v11644_v15 = vcombine.low %v1488_v1, %v1492_v2  ;;  %v11390_v16 = vcombine.low %v1233_v3, %v1237_v4  ;;  %v11383_v19 = vcombine.high %v1225_v12, %v1229_v14 }
 0x171   :  { %3881 = vmatprep.subr.bf16.mxu1 %v11311_v17  ;;  %v11637_v17 = vcombine.high %v1480_v10, %v1484_v11  ;;  %v11478_v1 = vcombine.low %v1321_v49, %v1325_v50  ;;  %v11471_v4 = vcombine.high %v1313_v58, %v1317_v18 }
 0x173   :  { %3841 = vmatpush1.bf16.msra.mxu0 %v11564_v23  ;;  %v1221_v23 = vld [vmem:[#allocation8 + $0x278] sm:$0xff] }
 0x174   :  { %3882 = vmatpush1.bf16.msra.mxu1 %v11310_v24  ;;  %3842 = vmatprep.subr.bf16.mxu0 %v11557_v25  ;;  %v11636_v24 = vcombine.low %v1480_v10, %v1484_v11  ;;  %v11382_v25 = vcombine.low %v1225_v12, %v1229_v14  ;;  %v11375_v27 = vcombine.high %v1217_v22, %v1221_v23  ;;  %v1437_v11 = vld [vmem:[#allocation8 + $0x938] sm:$0xff] }
 0x175   :  { %3883 = vmatprep.subr.bf16.mxu1 %v11303_v26  ;;  %v11629_v26 = vcombine.high %v1472_v20, %v1476_v21  ;;  %v11470_v14 = vcombine.low %v1313_v58, %v1317_v18  ;;  %v1521_v58 = vld [vmem:[#allocation8 + $0xbd8] sm:$0xff] }
 0x176   :  { %v1525_v18 = vld [vmem:[#allocation8 + $0xbf8] sm:$0xff] }
 0x177   :  { %3843 = vmatpush1.bf16.msra.mxu0 %v11556_v31  ;;  %v1213_v31 = vld [vmem:[#allocation8 + $0x238] sm:$0xff] }
 0x178   :  { %3884 = vmatpush1.bf16.msra.mxu1 %v11302_v32  ;;  %3844 = vmatprep.subr.bf16.mxu0 %v11677_v34  ;;  %v11628_v32 = vcombine.low %v1472_v20, %v1476_v21  ;;  %v11374_v34 = vcombine.low %v1217_v22, %v1221_v23  ;;  %v11367_v36 = vcombine.high %v1209_v63, %v1213_v31  ;;  %v1297_v20 = vld [vmem:[#allocation8 + $0x4d8] sm:$0xff] }
 0x179   :  { %3885 = vmatprep.subr.bf16.mxu1 %v11423_v35  ;;  %v11621_v35 = vcombine.high %v1464_v28, %v1468_v29  ;;  %v1301_v21 = vld [vmem:[#allocation8 + $0x4f8] sm:$0xff] }
 0x17a   :  { %v1425_v22 = vld [vmem:[#allocation8 + $0x8d8] sm:$0xff] }
 0x17b   :  { %3845 = vmatpush2.bf16.msra.mxu0 %v11676_v41  ;;  %v1461_v41 = vld [vmem:[#allocation8 + $0x9f8] sm:$0xff] }
 0x17c   :  { %3886 = vmatpush2.bf16.msra.mxu1 %v11422_v43  ;;  %3846 = vmatprep.subr.bf16.mxu0 %v11669_v45  ;;  %v11620_v43 = vcombine.low %v1464_v28, %v1468_v29  ;;  %v11366_v45 = vcombine.low %v1209_v63, %v1213_v31  ;;  %v11615_v47 = vcombine.high %v1457_v40, %v1461_v41  ;;  %v1417_v28 = vld [vmem:[#allocation8 + $0x898] sm:$0xff] }
 0x17d   :  { %3887 = vmatprep.subr.bf16.mxu1 %v11415_v46  ;;  %v11487_v46 = vcombine.high %v1329_v37, %v1333_v39  ;;  %v1421_v29 = vld [vmem:[#allocation8 + $0x8b8] sm:$0xff]  ;;  %v11454_v63 = vcombine.low %v1297_v20, %v1301_v21 }
 0x17f   :  { %3847 = vmatpush2.bf16.msra.mxu0 %v11668_v52  ;;  %v1453_v52 = vld [vmem:[#allocation8 + $0x9b8] sm:$0xff] }
 0x180   :  { %3888 = vmatpush2.bf16.msra.mxu1 %v11414_v54  ;;  %3848 = vmatprep.subr.bf16.mxu0 %v11661_v55  ;;  %v11486_v54 = vcombine.low %v1329_v37, %v1333_v39  ;;  %v11614_v55 = vcombine.low %v1457_v40, %v1461_v41  ;;  %v11607_v57 = vcombine.high %v1449_v51, %v1453_v52  ;;  %v1409_v37 = vld [vmem:[#allocation8 + $0x858] sm:$0xff] }
 0x181   :  { %3889 = vmatprep.subr.bf16.mxu1 %v11407_v56  ;;  %v11479_v56 = vcombine.high %v1321_v49, %v1325_v50  ;;  %v11606_v3 = vcombine.low %v1449_v51, %v1453_v52  ;;  %v1413_v39 = vld [vmem:[#allocation8 + $0x878] sm:$0xff]  ;;  %v11574_v41 = vcombine.low %v1417_v28, %v1421_v29 }
 0x182   :  { %v1401_v49 = vld [vmem:[#allocation8 + $0x818] sm:$0xff]  ;;  %v11566_v52 = vcombine.low %v1409_v37, %v1413_v39 }
 0x183   :  { %3849 = vmatpush2.bf16.msra.mxu0 %v11660_v9  ;;  %v1441_v9 = vld [vmem:[#allocation8 + $0x958] sm:$0xff] }
 0x184   :  { %3890 = vmatpush2.bf16.msra.mxu1 %v11406_v61  ;;  %3850 = vmatprep.subr.bf16.mxu0 %v11653_v62  ;;  %v1445_v61 = vld [vmem:[#allocation8 + $0x978] sm:$0xff] }
 0x185   :  { %3891 = vmatprep.subr.bf16.mxu1 %v11399_v0  ;;  %v1405_v50 = vld [vmem:[#allocation8 + $0x838] sm:$0xff] }
 0x187   :  { %3851 = vmatpush2.bf16.msra.mxu0 %v11652_v5 }
 0x188   :  { %3892 = vmatpush2.bf16.msra.mxu1 %v11398_v6  ;;  %3852 = vmatprep.subr.bf16.mxu0 %v11645_v7  ;;  %v11599_v7 = vcombine.high %v1441_v9, %v1445_v61 }
 0x189   :  { %3893 = vmatprep.subr.bf16.mxu1 %v11391_v8  ;;  %v1309_v8 = vld [vmem:[#allocation8 + $0x538] sm:$0xff] }
 0x18b   :  { %3853 = vmatpush2.bf16.msra.mxu0 %v11644_v15 }
 0x18c   :  { %3894 = vmatpush2.bf16.msra.mxu1 %v11390_v16  ;;  %3854 = vmatprep.subr.bf16.mxu0 %v11637_v17 }
 0x18d   :  { %3895 = vmatprep.subr.bf16.mxu1 %v11383_v19 }
 0x18f   :  { %3855 = vmatpush2.bf16.msra.mxu0 %v11636_v24  ;;  %v11455_v24 = vcombine.high %v1297_v20, %v1301_v21  ;;  %v1369_v20 = vld [vmem:[#allocation8 + $0x718] sm:$0xff] }
 0x190   :  { %3896 = vmatpush2.bf16.msra.mxu1 %v11382_v25  ;;  %3856 = vmatprep.subr.bf16.mxu0 %v11629_v26  ;;  %v1289_v26 = vld [vmem:[#allocation8 + $0x498] sm:$0xff] }
 0x191   :  { %3897 = vmatprep.subr.bf16.mxu1 %v11375_v27  ;;  %v1293_v27 = vld [vmem:[#allocation8 + $0x4b8] sm:$0xff] }
 0x192   :  { %v11446_v40 = vcombine.low %v1289_v26, %v1293_v27  ;;  %v1373_v21 = vld [vmem:[#allocation8 + $0x738] sm:$0xff] }
 0x193   :  { %3857 = vmatpush2.bf16.msra.mxu0 %v11628_v32  ;;  %v11447_v32 = vcombine.high %v1289_v26, %v1293_v27  ;;  %v1361_v26 = vld [vmem:[#allocation8 + $0x6d8] sm:$0xff] }
 0x194   :  { %3898 = vmatpush2.bf16.msra.mxu1 %v11374_v34  ;;  %3858 = vmatprep.subr.bf16.mxu0 %v11621_v35  ;;  %v11575_v34 = vcombine.high %v1417_v28, %v1421_v29  ;;  %v1281_v35 = vld [vmem:[#allocation8 + $0x458] sm:$0xff] }
 0x195   :  { %3899 = vmatprep.subr.bf16.mxu1 %v11367_v36  ;;  %v1285_v36 = vld [vmem:[#allocation8 + $0x478] sm:$0xff] }
 0x196   :  { %v11438_v51 = vcombine.low %v1281_v35, %v1285_v36  ;;  %v1365_v27 = vld [vmem:[#allocation8 + $0x6f8] sm:$0xff] }
 0x197   :  { %3859 = vmatpush2.bf16.msra.mxu0 %v11620_v43  ;;  %v11439_v43 = vcombine.high %v1281_v35, %v1285_v36  ;;  %v1489_v28 = vld [vmem:[#allocation8 + $0xad8] sm:$0xff] }
 0x198   :  { %3900 = vmatpush2.bf16.msra.mxu1 %v11366_v45  ;;  %3910 = vmatprep.subr.bf16.mxu0 %v11487_v46  ;;  %v11567_v45 = vcombine.high %v1409_v37, %v1413_v39  ;;  %v1273_v46 = vld [vmem:[#allocation8 + $0x418] sm:$0xff] }
 0x199   :  { %3951 = vmatprep.subr.bf16.mxu1 %v11615_v47  ;;  %v1277_v47 = vld [vmem:[#allocation8 + $0x438] sm:$0xff] }
 0x19a   :  { %v3616_v60 = vpop.f32.mrf.mxu0  ;;  %3861 = vmatmul.mubr.bf16.vlgmr.msra.gmra.mxu0 %v13233_v48  ;;  %v1493_v29 = vld [vmem:[#allocation8 + $0xaf8] sm:$0xff] }
 0x19b   :  { %v13253_v62 = vadd.f32 %v3616_v60, %v13245_v33  ;;  %v13255_v0 = vpop.f32.mrf.mxu1  ;;  %3902 = vmatmul.mubr.bf16.vlgmr.msra.gmra.mxu1 %v13216_v59  ;;  %3911 = vmatpush1.bf16.msra.mxu0 %v11486_v54  ;;  %v1305_v33 = vld [vmem:[#allocation8 + $0x518] sm:$0xff]  ;;  %v11431_v54 = vcombine.high %v1273_v46, %v1277_v47  ;;  %v11430_v60 = vcombine.low %v1273_v46, %v1277_v47 }
 0x19c   :  { %3952 = vmatpush1.bf16.msra.mxu1 %v11614_v55  ;;  %v3618_v2 = vpop.f32.mrf.mxu0  ;;  %3912 = vmatprep.subr.bf16.mxu0 %v11479_v56  ;;  %v1433_v59 = vld [vmem:[#allocation8 + $0x918] sm:$0xff]  ;;  %v11463_v16 = vcombine.high %v1305_v33, %v1309_v8  ;;  %v11462_v23 = vcombine.low %v1305_v33, %v1309_v8  ;;  %v11559_v55 = vcombine.high %v1401_v49, %v1405_v50 }
 0x19d   :  { %v13259_v5 = vadd.f32 %v3618_v2, %v13248_v42  ;;  %v13261_v6 = vpop.f32.mrf.mxu1  ;;  %3953 = vmatprep.subr.bf16.mxu1 %v11607_v57  ;;  %3942 = vmatprep.mubr.bf16.mxu0 %v13206_v13  ;;  %v11598_v42 = vcombine.low %v1441_v9, %v1445_v61  ;;  %v11591_v19 = vcombine.high %v1433_v59, %v1437_v11  ;;  %v1429_v13 = vld [vmem:[#allocation8 + $0x8f8] sm:$0xff] }
 0x19e   :  { %v3620_v10 = vpop.f32.mrf.mxu0  ;;  %3983 = vmatprep.mubr.bf16.mxu1 %v13225_v38  ;;  %v11590_v38 = vcombine.low %v1433_v59, %v1437_v11  ;;  %v11583_v25 = vcombine.high %v1425_v22, %v1429_v13  ;;  %v11582_v31 = vcombine.low %v1425_v22, %v1429_v13  ;;  %v1393_v56 = vld [vmem:[#allocation8 + $0x7d8] sm:$0xff]  ;;  %v11558_v9 = vcombine.low %v1401_v49, %v1405_v50 }
 0x19f   :  { %v3661_v12 = vpop.f32.mrf.mxu1  ;;  %3913 = vmatpush1.bf16.msra.mxu0 %v11478_v1  ;;  %v1397_v57 = vld [vmem:[#allocation8 + $0x7f8] sm:$0xff]  ;;  %v11679_v1 = vcombine.high %v1521_v58, %v1525_v18  ;;  %v11678_v8 = vcombine.low %v1521_v58, %v1525_v18 }
 0x1a0   :  { %3954 = vmatpush1.bf16.msra.mxu1 %v11606_v3  ;;  %v3621_v15 = vpop.f32.mrf.mxu0  ;;  %3914 = vmatprep.subr.bf16.mxu0 %v11471_v4  ;;  %v11551_v61 = vcombine.high %v1393_v56, %v1397_v57  ;;  %v1385_v2 = vld [vmem:[#allocation8 + $0x798] sm:$0xff]  ;;  %v11550_v33 = vcombine.low %v1393_v56, %v1397_v57 }
 0x1a1   :  { %v3662_v17 = vpop.f32.mrf.mxu1  ;;  %3955 = vmatprep.subr.bf16.mxu1 %v11599_v7  ;;  %v1389_v3 = vld [vmem:[#allocation8 + $0x7b8] sm:$0xff] }
 0x1a2   :  { %v1513_v4 = vld [vmem:[#allocation8 + $0xb98] sm:$0xff]  ;;  %v11543_v10 = vcombine.high %v1385_v2, %v1389_v3 }
 0x1a3   :  { %3915 = vmatpush1.bf16.msra.mxu0 %v11470_v14  ;;  %v1517_v7 = vld [vmem:[#allocation8 + $0xbb8] sm:$0xff] }
 0x1a4   :  { %3956 = vmatpush1.bf16.msra.mxu1 %v11598_v42  ;;  %3916 = vmatprep.subr.bf16.mxu0 %v11463_v16  ;;  %v11671_v59 = vcombine.high %v1513_v4, %v1517_v7  ;;  %v1377_v11 = vld [vmem:[#allocation8 + $0x758] sm:$0xff]  ;;  %v11542_v42 = vcombine.low %v1385_v2, %v1389_v3  ;;  %v11670_v16 = vcombine.low %v1513_v4, %v1517_v7  ;;  %v173_v4 = vld [vmem:[#allocation7 + $0x1c0] sm:$0xff] }
 0x1a5   :  { %3957 = vmatprep.subr.bf16.mxu1 %v11591_v19  ;;  %v1381_v12 = vld [vmem:[#allocation8 + $0x778] sm:$0xff]  ;;  %v177_v7 = vld [vmem:[#allocation7 + $0x1e0] sm:$0xff] }
 0x1a6   :  { %v1505_v14 = vld [vmem:[#allocation8 + $0xb58] sm:$0xff]  ;;  %v11535_v17 = vcombine.high %v1377_v11, %v1381_v12 }
 0x1a7   :  { %3917 = vmatpush1.bf16.msra.mxu0 %v11462_v23  ;;  %v1509_v15 = vld [vmem:[#allocation8 + $0xb78] sm:$0xff]  ;;  %v11534_v23 = vcombine.low %v1377_v11, %v1381_v12  ;;  %v11737_v12 = vcombine.high %v173_v4, %v177_v7 }
 0x1a8   :  { %3958 = vmatpush1.bf16.msra.mxu1 %v11590_v38  ;;  %3918 = vmatprep.subr.bf16.mxu0 %v11455_v24  ;;  %v11663_v19 = vcombine.high %v1505_v14, %v1509_v15  ;;  %v1497_v22 = vld [vmem:[#allocation8 + $0xb18] sm:$0xff]  ;;  %v11662_v38 = vcombine.low %v1505_v14, %v1509_v15  ;;  %v11527_v24 = vcombine.high %v1369_v20, %v1373_v21  ;;  %v165_v15 = vld [vmem:[#allocation7 + $0x180] sm:$0xff] }
 0x1a9   :  { %3959 = vmatprep.subr.bf16.mxu1 %v11583_v25  ;;  %v1501_v13 = vld [vmem:[#allocation8 + $0xb38] sm:$0xff] }
 0x1aa   :  { %v11655_v25 = vcombine.high %v1497_v22, %v1501_v13  ;;  %v1353_v35 = vld [vmem:[#allocation8 + $0x698] sm:$0xff] }
 0x1ab   :  { %3919 = vmatpush1.bf16.msra.mxu0 %v11454_v63  ;;  %v11526_v63 = vcombine.low %v1369_v20, %v1373_v21  ;;  %v1357_v36 = vld [vmem:[#allocation8 + $0x6b8] sm:$0xff]  ;;  %v11736_v20 = vcombine.low %v173_v4, %v177_v7  ;;  %v265_v4 = vld [vmem:[#allocation7 + $0x4a0] sm:$0xff] }
 0x1ac   :  { %3960 = vmatpush1.bf16.msra.mxu1 %v11582_v31  ;;  %3920 = vmatprep.subr.bf16.mxu0 %v11447_v32  ;;  %v11654_v31 = vcombine.low %v1497_v22, %v1501_v13  ;;  %v11519_v32 = vcombine.high %v1361_v26, %v1365_v27  ;;  %v1481_v37 = vld [vmem:[#allocation8 + $0xa98] sm:$0xff] }
 0x1ad   :  { %3961 = vmatprep.subr.bf16.mxu1 %v11575_v34  ;;  %v11647_v34 = vcombine.high %v1489_v28, %v1493_v29  ;;  %v1485_v39 = vld [vmem:[#allocation8 + $0xab8] sm:$0xff] }
 0x1ae   :  { %v1345_v46 = vld [vmem:[#allocation8 + $0x658] sm:$0xff] }
 0x1af   :  { %3921 = vmatpush1.bf16.msra.mxu0 %v11446_v40  ;;  %v11518_v40 = vcombine.low %v1361_v26, %v1365_v27  ;;  %v1349_v47 = vld [vmem:[#allocation8 + $0x678] sm:$0xff]  ;;  %v289_v26 = vld [vmem:[#allocation7 + $0x560] sm:$0xff] }
 0x1b0   :  { %3962 = vmatpush1.bf16.msra.mxu1 %v11574_v41  ;;  %3922 = vmatprep.subr.bf16.mxu0 %v11439_v43  ;;  %v11646_v41 = vcombine.low %v1489_v28, %v1493_v29  ;;  %v11511_v43 = vcombine.high %v1353_v35, %v1357_v36  ;;  %v1473_v49 = vld [vmem:[#allocation8 + $0xa58] sm:$0xff] }
 0x1b1   :  { %3963 = vmatprep.subr.bf16.mxu1 %v11567_v45  ;;  %v11639_v45 = vcombine.high %v1481_v37, %v1485_v39  ;;  %v1477_v50 = vld [vmem:[#allocation8 + $0xa78] sm:$0xff] }
 0x1b2   :  { %v11631_v56 = vcombine.high %v1473_v49, %v1477_v50  ;;  %v1337_v57 = vld [vmem:[#allocation8 + $0x618] sm:$0xff] }
 0x1b3   :  { %3923 = vmatpush1.bf16.msra.mxu0 %v11438_v51  ;;  %v11510_v51 = vcombine.low %v1353_v35, %v1357_v36  ;;  %v1341_v58 = vld [vmem:[#allocation8 + $0x638] sm:$0xff] }
 0x1b4   :  { %3964 = vmatpush1.bf16.msra.mxu1 %v11566_v52  ;;  %3924 = vmatprep.subr.bf16.mxu0 %v11431_v54  ;;  %v13265_v52 = vld [vmem:[#allocation2] sm:$0xff]  ;;  %v11638_v54 = vcombine.low %v1481_v37, %v1485_v39  ;;  %v1465_v18 = vld [vmem:[#allocation8 + $0xa18] sm:$0xff]  ;;  %v11495_v2 = vcombine.high %v1337_v57, %v1341_v58  ;;  %v149_v39 = vld [vmem:[#allocation7 + $0x100] sm:$0xff] }
 0x1b5   :  { %3965 = vmatprep.subr.bf16.mxu1 %v11559_v55  ;;  %v11503_v55 = vcombine.high %v1345_v46, %v1349_v47 }
 0x1b7   :  { %3925 = vmatpush1.bf16.msra.mxu0 %v11430_v60  ;;  %v1469_v60 = vld [vmem:[#allocation8 + $0xa38] sm:$0xff] }
 0x1b8   :  { %3966 = vmatpush1.bf16.msra.mxu1 %v11558_v9  ;;  %3926 = vmatprep.subr.bf16.mxu0 %v11551_v61  ;;  %v13269_v9 = vrot.slane %v13265_v52, %v13190_v53  ;;  %v11502_v61 = vcombine.low %v1345_v46, %v1349_v47  ;;  %v11623_v3 = vcombine.high %v1465_v18, %v1469_v60 }
 0x1b9   :  { %3967 = vmatprep.subr.bf16.mxu1 %v11679_v1  ;;  %v11630_v1 = vcombine.low %v1473_v49, %v1477_v50  ;;  %v11622_v11 = vcombine.low %v1465_v18, %v1469_v60 }
 0x1bb   :  { %3927 = vmatpush2.bf16.msra.mxu0 %v11550_v33  ;;  %v301_v33 = vld [vmem:[#allocation7 + $0x5c0] sm:$0xff] }
 0x1bc   :  { %3968 = vmatpush2.bf16.msra.mxu1 %v11678_v8  ;;  %3928 = vmatprep.subr.bf16.mxu0 %v11543_v10  ;;  %v305_v8 = vld [vmem:[#allocation7 + $0x5e0] sm:$0xff]  ;;  %v4009_v10 = vcombine.high %v13269_v9, %v13269_v9 }
 0x1bd   :  { %3969 = vmatprep.subr.bf16.mxu1 %v11671_v59  ;;  %v11494_v59 = vcombine.low %v1337_v57, %v1341_v58  ;;  %v11865_v14 = vcombine.high %v301_v33, %v305_v8  ;;  %v11864_v21 = vcombine.low %v301_v33, %v305_v8  ;;  %v273_v57 = vld [vmem:[#allocation7 + $0x4e0] sm:$0xff] }
 0x1bf   :  { %3929 = vmatpush2.bf16.msra.mxu0 %v11542_v42  ;;  %v169_v42 = vld [vmem:[#allocation7 + $0x1a0] sm:$0xff] }
 0x1c0   :  { %3970 = vmatpush2.bf16.msra.mxu1 %v11670_v16  ;;  %3930 = vmatprep.subr.bf16.mxu0 %v11535_v17  ;;  %v293_v16 = vld [vmem:[#allocation7 + $0x580] sm:$0xff]  ;;  %v11729_v22 = vcombine.high %v165_v15, %v169_v42 }
 0x1c1   :  { %3971 = vmatprep.subr.bf16.mxu1 %v11663_v19  ;;  %v297_v17 = vld [vmem:[#allocation7 + $0x5a0] sm:$0xff]  ;;  %v13274_v19 = vrot.slane %v4009_v10, %v13190_v53 }
 0x1c2   :  { %v11857_v13 = vcombine.high %v293_v16, %v297_v17 }
 0x1c3   :  { %3931 = vmatpush2.bf16.msra.mxu0 %v11534_v23  ;;  %v157_v23 = vld [vmem:[#allocation7 + $0x140] sm:$0xff]  ;;  %v13279_v27 = vcombine.high %v13274_v19, %v13274_v19 }
 0x1c4   :  { %3972 = vmatpush2.bf16.msra.mxu1 %v11662_v38  ;;  %3932 = vmatprep.subr.bf16.mxu0 %v11527_v24  ;;  %v161_v38 = vld [vmem:[#allocation7 + $0x160] sm:$0xff] }
 0x1c5   :  { %3973 = vmatprep.subr.bf16.mxu1 %v11655_v25  ;;  %v285_v25 = vld [vmem:[#allocation7 + $0x540] sm:$0xff]  ;;  %v11720_v46 = vcombine.low %v157_v23, %v161_v38 }
 0x1c6   :  { %v11849_v37 = vcombine.high %v285_v25, %v289_v26 }
 0x1c7   :  { %3933 = vmatpush2.bf16.msra.mxu0 %v11526_v63  ;;  %v11728_v63 = vcombine.low %v165_v15, %v169_v42 }
 0x1c8   :  { %3974 = vmatpush2.bf16.msra.mxu1 %v11654_v31  ;;  %3934 = vmatprep.subr.bf16.mxu0 %v11519_v32  ;;  %v11856_v32 = vcombine.low %v293_v16, %v297_v17 }
 0x1c9   :  { %3975 = vmatprep.subr.bf16.mxu1 %v11647_v34  ;;  %v11721_v34 = vcombine.high %v157_v23, %v161_v38 }
 0x1cb   :  { %3935 = vmatpush2.bf16.msra.mxu0 %v11518_v40  ;;  %v153_v40 = vld [vmem:[#allocation7 + $0x120] sm:$0xff] }
 0x1cc   :  { %3976 = vmatpush2.bf16.msra.mxu1 %v11646_v41  ;;  %3936 = vmatprep.subr.bf16.mxu0 %v11511_v43  ;;  %v281_v41 = vld [vmem:[#allocation7 + $0x520] sm:$0xff]  ;;  %v11713_v49 = vcombine.high %v149_v39, %v153_v40  ;;  %v11712_v58 = vcombine.low %v149_v39, %v153_v40 }
 0x1cd   :  { %3977 = vmatprep.subr.bf16.mxu1 %v11639_v45  ;;  %v357_v39 = vld [vmem:[#allocation7 + $0x780] sm:$0xff] }
 0x1ce   :  { %v361_v40 = vld [vmem:[#allocation7 + $0x7a0] sm:$0xff] }
 0x1cf   :  { %3937 = vmatpush2.bf16.msra.mxu0 %v11510_v51 }
 0x1d0   :  { %3978 = vmatpush2.bf16.msra.mxu1 %v11638_v54  ;;  %3938 = vmatprep.subr.bf16.mxu0 %v11503_v55  ;;  %v141_v54 = vld [vmem:[#allocation7 + $0xc0] sm:$0xff] }
 0x1d1   :  { %3979 = vmatprep.subr.bf16.mxu1 %v11631_v56  ;;  %v145_v55 = vld [vmem:[#allocation7 + $0xe0] sm:$0xff] }
 0x1d2   :  { %v269_v56 = vld [vmem:[#allocation7 + $0x4c0] sm:$0xff]  ;;  %v11705_v60 = vcombine.high %v141_v54, %v145_v55  ;;  %v11704_v7 = vcombine.low %v141_v54, %v145_v55 }
 0x1d3   :  { %3939 = vmatpush2.bf16.msra.mxu0 %v11502_v61  ;;  %v11833_v61 = vcombine.high %v269_v56, %v273_v57  ;;  %v11832_v33 = vcombine.low %v269_v56, %v273_v57  ;;  %v213_v56 = vld [vmem:[#allocation7 + $0x300] sm:$0xff] }
 0x1d4   :  { %3980 = vmatpush2.bf16.msra.mxu1 %v11630_v1  ;;  %3940 = vmatprep.subr.bf16.mxu0 %v11495_v2  ;;  %v133_v1 = vld [vmem:[#allocation7 + $0x80] sm:$0xff] }
 0x1d5   :  { %3981 = vmatprep.subr.bf16.mxu1 %v11623_v3  ;;  %v137_v2 = vld [vmem:[#allocation7 + $0xa0] sm:$0xff] }
 0x1d6   :  { %v261_v3 = vld [vmem:[#allocation7 + $0x480] sm:$0xff]  ;;  %v11697_v8 = vcombine.high %v133_v1, %v137_v2  ;;  %v11696_v15 = vcombine.low %v133_v1, %v137_v2 }
 0x1d7   :  { %3941 = vmatpush2.bf16.msra.mxu0 %v11494_v59  ;;  %v11825_v10 = vcombine.high %v261_v3, %v265_v4  ;;  %v125_v59 = vld [vmem:[#allocation7 + $0x40] sm:$0xff]  ;;  %v11824_v42 = vcombine.low %v261_v3, %v265_v4 }
 0x1d8   :  { %3982 = vmatpush2.bf16.msra.mxu1 %v11622_v11  ;;  %9228 = vmatprep.subr.bf16.mxu0 %v11737_v12  ;;  %v129_v11 = vld [vmem:[#allocation7 + $0x60] sm:$0xff] }
 0x1d9   :  { %9269 = vmatprep.subr.bf16.mxu1 %v11865_v14  ;;  %v253_v12 = vld [vmem:[#allocation7 + $0x440] sm:$0xff]  ;;  %v11689_v16 = vcombine.high %v125_v59, %v129_v11  ;;  %v11688_v23 = vcombine.low %v125_v59, %v129_v11 }
 0x1da   :  { %v3698_v24 = vpop.f32.mrf.mxu0  ;;  %3943 = vmatmul.mubr.bf16.vlgmr.msra.gmra.mxu0 %v13222_v30  ;;  %v257_v14 = vld [vmem:[#allocation7 + $0x460] sm:$0xff] }
 0x1db   :  { %v3699_v28 = vadd.f32 %v3698_v24, %v13255_v0  ;;  %v3739_v29 = vpop.f32.mrf.mxu1  ;;  %3984 = vmatmul.mubr.bf16.vlgmr.msra.gmra.mxu1 %v13233_v48  ;;  %9229 = vmatpush1.bf16.msra.mxu0 %v11736_v20  ;;  %v277_v48 = vld [vmem:[#allocation7 + $0x500] sm:$0xff]  ;;  %v11817_v17 = vcombine.high %v253_v12, %v257_v14  ;;  %v11816_v38 = vcombine.low %v253_v12, %v257_v14 }
 0x1dc   :  { %9270 = vmatpush1.bf16.msra.mxu1 %v11864_v21  ;;  %v3700_v31 = vpop.f32.mrf.mxu0  ;;  %9230 = vmatprep.subr.bf16.mxu0 %v11729_v22  ;;  %v11841_v51 = vcombine.high %v277_v48, %v281_v41  ;;  %v11840_v18 = vcombine.low %v277_v48, %v281_v41  ;;  %v117_v20 = vld [vmem:[#allocation7] sm:$0xff] }
 0x1dd   :  { %v13283_v35 = vadd.f32 %v3739_v29, %v3699_v28  ;;  %v3701_v30 = vadd.f32 %v3700_v31, %v13261_v6  ;;  %v3741_v36 = vpop.f32.mrf.mxu1  ;;  %9271 = vmatprep.subr.bf16.mxu1 %v11857_v13  ;;  %9260 = vmatprep.mubr.bf16.mxu0 %v13274_v19  ;;  %v11848_v6 = vcombine.low %v285_v25, %v289_v26  ;;  %v121_v21 = vld [vmem:[#allocation7 + $0x20] sm:$0xff] }
 0x1de   :  { %v3702_v0 = vpop.f32.mrf.mxu0  ;;  %9301 = vmatprep.mubr.bf16.mxu1 %v13279_v27  ;;  %v245_v22 = vld [vmem:[#allocation7 + $0x400] sm:$0xff]  ;;  %v11681_v24 = vcombine.high %v117_v20, %v121_v21  ;;  %v11680_v31 = vcombine.low %v117_v20, %v121_v21 }
 0x1df   :  { %v13288_v43 = vadd.f32 %v3741_v36, %v3701_v30  ;;  %v3743_v45 = vpop.f32.mrf.mxu1  ;;  %9231 = vmatpush1.bf16.msra.mxu0 %v11728_v63  ;;  %v249_v13 = vld [vmem:[#allocation7 + $0x420] sm:$0xff] }
 0x1e0   :  { %9272 = vmatpush1.bf16.msra.mxu1 %v11856_v32  ;;  %v3703_v47 = vpop.f32.mrf.mxu0  ;;  %9232 = vmatprep.subr.bf16.mxu0 %v11721_v34  ;;  %v11809_v25 = vcombine.high %v245_v22, %v249_v13  ;;  %v237_v26 = vld [vmem:[#allocation7 + $0x3c0] sm:$0xff]  ;;  %v11808_v32 = vcombine.low %v245_v22, %v249_v13  ;;  %v11921_v45 = vcombine.high %v357_v39, %v361_v40 }
 0x1e1   :  { %v3744_v50 = vpop.f32.mrf.mxu1  ;;  %9273 = vmatprep.subr.bf16.mxu1 %v11849_v37  ;;  %v241_v28 = vld [vmem:[#allocation7 + $0x3e0] sm:$0xff] }
 0x1e2   :  { %v365_v29 = vld [vmem:[#allocation7 + $0x7c0] sm:$0xff]  ;;  %v11801_v34 = vcombine.high %v237_v26, %v241_v28  ;;  %v11800_v0 = vcombine.low %v237_v26, %v241_v28 }
 0x1e3   :  { %9233 = vmatpush1.bf16.msra.mxu0 %v11720_v46  ;;  %v369_v63 = vld [vmem:[#allocation7 + $0x7e0] sm:$0xff] }
 0x1e4   :  { %9274 = vmatpush1.bf16.msra.mxu1 %v11848_v6  ;;  %9234 = vmatprep.subr.bf16.mxu0 %v11713_v49  ;;  %v11929_v30 = vcombine.high %v365_v29, %v369_v63  ;;  %v229_v36 = vld [vmem:[#allocation7 + $0x380] sm:$0xff]  ;;  %v11928_v48 = vcombine.low %v365_v29, %v369_v63 }
 0x1e5   :  { %9275 = vmatprep.subr.bf16.mxu1 %v11841_v51  ;;  %v233_v37 = vld [vmem:[#allocation7 + $0x3a0] sm:$0xff]  ;;  %v11920_v51 = vcombine.low %v357_v39, %v361_v40 }
 0x1e6   :  { %v11793_v41 = vcombine.high %v229_v36, %v233_v37  ;;  %v221_v46 = vld [vmem:[#allocation7 + $0x340] sm:$0xff]  ;;  %v11792_v50 = vcombine.low %v229_v36, %v233_v37 }
 0x1e7   :  { %9235 = vmatpush1.bf16.msra.mxu0 %v11712_v58  ;;  %v225_v47 = vld [vmem:[#allocation7 + $0x360] sm:$0xff] }
 0x1e8   :  { %9276 = vmatpush1.bf16.msra.mxu1 %v11840_v18  ;;  %9236 = vmatprep.subr.bf16.mxu0 %v11705_v60  ;;  %v349_v6 = vld [vmem:[#allocation7 + $0x740] sm:$0xff]  ;;  %v11785_v54 = vcombine.high %v221_v46, %v225_v47  ;;  %v11784_v60 = vcombine.low %v221_v46, %v225_v47  ;;  %v13299_v47 = vrot.slane %v13269_v9, %v13190_v53 }
 0x1e9   :  { %9277 = vmatprep.subr.bf16.mxu1 %v11833_v61  ;;  %v353_v49 = vld [vmem:[#allocation7 + $0x760] sm:$0xff] }
 0x1ea   :  { %v11913_v55 = vcombine.high %v349_v6, %v353_v49  ;;  %v217_v57 = vld [vmem:[#allocation7 + $0x320] sm:$0xff]  ;;  %v11912_v61 = vcombine.low %v349_v6, %v353_v49 }
 0x1eb   :  { %9237 = vmatpush1.bf16.msra.mxu0 %v11704_v7  ;;  %v341_v58 = vld [vmem:[#allocation7 + $0x700] sm:$0xff]  ;;  %v11777_v1 = vcombine.high %v213_v56, %v217_v57 }
 0x1ec   :  { %9278 = vmatpush1.bf16.msra.mxu1 %v11832_v33  ;;  %9238 = vmatprep.subr.bf16.mxu0 %v11697_v8  ;;  %v345_v18 = vld [vmem:[#allocation7 + $0x720] sm:$0xff]  ;;  %v11776_v8 = vcombine.low %v213_v56, %v217_v57 }
 0x1ed   :  { %9279 = vmatprep.subr.bf16.mxu1 %v11825_v10  ;;  %v11905_v2 = vcombine.high %v341_v58, %v345_v18  ;;  %v205_v3 = vld [vmem:[#allocation7 + $0x2c0] sm:$0xff]  ;;  %v11904_v10 = vcombine.low %v341_v58, %v345_v18  ;;  %v13306_v58 = vcombine.high %v13299_v47, %v13299_v47 }
 0x1ee   :  { %v209_v4 = vld [vmem:[#allocation7 + $0x2e0] sm:$0xff] }
 0x1ef   :  { %9239 = vmatpush1.bf16.msra.mxu0 %v11696_v15  ;;  %v333_v7 = vld [vmem:[#allocation7 + $0x6c0] sm:$0xff]  ;;  %v11769_v59 = vcombine.high %v205_v3, %v209_v4 }
 0x1f0   :  { %9280 = vmatpush1.bf16.msra.mxu1 %v11824_v42  ;;  %9240 = vmatprep.subr.bf16.mxu0 %v11689_v16  ;;  %v337_v33 = vld [vmem:[#allocation7 + $0x6e0] sm:$0xff]  ;;  %v11768_v16 = vcombine.low %v205_v3, %v209_v4 }
 0x1f1   :  { %9281 = vmatprep.subr.bf16.mxu1 %v11817_v17  ;;  %v11897_v11 = vcombine.high %v333_v7, %v337_v33  ;;  %v197_v12 = vld [vmem:[#allocation7 + $0x280] sm:$0xff]  ;;  %v11896_v17 = vcombine.low %v333_v7, %v337_v33 }
 0x1f2   :  { %v201_v14 = vld [vmem:[#allocation7 + $0x2a0] sm:$0xff] }
 0x1f3   :  { %9241 = vmatpush1.bf16.msra.mxu0 %v11688_v23  ;;  %v325_v15 = vld [vmem:[#allocation7 + $0x680] sm:$0xff]  ;;  %v11761_v20 = vcombine.high %v197_v12, %v201_v14 }
 0x1f4   :  { %9282 = vmatpush1.bf16.msra.mxu1 %v11816_v38  ;;  %9242 = vmatprep.subr.bf16.mxu0 %v11681_v24  ;;  %v329_v42 = vld [vmem:[#allocation7 + $0x6a0] sm:$0xff]  ;;  %v3994_v24 = vcombine.high %v13265_v52, %v13265_v52 }
 0x1f5   :  { %9283 = vmatprep.subr.bf16.mxu1 %v11809_v25  ;;  %v11889_v21 = vcombine.high %v325_v15, %v329_v42  ;;  %v189_v22 = vld [vmem:[#allocation7 + $0x240] sm:$0xff]  ;;  %v11760_v25 = vcombine.low %v197_v12, %v201_v14  ;;  %v11888_v26 = vcombine.low %v325_v15, %v329_v42 }
 0x1f6   :  { %v193_v13 = vld [vmem:[#allocation7 + $0x260] sm:$0xff] }
 0x1f7   :  { %9243 = vmatpush1.bf16.msra.mxu0 %v11680_v31  ;;  %v317_v23 = vld [vmem:[#allocation7 + $0x640] sm:$0xff]  ;;  %v11753_v28 = vcombine.high %v189_v22, %v193_v13  ;;  %v11752_v36 = vcombine.low %v189_v22, %v193_v13 }
 0x1f8   :  { %9284 = vmatpush1.bf16.msra.mxu1 %v11808_v32  ;;  %9244 = vmatprep.subr.bf16.mxu0 %v11801_v34  ;;  %v321_v38 = vld [vmem:[#allocation7 + $0x660] sm:$0xff] }
 0x1f9   :  { %9285 = vmatprep.subr.bf16.mxu1 %v11929_v30  ;;  %v11881_v29 = vcombine.high %v317_v23, %v321_v38  ;;  %v181_v63 = vld [vmem:[#allocation7 + $0x200] sm:$0xff]  ;;  %v13293_v30 = vrot.slane %v3994_v24, %v13190_v53  ;;  %v11880_v52 = vcombine.low %v317_v23, %v321_v38 }
 0x1fa   :  { %v185_v31 = vld [vmem:[#allocation7 + $0x220] sm:$0xff] }
 0x1fb   :  { %9245 = vmatpush2.bf16.msra.mxu0 %v11800_v0  ;;  %v309_v32 = vld [vmem:[#allocation7 + $0x600] sm:$0xff]  ;;  %v11745_v37 = vcombine.high %v181_v63, %v185_v31  ;;  %v11744_v46 = vcombine.low %v181_v63, %v185_v31 }
 0x1fc   :  { %9286 = vmatpush2.bf16.msra.mxu1 %v11928_v48  ;;  %9246 = vmatprep.subr.bf16.mxu0 %v11793_v41  ;;  %v313_v34 = vld [vmem:[#allocation7 + $0x620] sm:$0xff] }
 0x1fd   :  { %9287 = vmatprep.subr.bf16.mxu1 %v11921_v45  ;;  %v11873_v39 = vcombine.high %v309_v32, %v313_v34  ;;  %v429_v40 = vld [vmem:[#allocation7 + $0x9c0] sm:$0xff]  ;;  %v4010_v45 = vcombine.high %v13293_v30, %v13293_v30  ;;  %v11872_v6 = vcombine.low %v309_v32, %v313_v34 }
 0x1fe   :  { %v433_v0 = vld [vmem:[#allocation7 + $0x9e0] sm:$0xff] }
 0x1ff   :  { %9247 = vmatpush2.bf16.msra.mxu0 %v11792_v50  ;;  %v557_v48 = vld [vmem:[#allocation7 + $0xdc0] sm:$0xff]  ;;  %v11993_v49 = vcombine.high %v429_v40, %v433_v0  ;;  %v13302_v57 = vrot.slane %v4010_v45, %v13190_v53  ;;  %v11992_v9 = vcombine.low %v429_v40, %v433_v0 }
 0x200   :  { %9288 = vmatpush2.bf16.msra.mxu1 %v11920_v51  ;;  %9248 = vmatprep.subr.bf16.mxu0 %v11785_v54  ;;  %v561_v41 = vld [vmem:[#allocation7 + $0xde0] sm:$0xff] }
 0x201   :  { %9289 = vmatprep.subr.bf16.mxu1 %v11913_v55  ;;  %v12121_v50 = vcombine.high %v557_v48, %v561_v41  ;;  %v421_v51 = vld [vmem:[#allocation7 + $0x980] sm:$0xff]  ;;  %v12120_v18 = vcombine.low %v557_v48, %v561_v41  ;;  %v13311_v33 = vcombine.high %v13302_v57, %v13302_v57 }
 0x202   :  { %v425_v54 = vld [vmem:[#allocation7 + $0x9a0] sm:$0xff] }
 0x203   :  { %9249 = vmatpush2.bf16.msra.mxu0 %v11784_v60  ;;  %v549_v55 = vld [vmem:[#allocation7 + $0xd80] sm:$0xff]  ;;  %v11985_v60 = vcombine.high %v421_v51, %v425_v54 }
 0x204   :  { %9290 = vmatpush2.bf16.msra.mxu1 %v11912_v61  ;;  %9250 = vmatprep.subr.bf16.mxu0 %v11777_v1  ;;  %v553_v56 = vld [vmem:[#allocation7 + $0xda0] sm:$0xff] }
 0x205   :  { %9291 = vmatprep.subr.bf16.mxu1 %v11905_v2  ;;  %v12113_v61 = vcombine.high %v549_v55, %v553_v56  ;;  %v413_v1 = vld [vmem:[#allocation7 + $0x940] sm:$0xff]  ;;  %v12112_v12 = vcombine.low %v549_v55, %v553_v56 }
 0x206   :  { %v417_v2 = vld [vmem:[#allocation7 + $0x960] sm:$0xff] }
 0x207   :  { %9251 = vmatpush2.bf16.msra.mxu0 %v11776_v8  ;;  %v541_v4 = vld [vmem:[#allocation7 + $0xd40] sm:$0xff]  ;;  %v11977_v14 = vcombine.high %v413_v1, %v417_v2  ;;  %v11976_v38 = vcombine.low %v413_v1, %v417_v2 }
 0x208   :  { %9292 = vmatpush2.bf16.msra.mxu1 %v11904_v10  ;;  %9252 = vmatprep.subr.bf16.mxu0 %v11769_v59  ;;  %v545_v7 = vld [vmem:[#allocation7 + $0xd60] sm:$0xff]  ;;  %v11984_v10 = vcombine.low %v421_v51, %v425_v54 }
 0x209   :  { %9293 = vmatprep.subr.bf16.mxu1 %v11897_v11  ;;  %v12105_v42 = vcombine.high %v541_v4, %v545_v7  ;;  %v533_v22 = vld [vmem:[#allocation7 + $0xd00] sm:$0xff] }
 0x20a   :  { %v537_v13 = vld [vmem:[#allocation7 + $0xd20] sm:$0xff] }
 0x20b   :  { %9253 = vmatpush2.bf16.msra.mxu0 %v11768_v16  ;;  %v405_v16 = vld [vmem:[#allocation7 + $0x900] sm:$0xff] }
 0x20c   :  { %9294 = vmatpush2.bf16.msra.mxu1 %v11896_v17  ;;  %9254 = vmatprep.subr.bf16.mxu0 %v11761_v20  ;;  %v409_v17 = vld [vmem:[#allocation7 + $0x920] sm:$0xff] }
 0x20d   :  { %9295 = vmatprep.subr.bf16.mxu1 %v11889_v21  ;;  %v397_v63 = vld [vmem:[#allocation7 + $0x8c0] sm:$0xff] }
 0x20e   :  { %v401_v31 = vld [vmem:[#allocation7 + $0x8e0] sm:$0xff] }
 0x20f   :  { %9255 = vmatpush2.bf16.msra.mxu0 %v11760_v25  ;;  %v12104_v25 = vcombine.low %v541_v4, %v545_v7  ;;  %v525_v32 = vld [vmem:[#allocation7 + $0xcc0] sm:$0xff]  ;;  %v11960_v45 = vcombine.low %v397_v63, %v401_v31 }
 0x210   :  { %9296 = vmatpush2.bf16.msra.mxu1 %v11888_v26  ;;  %9256 = vmatprep.subr.bf16.mxu0 %v11753_v28  ;;  %v11969_v26 = vcombine.high %v405_v16, %v409_v17  ;;  %v529_v34 = vld [vmem:[#allocation7 + $0xce0] sm:$0xff] }
 0x211   :  { %9297 = vmatprep.subr.bf16.mxu1 %v11881_v29  ;;  %v12097_v29 = vcombine.high %v533_v22, %v537_v13  ;;  %v389_v40 = vld [vmem:[#allocation7 + $0x880] sm:$0xff] }
 0x212   :  { %v393_v0 = vld [vmem:[#allocation7 + $0x8a0] sm:$0xff] }
 0x213   :  { %9257 = vmatpush2.bf16.msra.mxu0 %v11752_v36  ;;  %v11968_v36 = vcombine.low %v405_v16, %v409_v17  ;;  %v517_v48 = vld [vmem:[#allocation7 + $0xc80] sm:$0xff]  ;;  %v11952_v56 = vcombine.low %v389_v40, %v393_v0 }
 0x214   :  { %9298 = vmatpush2.bf16.msra.mxu1 %v11880_v52  ;;  %9258 = vmatprep.subr.bf16.mxu0 %v11745_v37  ;;  %v12096_v52 = vcombine.low %v533_v22, %v537_v13  ;;  %v11961_v37 = vcombine.high %v397_v63, %v401_v31  ;;  %v521_v41 = vld [vmem:[#allocation7 + $0xca0] sm:$0xff] }
 0x215   :  { %9299 = vmatprep.subr.bf16.mxu1 %v11873_v39  ;;  %v12089_v39 = vcombine.high %v525_v32, %v529_v34  ;;  %v385_v51 = vld [vmem:[#allocation7 + $0x860] sm:$0xff] }
 0x216   :  { %v509_v54 = vld [vmem:[#allocation7 + $0xc40] sm:$0xff] }
 0x217   :  { %9259 = vmatpush2.bf16.msra.mxu0 %v11744_v46  ;;  %v12088_v46 = vcombine.low %v525_v32, %v529_v34  ;;  %v513_v55 = vld [vmem:[#allocation7 + $0xc60] sm:$0xff] }
 0x218   :  { %9300 = vmatpush2.bf16.msra.mxu1 %v11872_v6  ;;  %9310 = vmatprep.subr.bf16.mxu0 %v11993_v49  ;;  %v11953_v6 = vcombine.high %v389_v40, %v393_v0  ;;  %v12081_v49 = vcombine.high %v517_v48, %v521_v41  ;;  %v377_v1 = vld [vmem:[#allocation7 + $0x820] sm:$0xff]  ;;  %v12072_v7 = vcombine.low %v509_v54, %v513_v55 }
 0x219   :  { %9351 = vmatprep.subr.bf16.mxu1 %v12121_v50  ;;  %v381_v50 = vld [vmem:[#allocation7 + $0x840] sm:$0xff] }
 0x21a   :  { %v3780_v3 = vpop.f32.mrf.mxu0  ;;  %9261 = vmatmul.mubr.bf16.vlgmr.msra.gmra.mxu0 %v13299_v47  ;;  %v501_v2 = vld [vmem:[#allocation7 + $0xc00] sm:$0xff]  ;;  %v11944_v4 = vcombine.low %v381_v50, %v385_v51 }
 0x21b   :  { %v3821_v8 = vpop.f32.mrf.mxu1  ;;  %9302 = vmatmul.mubr.bf16.vlgmr.msra.gmra.mxu1 %v13306_v58  ;;  %9311 = vmatpush1.bf16.msra.mxu0 %v11992_v9  ;;  %v12080_v9 = vcombine.low %v517_v48, %v521_v41  ;;  %v485_v22 = vld [vmem:[#allocation7 + $0xb80] sm:$0xff] }
 0x21c   :  { %v13314_v59 = vadd.f32 %v3821_v8, %v3780_v3  ;;  %9352 = vmatpush1.bf16.msra.mxu1 %v12120_v18  ;;  %v3782_v11 = vpop.f32.mrf.mxu0  ;;  %9312 = vmatprep.subr.bf16.mxu0 %v11985_v60  ;;  %v11945_v18 = vcombine.high %v381_v50, %v385_v51  ;;  %v12073_v60 = vcombine.high %v509_v54, %v513_v55  ;;  %v505_v3 = vld [vmem:[#allocation7 + $0xc20] sm:$0xff] }
 0x21d   :  { %v3823_v15 = vpop.f32.mrf.mxu1  ;;  %9353 = vmatprep.subr.bf16.mxu1 %v12113_v61  ;;  %9342 = vmatprep.mubr.bf16.mxu0 %v13302_v57  ;;  %v373_v61 = vld [vmem:[#allocation7 + $0x800] sm:$0xff]  ;;  %v12064_v16 = vcombine.low %v501_v2, %v505_v3 }
 0x21e   :  { %v13317_v20 = vadd.f32 %v3823_v15, %v3782_v11  ;;  %v3784_v21 = vpop.f32.mrf.mxu0  ;;  %9383 = vmatprep.mubr.bf16.mxu1 %v13311_v33  ;;  %v11937_v8 = vcombine.high %v373_v61, %v377_v1  ;;  %v493_v11 = vld [vmem:[#allocation7 + $0xbc0] sm:$0xff] }
 0x21f   :  { %v3825_v23 = vpop.f32.mrf.mxu1  ;;  %9313 = vmatpush1.bf16.msra.mxu0 %v11984_v10  ;;  %v12065_v10 = vcombine.high %v501_v2, %v505_v3  ;;  %v625_v15 = vld [vmem:[#allocation7 + $0xfe0] sm:$0xff] }
 0x220   :  { %9354 = vmatpush1.bf16.msra.mxu1 %v12112_v12  ;;  %v3785_v24 = vpop.f32.mrf.mxu0  ;;  %9314 = vmatprep.subr.bf16.mxu0 %v11977_v14  ;;  %v497_v12 = vld [vmem:[#allocation7 + $0xbe0] sm:$0xff] }
 0x221   :  { %v3826_v28 = vpop.f32.mrf.mxu1  ;;  %9355 = vmatprep.subr.bf16.mxu1 %v12105_v42  ;;  %v621_v14 = vld [vmem:[#allocation7 + $0xfc0] sm:$0xff]  ;;  %v11936_v42 = vcombine.low %v373_v61, %v377_v1  ;;  %v12057_v17 = vcombine.high %v493_v11, %v497_v12  ;;  %v12056_v24 = vcombine.low %v493_v11, %v497_v12 }
 0x222   :  { %v12185_v21 = vcombine.high %v621_v14, %v625_v15  ;;  %v489_v13 = vld [vmem:[#allocation7 + $0xba0] sm:$0xff] }
 0x223   :  { %9315 = vmatpush1.bf16.msra.mxu0 %v11976_v38  ;;  %v613_v23 = vld [vmem:[#allocation7 + $0xf80] sm:$0xff]  ;;  %v12048_v34 = vcombine.low %v485_v22, %v489_v13 }
 0x224   :  { %9356 = vmatpush1.bf16.msra.mxu1 %v12104_v25  ;;  %9316 = vmatprep.subr.bf16.mxu0 %v11969_v26  ;;  %v617_v38 = vld [vmem:[#allocation7 + $0xfa0] sm:$0xff]  ;;  %v12184_v25 = vcombine.low %v621_v14, %v625_v15  ;;  %v12049_v26 = vcombine.high %v485_v22, %v489_v13 }
 0x225   :  { %9357 = vmatprep.subr.bf16.mxu1 %v12097_v29  ;;  %v12177_v28 = vcombine.high %v613_v23, %v617_v38  ;;  %v477_v29 = vld [vmem:[#allocation7 + $0xb40] sm:$0xff] }
 0x226   :  { %v481_v63 = vld [vmem:[#allocation7 + $0xb60] sm:$0xff] }
 0x227   :  { %9317 = vmatpush1.bf16.msra.mxu0 %v11968_v36  ;;  %v605_v31 = vld [vmem:[#allocation7 + $0xf40] sm:$0xff]  ;;  %v12176_v36 = vcombine.low %v613_v23, %v617_v38  ;;  %v12040_v41 = vcombine.low %v477_v29, %v481_v63 }
 0x228   :  { %9358 = vmatpush1.bf16.msra.mxu1 %v12096_v52  ;;  %9318 = vmatprep.subr.bf16.mxu0 %v11961_v37  ;;  %v609_v32 = vld [vmem:[#allocation7 + $0xf60] sm:$0xff]  ;;  %v12041_v52 = vcombine.high %v477_v29, %v481_v63 }
 0x229   :  { %9359 = vmatprep.subr.bf16.mxu1 %v12089_v39  ;;  %v12169_v37 = vcombine.high %v605_v31, %v609_v32  ;;  %v469_v39 = vld [vmem:[#allocation7 + $0xb00] sm:$0xff] }
 0x22a   :  { %v473_v40 = vld [vmem:[#allocation7 + $0xb20] sm:$0xff] }
 0x22b   :  { %9319 = vmatpush1.bf16.msra.mxu0 %v11960_v45  ;;  %v597_v0 = vld [vmem:[#allocation7 + $0xf00] sm:$0xff]  ;;  %v12168_v45 = vcombine.low %v605_v31, %v609_v32  ;;  %v12032_v55 = vcombine.low %v469_v39, %v473_v40 }
 0x22c   :  { %9360 = vmatpush1.bf16.msra.mxu1 %v12088_v46  ;;  %9320 = vmatprep.subr.bf16.mxu0 %v11953_v6  ;;  %v601_v48 = vld [vmem:[#allocation7 + $0xf20] sm:$0xff]  ;;  %v12033_v46 = vcombine.high %v469_v39, %v473_v40 }
 0x22d   :  { %9361 = vmatprep.subr.bf16.mxu1 %v12081_v49  ;;  %v12161_v6 = vcombine.high %v597_v0, %v601_v48  ;;  %v461_v49 = vld [vmem:[#allocation7 + $0xac0] sm:$0xff] }
 0x22e   :  { %v465_v50 = vld [vmem:[#allocation7 + $0xae0] sm:$0xff] }
 0x22f   :  { %9321 = vmatpush1.bf16.msra.mxu0 %v11952_v56  ;;  %v589_v51 = vld [vmem:[#allocation7 + $0xec0] sm:$0xff]  ;;  %v12160_v56 = vcombine.low %v597_v0, %v601_v48  ;;  %v12024_v3 = vcombine.low %v461_v49, %v465_v50 }
 0x230   :  { %9362 = vmatpush1.bf16.msra.mxu1 %v12080_v9  ;;  %9322 = vmatprep.subr.bf16.mxu0 %v11945_v18  ;;  %v593_v54 = vld [vmem:[#allocation7 + $0xee0] sm:$0xff]  ;;  %v12025_v9 = vcombine.high %v461_v49, %v465_v50 }
 0x231   :  { %9363 = vmatprep.subr.bf16.mxu1 %v12073_v60  ;;  %v12153_v18 = vcombine.high %v589_v51, %v593_v54  ;;  %v453_v60 = vld [vmem:[#allocation7 + $0xa80] sm:$0xff] }
 0x232   :  { %v457_v61 = vld [vmem:[#allocation7 + $0xaa0] sm:$0xff] }
 0x233   :  { %9323 = vmatpush1.bf16.msra.mxu0 %v11944_v4  ;;  %v581_v1 = vld [vmem:[#allocation7 + $0xe80] sm:$0xff]  ;;  %v12152_v4 = vcombine.low %v589_v51, %v593_v54  ;;  %v12016_v15 = vcombine.low %v453_v60, %v457_v61 }
 0x234   :  { %9364 = vmatpush1.bf16.msra.mxu1 %v12072_v7  ;;  %9324 = vmatprep.subr.bf16.mxu0 %v11937_v8  ;;  %v585_v2 = vld [vmem:[#allocation7 + $0xea0] sm:$0xff]  ;;  %v12017_v7 = vcombine.high %v453_v60, %v457_v61 }
 0x235   :  { %9365 = vmatprep.subr.bf16.mxu1 %v12065_v10  ;;  %v12145_v8 = vcombine.high %v581_v1, %v585_v2  ;;  %v445_v10 = vld [vmem:[#allocation7 + $0xa40] sm:$0xff] }
 0x236   :  { %v449_v11 = vld [vmem:[#allocation7 + $0xa60] sm:$0xff] }
 0x237   :  { %9325 = vmatpush1.bf16.msra.mxu0 %v11936_v42  ;;  %v573_v12 = vld [vmem:[#allocation7 + $0xe40] sm:$0xff]  ;;  %v13320_v42 = vld [vmem:[#allocation2 + $0x8] sm:$0xff] }
 0x238   :  { %9366 = vmatpush1.bf16.msra.mxu1 %v12064_v16  ;;  %9326 = vmatprep.subr.bf16.mxu0 %v12057_v17  ;;  %v577_v14 = vld [vmem:[#allocation7 + $0xe60] sm:$0xff]  ;;  %v12144_v16 = vcombine.low %v581_v1, %v585_v2  ;;  %v12009_v17 = vcombine.high %v445_v10, %v449_v11 }
 0x239   :  { %9367 = vmatprep.subr.bf16.mxu1 %v12185_v21  ;;  %v12137_v21 = vcombine.high %v573_v12, %v577_v14  ;;  %v437_v22 = vld [vmem:[#allocation7 + $0xa00] sm:$0xff] }
 0x23a   :  { %v441_v13 = vld [vmem:[#allocation7 + $0xa20] sm:$0xff] }
 0x23b   :  { %9327 = vmatpush2.bf16.msra.mxu0 %v12056_v24  ;;  %v565_v23 = vld [vmem:[#allocation7 + $0xe00] sm:$0xff]  ;;  %v13324_v24 = vrot.slane %v13320_v42, %v13190_v53 }
 0x23c   :  { %9368 = vmatpush2.bf16.msra.mxu1 %v12184_v25  ;;  %9328 = vmatprep.subr.bf16.mxu0 %v12049_v26  ;;  %v569_v38 = vld [vmem:[#allocation7 + $0xe20] sm:$0xff]  ;;  %v12008_v25 = vcombine.low %v445_v10, %v449_v11  ;;  %v12136_v26 = vcombine.low %v573_v12, %v577_v14 }
 0x23d   :  { %9369 = vmatprep.subr.bf16.mxu1 %v12177_v28  ;;  %v12001_v28 = vcombine.high %v437_v22, %v441_v13  ;;  %v12129_v29 = vcombine.high %v565_v23, %v569_v38  ;;  %v685_v63 = vld [vmem:[#allocation7 + $0x11c0] sm:$0xff]  ;;  %v12128_v39 = vcombine.low %v565_v23, %v569_v38 }
 0x23e   :  { %v689_v31 = vld [vmem:[#allocation7 + $0x11e0] sm:$0xff] }
 0x23f   :  { %9329 = vmatpush2.bf16.msra.mxu0 %v12048_v34  ;;  %v813_v32 = vld [vmem:[#allocation7 + $0x15c0] sm:$0xff]  ;;  %v12249_v40 = vcombine.high %v685_v63, %v689_v31 }
 0x240   :  { %9370 = vmatpush2.bf16.msra.mxu1 %v12176_v36  ;;  %9330 = vmatprep.subr.bf16.mxu0 %v12041_v52  ;;  %v817_v34 = vld [vmem:[#allocation7 + $0x15e0] sm:$0xff]  ;;  %v4058_v36 = vcombine.high %v13324_v24, %v13324_v24  ;;  %v12000_v52 = vcombine.low %v437_v22, %v441_v13 }
 0x241   :  { %9371 = vmatprep.subr.bf16.mxu1 %v12169_v37  ;;  %v13330_v37 = vrot.slane %v13293_v30, %v13190_v53  ;;  %v12377_v0 = vcombine.high %v813_v32, %v817_v34  ;;  %v677_v48 = vld [vmem:[#allocation7 + $0x1180] sm:$0xff]  ;;  %v12248_v30 = vcombine.low %v685_v63, %v689_v31  ;;  %v12376_v50 = vcombine.low %v813_v32, %v817_v34 }
 0x242   :  { %v801_v60 = vld [vmem:[#allocation7 + $0x1560] sm:$0xff] }
 0x243   :  { %9331 = vmatpush2.bf16.msra.mxu0 %v12040_v41  ;;  %v681_v41 = vld [vmem:[#allocation7 + $0x11a0] sm:$0xff]  ;;  %v13337_v49 = vcombine.high %v13330_v37, %v13330_v37 }
 0x244   :  { %9372 = vmatpush2.bf16.msra.mxu1 %v12168_v45  ;;  %9332 = vmatprep.subr.bf16.mxu0 %v12033_v46  ;;  %v805_v45 = vld [vmem:[#allocation7 + $0x1580] sm:$0xff]  ;;  %v12241_v51 = vcombine.high %v677_v48, %v681_v41 }
 0x245   :  { %9373 = vmatprep.subr.bf16.mxu1 %v12161_v6  ;;  %v809_v46 = vld [vmem:[#allocation7 + $0x15a0] sm:$0xff]  ;;  %v13333_v6 = vrot.slane %v4058_v36, %v13190_v53 }
 0x246   :  { %v12369_v54 = vcombine.high %v805_v45, %v809_v46  ;;  %v665_v14 = vld [vmem:[#allocation7 + $0x1120] sm:$0xff] }
 0x247   :  { %9333 = vmatpush2.bf16.msra.mxu0 %v12032_v55  ;;  %v669_v55 = vld [vmem:[#allocation7 + $0x1140] sm:$0xff]  ;;  %v13342_v61 = vcombine.high %v13333_v6, %v13333_v6 }
 0x248   :  { %9374 = vmatpush2.bf16.msra.mxu1 %v12160_v56  ;;  %9334 = vmatprep.subr.bf16.mxu0 %v12025_v9  ;;  %v673_v56 = vld [vmem:[#allocation7 + $0x1160] sm:$0xff] }
 0x249   :  { %9375 = vmatprep.subr.bf16.mxu1 %v12153_v18  ;;  %v797_v18 = vld [vmem:[#allocation7 + $0x1540] sm:$0xff]  ;;  %v12232_v22 = vcombine.low %v669_v55, %v673_v56 }
 0x24a   :  { %v12361_v12 = vcombine.high %v797_v18, %v801_v60  ;;  %v785_v63 = vld [vmem:[#allocation7 + $0x14e0] sm:$0xff] }
 0x24b   :  { %9335 = vmatpush2.bf16.msra.mxu0 %v12024_v3  ;;  %v12240_v3 = vcombine.low %v677_v48, %v681_v41 }
 0x24c   :  { %9376 = vmatpush2.bf16.msra.mxu1 %v12152_v4  ;;  %9336 = vmatprep.subr.bf16.mxu0 %v12017_v7  ;;  %v12368_v7 = vcombine.low %v805_v45, %v809_v46 }
 0x24d   :  { %9377 = vmatprep.subr.bf16.mxu1 %v12145_v8  ;;  %v12233_v8 = vcombine.high %v669_v55, %v673_v56 }
 0x24f   :  { %9337 = vmatpush2.bf16.msra.mxu0 %v12016_v15 }
 0x250   :  { %9378 = vmatpush2.bf16.msra.mxu1 %v12144_v16  ;;  %9338 = vmatprep.subr.bf16.mxu0 %v12009_v17  ;;  %v789_v16 = vld [vmem:[#allocation7 + $0x1500] sm:$0xff] }
 0x251   :  { %9379 = vmatprep.subr.bf16.mxu1 %v12137_v21  ;;  %v793_v17 = vld [vmem:[#allocation7 + $0x1520] sm:$0xff] }
 0x252   :  { %v12352_v32 = vcombine.low %v789_v16, %v793_v17 }
 0x253   :  { %9339 = vmatpush2.bf16.msra.mxu0 %v12008_v25  ;;  %v12353_v25 = vcombine.high %v789_v16, %v793_v17  ;;  %v753_v16 = vld [vmem:[#allocation7 + $0x13e0] sm:$0xff] }
 0x254   :  { %9380 = vmatpush2.bf16.msra.mxu1 %v12136_v26  ;;  %9340 = vmatprep.subr.bf16.mxu0 %v12001_v28  ;;  %v653_v26 = vld [vmem:[#allocation7 + $0x10c0] sm:$0xff] }
 0x255   :  { %9381 = vmatprep.subr.bf16.mxu1 %v12129_v29  ;;  %v657_v28 = vld [vmem:[#allocation7 + $0x10e0] sm:$0xff] }
 0x256   :  { %v781_v29 = vld [vmem:[#allocation7 + $0x14c0] sm:$0xff]  ;;  %v12217_v34 = vcombine.high %v653_v26, %v657_v28  ;;  %v12216_v48 = vcombine.low %v653_v26, %v657_v28 }
 0x257   :  { %9341 = vmatpush2.bf16.msra.mxu0 %v12000_v52  ;;  %v12345_v36 = vcombine.high %v781_v29, %v785_v63  ;;  %v645_v52 = vld [vmem:[#allocation7 + $0x1080] sm:$0xff]  ;;  %v12344_v41 = vcombine.low %v781_v29, %v785_v63 }
 0x258   :  { %9382 = vmatpush2.bf16.msra.mxu1 %v12128_v39  ;;  %9392 = vmatprep.subr.bf16.mxu0 %v12249_v40  ;;  %v649_v39 = vld [vmem:[#allocation7 + $0x10a0] sm:$0xff] }
 0x259   :  { %9433 = vmatprep.subr.bf16.mxu1 %v12377_v0  ;;  %v773_v40 = vld [vmem:[#allocation7 + $0x1480] sm:$0xff]  ;;  %v12209_v45 = vcombine.high %v645_v52, %v649_v39  ;;  %v12208_v55 = vcombine.low %v645_v52, %v649_v39 }
 0x25a   :  { %v3862_v9 = vpop.f32.mrf.mxu0  ;;  %9343 = vmatmul.mubr.bf16.vlgmr.msra.gmra.mxu0 %v13330_v37  ;;  %v777_v0 = vld [vmem:[#allocation7 + $0x14a0] sm:$0xff] }
 0x25b   :  { %v13345_v1 = vadd.f32 %v3862_v9, %v13314_v59  ;;  %v13347_v2 = vpop.f32.mrf.mxu1  ;;  %9384 = vmatmul.mubr.bf16.vlgmr.msra.gmra.mxu1 %v13337_v49  ;;  %9393 = vmatpush1.bf16.msra.mxu0 %v12248_v30  ;;  %v661_v59 = vld [vmem:[#allocation7 + $0x1100] sm:$0xff]  ;;  %v12337_v46 = vcombine.high %v773_v40, %v777_v0  ;;  %v12336_v56 = vcombine.low %v773_v40, %v777_v0 }
 0x25c   :  { %9434 = vmatpush1.bf16.msra.mxu1 %v12376_v50  ;;  %v3864_v4 = vpop.f32.mrf.mxu0  ;;  %9394 = vmatprep.subr.bf16.mxu0 %v12241_v51  ;;  %v12225_v23 = vcombine.high %v661_v59, %v665_v14  ;;  %v12224_v31 = vcombine.low %v661_v59, %v665_v14  ;;  %v637_v30 = vld [vmem:[#allocation7 + $0x1040] sm:$0xff] }
 0x25d   :  { %v13351_v10 = vadd.f32 %v3864_v4, %v13317_v20  ;;  %v13353_v11 = vpop.f32.mrf.mxu1  ;;  %9435 = vmatprep.subr.bf16.mxu1 %v12369_v54  ;;  %9424 = vmatprep.mubr.bf16.mxu0 %v13333_v6  ;;  %v12360_v20 = vcombine.low %v797_v18, %v801_v60  ;;  %v641_v50 = vld [vmem:[#allocation7 + $0x1060] sm:$0xff] }
 0x25e   :  { %v3866_v15 = vpop.f32.mrf.mxu0  ;;  %9465 = vmatprep.mubr.bf16.mxu1 %v13342_v61  ;;  %v765_v51 = vld [vmem:[#allocation7 + $0x1440] sm:$0xff]  ;;  %v12201_v9 = vcombine.high %v637_v30, %v641_v50 }
 0x25f   :  { %v3907_v21 = vpop.f32.mrf.mxu1  ;;  %9395 = vmatpush1.bf16.msra.mxu0 %v12240_v3  ;;  %v769_v54 = vld [vmem:[#allocation7 + $0x1460] sm:$0xff] }
 0x260   :  { %9436 = vmatpush1.bf16.msra.mxu1 %v12368_v7  ;;  %v3867_v13 = vpop.f32.mrf.mxu0  ;;  %9396 = vmatprep.subr.bf16.mxu0 %v12233_v8  ;;  %v12329_v18 = vcombine.high %v765_v51, %v769_v54  ;;  %v629_v60 = vld [vmem:[#allocation7 + $0x1000] sm:$0xff]  ;;  %v12200_v8 = vcombine.low %v637_v30, %v641_v50 }
 0x261   :  { %v3908_v38 = vpop.f32.mrf.mxu1  ;;  %9437 = vmatprep.subr.bf16.mxu1 %v12361_v12  ;;  %v633_v3 = vld [vmem:[#allocation7 + $0x1020] sm:$0xff]  ;;  %v12328_v12 = vcombine.low %v765_v51, %v769_v54 }
 0x262   :  { %v757_v4 = vld [vmem:[#allocation7 + $0x1400] sm:$0xff]  ;;  %v12193_v59 = vcombine.high %v629_v60, %v633_v3 }
 0x263   :  { %9397 = vmatpush1.bf16.msra.mxu0 %v12232_v22  ;;  %v761_v7 = vld [vmem:[#allocation7 + $0x1420] sm:$0xff]  ;;  %v12192_v22 = vcombine.low %v629_v60, %v633_v3 }
 0x264   :  { %9438 = vmatpush1.bf16.msra.mxu1 %v12360_v20  ;;  %9398 = vmatprep.subr.bf16.mxu0 %v12225_v23  ;;  %v12321_v14 = vcombine.high %v757_v4, %v761_v7  ;;  %v749_v15 = vld [vmem:[#allocation7 + $0x13c0] sm:$0xff]  ;;  %v12320_v13 = vcombine.low %v757_v4, %v761_v7 }
 0x265   :  { %9439 = vmatprep.subr.bf16.mxu1 %v12353_v25  ;;  %v877_v17 = vld [vmem:[#allocation7 + $0x17c0] sm:$0xff]  ;;  %v12313_v20 = vcombine.high %v749_v15, %v753_v16  ;;  %v12312_v29 = vcombine.low %v749_v15, %v753_v16 }
 0x266   :  { %v881_v21 = vld [vmem:[#allocation7 + $0x17e0] sm:$0xff] }
 0x267   :  { %9399 = vmatpush1.bf16.msra.mxu0 %v12224_v31  ;;  %v12441_v23 = vcombine.high %v877_v17, %v881_v21  ;;  %v741_v38 = vld [vmem:[#allocation7 + $0x1380] sm:$0xff]  ;;  %v12440_v63 = vcombine.low %v877_v17, %v881_v21 }
 0x268   :  { %9440 = vmatpush1.bf16.msra.mxu1 %v12352_v32  ;;  %9400 = vmatprep.subr.bf16.mxu0 %v12217_v34  ;;  %v745_v25 = vld [vmem:[#allocation7 + $0x13a0] sm:$0xff] }
 0x269   :  { %9441 = vmatprep.subr.bf16.mxu1 %v12345_v36  ;;  %v869_v26 = vld [vmem:[#allocation7 + $0x1780] sm:$0xff]  ;;  %v12305_v31 = vcombine.high %v741_v38, %v745_v25  ;;  %v12304_v40 = vcombine.low %v741_v38, %v745_v25 }
 0x26a   :  { %v873_v28 = vld [vmem:[#allocation7 + $0x17a0] sm:$0xff] }
 0x26b   :  { %9401 = vmatpush1.bf16.msra.mxu0 %v12216_v48  ;;  %v12433_v32 = vcombine.high %v869_v26, %v873_v28  ;;  %v733_v34 = vld [vmem:[#allocation7 + $0x1340] sm:$0xff]  ;;  %v12432_v0 = vcombine.low %v869_v26, %v873_v28  ;;  %v4043_v26 = vcombine.high %v13320_v42, %v13320_v42 }
 0x26c   :  { %9442 = vmatpush1.bf16.msra.mxu1 %v12344_v41  ;;  %9402 = vmatprep.subr.bf16.mxu0 %v12209_v45  ;;  %v737_v36 = vld [vmem:[#allocation7 + $0x1360] sm:$0xff] }
 0x26d   :  { %9443 = vmatprep.subr.bf16.mxu1 %v12337_v46  ;;  %v861_v52 = vld [vmem:[#allocation7 + $0x1740] sm:$0xff]  ;;  %v12297_v48 = vcombine.high %v733_v34, %v737_v36  ;;  %v12296_v51 = vcombine.low %v733_v34, %v737_v36 }
 0x26e   :  { %v865_v39 = vld [vmem:[#allocation7 + $0x1760] sm:$0xff] }
 0x26f   :  { %9403 = vmatpush1.bf16.msra.mxu0 %v12208_v55  ;;  %v12425_v41 = vcombine.high %v861_v52, %v865_v39  ;;  %v725_v45 = vld [vmem:[#allocation7 + $0x1300] sm:$0xff]  ;;  %v12424_v54 = vcombine.low %v861_v52, %v865_v39  ;;  %v13360_v39 = vrot.slane %v4043_v26, %v13190_v53 }
 0x270   :  { %9444 = vmatpush1.bf16.msra.mxu1 %v12336_v56  ;;  %9404 = vmatprep.subr.bf16.mxu0 %v12201_v9  ;;  %v729_v46 = vld [vmem:[#allocation7 + $0x1320] sm:$0xff] }
 0x271   :  { %9445 = vmatprep.subr.bf16.mxu1 %v12329_v18  ;;  %v853_v30 = vld [vmem:[#allocation7 + $0x1700] sm:$0xff]  ;;  %v12289_v55 = vcombine.high %v725_v45, %v729_v46  ;;  %v12288_v4 = vcombine.low %v725_v45, %v729_v46 }
 0x272   :  { %v857_v50 = vld [vmem:[#allocation7 + $0x1720] sm:$0xff] }
 0x273   :  { %9405 = vmatpush1.bf16.msra.mxu0 %v12200_v8  ;;  %v12417_v56 = vcombine.high %v853_v30, %v857_v50  ;;  %v717_v9 = vld [vmem:[#allocation7 + $0x12c0] sm:$0xff]  ;;  %v12416_v7 = vcombine.low %v853_v30, %v857_v50  ;;  %v4059_v50 = vcombine.high %v13360_v39, %v13360_v39 }
 0x274   :  { %9446 = vmatpush1.bf16.msra.mxu1 %v12328_v12  ;;  %9406 = vmatprep.subr.bf16.mxu0 %v12193_v59  ;;  %v721_v18 = vld [vmem:[#allocation7 + $0x12e0] sm:$0xff] }
 0x275   :  { %9447 = vmatprep.subr.bf16.mxu1 %v12321_v14  ;;  %v845_v60 = vld [vmem:[#allocation7 + $0x16c0] sm:$0xff]  ;;  %v12281_v8 = vcombine.high %v717_v9, %v721_v18  ;;  %v12280_v17 = vcombine.low %v717_v9, %v721_v18 }
 0x276   :  { %v849_v3 = vld [vmem:[#allocation7 + $0x16e0] sm:$0xff] }
 0x277   :  { %9407 = vmatpush1.bf16.msra.mxu0 %v12192_v22  ;;  %v12409_v12 = vcombine.high %v845_v60, %v849_v3  ;;  %v709_v59 = vld [vmem:[#allocation7 + $0x1280] sm:$0xff]  ;;  %v12408_v21 = vcombine.low %v845_v60, %v849_v3 }
 0x278   :  { %9448 = vmatpush1.bf16.msra.mxu1 %v12320_v13  ;;  %9408 = vmatprep.subr.bf16.mxu0 %v12313_v20  ;;  %v713_v14 = vld [vmem:[#allocation7 + $0x12a0] sm:$0xff] }
 0x279   :  { %9449 = vmatprep.subr.bf16.mxu1 %v12441_v23  ;;  %v837_v15 = vld [vmem:[#allocation7 + $0x1680] sm:$0xff]  ;;  %v12273_v22 = vcombine.high %v709_v59, %v713_v14  ;;  %v12272_v28 = vcombine.low %v709_v59, %v713_v14 }
 0x27a   :  { %v841_v16 = vld [vmem:[#allocation7 + $0x16a0] sm:$0xff] }
 0x27b   :  { %9409 = vmatpush2.bf16.msra.mxu0 %v12312_v29  ;;  %v12401_v13 = vcombine.high %v837_v15, %v841_v16  ;;  %v701_v20 = vld [vmem:[#allocation7 + $0x1240] sm:$0xff]  ;;  %v12400_v29 = vcombine.low %v837_v15, %v841_v16 }
 0x27c   :  { %9450 = vmatpush2.bf16.msra.mxu1 %v12440_v63  ;;  %9410 = vmatprep.subr.bf16.mxu0 %v12305_v31  ;;  %v705_v23 = vld [vmem:[#allocation7 + $0x1260] sm:$0xff] }
 0x27d   :  { %9451 = vmatprep.subr.bf16.mxu1 %v12433_v32  ;;  %v829_v38 = vld [vmem:[#allocation7 + $0x1640] sm:$0xff]  ;;  %v12265_v63 = vcombine.high %v701_v20, %v705_v23 }
 0x27e   :  { %v833_v25 = vld [vmem:[#allocation7 + $0x1660] sm:$0xff] }
 0x27f   :  { %9411 = vmatpush2.bf16.msra.mxu0 %v12304_v40  ;;  %v12393_v31 = vcombine.high %v829_v38, %v833_v25  ;;  %v693_v32 = vld [vmem:[#allocation7 + $0x1200] sm:$0xff]  ;;  %v12264_v40 = vcombine.low %v701_v20, %v705_v23  ;;  %v12392_v42 = vcombine.low %v829_v38, %v833_v25 }
 0x280   :  { %9452 = vmatpush2.bf16.msra.mxu1 %v12432_v0  ;;  %9412 = vmatprep.subr.bf16.mxu0 %v12297_v48  ;;  %v697_v34 = vld [vmem:[#allocation7 + $0x1220] sm:$0xff] }
 0x281   :  { %9453 = vmatprep.subr.bf16.mxu1 %v12425_v41  ;;  %v821_v36 = vld [vmem:[#allocation7 + $0x1600] sm:$0xff]  ;;  %v12257_v0 = vcombine.high %v693_v32, %v697_v34 }
 0x282   :  { %v825_v52 = vld [vmem:[#allocation7 + $0x1620] sm:$0xff] }
 0x283   :  { %9413 = vmatpush2.bf16.msra.mxu0 %v12296_v51  ;;  %v12385_v48 = vcombine.high %v821_v36, %v825_v52  ;;  %v941_v41 = vld [vmem:[#allocation7 + $0x19c0] sm:$0xff]  ;;  %v12256_v51 = vcombine.low %v693_v32, %v697_v34 }
 0x284   :  { %9454 = vmatpush2.bf16.msra.mxu1 %v12424_v54  ;;  %9414 = vmatprep.subr.bf16.mxu0 %v12289_v55  ;;  %v945_v45 = vld [vmem:[#allocation7 + $0x19e0] sm:$0xff]  ;;  %v13366_v54 = vrot.slane %v13324_v24, %v13190_v53  ;;  %v12384_v55 = vcombine.low %v821_v36, %v825_v52 }
 0x285   :  { %9455 = vmatprep.subr.bf16.mxu1 %v12417_v56  ;;  %v1069_v46 = vld [vmem:[#allocation7 + $0x1dc0] sm:$0xff]  ;;  %v12505_v56 = vcombine.high %v941_v41, %v945_v45  ;;  %v12504_v24 = vcombine.low %v941_v41, %v945_v45 }
 0x286   :  { %v1073_v30 = vld [vmem:[#allocation7 + $0x1de0] sm:$0xff] }
 0x287   :  { %9415 = vmatpush2.bf16.msra.mxu0 %v12288_v4  ;;  %v12633_v9 = vcombine.high %v1069_v46, %v1073_v30  ;;  %v933_v18 = vld [vmem:[#allocation7 + $0x1980] sm:$0xff] }
 0x288   :  { %9456 = vmatpush2.bf16.msra.mxu1 %v12416_v7  ;;  %9416 = vmatprep.subr.bf16.mxu0 %v12281_v8  ;;  %v937_v60 = vld [vmem:[#allocation7 + $0x19a0] sm:$0xff]  ;;  %v13369_v7 = vrot.slane %v4059_v50, %v13190_v53  ;;  %v13373_v8 = vcombine.high %v13366_v54, %v13366_v54 }
 0x289   :  { %9457 = vmatprep.subr.bf16.mxu1 %v12409_v12  ;;  %v1061_v3 = vld [vmem:[#allocation7 + $0x1d80] sm:$0xff]  ;;  %v12632_v12 = vcombine.low %v1069_v46, %v1073_v30  ;;  %v12497_v59 = vcombine.high %v933_v18, %v937_v60  ;;  %v12496_v38 = vcombine.low %v933_v18, %v937_v60 }
 0x28a   :  { %v1065_v4 = vld [vmem:[#allocation7 + $0x1da0] sm:$0xff] }
 0x28b   :  { %9417 = vmatpush2.bf16.msra.mxu0 %v12280_v17  ;;  %v12625_v14 = vcombine.high %v1061_v3, %v1065_v4  ;;  %v925_v15 = vld [vmem:[#allocation7 + $0x1940] sm:$0xff]  ;;  %v12624_v26 = vcombine.low %v1061_v3, %v1065_v4 }
 0x28c   :  { %9458 = vmatpush2.bf16.msra.mxu1 %v12408_v21  ;;  %9418 = vmatprep.subr.bf16.mxu0 %v12273_v22  ;;  %v929_v16 = vld [vmem:[#allocation7 + $0x1960] sm:$0xff] }
 0x28d   :  { %9459 = vmatprep.subr.bf16.mxu1 %v12401_v13  ;;  %v1053_v21 = vld [vmem:[#allocation7 + $0x1d40] sm:$0xff]  ;;  %v13378_v13 = vcombine.high %v13369_v7, %v13369_v7 }
 0x28e   :  { %v1057_v22 = vld [vmem:[#allocation7 + $0x1d60] sm:$0xff] }
 0x28f   :  { %9419 = vmatpush2.bf16.msra.mxu0 %v12272_v28  ;;  %v12489_v28 = vcombine.high %v925_v15, %v929_v16  ;;  %v12617_v32 = vcombine.high %v1053_v21, %v1057_v22  ;;  %v917_v34 = vld [vmem:[#allocation7 + $0x1900] sm:$0xff] }
 0x290   :  { %9460 = vmatpush2.bf16.msra.mxu1 %v12400_v29  ;;  %9420 = vmatprep.subr.bf16.mxu0 %v12265_v63  ;;  %v921_v36 = vld [vmem:[#allocation7 + $0x1920] sm:$0xff] }
 0x291   :  { %9461 = vmatprep.subr.bf16.mxu1 %v12393_v31  ;;  %v1045_v52 = vld [vmem:[#allocation7 + $0x1d00] sm:$0xff]  ;;  %v12481_v45 = vcombine.high %v917_v34, %v921_v36 }
 0x292   :  { %v909_v50 = vld [vmem:[#allocation7 + $0x18c0] sm:$0xff] }
 0x293   :  { %9421 = vmatpush2.bf16.msra.mxu0 %v12264_v40  ;;  %v1049_v40 = vld [vmem:[#allocation7 + $0x1d20] sm:$0xff] }
 0x294   :  { %9462 = vmatpush2.bf16.msra.mxu1 %v12392_v42  ;;  %9422 = vmatprep.subr.bf16.mxu0 %v12257_v0  ;;  %v12609_v30 = vcombine.high %v1045_v52, %v1049_v40  ;;  %v12608_v18 = vcombine.low %v1045_v52, %v1049_v40  ;;  %v901_v4 = vld [vmem:[#allocation7 + $0x1880] sm:$0xff] }
 0x295   :  { %9463 = vmatprep.subr.bf16.mxu1 %v12385_v48  ;;  %v12488_v48 = vcombine.low %v925_v15, %v929_v16 }
 0x297   :  { %9423 = vmatpush2.bf16.msra.mxu0 %v12256_v51  ;;  %v913_v51 = vld [vmem:[#allocation7 + $0x18e0] sm:$0xff] }
 0x298   :  { %9464 = vmatpush2.bf16.msra.mxu1 %v12384_v55  ;;  %9474 = vmatprep.subr.bf16.mxu0 %v12505_v56  ;;  %v1037_v55 = vld [vmem:[#allocation7 + $0x1cc0] sm:$0xff]  ;;  %v12473_v60 = vcombine.high %v909_v50, %v913_v51 }
 0x299   :  { %9515 = vmatprep.subr.bf16.mxu1 %v12633_v9  ;;  %v1041_v56 = vld [vmem:[#allocation7 + $0x1ce0] sm:$0xff]  ;;  %v12480_v9 = vcombine.low %v917_v34, %v921_v36 }
 0x29a   :  { %v3944_v17 = vpop.f32.mrf.mxu0  ;;  %9425 = vmatmul.mubr.bf16.vlgmr.msra.gmra.mxu0 %v13366_v54  ;;  %v12601_v3 = vcombine.high %v1037_v55, %v1041_v56  ;;  %v12600_v15 = vcombine.low %v1037_v55, %v1041_v56  ;;  %v1017_v34 = vld [vmem:[#allocation7 + $0x1c20] sm:$0xff] }
 0x29b   :  { %v3945_v20 = vadd.f32 %v3944_v17, %v13347_v2  ;;  %v3985_v23 = vpop.f32.mrf.mxu1  ;;  %9466 = vmatmul.mubr.bf16.vlgmr.msra.gmra.mxu1 %v13373_v8  ;;  %9475 = vmatpush1.bf16.msra.mxu0 %v12504_v24  ;;  %v905_v24 = vld [vmem:[#allocation7 + $0x18a0] sm:$0xff] }
 0x29c   :  { %9516 = vmatpush1.bf16.msra.mxu1 %v12632_v12  ;;  %v3946_v25 = vpop.f32.mrf.mxu0  ;;  %9476 = vmatprep.subr.bf16.mxu0 %v12497_v59  ;;  %v1029_v12 = vld [vmem:[#allocation7 + $0x1c80] sm:$0xff]  ;;  %v12465_v16 = vcombine.high %v901_v4, %v905_v24 }
 0x29d   :  { %v13382_v29 = vadd.f32 %v3985_v23, %v3945_v20  ;;  %v3947_v63 = vadd.f32 %v3946_v25, %v13353_v11  ;;  %v3987_v31 = vpop.f32.mrf.mxu1  ;;  %9517 = vmatprep.subr.bf16.mxu1 %v12625_v14  ;;  %9506 = vmatprep.mubr.bf16.mxu0 %v13369_v7  ;;  %v12616_v11 = vcombine.low %v1053_v21, %v1057_v22  ;;  %v1033_v59 = vld [vmem:[#allocation7 + $0x1ca0] sm:$0xff] }
 0x29e   :  { %v3948_v2 = vpop.f32.mrf.mxu0  ;;  %9547 = vmatprep.mubr.bf16.mxu1 %v13378_v13  ;;  %v12472_v14 = vcombine.low %v909_v50, %v913_v51  ;;  %v12593_v17 = vcombine.high %v1029_v12, %v1033_v59  ;;  %v893_v21 = vld [vmem:[#allocation7 + $0x1840] sm:$0xff]  ;;  %v12592_v25 = vcombine.low %v1029_v12, %v1033_v59 }
 0x29f   :  { %v13387_v42 = vadd.f32 %v3987_v31, %v3947_v63  ;;  %v3989_v0 = vpop.f32.mrf.mxu1  ;;  %9477 = vmatpush1.bf16.msra.mxu0 %v12496_v38  ;;  %v897_v22 = vld [vmem:[#allocation7 + $0x1860] sm:$0xff]  ;;  %v12464_v38 = vcombine.low %v901_v4, %v905_v24 }
 0x2a0   :  { %9518 = vmatpush1.bf16.msra.mxu1 %v12624_v26  ;;  %v3949_v41 = vpop.f32.mrf.mxu0  ;;  %9478 = vmatprep.subr.bf16.mxu0 %v12489_v28  ;;  %v1021_v20 = vld [vmem:[#allocation7 + $0x1c40] sm:$0xff]  ;;  %v12457_v26 = vcombine.high %v893_v21, %v897_v22  ;;  %v12456_v36 = vcombine.low %v893_v21, %v897_v22 }
 0x2a1   :  { %v3990_v46 = vpop.f32.mrf.mxu1  ;;  %9519 = vmatprep.subr.bf16.mxu1 %v12617_v32  ;;  %v1025_v23 = vld [vmem:[#allocation7 + $0x1c60] sm:$0xff] }
 0x2a2   :  { %v12585_v28 = vcombine.high %v1021_v20, %v1025_v23  ;;  %v885_v63 = vld [vmem:[#allocation7 + $0x1800] sm:$0xff]  ;;  %v12584_v2 = vcombine.low %v1021_v20, %v1025_v23 }
 0x2a3   :  { %9479 = vmatpush1.bf16.msra.mxu0 %v12488_v48  ;;  %v889_v31 = vld [vmem:[#allocation7 + $0x1820] sm:$0xff] }
 0x2a4   :  { %9520 = vmatpush1.bf16.msra.mxu1 %v12616_v11  ;;  %9480 = vmatprep.subr.bf16.mxu0 %v12481_v45  ;;  %v1013_v32 = vld [vmem:[#allocation7 + $0x1c00] sm:$0xff]  ;;  %v12449_v52 = vcombine.high %v885_v63, %v889_v31  ;;  %v12448_v45 = vcombine.low %v885_v63, %v889_v31 }
 0x2a5   :  { %9521 = vmatprep.subr.bf16.mxu1 %v12609_v30  ;;  %v12577_v40 = vcombine.high %v1013_v32, %v1017_v34  ;;  %v1005_v0 = vld [vmem:[#allocation7 + $0x1bc0] sm:$0xff]  ;;  %v12576_v46 = vcombine.low %v1013_v32, %v1017_v34 }
 0x2a6   :  { %v1009_v48 = vld [vmem:[#allocation7 + $0x1be0] sm:$0xff] }
 0x2a7   :  { %9481 = vmatpush1.bf16.msra.mxu0 %v12480_v9  ;;  %v1133_v41 = vld [vmem:[#allocation7 + $0x1fc0] sm:$0xff]  ;;  %v12569_v30 = vcombine.high %v1005_v0, %v1009_v48 }
 0x2a8   :  { %9522 = vmatpush1.bf16.msra.mxu1 %v12608_v18  ;;  %9482 = vmatprep.subr.bf16.mxu0 %v12473_v60  ;;  %v1137_v11 = vld [vmem:[#allocation7 + $0x1fe0] sm:$0xff]  ;;  %v12568_v18 = vcombine.low %v1005_v0, %v1009_v48 }
 0x2a9   :  { %9523 = vmatprep.subr.bf16.mxu1 %v12601_v3  ;;  %v12697_v50 = vcombine.high %v1133_v41, %v1137_v11  ;;  %v997_v51 = vld [vmem:[#allocation7 + $0x1b80] sm:$0xff]  ;;  %v12696_v60 = vcombine.low %v1133_v41, %v1137_v11 }
 0x2aa   :  { %v1001_v55 = vld [vmem:[#allocation7 + $0x1ba0] sm:$0xff] }
 0x2ab   :  { %9483 = vmatpush1.bf16.msra.mxu0 %v12472_v14  ;;  %v1125_v56 = vld [vmem:[#allocation7 + $0x1f80] sm:$0xff]  ;;  %v12561_v3 = vcombine.high %v997_v51, %v1001_v55 }
 0x2ac   :  { %9524 = vmatpush1.bf16.msra.mxu1 %v12600_v15  ;;  %9484 = vmatprep.subr.bf16.mxu0 %v12465_v16  ;;  %v1129_v9 = vld [vmem:[#allocation7 + $0x1fa0] sm:$0xff]  ;;  %v12560_v15 = vcombine.low %v997_v51, %v1001_v55 }
 0x2ad   :  { %9525 = vmatprep.subr.bf16.mxu1 %v12593_v17  ;;  %v12689_v4 = vcombine.high %v1125_v56, %v1129_v9  ;;  %v989_v24 = vld [vmem:[#allocation7 + $0x1b40] sm:$0xff]  ;;  %v12688_v16 = vcombine.low %v1125_v56, %v1129_v9 }
 0x2ae   :  { %v993_v12 = vld [vmem:[#allocation7 + $0x1b60] sm:$0xff] }
 0x2af   :  { %9485 = vmatpush1.bf16.msra.mxu0 %v12464_v38  ;;  %v1117_v59 = vld [vmem:[#allocation7 + $0x1f40] sm:$0xff]  ;;  %v12553_v17 = vcombine.high %v989_v24, %v993_v12 }
 0x2b0   :  { %9526 = vmatpush1.bf16.msra.mxu1 %v12592_v25  ;;  %9486 = vmatprep.subr.bf16.mxu0 %v12457_v26  ;;  %v1121_v14 = vld [vmem:[#allocation7 + $0x1f60] sm:$0xff]  ;;  %v12552_v25 = vcombine.low %v989_v24, %v993_v12 }
 0x2b1   :  { %9527 = vmatprep.subr.bf16.mxu1 %v12585_v28  ;;  %v12681_v21 = vcombine.high %v1117_v59, %v1121_v14  ;;  %v981_v22 = vld [vmem:[#allocation7 + $0x1b00] sm:$0xff]  ;;  %v12680_v26 = vcombine.low %v1117_v59, %v1121_v14 }
 0x2b2   :  { %v985_v20 = vld [vmem:[#allocation7 + $0x1b20] sm:$0xff] }
 0x2b3   :  { %9487 = vmatpush1.bf16.msra.mxu0 %v12456_v36  ;;  %v1109_v23 = vld [vmem:[#allocation7 + $0x1f00] sm:$0xff]  ;;  %v12545_v28 = vcombine.high %v981_v22, %v985_v20 }
 0x2b4   :  { %9528 = vmatpush1.bf16.msra.mxu1 %v12584_v2  ;;  %9488 = vmatprep.subr.bf16.mxu0 %v12449_v52  ;;  %v1113_v38 = vld [vmem:[#allocation7 + $0x1f20] sm:$0xff]  ;;  %v12544_v2 = vcombine.low %v981_v22, %v985_v20  ;;  %v174_v20 = vld [vmem:[#allocation7 + $0x1c8] sm:$0xff] }
 0x2b5   :  { %9529 = vmatprep.subr.bf16.mxu1 %v12577_v40  ;;  %v12673_v63 = vcombine.high %v1109_v23, %v1113_v38  ;;  %v973_v31 = vld [vmem:[#allocation7 + $0x1ac0] sm:$0xff]  ;;  %v12672_v52 = vcombine.low %v1109_v23, %v1113_v38  ;;  %v178_v23 = vld [vmem:[#allocation7 + $0x1e8] sm:$0xff] }
 0x2b6   :  { %v977_v32 = vld [vmem:[#allocation7 + $0x1ae0] sm:$0xff]  ;;  %v302_v38 = vld [vmem:[#allocation7 + $0x5c8] sm:$0xff] }
 0x2b7   :  { %9489 = vmatpush1.bf16.msra.mxu0 %v12448_v45  ;;  %v1101_v34 = vld [vmem:[#allocation7 + $0x1ec0] sm:$0xff]  ;;  %v12537_v40 = vcombine.high %v973_v31, %v977_v32 }
 0x2b8   :  { %9530 = vmatpush1.bf16.msra.mxu1 %v12576_v46  ;;  %9490 = vmatprep.subr.bf16.mxu0 %v12569_v30  ;;  %v1105_v36 = vld [vmem:[#allocation7 + $0x1ee0] sm:$0xff]  ;;  %v12536_v46 = vcombine.low %v973_v31, %v977_v32  ;;  %v11739_v31 = vcombine.high %v174_v20, %v178_v23 }
 0x2b9   :  { %9531 = vmatprep.subr.bf16.mxu1 %v12697_v50  ;;  %v12665_v0 = vcombine.high %v1101_v34, %v1105_v36  ;;  %v965_v48 = vld [vmem:[#allocation7 + $0x1a80] sm:$0xff]  ;;  %v12664_v30 = vcombine.low %v1101_v34, %v1105_v36  ;;  %v166_v34 = vld [vmem:[#allocation7 + $0x188] sm:$0xff] }
 0x2ba   :  { %v969_v41 = vld [vmem:[#allocation7 + $0x1aa0] sm:$0xff]  ;;  %v170_v36 = vld [vmem:[#allocation7 + $0x1a8] sm:$0xff] }
 0x2bb   :  { %9491 = vmatpush2.bf16.msra.mxu0 %v12568_v18  ;;  %v1093_v11 = vld [vmem:[#allocation7 + $0x1e80] sm:$0xff]  ;;  %v12529_v50 = vcombine.high %v965_v48, %v969_v41 }
 0x2bc   :  { %9532 = vmatpush2.bf16.msra.mxu1 %v12696_v60  ;;  %9492 = vmatprep.subr.bf16.mxu0 %v12561_v3  ;;  %v1097_v45 = vld [vmem:[#allocation7 + $0x1ea0] sm:$0xff]  ;;  %v12528_v60 = vcombine.low %v965_v48, %v969_v41  ;;  %v158_v41 = vld [vmem:[#allocation7 + $0x148] sm:$0xff] }
 0x2bd   :  { %9533 = vmatprep.subr.bf16.mxu1 %v12689_v4  ;;  %v12657_v51 = vcombine.high %v1093_v11, %v1097_v45  ;;  %v957_v55 = vld [vmem:[#allocation7 + $0x1a40] sm:$0xff]  ;;  %v12656_v3 = vcombine.low %v1093_v11, %v1097_v45  ;;  %v162_v11 = vld [vmem:[#allocation7 + $0x168] sm:$0xff] }
 0x2be   :  { %v961_v56 = vld [vmem:[#allocation7 + $0x1a60] sm:$0xff] }
 0x2bf   :  { %9493 = vmatpush2.bf16.msra.mxu0 %v12560_v15  ;;  %v1085_v9 = vld [vmem:[#allocation7 + $0x1e40] sm:$0xff]  ;;  %v12521_v4 = vcombine.high %v957_v55, %v961_v56 }
 0x2c0   :  { %9534 = vmatpush2.bf16.msra.mxu1 %v12688_v16  ;;  %9494 = vmatprep.subr.bf16.mxu0 %v12553_v17  ;;  %v1089_v18 = vld [vmem:[#allocation7 + $0x1e60] sm:$0xff]  ;;  %v12520_v16 = vcombine.low %v957_v55, %v961_v56  ;;  %v11730_v55 = vcombine.low %v166_v34, %v170_v36 }
 0x2c1   :  { %9535 = vmatprep.subr.bf16.mxu1 %v12681_v21  ;;  %v12649_v24 = vcombine.high %v1085_v9, %v1089_v18  ;;  %v949_v12 = vld [vmem:[#allocation7 + $0x1a00] sm:$0xff]  ;;  %v12648_v17 = vcombine.low %v1085_v9, %v1089_v18  ;;  %v11723_v18 = vcombine.high %v158_v41, %v162_v11 }
 0x2c2   :  { %v953_v59 = vld [vmem:[#allocation7 + $0x1a20] sm:$0xff] }
 0x2c3   :  { %9495 = vmatpush2.bf16.msra.mxu0 %v12552_v25  ;;  %v1077_v14 = vld [vmem:[#allocation7 + $0x1e00] sm:$0xff]  ;;  %v12513_v21 = vcombine.high %v949_v12, %v953_v59  ;;  %v306_v25 = vld [vmem:[#allocation7 + $0x5e8] sm:$0xff] }
 0x2c4   :  { %9536 = vmatpush2.bf16.msra.mxu1 %v12680_v26  ;;  %9496 = vmatprep.subr.bf16.mxu0 %v12545_v28  ;;  %v1081_v15 = vld [vmem:[#allocation7 + $0x1e20] sm:$0xff]  ;;  %v12512_v26 = vcombine.low %v949_v12, %v953_v59  ;;  %v13391_v28 = vrot.slane %v13360_v39, %v13190_v53  ;;  %v11867_v32 = vcombine.high %v302_v38, %v306_v25  ;;  %v150_v12 = vld [vmem:[#allocation7 + $0x108] sm:$0xff] }
 0x2c5   :  { %9537 = vmatprep.subr.bf16.mxu1 %v12673_v63  ;;  %v12641_v22 = vcombine.high %v1077_v14, %v1081_v15  ;;  %v12640_v63 = vcombine.low %v1077_v14, %v1081_v15  ;;  %v11866_v53 = vcombine.low %v302_v38, %v306_v25  ;;  %v11731_v39 = vcombine.high %v166_v34, %v170_v36  ;;  %v154_v59 = vld [vmem:[#allocation7 + $0x128] sm:$0xff] }
 0x2c6   :  { %v278_v14 = vld [vmem:[#allocation7 + $0x508] sm:$0xff] }
 0x2c7   :  { %9497 = vmatpush2.bf16.msra.mxu0 %v12544_v2  ;;  %v294_v2 = vld [vmem:[#allocation7 + $0x588] sm:$0xff] }
 0x2c8   :  { %9538 = vmatpush2.bf16.msra.mxu1 %v12672_v52  ;;  %9498 = vmatprep.subr.bf16.mxu0 %v12537_v40  ;;  %v298_v52 = vld [vmem:[#allocation7 + $0x5a8] sm:$0xff]  ;;  %v13395_v40 = vcombine.high %v13391_v28, %v13391_v28 }
 0x2c9   :  { %9539 = vmatprep.subr.bf16.mxu1 %v12665_v0  ;;  %v11738_v0 = vcombine.low %v174_v20, %v178_v23  ;;  %v11859_v48 = vcombine.high %v294_v2, %v298_v52  ;;  %v11858_v9 = vcombine.low %v294_v2, %v298_v52  ;;  %v282_v15 = vld [vmem:[#allocation7 + $0x528] sm:$0xff]  ;;  %v11715_v20 = vcombine.high %v150_v12, %v154_v59 }
 0x2ca   :  { %v11843_v38 = vcombine.high %v278_v14, %v282_v15  ;;  %v142_v25 = vld [vmem:[#allocation7 + $0xc8] sm:$0xff]  ;;  %v11842_v34 = vcombine.low %v278_v14, %v282_v15 }
 0x2cb   :  { %9499 = vmatpush2.bf16.msra.mxu0 %v12536_v46  ;;  %v286_v46 = vld [vmem:[#allocation7 + $0x548] sm:$0xff] }
 0x2cc   :  { %9540 = vmatpush2.bf16.msra.mxu1 %v12664_v30  ;;  %9500 = vmatprep.subr.bf16.mxu0 %v12529_v50  ;;  %v290_v30 = vld [vmem:[#allocation7 + $0x568] sm:$0xff] }
 0x2cd   :  { %9541 = vmatprep.subr.bf16.mxu1 %v12657_v51  ;;  %v134_v52 = vld [vmem:[#allocation7 + $0x88] sm:$0xff] }
 0x2cf   :  { %9501 = vmatpush2.bf16.msra.mxu0 %v12528_v60 }
 0x2d0   :  { %9542 = vmatpush2.bf16.msra.mxu1 %v12656_v3  ;;  %9502 = vmatprep.subr.bf16.mxu0 %v12521_v4 }
 0x2d1   :  { %9543 = vmatprep.subr.bf16.mxu1 %v12649_v24  ;;  %v11851_v24 = vcombine.high %v286_v46, %v290_v30 }
 0x2d3   :  { %9503 = vmatpush2.bf16.msra.mxu0 %v12520_v16 }
 0x2d4   :  { %9544 = vmatpush2.bf16.msra.mxu1 %v12648_v17  ;;  %9504 = vmatprep.subr.bf16.mxu0 %v12513_v21  ;;  %v11722_v21 = vcombine.low %v158_v41, %v162_v11 }
 0x2d5   :  { %9545 = vmatprep.subr.bf16.mxu1 %v12641_v22 }
 0x2d7   :  { %9505 = vmatpush2.bf16.msra.mxu0 %v12512_v26  ;;  %v146_v26 = vld [vmem:[#allocation7 + $0xe8] sm:$0xff] }
 0x2d8   :  { %9546 = vmatpush2.bf16.msra.mxu1 %v12640_v63  ;;  %9556 = vmatprep.subr.bf16.mxu0 %v11739_v31  ;;  %v270_v63 = vld [vmem:[#allocation7 + $0x4c8] sm:$0xff]  ;;  %v11707_v36 = vcombine.high %v142_v25, %v146_v26 }
 0x2d9   :  { %9597 = vmatprep.subr.bf16.mxu1 %v11867_v32  ;;  %v274_v31 = vld [vmem:[#allocation7 + $0x4e8] sm:$0xff]  ;;  %v11714_v32 = vcombine.low %v150_v12, %v154_v59 }
 0x2da   :  { %v9262_v45 = vpop.f32.mrf.mxu0  ;;  %9507 = vmatmul.mubr.bf16.vlgmr.msra.gmra.mxu0 %v13391_v28  ;;  %v11835_v2 = vcombine.high %v270_v63, %v274_v31  ;;  %v11834_v41 = vcombine.low %v270_v63, %v274_v31  ;;  %v250_v12 = vld [vmem:[#allocation7 + $0x428] sm:$0xff] }
 0x2db   :  { %v9263_v50 = vadd.f32 %v9262_v45, %v13253_v62  ;;  %v9303_v51 = vpop.f32.mrf.mxu1  ;;  %9548 = vmatmul.mubr.bf16.vlgmr.msra.gmra.mxu1 %v13395_v40  ;;  %9557 = vmatpush1.bf16.msra.mxu0 %v11738_v0  ;;  %v138_v0 = vld [vmem:[#allocation7 + $0xa8] sm:$0xff] }
 0x2dc   :  { %9598 = vmatpush1.bf16.msra.mxu1 %v11866_v53  ;;  %v9264_v56 = vpop.f32.mrf.mxu0  ;;  %9558 = vmatprep.subr.bf16.mxu0 %v11731_v39  ;;  %v262_v53 = vld [vmem:[#allocation7 + $0x488] sm:$0xff]  ;;  %v11699_v11 = vcombine.high %v134_v52, %v138_v0 }
 0x2dd   :  { %v13400_v60 = vadd.f32 %v9303_v51, %v9263_v50  ;;  %v9265_v3 = vadd.f32 %v9264_v56, %v13259_v5  ;;  %v9305_v4 = vpop.f32.mrf.mxu1  ;;  %9599 = vmatprep.subr.bf16.mxu1 %v11859_v48  ;;  %9588 = vmatprep.mubr.bf16.mxu0 %v13274_v19  ;;  %v11850_v5 = vcombine.low %v286_v46, %v290_v30  ;;  %v266_v39 = vld [vmem:[#allocation7 + $0x4a8] sm:$0xff] }
 0x2de   :  { %v9266_v62 = vpop.f32.mrf.mxu0  ;;  %9629 = vmatprep.mubr.bf16.mxu1 %v13279_v27  ;;  %v11706_v48 = vcombine.low %v142_v25, %v146_v26  ;;  %v11827_v45 = vcombine.high %v262_v53, %v266_v39  ;;  %v126_v46 = vld [vmem:[#allocation7 + $0x48] sm:$0xff]  ;;  %v11826_v56 = vcombine.low %v262_v53, %v266_v39 }
 0x2df   :  { %v13405_v16 = vadd.f32 %v9305_v4, %v9265_v3  ;;  %v9307_v17 = vpop.f32.mrf.mxu1  ;;  %9559 = vmatpush1.bf16.msra.mxu0 %v11730_v55  ;;  %v130_v30 = vld [vmem:[#allocation7 + $0x68] sm:$0xff]  ;;  %v11698_v55 = vcombine.low %v134_v52, %v138_v0 }
 0x2e0   :  { %9600 = vmatpush1.bf16.msra.mxu1 %v11858_v9  ;;  %v9267_v22 = vpop.f32.mrf.mxu0  ;;  %9560 = vmatprep.subr.bf16.mxu0 %v11723_v18  ;;  %v254_v50 = vld [vmem:[#allocation7 + $0x448] sm:$0xff]  ;;  %v11691_v9 = vcombine.high %v126_v46, %v130_v30  ;;  %v11690_v59 = vcombine.low %v126_v46, %v130_v30 }
 0x2e1   :  { %v9308_v23 = vpop.f32.mrf.mxu1  ;;  %9601 = vmatprep.subr.bf16.mxu1 %v11851_v24  ;;  %v258_v51 = vld [vmem:[#allocation7 + $0x468] sm:$0xff] }
 0x2e2   :  { %v11819_v18 = vcombine.high %v254_v50, %v258_v51  ;;  %v118_v3 = vld [vmem:[#allocation7 + $0x8] sm:$0xff]  ;;  %v11818_v62 = vcombine.low %v254_v50, %v258_v51 }
 0x2e3   :  { %9561 = vmatpush1.bf16.msra.mxu0 %v11722_v21  ;;  %v122_v4 = vld [vmem:[#allocation7 + $0x28] sm:$0xff] }
 0x2e4   :  { %9602 = vmatpush1.bf16.msra.mxu1 %v11850_v5  ;;  %9562 = vmatprep.subr.bf16.mxu0 %v11715_v20  ;;  %v246_v24 = vld [vmem:[#allocation7 + $0x408] sm:$0xff]  ;;  %v11683_v14 = vcombine.high %v118_v3, %v122_v4  ;;  %v11682_v20 = vcombine.low %v118_v3, %v122_v4 }
 0x2e5   :  { %9603 = vmatprep.subr.bf16.mxu1 %v11843_v38  ;;  %v11811_v15 = vcombine.high %v246_v24, %v250_v12  ;;  %v238_v17 = vld [vmem:[#allocation7 + $0x3c8] sm:$0xff]  ;;  %v11810_v23 = vcombine.low %v246_v24, %v250_v12 }
 0x2e6   :  { %v242_v21 = vld [vmem:[#allocation7 + $0x3e8] sm:$0xff] }
 0x2e7   :  { %9563 = vmatpush1.bf16.msra.mxu0 %v11714_v32  ;;  %v366_v22 = vld [vmem:[#allocation7 + $0x7c8] sm:$0xff]  ;;  %v11803_v38 = vcombine.high %v238_v17, %v242_v21 }
 0x2e8   :  { %9604 = vmatpush1.bf16.msra.mxu1 %v11842_v34  ;;  %9564 = vmatprep.subr.bf16.mxu0 %v11707_v36  ;;  %v370_v5 = vld [vmem:[#allocation7 + $0x7e8] sm:$0xff]  ;;  %v11802_v34 = vcombine.low %v238_v17, %v242_v21 }
 0x2e9   :  { %9605 = vmatprep.subr.bf16.mxu1 %v11835_v2  ;;  %v11931_v25 = vcombine.high %v366_v22, %v370_v5  ;;  %v230_v26 = vld [vmem:[#allocation7 + $0x388] sm:$0xff]  ;;  %v11930_v36 = vcombine.low %v366_v22, %v370_v5 }
 0x2ea   :  { %v234_v63 = vld [vmem:[#allocation7 + $0x3a8] sm:$0xff] }
 0x2eb   :  { %9565 = vmatpush1.bf16.msra.mxu0 %v11706_v48  ;;  %v358_v31 = vld [vmem:[#allocation7 + $0x788] sm:$0xff]  ;;  %v11795_v2 = vcombine.high %v230_v26, %v234_v63 }
 0x2ec   :  { %9606 = vmatpush1.bf16.msra.mxu1 %v11834_v41  ;;  %9566 = vmatprep.subr.bf16.mxu0 %v11699_v11  ;;  %v362_v32 = vld [vmem:[#allocation7 + $0x7a8] sm:$0xff]  ;;  %v11794_v41 = vcombine.low %v230_v26, %v234_v63 }
 0x2ed   :  { %9607 = vmatprep.subr.bf16.mxu1 %v11827_v45  ;;  %v11923_v52 = vcombine.high %v358_v31, %v362_v32  ;;  %v222_v0 = vld [vmem:[#allocation7 + $0x348] sm:$0xff]  ;;  %v11922_v11 = vcombine.low %v358_v31, %v362_v32 }
 0x2ee   :  { %v226_v53 = vld [vmem:[#allocation7 + $0x368] sm:$0xff] }
 0x2ef   :  { %9567 = vmatpush1.bf16.msra.mxu0 %v11698_v55  ;;  %v350_v39 = vld [vmem:[#allocation7 + $0x748] sm:$0xff]  ;;  %v11787_v45 = vcombine.high %v222_v0, %v226_v53 }
 0x2f0   :  { %9608 = vmatpush1.bf16.msra.mxu1 %v11826_v56  ;;  %9568 = vmatprep.subr.bf16.mxu0 %v11691_v9  ;;  %v354_v48 = vld [vmem:[#allocation7 + $0x768] sm:$0xff]  ;;  %v11786_v56 = vcombine.low %v222_v0, %v226_v53 }
 0x2f1   :  { %9609 = vmatprep.subr.bf16.mxu1 %v11819_v18  ;;  %v11915_v46 = vcombine.high %v350_v39, %v354_v48  ;;  %v214_v30 = vld [vmem:[#allocation7 + $0x308] sm:$0xff]  ;;  %v11914_v9 = vcombine.low %v350_v39, %v354_v48 }
 0x2f2   :  { %v218_v50 = vld [vmem:[#allocation7 + $0x328] sm:$0xff] }
 0x2f3   :  { %9569 = vmatpush1.bf16.msra.mxu0 %v11690_v59  ;;  %v342_v51 = vld [vmem:[#allocation7 + $0x708] sm:$0xff]  ;;  %v11779_v18 = vcombine.high %v214_v30, %v218_v50 }
 0x2f4   :  { %9610 = vmatpush1.bf16.msra.mxu1 %v11818_v62  ;;  %9570 = vmatprep.subr.bf16.mxu0 %v11683_v14  ;;  %v346_v55 = vld [vmem:[#allocation7 + $0x728] sm:$0xff]  ;;  %v11778_v62 = vcombine.low %v214_v30, %v218_v50 }
 0x2f5   :  { %9611 = vmatprep.subr.bf16.mxu1 %v11811_v15  ;;  %v11907_v3 = vcombine.high %v342_v51, %v346_v55  ;;  %v206_v4 = vld [vmem:[#allocation7 + $0x2c8] sm:$0xff]  ;;  %v11906_v14 = vcombine.low %v342_v51, %v346_v55 }
 0x2f6   :  { %v210_v24 = vld [vmem:[#allocation7 + $0x2e8] sm:$0xff] }
 0x2f7   :  { %9571 = vmatpush1.bf16.msra.mxu0 %v11682_v20  ;;  %v334_v12 = vld [vmem:[#allocation7 + $0x6c8] sm:$0xff]  ;;  %v11771_v15 = vcombine.high %v206_v4, %v210_v24 }
 0x2f8   :  { %9612 = vmatpush1.bf16.msra.mxu1 %v11810_v23  ;;  %9572 = vmatprep.subr.bf16.mxu0 %v11803_v38  ;;  %v338_v59 = vld [vmem:[#allocation7 + $0x6e8] sm:$0xff]  ;;  %v11770_v23 = vcombine.low %v206_v4, %v210_v24 }
 0x2f9   :  { %9613 = vmatprep.subr.bf16.mxu1 %v11931_v25  ;;  %v11899_v17 = vcombine.high %v334_v12, %v338_v59  ;;  %v198_v21 = vld [vmem:[#allocation7 + $0x288] sm:$0xff]  ;;  %v11898_v38 = vcombine.low %v334_v12, %v338_v59 }
 0x2fa   :  { %v202_v22 = vld [vmem:[#allocation7 + $0x2a8] sm:$0xff] }
 0x2fb   :  { %9573 = vmatpush2.bf16.msra.mxu0 %v11802_v34  ;;  %v326_v5 = vld [vmem:[#allocation7 + $0x688] sm:$0xff]  ;;  %v11763_v25 = vcombine.high %v198_v21, %v202_v22 }
 0x2fc   :  { %9614 = vmatpush2.bf16.msra.mxu1 %v11930_v36  ;;  %9574 = vmatprep.subr.bf16.mxu0 %v11795_v2  ;;  %v330_v20 = vld [vmem:[#allocation7 + $0x6a8] sm:$0xff]  ;;  %v11762_v36 = vcombine.low %v198_v21, %v202_v22 }
 0x2fd   :  { %9615 = vmatprep.subr.bf16.mxu1 %v11923_v52  ;;  %v11891_v26 = vcombine.high %v326_v5, %v330_v20  ;;  %v190_v63 = vld [vmem:[#allocation7 + $0x248] sm:$0xff]  ;;  %v11890_v2 = vcombine.low %v326_v5, %v330_v20 }
 0x2fe   :  { %v194_v31 = vld [vmem:[#allocation7 + $0x268] sm:$0xff] }
 0x2ff   :  { %9575 = vmatpush2.bf16.msra.mxu0 %v11794_v41  ;;  %v318_v32 = vld [vmem:[#allocation7 + $0x648] sm:$0xff]  ;;  %v11755_v52 = vcombine.high %v190_v63, %v194_v31 }
 0x300   :  { %9616 = vmatpush2.bf16.msra.mxu1 %v11922_v11  ;;  %9576 = vmatprep.subr.bf16.mxu0 %v11787_v45  ;;  %v322_v34 = vld [vmem:[#allocation7 + $0x668] sm:$0xff]  ;;  %v11754_v11 = vcombine.low %v190_v63, %v194_v31 }
 0x301   :  { %9617 = vmatprep.subr.bf16.mxu1 %v11915_v46  ;;  %v11883_v0 = vcombine.high %v318_v32, %v322_v34  ;;  %v182_v53 = vld [vmem:[#allocation7 + $0x208] sm:$0xff]  ;;  %v11882_v45 = vcombine.low %v318_v32, %v322_v34 }
 0x302   :  { %v186_v39 = vld [vmem:[#allocation7 + $0x228] sm:$0xff] }
 0x303   :  { %9577 = vmatpush2.bf16.msra.mxu0 %v11786_v56  ;;  %v310_v48 = vld [vmem:[#allocation7 + $0x608] sm:$0xff]  ;;  %v11747_v46 = vcombine.high %v182_v53, %v186_v39 }
 0x304   :  { %9618 = vmatpush2.bf16.msra.mxu1 %v11914_v9  ;;  %9578 = vmatprep.subr.bf16.mxu0 %v11779_v18  ;;  %v314_v41 = vld [vmem:[#allocation7 + $0x628] sm:$0xff]  ;;  %v11746_v9 = vcombine.low %v182_v53, %v186_v39 }
 0x305   :  { %9619 = vmatprep.subr.bf16.mxu1 %v11907_v3  ;;  %v11875_v30 = vcombine.high %v310_v48, %v314_v41  ;;  %v430_v50 = vld [vmem:[#allocation7 + $0x9c8] sm:$0xff]  ;;  %v11874_v18 = vcombine.low %v310_v48, %v314_v41 }
 0x306   :  { %v434_v51 = vld [vmem:[#allocation7 + $0x9e8] sm:$0xff] }
 0x307   :  { %9579 = vmatpush2.bf16.msra.mxu0 %v11778_v62  ;;  %v558_v55 = vld [vmem:[#allocation7 + $0xdc8] sm:$0xff]  ;;  %v11995_v3 = vcombine.high %v430_v50, %v434_v51 }
 0x308   :  { %9620 = vmatpush2.bf16.msra.mxu1 %v11906_v14  ;;  %9580 = vmatprep.subr.bf16.mxu0 %v11771_v15  ;;  %v562_v56 = vld [vmem:[#allocation7 + $0xde8] sm:$0xff]  ;;  %v11994_v14 = vcombine.low %v430_v50, %v434_v51 }
 0x309   :  { %9621 = vmatprep.subr.bf16.mxu1 %v11899_v17  ;;  %v12123_v4 = vcombine.high %v558_v55, %v562_v56  ;;  %v422_v24 = vld [vmem:[#allocation7 + $0x988] sm:$0xff]  ;;  %v12122_v15 = vcombine.low %v558_v55, %v562_v56 }
 0x30a   :  { %v426_v12 = vld [vmem:[#allocation7 + $0x9a8] sm:$0xff] }
 0x30b   :  { %9581 = vmatpush2.bf16.msra.mxu0 %v11770_v23  ;;  %v550_v59 = vld [vmem:[#allocation7 + $0xd88] sm:$0xff]  ;;  %v11987_v17 = vcombine.high %v422_v24, %v426_v12  ;;  %v11986_v63 = vcombine.low %v422_v24, %v426_v12 }
 0x30c   :  { %9622 = vmatpush2.bf16.msra.mxu1 %v11898_v38  ;;  %9582 = vmatprep.subr.bf16.mxu0 %v11763_v25  ;;  %v554_v62 = vld [vmem:[#allocation7 + $0xda8] sm:$0xff] }
 0x30d   :  { %9623 = vmatprep.subr.bf16.mxu1 %v11891_v26  ;;  %v12115_v21 = vcombine.high %v550_v59, %v554_v62  ;;  %v414_v22 = vld [vmem:[#allocation7 + $0x948] sm:$0xff]  ;;  %v12114_v32 = vcombine.low %v550_v59, %v554_v62 }
 0x30e   :  { %v418_v5 = vld [vmem:[#allocation7 + $0x968] sm:$0xff] }
 0x30f   :  { %9583 = vmatpush2.bf16.msra.mxu0 %v11762_v36  ;;  %v542_v23 = vld [vmem:[#allocation7 + $0xd48] sm:$0xff]  ;;  %v11979_v34 = vcombine.high %v414_v22, %v418_v5 }
 0x310   :  { %9624 = vmatpush2.bf16.msra.mxu1 %v11890_v2  ;;  %9584 = vmatprep.subr.bf16.mxu0 %v11755_v52  ;;  %v546_v38 = vld [vmem:[#allocation7 + $0xd68] sm:$0xff] }
 0x311   :  { %9625 = vmatprep.subr.bf16.mxu1 %v11883_v0  ;;  %v12107_v0 = vcombine.high %v542_v23, %v546_v38  ;;  %v406_v53 = vld [vmem:[#allocation7 + $0x908] sm:$0xff] }
 0x312   :  { %v410_v39 = vld [vmem:[#allocation7 + $0x928] sm:$0xff] }
 0x313   :  { %9585 = vmatpush2.bf16.msra.mxu0 %v11754_v11  ;;  %v534_v48 = vld [vmem:[#allocation7 + $0xd08] sm:$0xff]  ;;  %v11971_v50 = vcombine.high %v406_v53, %v410_v39 }
 0x314   :  { %9626 = vmatpush2.bf16.msra.mxu1 %v11882_v45  ;;  %9586 = vmatprep.subr.bf16.mxu0 %v11747_v46  ;;  %v538_v41 = vld [vmem:[#allocation7 + $0xd28] sm:$0xff]  ;;  %v11978_v46 = vcombine.low %v414_v22, %v418_v5 }
 0x315   :  { %9627 = vmatprep.subr.bf16.mxu1 %v11875_v30  ;;  %v12099_v55 = vcombine.high %v534_v48, %v538_v41  ;;  %v398_v56 = vld [vmem:[#allocation7 + $0x8c8] sm:$0xff]  ;;  %v12098_v24 = vcombine.low %v534_v48, %v538_v41 }
 0x316   :  { %v390_v62 = vld [vmem:[#allocation7 + $0x888] sm:$0xff] }
 0x317   :  { %9587 = vmatpush2.bf16.msra.mxu0 %v11746_v9  ;;  %v402_v9 = vld [vmem:[#allocation7 + $0x8e8] sm:$0xff] }
 0x318   :  { %9628 = vmatpush2.bf16.msra.mxu1 %v11874_v18  ;;  %9638 = vmatprep.subr.bf16.mxu0 %v11995_v3  ;;  %v526_v18 = vld [vmem:[#allocation7 + $0xcc8] sm:$0xff]  ;;  %v11963_v12 = vcombine.high %v398_v56, %v402_v9 }
 0x319   :  { %9679 = vmatprep.subr.bf16.mxu1 %v12123_v4  ;;  %v530_v3 = vld [vmem:[#allocation7 + $0xce8] sm:$0xff]  ;;  %v11970_v4 = vcombine.low %v406_v53, %v410_v39 }
 0x31a   :  { %v9344_v20 = vpop.f32.mrf.mxu0  ;;  %9589 = vmatmul.mubr.bf16.vlgmr.msra.gmra.mxu0 %v13299_v47  ;;  %v12091_v59 = vcombine.high %v526_v18, %v530_v3  ;;  %v12090_v22 = vcombine.low %v526_v18, %v530_v3  ;;  %v506_v53 = vld [vmem:[#allocation7 + $0xc28] sm:$0xff] }
 0x31b   :  { %v9345_v25 = vadd.f32 %v9344_v20, %v13400_v60  ;;  %v9385_v26 = vpop.f32.mrf.mxu1  ;;  %9630 = vmatmul.mubr.bf16.vlgmr.msra.gmra.mxu1 %v13306_v58  ;;  %9639 = vmatpush1.bf16.msra.mxu0 %v11994_v14  ;;  %v394_v14 = vld [vmem:[#allocation7 + $0x8a8] sm:$0xff] }
 0x31c   :  { %9680 = vmatpush1.bf16.msra.mxu1 %v12122_v15  ;;  %v9346_v31 = vpop.f32.mrf.mxu0  ;;  %9640 = vmatprep.subr.bf16.mxu0 %v11987_v17  ;;  %v518_v15 = vld [vmem:[#allocation7 + $0xc88] sm:$0xff]  ;;  %v11955_v5 = vcombine.high %v390_v62, %v394_v14 }
 0x31d   :  { %v13410_v36 = vadd.f32 %v9385_v26, %v9345_v25  ;;  %v9347_v2 = vadd.f32 %v9346_v31, %v13405_v16  ;;  %v9387_v52 = vpop.f32.mrf.mxu1  ;;  %9681 = vmatprep.subr.bf16.mxu1 %v12115_v21  ;;  %9670 = vmatprep.mubr.bf16.mxu0 %v13302_v57  ;;  %v12106_v16 = vcombine.low %v542_v23, %v546_v38  ;;  %v522_v17 = vld [vmem:[#allocation7 + $0xca8] sm:$0xff] }
 0x31e   :  { %v9348_v60 = vpop.f32.mrf.mxu0  ;;  %9711 = vmatprep.mubr.bf16.mxu1 %v13311_v33  ;;  %v11962_v21 = vcombine.low %v398_v56, %v402_v9  ;;  %v12083_v20 = vcombine.high %v518_v15, %v522_v17  ;;  %v382_v23 = vld [vmem:[#allocation7 + $0x848] sm:$0xff]  ;;  %v12082_v31 = vcombine.low %v518_v15, %v522_v17 }
 0x31f   :  { %v13415_v11 = vadd.f32 %v9387_v52, %v9347_v2  ;;  %v9389_v45 = vpop.f32.mrf.mxu1  ;;  %9641 = vmatpush1.bf16.msra.mxu0 %v11986_v63  ;;  %v386_v38 = vld [vmem:[#allocation7 + $0x868] sm:$0xff]  ;;  %v11954_v63 = vcombine.low %v390_v62, %v394_v14 }
 0x320   :  { %9682 = vmatpush1.bf16.msra.mxu1 %v12114_v32  ;;  %v9349_v30 = vpop.f32.mrf.mxu0  ;;  %9642 = vmatprep.subr.bf16.mxu0 %v11979_v34  ;;  %v510_v25 = vld [vmem:[#allocation7 + $0xc48] sm:$0xff]  ;;  %v11947_v32 = vcombine.high %v382_v23, %v386_v38  ;;  %v11946_v39 = vcombine.low %v382_v23, %v386_v38 }
 0x321   :  { %v9390_v51 = vpop.f32.mrf.mxu1  ;;  %9683 = vmatprep.subr.bf16.mxu1 %v12107_v0  ;;  %v514_v26 = vld [vmem:[#allocation7 + $0xc68] sm:$0xff] }
 0x322   :  { %v12075_v34 = vcombine.high %v510_v25, %v514_v26  ;;  %v374_v2 = vld [vmem:[#allocation7 + $0x808] sm:$0xff]  ;;  %v12074_v60 = vcombine.low %v510_v25, %v514_v26 }
 0x323   :  { %9643 = vmatpush1.bf16.msra.mxu0 %v11978_v46  ;;  %v378_v52 = vld [vmem:[#allocation7 + $0x828] sm:$0xff] }
 0x324   :  { %9684 = vmatpush1.bf16.msra.mxu1 %v12106_v16  ;;  %9644 = vmatprep.subr.bf16.mxu0 %v11971_v50  ;;  %v502_v0 = vld [vmem:[#allocation7 + $0xc08] sm:$0xff]  ;;  %v11939_v48 = vcombine.high %v374_v2, %v378_v52  ;;  %v11938_v50 = vcombine.low %v374_v2, %v378_v52 }
 0x325   :  { %9685 = vmatprep.subr.bf16.mxu1 %v12099_v55  ;;  %v12067_v41 = vcombine.high %v502_v0, %v506_v53  ;;  %v494_v45 = vld [vmem:[#allocation7 + $0xbc8] sm:$0xff]  ;;  %v12066_v51 = vcombine.low %v502_v0, %v506_v53 }
 0x326   :  { %v498_v46 = vld [vmem:[#allocation7 + $0xbe8] sm:$0xff] }
 0x327   :  { %9645 = vmatpush1.bf16.msra.mxu0 %v11970_v4  ;;  %v622_v30 = vld [vmem:[#allocation7 + $0xfc8] sm:$0xff]  ;;  %v12059_v55 = vcombine.high %v494_v45, %v498_v46 }
 0x328   :  { %9686 = vmatpush1.bf16.msra.mxu1 %v12098_v24  ;;  %9646 = vmatprep.subr.bf16.mxu0 %v11963_v12  ;;  %v626_v16 = vld [vmem:[#allocation7 + $0xfe8] sm:$0xff]  ;;  %v12058_v24 = vcombine.low %v494_v45, %v498_v46 }
 0x329   :  { %9687 = vmatprep.subr.bf16.mxu1 %v12091_v59  ;;  %v12187_v56 = vcombine.high %v622_v30, %v626_v16  ;;  %v486_v9 = vld [vmem:[#allocation7 + $0xb88] sm:$0xff]  ;;  %v12186_v12 = vcombine.low %v622_v30, %v626_v16 }
 0x32a   :  { %v490_v18 = vld [vmem:[#allocation7 + $0xba8] sm:$0xff] }
 0x32b   :  { %9647 = vmatpush1.bf16.msra.mxu0 %v11962_v21  ;;  %v614_v3 = vld [vmem:[#allocation7 + $0xf88] sm:$0xff]  ;;  %v12051_v59 = vcombine.high %v486_v9, %v490_v18 }
 0x32c   :  { %9688 = vmatpush1.bf16.msra.mxu1 %v12090_v22  ;;  %9648 = vmatprep.subr.bf16.mxu0 %v11955_v5  ;;  %v618_v4 = vld [vmem:[#allocation7 + $0xfa8] sm:$0xff]  ;;  %v12050_v22 = vcombine.low %v486_v9, %v490_v18 }
 0x32d   :  { %9689 = vmatprep.subr.bf16.mxu1 %v12083_v20  ;;  %v12179_v62 = vcombine.high %v614_v3, %v618_v4  ;;  %v478_v14 = vld [vmem:[#allocation7 + $0xb48] sm:$0xff]  ;;  %v12178_v5 = vcombine.low %v614_v3, %v618_v4 }
 0x32e   :  { %v482_v15 = vld [vmem:[#allocation7 + $0xb68] sm:$0xff] }
 0x32f   :  { %9649 = vmatpush1.bf16.msra.mxu0 %v11954_v63  ;;  %v606_v17 = vld [vmem:[#allocation7 + $0xf48] sm:$0xff]  ;;  %v12043_v20 = vcombine.high %v478_v14, %v482_v15 }
 0x330   :  { %9690 = vmatpush1.bf16.msra.mxu1 %v12082_v31  ;;  %9650 = vmatprep.subr.bf16.mxu0 %v11947_v32  ;;  %v610_v21 = vld [vmem:[#allocation7 + $0xf68] sm:$0xff]  ;;  %v12042_v31 = vcombine.low %v478_v14, %v482_v15 }
 0x331   :  { %9691 = vmatprep.subr.bf16.mxu1 %v12075_v34  ;;  %v12171_v23 = vcombine.high %v606_v17, %v610_v21  ;;  %v470_v38 = vld [vmem:[#allocation7 + $0xb08] sm:$0xff]  ;;  %v12170_v32 = vcombine.low %v606_v17, %v610_v21 }
 0x332   :  { %v474_v25 = vld [vmem:[#allocation7 + $0xb28] sm:$0xff] }
 0x333   :  { %9651 = vmatpush1.bf16.msra.mxu0 %v11946_v39  ;;  %v598_v26 = vld [vmem:[#allocation7 + $0xf08] sm:$0xff]  ;;  %v12035_v34 = vcombine.high %v470_v38, %v474_v25 }
 0x334   :  { %9692 = vmatpush1.bf16.msra.mxu1 %v12074_v60  ;;  %9652 = vmatprep.subr.bf16.mxu0 %v11939_v48  ;;  %v602_v63 = vld [vmem:[#allocation7 + $0xf28] sm:$0xff]  ;;  %v12034_v60 = vcombine.low %v470_v38, %v474_v25 }
 0x335   :  { %9693 = vmatprep.subr.bf16.mxu1 %v12067_v41  ;;  %v12163_v2 = vcombine.high %v598_v26, %v602_v63  ;;  %v462_v52 = vld [vmem:[#allocation7 + $0xac8] sm:$0xff]  ;;  %v12162_v48 = vcombine.low %v598_v26, %v602_v63 }
 0x336   :  { %v466_v0 = vld [vmem:[#allocation7 + $0xae8] sm:$0xff] }
 0x337   :  { %9653 = vmatpush1.bf16.msra.mxu0 %v11938_v50  ;;  %v590_v53 = vld [vmem:[#allocation7 + $0xec8] sm:$0xff]  ;;  %v12027_v41 = vcombine.high %v462_v52, %v466_v0 }
 0x338   :  { %9694 = vmatpush1.bf16.msra.mxu1 %v12066_v51  ;;  %9654 = vmatprep.subr.bf16.mxu0 %v12059_v55  ;;  %v594_v39 = vld [vmem:[#allocation7 + $0xee8] sm:$0xff]  ;;  %v12026_v51 = vcombine.low %v462_v52, %v466_v0 }
 0x339   :  { %9695 = vmatprep.subr.bf16.mxu1 %v12187_v56  ;;  %v12155_v45 = vcombine.high %v590_v53, %v594_v39  ;;  %v454_v46 = vld [vmem:[#allocation7 + $0xa88] sm:$0xff]  ;;  %v12154_v55 = vcombine.low %v590_v53, %v594_v39 }
 0x33a   :  { %v458_v30 = vld [vmem:[#allocation7 + $0xaa8] sm:$0xff] }
 0x33b   :  { %9655 = vmatpush2.bf16.msra.mxu0 %v12058_v24  ;;  %v582_v16 = vld [vmem:[#allocation7 + $0xe88] sm:$0xff]  ;;  %v12019_v56 = vcombine.high %v454_v46, %v458_v30 }
 0x33c   :  { %9696 = vmatpush2.bf16.msra.mxu1 %v12186_v12  ;;  %9656 = vmatprep.subr.bf16.mxu0 %v12051_v59  ;;  %v586_v50 = vld [vmem:[#allocation7 + $0xea8] sm:$0xff]  ;;  %v12018_v12 = vcombine.low %v454_v46, %v458_v30 }
 0x33d   :  { %9697 = vmatprep.subr.bf16.mxu1 %v12179_v62  ;;  %v12147_v9 = vcombine.high %v582_v16, %v586_v50  ;;  %v446_v18 = vld [vmem:[#allocation7 + $0xa48] sm:$0xff]  ;;  %v12146_v59 = vcombine.low %v582_v16, %v586_v50 }
 0x33e   :  { %v450_v3 = vld [vmem:[#allocation7 + $0xa68] sm:$0xff] }
 0x33f   :  { %9657 = vmatpush2.bf16.msra.mxu0 %v12050_v22  ;;  %v574_v4 = vld [vmem:[#allocation7 + $0xe48] sm:$0xff]  ;;  %v12011_v62 = vcombine.high %v446_v18, %v450_v3 }
 0x340   :  { %9698 = vmatpush2.bf16.msra.mxu1 %v12178_v5  ;;  %9658 = vmatprep.subr.bf16.mxu0 %v12043_v20  ;;  %v578_v24 = vld [vmem:[#allocation7 + $0xe68] sm:$0xff]  ;;  %v12010_v5 = vcombine.low %v446_v18, %v450_v3 }
 0x341   :  { %9699 = vmatprep.subr.bf16.mxu1 %v12171_v23  ;;  %v12139_v14 = vcombine.high %v574_v4, %v578_v24  ;;  %v438_v15 = vld [vmem:[#allocation7 + $0xa08] sm:$0xff]  ;;  %v12138_v20 = vcombine.low %v574_v4, %v578_v24 }
 0x342   :  { %v442_v17 = vld [vmem:[#allocation7 + $0xa28] sm:$0xff] }
 0x343   :  { %9659 = vmatpush2.bf16.msra.mxu0 %v12042_v31  ;;  %v566_v21 = vld [vmem:[#allocation7 + $0xe08] sm:$0xff]  ;;  %v12003_v23 = vcombine.high %v438_v15, %v442_v17 }
 0x344   :  { %9700 = vmatpush2.bf16.msra.mxu1 %v12170_v32  ;;  %9660 = vmatprep.subr.bf16.mxu0 %v12035_v34  ;;  %v570_v22 = vld [vmem:[#allocation7 + $0xe28] sm:$0xff]  ;;  %v12002_v32 = vcombine.low %v438_v15, %v442_v17 }
 0x345   :  { %9701 = vmatprep.subr.bf16.mxu1 %v12163_v2  ;;  %v12131_v38 = vcombine.high %v566_v21, %v570_v22  ;;  %v686_v25 = vld [vmem:[#allocation7 + $0x11c8] sm:$0xff]  ;;  %v12130_v34 = vcombine.low %v566_v21, %v570_v22 }
 0x346   :  { %v690_v26 = vld [vmem:[#allocation7 + $0x11e8] sm:$0xff] }
 0x347   :  { %9661 = vmatpush2.bf16.msra.mxu0 %v12034_v60  ;;  %v814_v63 = vld [vmem:[#allocation7 + $0x15c8] sm:$0xff]  ;;  %v12251_v2 = vcombine.high %v686_v25, %v690_v26 }
 0x348   :  { %9702 = vmatpush2.bf16.msra.mxu1 %v12162_v48  ;;  %9662 = vmatprep.subr.bf16.mxu0 %v12027_v41  ;;  %v818_v31 = vld [vmem:[#allocation7 + $0x15e8] sm:$0xff]  ;;  %v12250_v48 = vcombine.low %v686_v25, %v690_v26 }
 0x349   :  { %9703 = vmatprep.subr.bf16.mxu1 %v12155_v45  ;;  %v12379_v52 = vcombine.high %v814_v63, %v818_v31  ;;  %v678_v0 = vld [vmem:[#allocation7 + $0x1188] sm:$0xff]  ;;  %v12378_v41 = vcombine.low %v814_v63, %v818_v31 }
 0x34a   :  { %v682_v53 = vld [vmem:[#allocation7 + $0x11a8] sm:$0xff] }
 0x34b   :  { %9663 = vmatpush2.bf16.msra.mxu0 %v12026_v51  ;;  %v806_v39 = vld [vmem:[#allocation7 + $0x1588] sm:$0xff]  ;;  %v12243_v45 = vcombine.high %v678_v0, %v682_v53  ;;  %v12242_v18 = vcombine.low %v678_v0, %v682_v53 }
 0x34c   :  { %9704 = vmatpush2.bf16.msra.mxu1 %v12154_v55  ;;  %9664 = vmatprep.subr.bf16.mxu0 %v12019_v56  ;;  %v810_v60 = vld [vmem:[#allocation7 + $0x15a8] sm:$0xff] }
 0x34d   :  { %9705 = vmatprep.subr.bf16.mxu1 %v12147_v9  ;;  %v12371_v46 = vcombine.high %v806_v39, %v810_v60  ;;  %v670_v30 = vld [vmem:[#allocation7 + $0x1148] sm:$0xff]  ;;  %v12370_v4 = vcombine.low %v806_v39, %v810_v60 }
 0x34e   :  { %v674_v16 = vld [vmem:[#allocation7 + $0x1168] sm:$0xff] }
 0x34f   :  { %9665 = vmatpush2.bf16.msra.mxu0 %v12018_v12  ;;  %v798_v51 = vld [vmem:[#allocation7 + $0x1548] sm:$0xff]  ;;  %v12235_v24 = vcombine.high %v670_v30, %v674_v16 }
 0x350   :  { %9706 = vmatpush2.bf16.msra.mxu1 %v12146_v59  ;;  %9666 = vmatprep.subr.bf16.mxu0 %v12011_v62  ;;  %v802_v55 = vld [vmem:[#allocation7 + $0x1568] sm:$0xff] }
 0x351   :  { %9707 = vmatprep.subr.bf16.mxu1 %v12139_v14  ;;  %v12363_v14 = vcombine.high %v798_v51, %v802_v55  ;;  %v662_v15 = vld [vmem:[#allocation7 + $0x1108] sm:$0xff] }
 0x352   :  { %v666_v17 = vld [vmem:[#allocation7 + $0x1128] sm:$0xff] }
 0x353   :  { %9667 = vmatpush2.bf16.msra.mxu0 %v12010_v5  ;;  %v790_v21 = vld [vmem:[#allocation7 + $0x1508] sm:$0xff]  ;;  %v12227_v25 = vcombine.high %v662_v15, %v666_v17 }
 0x354   :  { %9708 = vmatpush2.bf16.msra.mxu1 %v12138_v20  ;;  %9668 = vmatprep.subr.bf16.mxu0 %v12003_v23  ;;  %v794_v22 = vld [vmem:[#allocation7 + $0x1528] sm:$0xff]  ;;  %v12234_v23 = vcombine.low %v670_v30, %v674_v16 }
 0x355   :  { %9709 = vmatprep.subr.bf16.mxu1 %v12131_v38  ;;  %v12355_v63 = vcombine.high %v790_v21, %v794_v22  ;;  %v654_v31 = vld [vmem:[#allocation7 + $0x10c8] sm:$0xff]  ;;  %v12354_v0 = vcombine.low %v790_v21, %v794_v22 }
 0x356   :  { %v646_v60 = vld [vmem:[#allocation7 + $0x1088] sm:$0xff] }
 0x357   :  { %9669 = vmatpush2.bf16.msra.mxu0 %v12002_v32  ;;  %v658_v32 = vld [vmem:[#allocation7 + $0x10e8] sm:$0xff] }
 0x358   :  { %9710 = vmatpush2.bf16.msra.mxu1 %v12130_v34  ;;  %9720 = vmatprep.subr.bf16.mxu0 %v12251_v2  ;;  %v782_v34 = vld [vmem:[#allocation7 + $0x14c8] sm:$0xff]  ;;  %v12219_v53 = vcombine.high %v654_v31, %v658_v32 }
 0x359   :  { %9761 = vmatprep.subr.bf16.mxu1 %v12379_v52  ;;  %v786_v2 = vld [vmem:[#allocation7 + $0x14e8] sm:$0xff]  ;;  %v12226_v52 = vcombine.low %v662_v15, %v666_v17 }
 0x35a   :  { %v9426_v50 = vpop.f32.mrf.mxu0  ;;  %9671 = vmatmul.mubr.bf16.vlgmr.msra.gmra.mxu0 %v13330_v37  ;;  %v12347_v39 = vcombine.high %v782_v34, %v786_v2  ;;  %v12346_v30 = vcombine.low %v782_v34, %v786_v2  ;;  %v762_v15 = vld [vmem:[#allocation7 + $0x1428] sm:$0xff] }
 0x35b   :  { %v9427_v56 = vadd.f32 %v9426_v50, %v13410_v36  ;;  %v9467_v9 = vpop.f32.mrf.mxu1  ;;  %9712 = vmatmul.mubr.bf16.vlgmr.msra.gmra.mxu1 %v13337_v49  ;;  %9721 = vmatpush1.bf16.msra.mxu0 %v12250_v48  ;;  %v650_v48 = vld [vmem:[#allocation7 + $0x10a8] sm:$0xff] }
 0x35c   :  { %9762 = vmatpush1.bf16.msra.mxu1 %v12378_v41  ;;  %v9428_v3 = vpop.f32.mrf.mxu0  ;;  %9722 = vmatprep.subr.bf16.mxu0 %v12243_v45  ;;  %v774_v41 = vld [vmem:[#allocation7 + $0x1488] sm:$0xff]  ;;  %v12211_v16 = vcombine.high %v646_v60, %v650_v48 }
 0x35d   :  { %v13420_v12 = vadd.f32 %v9467_v9, %v9427_v56  ;;  %v9429_v59 = vadd.f32 %v9428_v3, %v13415_v11  ;;  %v9469_v62 = vpop.f32.mrf.mxu1  ;;  %9763 = vmatprep.subr.bf16.mxu1 %v12371_v46  ;;  %9752 = vmatprep.mubr.bf16.mxu0 %v13333_v6  ;;  %v12362_v11 = vcombine.low %v798_v51, %v802_v55  ;;  %v778_v45 = vld [vmem:[#allocation7 + $0x14a8] sm:$0xff] }
 0x35e   :  { %v9430_v36 = vpop.f32.mrf.mxu0  ;;  %9793 = vmatprep.mubr.bf16.mxu1 %v13342_v61  ;;  %v12218_v46 = vcombine.low %v654_v31, %v658_v32  ;;  %v12339_v50 = vcombine.high %v774_v41, %v778_v45  ;;  %v638_v51 = vld [vmem:[#allocation7 + $0x1048] sm:$0xff]  ;;  %v12338_v3 = vcombine.low %v774_v41, %v778_v45 }
 0x35f   :  { %v13425_v5 = vadd.f32 %v9469_v62, %v9429_v59  ;;  %v9471_v20 = vpop.f32.mrf.mxu1  ;;  %9723 = vmatpush1.bf16.msra.mxu0 %v12242_v18  ;;  %v642_v55 = vld [vmem:[#allocation7 + $0x1068] sm:$0xff]  ;;  %v12210_v18 = vcombine.low %v646_v60, %v650_v48 }
 0x360   :  { %9764 = vmatpush1.bf16.msra.mxu1 %v12370_v4  ;;  %v9431_v38 = vpop.f32.mrf.mxu0  ;;  %9724 = vmatprep.subr.bf16.mxu0 %v12235_v24  ;;  %v766_v56 = vld [vmem:[#allocation7 + $0x1448] sm:$0xff]  ;;  %v12203_v4 = vcombine.high %v638_v51, %v642_v55  ;;  %v12202_v17 = vcombine.low %v638_v51, %v642_v55 }
 0x361   :  { %v9472_v26 = vpop.f32.mrf.mxu1  ;;  %9765 = vmatprep.subr.bf16.mxu1 %v12363_v14  ;;  %v770_v9 = vld [vmem:[#allocation7 + $0x1468] sm:$0xff] }
 0x362   :  { %v12331_v24 = vcombine.high %v766_v56, %v770_v9  ;;  %v630_v59 = vld [vmem:[#allocation7 + $0x1008] sm:$0xff]  ;;  %v12330_v36 = vcombine.low %v766_v56, %v770_v9 }
 0x363   :  { %9725 = vmatpush1.bf16.msra.mxu0 %v12234_v23  ;;  %v634_v62 = vld [vmem:[#allocation7 + $0x1028] sm:$0xff] }
 0x364   :  { %9766 = vmatpush1.bf16.msra.mxu1 %v12362_v11  ;;  %9726 = vmatprep.subr.bf16.mxu0 %v12227_v25  ;;  %v758_v14 = vld [vmem:[#allocation7 + $0x1408] sm:$0xff]  ;;  %v12195_v21 = vcombine.high %v630_v59, %v634_v62  ;;  %v12194_v25 = vcombine.low %v630_v59, %v634_v62 }
 0x365   :  { %9767 = vmatprep.subr.bf16.mxu1 %v12355_v63  ;;  %v12323_v22 = vcombine.high %v758_v14, %v762_v15  ;;  %v750_v20 = vld [vmem:[#allocation7 + $0x13c8] sm:$0xff]  ;;  %v12322_v26 = vcombine.low %v758_v14, %v762_v15 }
 0x366   :  { %v754_v23 = vld [vmem:[#allocation7 + $0x13e8] sm:$0xff] }
 0x367   :  { %9727 = vmatpush1.bf16.msra.mxu0 %v12226_v52  ;;  %v878_v38 = vld [vmem:[#allocation7 + $0x17c8] sm:$0xff]  ;;  %v12315_v63 = vcombine.high %v750_v20, %v754_v23 }
 0x368   :  { %9768 = vmatpush1.bf16.msra.mxu1 %v12354_v0  ;;  %9728 = vmatprep.subr.bf16.mxu0 %v12219_v53  ;;  %v882_v11 = vld [vmem:[#allocation7 + $0x17e8] sm:$0xff]  ;;  %v12314_v0 = vcombine.low %v750_v20, %v754_v23 }
 0x369   :  { %9769 = vmatprep.subr.bf16.mxu1 %v12347_v39  ;;  %v12443_v31 = vcombine.high %v878_v38, %v882_v11  ;;  %v742_v32 = vld [vmem:[#allocation7 + $0x1388] sm:$0xff]  ;;  %v12442_v53 = vcombine.low %v878_v38, %v882_v11 }
 0x36a   :  { %v746_v34 = vld [vmem:[#allocation7 + $0x13a8] sm:$0xff] }
 0x36b   :  { %9729 = vmatpush1.bf16.msra.mxu0 %v12218_v46  ;;  %v870_v2 = vld [vmem:[#allocation7 + $0x1788] sm:$0xff]  ;;  %v12307_v39 = vcombine.high %v742_v32, %v746_v34 }
 0x36c   :  { %9770 = vmatpush1.bf16.msra.mxu1 %v12346_v30  ;;  %9730 = vmatprep.subr.bf16.mxu0 %v12211_v16  ;;  %v874_v52 = vld [vmem:[#allocation7 + $0x17a8] sm:$0xff]  ;;  %v12306_v30 = vcombine.low %v742_v32, %v746_v34 }
 0x36d   :  { %9771 = vmatprep.subr.bf16.mxu1 %v12339_v50  ;;  %v12435_v60 = vcombine.high %v870_v2, %v874_v52  ;;  %v734_v48 = vld [vmem:[#allocation7 + $0x1348] sm:$0xff]  ;;  %v12434_v16 = vcombine.low %v870_v2, %v874_v52 }
 0x36e   :  { %v738_v41 = vld [vmem:[#allocation7 + $0x1368] sm:$0xff] }
 0x36f   :  { %9731 = vmatpush1.bf16.msra.mxu0 %v12210_v18  ;;  %v862_v45 = vld [vmem:[#allocation7 + $0x1748] sm:$0xff]  ;;  %v12299_v50 = vcombine.high %v734_v48, %v738_v41 }
 0x370   :  { %9772 = vmatpush1.bf16.msra.mxu1 %v12338_v3  ;;  %9732 = vmatprep.subr.bf16.mxu0 %v12203_v4  ;;  %v866_v46 = vld [vmem:[#allocation7 + $0x1768] sm:$0xff]  ;;  %v12298_v3 = vcombine.low %v734_v48, %v738_v41 }
 0x371   :  { %9773 = vmatprep.subr.bf16.mxu1 %v12331_v24  ;;  %v12427_v51 = vcombine.high %v862_v45, %v866_v46  ;;  %v726_v55 = vld [vmem:[#allocation7 + $0x1308] sm:$0xff]  ;;  %v12426_v4 = vcombine.low %v862_v45, %v866_v46 }
 0x372   :  { %v730_v56 = vld [vmem:[#allocation7 + $0x1328] sm:$0xff] }
 0x373   :  { %9733 = vmatpush1.bf16.msra.mxu0 %v12202_v17  ;;  %v854_v9 = vld [vmem:[#allocation7 + $0x1708] sm:$0xff]  ;;  %v12291_v24 = vcombine.high %v726_v55, %v730_v56 }
 0x374   :  { %9774 = vmatpush1.bf16.msra.mxu1 %v12330_v36  ;;  %9734 = vmatprep.subr.bf16.mxu0 %v12195_v21  ;;  %v858_v18 = vld [vmem:[#allocation7 + $0x1728] sm:$0xff]  ;;  %v12290_v36 = vcombine.low %v726_v55, %v730_v56 }
 0x375   :  { %9775 = vmatprep.subr.bf16.mxu1 %v12323_v22  ;;  %v12419_v59 = vcombine.high %v854_v9, %v858_v18  ;;  %v718_v62 = vld [vmem:[#allocation7 + $0x12c8] sm:$0xff]  ;;  %v12418_v21 = vcombine.low %v854_v9, %v858_v18 }
 0x376   :  { %v722_v14 = vld [vmem:[#allocation7 + $0x12e8] sm:$0xff] }
 0x377   :  { %9735 = vmatpush1.bf16.msra.mxu0 %v12194_v25  ;;  %v846_v15 = vld [vmem:[#allocation7 + $0x16c8] sm:$0xff]  ;;  %v12283_v22 = vcombine.high %v718_v62, %v722_v14 }
 0x378   :  { %9776 = vmatpush1.bf16.msra.mxu1 %v12322_v26  ;;  %9736 = vmatprep.subr.bf16.mxu0 %v12315_v63  ;;  %v850_v17 = vld [vmem:[#allocation7 + $0x16e8] sm:$0xff]  ;;  %v12282_v26 = vcombine.low %v718_v62, %v722_v14 }
 0x379   :  { %9777 = vmatprep.subr.bf16.mxu1 %v12443_v31  ;;  %v12411_v20 = vcombine.high %v846_v15, %v850_v17  ;;  %v710_v23 = vld [vmem:[#allocation7 + $0x1288] sm:$0xff]  ;;  %v12410_v63 = vcombine.low %v846_v15, %v850_v17 }
 0x37a   :  { %v714_v38 = vld [vmem:[#allocation7 + $0x12a8] sm:$0xff] }
 0x37b   :  { %9737 = vmatpush2.bf16.msra.mxu0 %v12314_v0  ;;  %v838_v11 = vld [vmem:[#allocation7 + $0x1688] sm:$0xff]  ;;  %v12275_v31 = vcombine.high %v710_v23, %v714_v38 }
 0x37c   :  { %9778 = vmatpush2.bf16.msra.mxu1 %v12442_v53  ;;  %9738 = vmatprep.subr.bf16.mxu0 %v12307_v39  ;;  %v842_v25 = vld [vmem:[#allocation7 + $0x16a8] sm:$0xff]  ;;  %v12274_v53 = vcombine.low %v710_v23, %v714_v38 }
 0x37d   :  { %9779 = vmatprep.subr.bf16.mxu1 %v12435_v60  ;;  %v12403_v32 = vcombine.high %v838_v11, %v842_v25  ;;  %v702_v34 = vld [vmem:[#allocation7 + $0x1248] sm:$0xff]  ;;  %v12402_v39 = vcombine.low %v838_v11, %v842_v25 }
 0x37e   :  { %v706_v2 = vld [vmem:[#allocation7 + $0x1268] sm:$0xff] }
 0x37f   :  { %9739 = vmatpush2.bf16.msra.mxu0 %v12306_v30  ;;  %v830_v52 = vld [vmem:[#allocation7 + $0x1648] sm:$0xff]  ;;  %v12267_v60 = vcombine.high %v702_v34, %v706_v2 }
 0x380   :  { %9780 = vmatpush2.bf16.msra.mxu1 %v12434_v16  ;;  %9740 = vmatprep.subr.bf16.mxu0 %v12299_v50  ;;  %v834_v0 = vld [vmem:[#allocation7 + $0x1668] sm:$0xff]  ;;  %v12266_v16 = vcombine.low %v702_v34, %v706_v2 }
 0x381   :  { %9781 = vmatprep.subr.bf16.mxu1 %v12427_v51  ;;  %v12395_v48 = vcombine.high %v830_v52, %v834_v0  ;;  %v694_v41 = vld [vmem:[#allocation7 + $0x1208] sm:$0xff]  ;;  %v12394_v50 = vcombine.low %v830_v52, %v834_v0 }
 0x382   :  { %v698_v45 = vld [vmem:[#allocation7 + $0x1228] sm:$0xff] }
 0x383   :  { %9741 = vmatpush2.bf16.msra.mxu0 %v12298_v3  ;;  %v822_v46 = vld [vmem:[#allocation7 + $0x1608] sm:$0xff]  ;;  %v12259_v51 = vcombine.high %v694_v41, %v698_v45 }
 0x384   :  { %9782 = vmatpush2.bf16.msra.mxu1 %v12426_v4  ;;  %9742 = vmatprep.subr.bf16.mxu0 %v12291_v24  ;;  %v826_v30 = vld [vmem:[#allocation7 + $0x1628] sm:$0xff]  ;;  %v12258_v4 = vcombine.low %v694_v41, %v698_v45 }
 0x385   :  { %9783 = vmatprep.subr.bf16.mxu1 %v12419_v59  ;;  %v12387_v55 = vcombine.high %v822_v46, %v826_v30  ;;  %v942_v56 = vld [vmem:[#allocation7 + $0x19c8] sm:$0xff]  ;;  %v12386_v24 = vcombine.low %v822_v46, %v826_v30 }
 0x386   :  { %v946_v9 = vld [vmem:[#allocation7 + $0x19e8] sm:$0xff] }
 0x387   :  { %9743 = vmatpush2.bf16.msra.mxu0 %v12290_v36  ;;  %v1070_v18 = vld [vmem:[#allocation7 + $0x1dc8] sm:$0xff]  ;;  %v12507_v59 = vcombine.high %v942_v56, %v946_v9 }
 0x388   :  { %9784 = vmatpush2.bf16.msra.mxu1 %v12418_v21  ;;  %9744 = vmatprep.subr.bf16.mxu0 %v12283_v22  ;;  %v1074_v3 = vld [vmem:[#allocation7 + $0x1de8] sm:$0xff]  ;;  %v12506_v21 = vcombine.low %v942_v56, %v946_v9 }
 0x389   :  { %9785 = vmatprep.subr.bf16.mxu1 %v12411_v20  ;;  %v12635_v62 = vcombine.high %v1070_v18, %v1074_v3  ;;  %v934_v14 = vld [vmem:[#allocation7 + $0x1988] sm:$0xff]  ;;  %v12634_v22 = vcombine.low %v1070_v18, %v1074_v3 }
 0x38a   :  { %v938_v15 = vld [vmem:[#allocation7 + $0x19a8] sm:$0xff] }
 0x38b   :  { %9745 = vmatpush2.bf16.msra.mxu0 %v12282_v26  ;;  %v1062_v17 = vld [vmem:[#allocation7 + $0x1d88] sm:$0xff]  ;;  %v12499_v20 = vcombine.high %v934_v14, %v938_v15  ;;  %v12498_v34 = vcombine.low %v934_v14, %v938_v15 }
 0x38c   :  { %9786 = vmatpush2.bf16.msra.mxu1 %v12410_v63  ;;  %9746 = vmatprep.subr.bf16.mxu0 %v12275_v31  ;;  %v1066_v36 = vld [vmem:[#allocation7 + $0x1da8] sm:$0xff] }
 0x38d   :  { %9787 = vmatprep.subr.bf16.mxu1 %v12403_v32  ;;  %v12627_v23 = vcombine.high %v1062_v17, %v1066_v36  ;;  %v926_v38 = vld [vmem:[#allocation7 + $0x1948] sm:$0xff]  ;;  %v12626_v52 = vcombine.low %v1062_v17, %v1066_v36 }
 0x38e   :  { %v930_v11 = vld [vmem:[#allocation7 + $0x1968] sm:$0xff] }
 0x38f   :  { %9747 = vmatpush2.bf16.msra.mxu0 %v12274_v53  ;;  %v1054_v26 = vld [vmem:[#allocation7 + $0x1d48] sm:$0xff]  ;;  %v12491_v0 = vcombine.high %v926_v38, %v930_v11 }
 0x390   :  { %9788 = vmatpush2.bf16.msra.mxu1 %v12402_v39  ;;  %9748 = vmatprep.subr.bf16.mxu0 %v12267_v60  ;;  %v1058_v63 = vld [vmem:[#allocation7 + $0x1d68] sm:$0xff] }
 0x391   :  { %9789 = vmatprep.subr.bf16.mxu1 %v12395_v48  ;;  %v12619_v48 = vcombine.high %v1054_v26, %v1058_v63  ;;  %v918_v41 = vld [vmem:[#allocation7 + $0x1908] sm:$0xff] }
 0x392   :  { %v922_v45 = vld [vmem:[#allocation7 + $0x1928] sm:$0xff] }
 0x393   :  { %9749 = vmatpush2.bf16.msra.mxu0 %v12266_v16  ;;  %v1046_v46 = vld [vmem:[#allocation7 + $0x1d08] sm:$0xff]  ;;  %v12483_v56 = vcombine.high %v918_v41, %v922_v45 }
 0x394   :  { %9790 = vmatpush2.bf16.msra.mxu1 %v12394_v50  ;;  %9750 = vmatprep.subr.bf16.mxu0 %v12259_v51  ;;  %v1050_v30 = vld [vmem:[#allocation7 + $0x1d28] sm:$0xff]  ;;  %v12490_v51 = vcombine.low %v926_v38, %v930_v11 }
 0x395   :  { %9791 = vmatprep.subr.bf16.mxu1 %v12387_v55  ;;  %v12611_v18 = vcombine.high %v1046_v46, %v1050_v30  ;;  %v910_v3 = vld [vmem:[#allocation7 + $0x18c8] sm:$0xff]  ;;  %v12610_v14 = vcombine.low %v1046_v46, %v1050_v30 }
 0x396   :  { %v902_v36 = vld [vmem:[#allocation7 + $0x1888] sm:$0xff] }
 0x397   :  { %9751 = vmatpush2.bf16.msra.mxu0 %v12258_v4  ;;  %v914_v4 = vld [vmem:[#allocation7 + $0x18e8] sm:$0xff] }
 0x398   :  { %9792 = vmatpush2.bf16.msra.mxu1 %v12386_v24  ;;  %9802 = vmatprep.subr.bf16.mxu0 %v12507_v59  ;;  %v1038_v24 = vld [vmem:[#allocation7 + $0x1cc8] sm:$0xff]  ;;  %v12475_v15 = vcombine.high %v910_v3, %v914_v4 }
 0x399   :  { %9843 = vmatprep.subr.bf16.mxu1 %v12635_v62  ;;  %v1042_v59 = vld [vmem:[#allocation7 + $0x1ce8] sm:$0xff]  ;;  %v12482_v62 = vcombine.low %v918_v41, %v922_v45 }
 0x39a   :  { %v9508_v25 = vpop.f32.mrf.mxu0  ;;  %9753 = vmatmul.mubr.bf16.vlgmr.msra.gmra.mxu0 %v13366_v54  ;;  %v12603_v17 = vcombine.high %v1038_v24, %v1042_v59  ;;  %v12602_v38 = vcombine.low %v1038_v24, %v1042_v59  ;;  %v1018_v41 = vld [vmem:[#allocation7 + $0x1c28] sm:$0xff] }
 0x39b   :  { %v9509_v31 = vadd.f32 %v9508_v25, %v13420_v12  ;;  %v9549_v32 = vpop.f32.mrf.mxu1  ;;  %9794 = vmatmul.mubr.bf16.vlgmr.msra.gmra.mxu1 %v13373_v8  ;;  %9803 = vmatpush1.bf16.msra.mxu0 %v12506_v21  ;;  %v906_v21 = vld [vmem:[#allocation7 + $0x18a8] sm:$0xff] }
 0x39c   :  { %9844 = vmatpush1.bf16.msra.mxu1 %v12634_v22  ;;  %v9510_v2 = vpop.f32.mrf.mxu0  ;;  %9804 = vmatprep.subr.bf16.mxu0 %v12499_v20  ;;  %v1030_v22 = vld [vmem:[#allocation7 + $0x1c88] sm:$0xff]  ;;  %v12467_v11 = vcombine.high %v902_v36, %v906_v21 }
 0x39d   :  { %v13430_v53 = vadd.f32 %v9549_v32, %v9509_v31  ;;  %v9511_v39 = vadd.f32 %v9510_v2, %v13425_v5  ;;  %v9551_v60 = vpop.f32.mrf.mxu1  ;;  %9845 = vmatprep.subr.bf16.mxu1 %v12627_v23  ;;  %9834 = vmatprep.mubr.bf16.mxu0 %v13369_v7  ;;  %v12618_v5 = vcombine.low %v1054_v26, %v1058_v63  ;;  %v1034_v20 = vld [vmem:[#allocation7 + $0x1ca8] sm:$0xff] }
 0x39e   :  { %v9512_v12 = vpop.f32.mrf.mxu0  ;;  %9875 = vmatprep.mubr.bf16.mxu1 %v13378_v13  ;;  %v12474_v23 = vcombine.low %v910_v3, %v914_v4  ;;  %v12595_v25 = vcombine.high %v1030_v22, %v1034_v20  ;;  %v894_v26 = vld [vmem:[#allocation7 + $0x1848] sm:$0xff]  ;;  %v12594_v2 = vcombine.low %v1030_v22, %v1034_v20 }
 0x39f   :  { %v13435_v16 = vadd.f32 %v9551_v60, %v9511_v39  ;;  %v9553_v50 = vpop.f32.mrf.mxu1  ;;  %9805 = vmatpush1.bf16.msra.mxu0 %v12498_v34  ;;  %v898_v63 = vld [vmem:[#allocation7 + $0x1868] sm:$0xff]  ;;  %v12466_v34 = vcombine.low %v902_v36, %v906_v21 }
 0x3a0   :  { %9846 = vmatpush1.bf16.msra.mxu1 %v12626_v52  ;;  %v9513_v55 = vpop.f32.mrf.mxu0  ;;  %9806 = vmatprep.subr.bf16.mxu0 %v12491_v0  ;;  %v1022_v31 = vld [vmem:[#allocation7 + $0x1c48] sm:$0xff]  ;;  %v12459_v52 = vcombine.high %v894_v26, %v898_v63  ;;  %v12458_v45 = vcombine.low %v894_v26, %v898_v63 }
 0x3a1   :  { %v9554_v9 = vpop.f32.mrf.mxu1  ;;  %9847 = vmatprep.subr.bf16.mxu1 %v12619_v48  ;;  %v1026_v32 = vld [vmem:[#allocation7 + $0x1c68] sm:$0xff] }
 0x3a2   :  { %v12587_v0 = vcombine.high %v1022_v31, %v1026_v32  ;;  %v886_v39 = vld [vmem:[#allocation7 + $0x1808] sm:$0xff]  ;;  %v12586_v12 = vcombine.low %v1022_v31, %v1026_v32 }
 0x3a3   :  { %9807 = vmatpush1.bf16.msra.mxu0 %v12490_v51  ;;  %v890_v60 = vld [vmem:[#allocation7 + $0x1828] sm:$0xff] }
 0x3a4   :  { %9848 = vmatpush1.bf16.msra.mxu1 %v12618_v5  ;;  %9808 = vmatprep.subr.bf16.mxu0 %v12483_v56  ;;  %v1014_v48 = vld [vmem:[#allocation7 + $0x1c08] sm:$0xff]  ;;  %v12451_v46 = vcombine.high %v886_v39, %v890_v60  ;;  %v12450_v56 = vcombine.low %v886_v39, %v890_v60 }
 0x3a5   :  { %9849 = vmatprep.subr.bf16.mxu1 %v12611_v18  ;;  %v12579_v30 = vcombine.high %v1014_v48, %v1018_v41  ;;  %v1006_v50 = vld [vmem:[#allocation7 + $0x1bc8] sm:$0xff]  ;;  %v12578_v9 = vcombine.low %v1014_v48, %v1018_v41 }
 0x3a6   :  { %v1010_v51 = vld [vmem:[#allocation7 + $0x1be8] sm:$0xff] }
 0x3a7   :  { %9809 = vmatpush1.bf16.msra.mxu0 %v12482_v62  ;;  %v1134_v55 = vld [vmem:[#allocation7 + $0x1fc8] sm:$0xff]  ;;  %v12571_v18 = vcombine.high %v1006_v50, %v1010_v51 }
 0x3a8   :  { %9850 = vmatpush1.bf16.msra.mxu1 %v12610_v14  ;;  %9810 = vmatprep.subr.bf16.mxu0 %v12475_v15  ;;  %v1138_v5 = vld [vmem:[#allocation7 + $0x1fe8] sm:$0xff]  ;;  %v12570_v14 = vcombine.low %v1006_v50, %v1010_v51 }
 0x3a9   :  { %9851 = vmatprep.subr.bf16.mxu1 %v12603_v17  ;;  %v12699_v3 = vcombine.high %v1134_v55, %v1138_v5  ;;  %v998_v4 = vld [vmem:[#allocation7 + $0x1b88] sm:$0xff]  ;;  %v12698_v15 = vcombine.low %v1134_v55, %v1138_v5 }
 0x3aa   :  { %v1002_v24 = vld [vmem:[#allocation7 + $0x1ba8] sm:$0xff] }
 0x3ab   :  { %9811 = vmatpush1.bf16.msra.mxu0 %v12474_v23  ;;  %v1126_v59 = vld [vmem:[#allocation7 + $0x1f88] sm:$0xff]  ;;  %v12563_v17 = vcombine.high %v998_v4, %v1002_v24 }
 0x3ac   :  { %9852 = vmatpush1.bf16.msra.mxu1 %v12602_v38  ;;  %9812 = vmatprep.subr.bf16.mxu0 %v12467_v11  ;;  %v1130_v62 = vld [vmem:[#allocation7 + $0x1fa8] sm:$0xff]  ;;  %v12562_v38 = vcombine.low %v998_v4, %v1002_v24 }
 0x3ad   :  { %9853 = vmatprep.subr.bf16.mxu1 %v12595_v25  ;;  %v12691_v36 = vcombine.high %v1126_v59, %v1130_v62  ;;  %v990_v21 = vld [vmem:[#allocation7 + $0x1b48] sm:$0xff]  ;;  %v12690_v11 = vcombine.low %v1126_v59, %v1130_v62 }
 0x3ae   :  { %v994_v22 = vld [vmem:[#allocation7 + $0x1b68] sm:$0xff] }
 0x3af   :  { %9813 = vmatpush1.bf16.msra.mxu0 %v12466_v34  ;;  %v1118_v20 = vld [vmem:[#allocation7 + $0x1f48] sm:$0xff]  ;;  %v12555_v25 = vcombine.high %v990_v21, %v994_v22 }
 0x3b0   :  { %9854 = vmatpush1.bf16.msra.mxu1 %v12594_v2  ;;  %9814 = vmatprep.subr.bf16.mxu0 %v12459_v52  ;;  %v1122_v23 = vld [vmem:[#allocation7 + $0x1f68] sm:$0xff]  ;;  %v12554_v2 = vcombine.low %v990_v21, %v994_v22 }
 0x3b1   :  { %9855 = vmatprep.subr.bf16.mxu1 %v12587_v0  ;;  %v12683_v26 = vcombine.high %v1118_v20, %v1122_v23  ;;  %v982_v63 = vld [vmem:[#allocation7 + $0x1b08] sm:$0xff]  ;;  %v12682_v52 = vcombine.low %v1118_v20, %v1122_v23 }
 0x3b2   :  { %v986_v31 = vld [vmem:[#allocation7 + $0x1b28] sm:$0xff] }
 0x3b3   :  { %9815 = vmatpush1.bf16.msra.mxu0 %v12458_v45  ;;  %v1110_v32 = vld [vmem:[#allocation7 + $0x1f08] sm:$0xff]  ;;  %v12547_v0 = vcombine.high %v982_v63, %v986_v31 }
 0x3b4   :  { %9856 = vmatpush1.bf16.msra.mxu1 %v12586_v12  ;;  %9816 = vmatprep.subr.bf16.mxu0 %v12451_v46  ;;  %v1114_v34 = vld [vmem:[#allocation7 + $0x1f28] sm:$0xff]  ;;  %v12546_v12 = vcombine.low %v982_v63, %v986_v31  ;;  %v175_v31 = vld [vmem:[#allocation7 + $0x1d0] sm:$0xff] }
 0x3b5   :  { %9857 = vmatprep.subr.bf16.mxu1 %v12579_v30  ;;  %v12675_v39 = vcombine.high %v1110_v32, %v1114_v34  ;;  %v974_v60 = vld [vmem:[#allocation7 + $0x1ac8] sm:$0xff]  ;;  %v12674_v46 = vcombine.low %v1110_v32, %v1114_v34  ;;  %v179_v32 = vld [vmem:[#allocation7 + $0x1f0] sm:$0xff] }
 0x3b6   :  { %v978_v48 = vld [vmem:[#allocation7 + $0x1ae8] sm:$0xff]  ;;  %v303_v34 = vld [vmem:[#allocation7 + $0x5d0] sm:$0xff] }
 0x3b7   :  { %9817 = vmatpush1.bf16.msra.mxu0 %v12450_v56  ;;  %v1102_v41 = vld [vmem:[#allocation7 + $0x1ec8] sm:$0xff]  ;;  %v12539_v30 = vcombine.high %v974_v60, %v978_v48 }
 0x3b8   :  { %9858 = vmatpush1.bf16.msra.mxu1 %v12578_v9  ;;  %9818 = vmatprep.subr.bf16.mxu0 %v12571_v18  ;;  %v1106_v45 = vld [vmem:[#allocation7 + $0x1ee8] sm:$0xff]  ;;  %v12538_v9 = vcombine.low %v974_v60, %v978_v48  ;;  %v167_v48 = vld [vmem:[#allocation7 + $0x190] sm:$0xff] }
 0x3b9   :  { %9859 = vmatprep.subr.bf16.mxu1 %v12699_v3  ;;  %v12667_v50 = vcombine.high %v1102_v41, %v1106_v45  ;;  %v966_v51 = vld [vmem:[#allocation7 + $0x1a88] sm:$0xff]  ;;  %v12666_v18 = vcombine.low %v1102_v41, %v1106_v45  ;;  %v171_v41 = vld [vmem:[#allocation7 + $0x1b0] sm:$0xff] }
 0x3ba   :  { %v970_v55 = vld [vmem:[#allocation7 + $0x1aa8] sm:$0xff]  ;;  %v295_v45 = vld [vmem:[#allocation7 + $0x590] sm:$0xff] }
 0x3bb   :  { %9819 = vmatpush2.bf16.msra.mxu0 %v12570_v14  ;;  %v1094_v5 = vld [vmem:[#allocation7 + $0x1e88] sm:$0xff]  ;;  %v12531_v3 = vcombine.high %v966_v51, %v970_v55 }
 0x3bc   :  { %9860 = vmatpush2.bf16.msra.mxu1 %v12698_v15  ;;  %9820 = vmatprep.subr.bf16.mxu0 %v12563_v17  ;;  %v1098_v56 = vld [vmem:[#allocation7 + $0x1ea8] sm:$0xff]  ;;  %v12530_v15 = vcombine.low %v966_v51, %v970_v55  ;;  %v159_v55 = vld [vmem:[#allocation7 + $0x150] sm:$0xff] }
 0x3bd   :  { %9861 = vmatprep.subr.bf16.mxu1 %v12691_v36  ;;  %v12659_v4 = vcombine.high %v1094_v5, %v1098_v56  ;;  %v958_v24 = vld [vmem:[#allocation7 + $0x1a48] sm:$0xff]  ;;  %v12658_v17 = vcombine.low %v1094_v5, %v1098_v56  ;;  %v163_v5 = vld [vmem:[#allocation7 + $0x170] sm:$0xff] }
 0x3be   :  { %v962_v59 = vld [vmem:[#allocation7 + $0x1a68] sm:$0xff] }
 0x3bf   :  { %9821 = vmatpush2.bf16.msra.mxu0 %v12562_v38  ;;  %v1086_v62 = vld [vmem:[#allocation7 + $0x1e48] sm:$0xff]  ;;  %v12523_v36 = vcombine.high %v958_v24, %v962_v59 }
 0x3c0   :  { %9862 = vmatpush2.bf16.msra.mxu1 %v12690_v11  ;;  %9822 = vmatprep.subr.bf16.mxu0 %v12555_v25  ;;  %v1090_v14 = vld [vmem:[#allocation7 + $0x1e68] sm:$0xff]  ;;  %v12522_v11 = vcombine.low %v958_v24, %v962_v59  ;;  %v11732_v24 = vcombine.low %v167_v48, %v171_v41 }
 0x3c1   :  { %9863 = vmatprep.subr.bf16.mxu1 %v12683_v26  ;;  %v12651_v21 = vcombine.high %v1086_v62, %v1090_v14  ;;  %v950_v22 = vld [vmem:[#allocation7 + $0x1a08] sm:$0xff]  ;;  %v12650_v25 = vcombine.low %v1086_v62, %v1090_v14  ;;  %v11725_v14 = vcombine.high %v159_v55, %v163_v5 }
 0x3c2   :  { %v954_v20 = vld [vmem:[#allocation7 + $0x1a28] sm:$0xff] }
 0x3c3   :  { %9823 = vmatpush2.bf16.msra.mxu0 %v12554_v2  ;;  %v1078_v23 = vld [vmem:[#allocation7 + $0x1e08] sm:$0xff]  ;;  %v12515_v26 = vcombine.high %v950_v22, %v954_v20  ;;  %v307_v2 = vld [vmem:[#allocation7 + $0x5f0] sm:$0xff] }
 0x3c4   :  { %9864 = vmatpush2.bf16.msra.mxu1 %v12682_v52  ;;  %9824 = vmatprep.subr.bf16.mxu0 %v12547_v0  ;;  %v1082_v38 = vld [vmem:[#allocation7 + $0x1e28] sm:$0xff]  ;;  %v12514_v52 = vcombine.low %v950_v22, %v954_v20  ;;  %v11869_v60 = vcombine.high %v303_v34, %v307_v2  ;;  %v151_v22 = vld [vmem:[#allocation7 + $0x110] sm:$0xff] }
 0x3c5   :  { %9865 = vmatprep.subr.bf16.mxu1 %v12675_v39  ;;  %v12643_v63 = vcombine.high %v1078_v23, %v1082_v38  ;;  %v12642_v0 = vcombine.low %v1078_v23, %v1082_v38  ;;  %v11741_v39 = vcombine.high %v175_v31, %v179_v32  ;;  %v155_v20 = vld [vmem:[#allocation7 + $0x130] sm:$0xff] }
 0x3c6   :  { %v279_v23 = vld [vmem:[#allocation7 + $0x510] sm:$0xff] }
 0x3c7   :  { %9825 = vmatpush2.bf16.msra.mxu0 %v12546_v12  ;;  %v299_v12 = vld [vmem:[#allocation7 + $0x5b0] sm:$0xff] }
 0x3c8   :  { %9866 = vmatpush2.bf16.msra.mxu1 %v12674_v46  ;;  %9826 = vmatprep.subr.bf16.mxu0 %v12539_v30  ;;  %v11740_v46 = vcombine.low %v175_v31, %v179_v32  ;;  %v11868_v30 = vcombine.low %v303_v34, %v307_v2  ;;  %v11861_v51 = vcombine.high %v295_v45, %v299_v12  ;;  %v283_v38 = vld [vmem:[#allocation7 + $0x530] sm:$0xff] }
 0x3c9   :  { %9867 = vmatprep.subr.bf16.mxu1 %v12667_v50  ;;  %v11733_v50 = vcombine.high %v167_v48, %v171_v41  ;;  %v11860_v62 = vcombine.low %v295_v45, %v299_v12  ;;  %v11717_v31 = vcombine.high %v151_v22, %v155_v20  ;;  %v11845_v34 = vcombine.high %v279_v23, %v283_v38  ;;  %v143_v2 = vld [vmem:[#allocation7 + $0xd0] sm:$0xff] }
 0x3ca   :  { %v11844_v48 = vcombine.low %v279_v23, %v283_v38  ;;  %v135_v12 = vld [vmem:[#allocation7 + $0x90] sm:$0xff] }
 0x3cb   :  { %9827 = vmatpush2.bf16.msra.mxu0 %v12538_v9  ;;  %v287_v9 = vld [vmem:[#allocation7 + $0x550] sm:$0xff] }
 0x3cc   :  { %9868 = vmatpush2.bf16.msra.mxu1 %v12666_v18  ;;  %9828 = vmatprep.subr.bf16.mxu0 %v12531_v3  ;;  %v291_v18 = vld [vmem:[#allocation7 + $0x570] sm:$0xff] }
 0x3cd   :  { %9869 = vmatprep.subr.bf16.mxu1 %v12659_v4 }
 0x3cf   :  { %9829 = vmatpush2.bf16.msra.mxu0 %v12530_v15 }
 0x3d0   :  { %9870 = vmatpush2.bf16.msra.mxu1 %v12658_v17  ;;  %9830 = vmatprep.subr.bf16.mxu0 %v12523_v36 }
 0x3d1   :  { %9871 = vmatprep.subr.bf16.mxu1 %v12651_v21  ;;  %v11853_v21 = vcombine.high %v287_v9, %v291_v18 }
 0x3d3   :  { %9831 = vmatpush2.bf16.msra.mxu0 %v12522_v11 }
 0x3d4   :  { %9872 = vmatpush2.bf16.msra.mxu1 %v12650_v25  ;;  %9832 = vmatprep.subr.bf16.mxu0 %v12515_v26  ;;  %v11724_v26 = vcombine.low %v159_v55, %v163_v5 }
 0x3d5   :  { %9873 = vmatprep.subr.bf16.mxu1 %v12643_v63 }
 0x3d7   :  { %9833 = vmatpush2.bf16.msra.mxu0 %v12514_v52  ;;  %v147_v52 = vld [vmem:[#allocation7 + $0xf0] sm:$0xff] }
 0x3d8   :  { %9874 = vmatpush2.bf16.msra.mxu1 %v12642_v0  ;;  %9884 = vmatprep.subr.bf16.mxu0 %v11741_v39  ;;  %v271_v0 = vld [vmem:[#allocation7 + $0x4d0] sm:$0xff]  ;;  %v11709_v41 = vcombine.high %v143_v2, %v147_v52 }
 0x3d9   :  { %9925 = vmatprep.subr.bf16.mxu1 %v11869_v60  ;;  %v275_v39 = vld [vmem:[#allocation7 + $0x4f0] sm:$0xff]  ;;  %v11716_v60 = vcombine.low %v151_v22, %v155_v20 }
 0x3da   :  { %v9590_v56 = vpop.f32.mrf.mxu0  ;;  %9835 = vmatmul.mubr.bf16.vlgmr.msra.gmra.mxu0 %v13391_v28  ;;  %v11837_v45 = vcombine.high %v271_v0, %v275_v39  ;;  %v11836_v55 = vcombine.low %v271_v0, %v275_v39  ;;  %v251_v22 = vld [vmem:[#allocation7 + $0x430] sm:$0xff] }
 0x3db   :  { %v9591_v3 = vadd.f32 %v9590_v56, %v13283_v35  ;;  %v9631_v4 = vpop.f32.mrf.mxu1  ;;  %9876 = vmatmul.mubr.bf16.vlgmr.msra.gmra.mxu1 %v13395_v40  ;;  %9885 = vmatpush1.bf16.msra.mxu0 %v11740_v46  ;;  %v139_v46 = vld [vmem:[#allocation7 + $0xb0] sm:$0xff] }
 0x3dc   :  { %9926 = vmatpush1.bf16.msra.mxu1 %v11868_v30  ;;  %v9592_v59 = vpop.f32.mrf.mxu0  ;;  %9886 = vmatprep.subr.bf16.mxu0 %v11733_v50  ;;  %v263_v30 = vld [vmem:[#allocation7 + $0x490] sm:$0xff]  ;;  %v11701_v5 = vcombine.high %v135_v12, %v139_v46 }
 0x3dd   :  { %v13440_v15 = vadd.f32 %v9631_v4, %v9591_v3  ;;  %v9593_v17 = vadd.f32 %v9592_v59, %v13288_v43  ;;  %v9633_v36 = vpop.f32.mrf.mxu1  ;;  %9927 = vmatprep.subr.bf16.mxu1 %v11861_v51  ;;  %9916 = vmatprep.mubr.bf16.mxu0 %v13274_v19  ;;  %v11852_v43 = vcombine.low %v287_v9, %v291_v18  ;;  %v267_v50 = vld [vmem:[#allocation7 + $0x4b0] sm:$0xff] }
 0x3de   :  { %v9594_v35 = vpop.f32.mrf.mxu0  ;;  %9957 = vmatprep.mubr.bf16.mxu1 %v13279_v27  ;;  %v11708_v51 = vcombine.low %v143_v2, %v147_v52  ;;  %v11829_v56 = vcombine.high %v263_v30, %v267_v50  ;;  %v127_v9 = vld [vmem:[#allocation7 + $0x50] sm:$0xff]  ;;  %v11828_v59 = vcombine.low %v263_v30, %v267_v50 }
 0x3df   :  { %v13445_v11 = vadd.f32 %v9633_v36, %v9593_v17  ;;  %v9635_v25 = vpop.f32.mrf.mxu1  ;;  %9887 = vmatpush1.bf16.msra.mxu0 %v11732_v24  ;;  %v131_v18 = vld [vmem:[#allocation7 + $0x70] sm:$0xff]  ;;  %v11700_v24 = vcombine.low %v135_v12, %v139_v46 }
 0x3e0   :  { %9928 = vmatpush1.bf16.msra.mxu1 %v11860_v62  ;;  %v9595_v63 = vpop.f32.mrf.mxu0  ;;  %9888 = vmatprep.subr.bf16.mxu0 %v11725_v14  ;;  %v255_v3 = vld [vmem:[#allocation7 + $0x450] sm:$0xff]  ;;  %v11693_v62 = vcombine.high %v127_v9, %v131_v18  ;;  %v11692_v20 = vcombine.low %v127_v9, %v131_v18 }
 0x3e1   :  { %v9636_v32 = vpop.f32.mrf.mxu1  ;;  %9929 = vmatprep.subr.bf16.mxu1 %v11853_v21  ;;  %v259_v4 = vld [vmem:[#allocation7 + $0x470] sm:$0xff] }
 0x3e2   :  { %v11821_v14 = vcombine.high %v255_v3, %v259_v4  ;;  %v119_v17 = vld [vmem:[#allocation7 + $0x10] sm:$0xff]  ;;  %v11820_v35 = vcombine.low %v255_v3, %v259_v4 }
 0x3e3   :  { %9889 = vmatpush1.bf16.msra.mxu0 %v11724_v26  ;;  %v123_v36 = vld [vmem:[#allocation7 + $0x30] sm:$0xff] }
 0x3e4   :  { %9930 = vmatpush1.bf16.msra.mxu1 %v11852_v43  ;;  %9890 = vmatprep.subr.bf16.mxu0 %v11717_v31  ;;  %v247_v21 = vld [vmem:[#allocation7 + $0x410] sm:$0xff]  ;;  %v11685_v23 = vcombine.high %v119_v17, %v123_v36  ;;  %v11684_v31 = vcombine.low %v119_v17, %v123_v36 }
 0x3e5   :  { %9931 = vmatprep.subr.bf16.mxu1 %v11845_v34  ;;  %v11813_v38 = vcombine.high %v247_v21, %v251_v22  ;;  %v239_v25 = vld [vmem:[#allocation7 + $0x3d0] sm:$0xff]  ;;  %v11812_v32 = vcombine.low %v247_v21, %v251_v22 }
 0x3e6   :  { %v243_v26 = vld [vmem:[#allocation7 + $0x3f0] sm:$0xff] }
 0x3e7   :  { %9891 = vmatpush1.bf16.msra.mxu0 %v11716_v60  ;;  %v367_v63 = vld [vmem:[#allocation7 + $0x7d0] sm:$0xff]  ;;  %v11805_v34 = vcombine.high %v239_v25, %v243_v26 }
 0x3e8   :  { %9932 = vmatpush1.bf16.msra.mxu1 %v11844_v48  ;;  %9892 = vmatprep.subr.bf16.mxu0 %v11709_v41  ;;  %v371_v43 = vld [vmem:[#allocation7 + $0x7f0] sm:$0xff]  ;;  %v11804_v48 = vcombine.low %v239_v25, %v243_v26 }
 0x3e9   :  { %9933 = vmatprep.subr.bf16.mxu1 %v11837_v45  ;;  %v11933_v2 = vcombine.high %v367_v63, %v371_v43  ;;  %v231_v52 = vld [vmem:[#allocation7 + $0x390] sm:$0xff]  ;;  %v11932_v41 = vcombine.low %v367_v63, %v371_v43 }
 0x3ea   :  { %v235_v0 = vld [vmem:[#allocation7 + $0x3b0] sm:$0xff] }
 0x3eb   :  { %9893 = vmatpush1.bf16.msra.mxu0 %v11708_v51  ;;  %v359_v39 = vld [vmem:[#allocation7 + $0x790] sm:$0xff]  ;;  %v11797_v45 = vcombine.high %v231_v52, %v235_v0 }
 0x3ec   :  { %9934 = vmatpush1.bf16.msra.mxu1 %v11836_v55  ;;  %9894 = vmatprep.subr.bf16.mxu0 %v11701_v5  ;;  %v363_v60 = vld [vmem:[#allocation7 + $0x7b0] sm:$0xff]  ;;  %v11796_v55 = vcombine.low %v231_v52, %v235_v0 }
 0x3ed   :  { %9935 = vmatprep.subr.bf16.mxu1 %v11829_v56  ;;  %v11925_v12 = vcombine.high %v359_v39, %v363_v60  ;;  %v223_v46 = vld [vmem:[#allocation7 + $0x350] sm:$0xff]  ;;  %v11924_v5 = vcombine.low %v359_v39, %v363_v60 }
 0x3ee   :  { %v227_v30 = vld [vmem:[#allocation7 + $0x370] sm:$0xff] }
 0x3ef   :  { %9895 = vmatpush1.bf16.msra.mxu0 %v11700_v24  ;;  %v351_v50 = vld [vmem:[#allocation7 + $0x750] sm:$0xff]  ;;  %v11789_v56 = vcombine.high %v223_v46, %v227_v30 }
 0x3f0   :  { %9936 = vmatpush1.bf16.msra.mxu1 %v11828_v59  ;;  %9896 = vmatprep.subr.bf16.mxu0 %v11693_v62  ;;  %v355_v51 = vld [vmem:[#allocation7 + $0x770] sm:$0xff]  ;;  %v11788_v59 = vcombine.low %v223_v46, %v227_v30 }
 0x3f1   :  { %9937 = vmatprep.subr.bf16.mxu1 %v11821_v14  ;;  %v11917_v9 = vcombine.high %v351_v50, %v355_v51  ;;  %v215_v18 = vld [vmem:[#allocation7 + $0x310] sm:$0xff]  ;;  %v11916_v62 = vcombine.low %v351_v50, %v355_v51 }
 0x3f2   :  { %v219_v3 = vld [vmem:[#allocation7 + $0x330] sm:$0xff] }
 0x3f3   :  { %9897 = vmatpush1.bf16.msra.mxu0 %v11692_v20  ;;  %v343_v4 = vld [vmem:[#allocation7 + $0x710] sm:$0xff]  ;;  %v11781_v14 = vcombine.high %v215_v18, %v219_v3 }
 0x3f4   :  { %9938 = vmatpush1.bf16.msra.mxu1 %v11820_v35  ;;  %9898 = vmatprep.subr.bf16.mxu0 %v11685_v23  ;;  %v347_v24 = vld [vmem:[#allocation7 + $0x730] sm:$0xff]  ;;  %v11780_v35 = vcombine.low %v215_v18, %v219_v3 }
 0x3f5   :  { %9939 = vmatprep.subr.bf16.mxu1 %v11813_v38  ;;  %v11909_v17 = vcombine.high %v343_v4, %v347_v24  ;;  %v207_v36 = vld [vmem:[#allocation7 + $0x2d0] sm:$0xff]  ;;  %v11908_v23 = vcombine.low %v343_v4, %v347_v24 }
 0x3f6   :  { %v211_v21 = vld [vmem:[#allocation7 + $0x2f0] sm:$0xff] }
 0x3f7   :  { %9899 = vmatpush1.bf16.msra.mxu0 %v11684_v31  ;;  %v335_v22 = vld [vmem:[#allocation7 + $0x6d0] sm:$0xff]  ;;  %v11773_v38 = vcombine.high %v207_v36, %v211_v21 }
 0x3f8   :  { %9940 = vmatpush1.bf16.msra.mxu1 %v11812_v32  ;;  %9900 = vmatprep.subr.bf16.mxu0 %v11805_v34  ;;  %v339_v20 = vld [vmem:[#allocation7 + $0x6f0] sm:$0xff]  ;;  %v11772_v32 = vcombine.low %v207_v36, %v211_v21 }
 0x3f9   :  { %9941 = vmatprep.subr.bf16.mxu1 %v11933_v2  ;;  %v11901_v25 = vcombine.high %v335_v22, %v339_v20  ;;  %v199_v26 = vld [vmem:[#allocation7 + $0x290] sm:$0xff]  ;;  %v11900_v34 = vcombine.low %v335_v22, %v339_v20 }
 0x3fa   :  { %v203_v63 = vld [vmem:[#allocation7 + $0x2b0] sm:$0xff] }
 0x3fb   :  { %9901 = vmatpush2.bf16.msra.mxu0 %v11804_v48  ;;  %v327_v43 = vld [vmem:[#allocation7 + $0x690] sm:$0xff]  ;;  %v11765_v2 = vcombine.high %v199_v26, %v203_v63 }
 0x3fc   :  { %9942 = vmatpush2.bf16.msra.mxu1 %v11932_v41  ;;  %9902 = vmatprep.subr.bf16.mxu0 %v11797_v45  ;;  %v331_v31 = vld [vmem:[#allocation7 + $0x6b0] sm:$0xff]  ;;  %v11764_v41 = vcombine.low %v199_v26, %v203_v63 }
 0x3fd   :  { %9943 = vmatprep.subr.bf16.mxu1 %v11925_v12  ;;  %v11893_v52 = vcombine.high %v327_v43, %v331_v31  ;;  %v191_v0 = vld [vmem:[#allocation7 + $0x250] sm:$0xff]  ;;  %v11892_v45 = vcombine.low %v327_v43, %v331_v31 }
 0x3fe   :  { %v195_v39 = vld [vmem:[#allocation7 + $0x270] sm:$0xff] }
 0x3ff   :  { %9903 = vmatpush2.bf16.msra.mxu0 %v11796_v55  ;;  %v319_v60 = vld [vmem:[#allocation7 + $0x650] sm:$0xff]  ;;  %v11757_v12 = vcombine.high %v191_v0, %v195_v39 }
 0x400   :  { %9944 = vmatpush2.bf16.msra.mxu1 %v11924_v5  ;;  %9904 = vmatprep.subr.bf16.mxu0 %v11789_v56  ;;  %v323_v48 = vld [vmem:[#allocation7 + $0x670] sm:$0xff]  ;;  %v11756_v5 = vcombine.low %v191_v0, %v195_v39 }
 0x401   :  { %9945 = vmatprep.subr.bf16.mxu1 %v11917_v9  ;;  %v11885_v46 = vcombine.high %v319_v60, %v323_v48  ;;  %v183_v30 = vld [vmem:[#allocation7 + $0x210] sm:$0xff]  ;;  %v11884_v56 = vcombine.low %v319_v60, %v323_v48 }
 0x402   :  { %v187_v50 = vld [vmem:[#allocation7 + $0x230] sm:$0xff] }
 0x403   :  { %9905 = vmatpush2.bf16.msra.mxu0 %v11788_v59  ;;  %v311_v51 = vld [vmem:[#allocation7 + $0x610] sm:$0xff]  ;;  %v11749_v9 = vcombine.high %v183_v30, %v187_v50 }
 0x404   :  { %9946 = vmatpush2.bf16.msra.mxu1 %v11916_v62  ;;  %9906 = vmatprep.subr.bf16.mxu0 %v11781_v14  ;;  %v315_v55 = vld [vmem:[#allocation7 + $0x630] sm:$0xff]  ;;  %v11748_v62 = vcombine.low %v183_v30, %v187_v50 }
 0x405   :  { %9947 = vmatprep.subr.bf16.mxu1 %v11909_v17  ;;  %v11877_v18 = vcombine.high %v311_v51, %v315_v55  ;;  %v431_v3 = vld [vmem:[#allocation7 + $0x9d0] sm:$0xff]  ;;  %v11876_v14 = vcombine.low %v311_v51, %v315_v55 }
 0x406   :  { %v435_v4 = vld [vmem:[#allocation7 + $0x9f0] sm:$0xff] }
 0x407   :  { %9907 = vmatpush2.bf16.msra.mxu0 %v11780_v35  ;;  %v559_v24 = vld [vmem:[#allocation7 + $0xdd0] sm:$0xff]  ;;  %v11997_v17 = vcombine.high %v431_v3, %v435_v4 }
 0x408   :  { %9948 = vmatpush2.bf16.msra.mxu1 %v11908_v23  ;;  %9908 = vmatprep.subr.bf16.mxu0 %v11773_v38  ;;  %v563_v59 = vld [vmem:[#allocation7 + $0xdf0] sm:$0xff]  ;;  %v11996_v23 = vcombine.low %v431_v3, %v435_v4 }
 0x409   :  { %9949 = vmatprep.subr.bf16.mxu1 %v11901_v25  ;;  %v12125_v36 = vcombine.high %v559_v24, %v563_v59  ;;  %v423_v21 = vld [vmem:[#allocation7 + $0x990] sm:$0xff]  ;;  %v12124_v38 = vcombine.low %v559_v24, %v563_v59 }
 0x40a   :  { %v427_v22 = vld [vmem:[#allocation7 + $0x9b0] sm:$0xff] }
 0x40b   :  { %9909 = vmatpush2.bf16.msra.mxu0 %v11772_v32  ;;  %v551_v20 = vld [vmem:[#allocation7 + $0xd90] sm:$0xff]  ;;  %v11989_v25 = vcombine.high %v423_v21, %v427_v22  ;;  %v11988_v0 = vcombine.low %v423_v21, %v427_v22 }
 0x40c   :  { %9950 = vmatpush2.bf16.msra.mxu1 %v11900_v34  ;;  %9910 = vmatprep.subr.bf16.mxu0 %v11765_v2  ;;  %v555_v35 = vld [vmem:[#allocation7 + $0xdb0] sm:$0xff] }
 0x40d   :  { %9951 = vmatprep.subr.bf16.mxu1 %v11893_v52  ;;  %v12117_v26 = vcombine.high %v551_v20, %v555_v35  ;;  %v415_v63 = vld [vmem:[#allocation7 + $0x950] sm:$0xff]  ;;  %v12116_v60 = vcombine.low %v551_v20, %v555_v35 }
 0x40e   :  { %v419_v43 = vld [vmem:[#allocation7 + $0x970] sm:$0xff] }
 0x40f   :  { %9911 = vmatpush2.bf16.msra.mxu0 %v11764_v41  ;;  %v543_v32 = vld [vmem:[#allocation7 + $0xd50] sm:$0xff]  ;;  %v11981_v48 = vcombine.high %v415_v63, %v419_v43 }
 0x410   :  { %9952 = vmatpush2.bf16.msra.mxu1 %v11892_v45  ;;  %9912 = vmatprep.subr.bf16.mxu0 %v11757_v12  ;;  %v547_v34 = vld [vmem:[#allocation7 + $0xd70] sm:$0xff] }
 0x411   :  { %9953 = vmatprep.subr.bf16.mxu1 %v11885_v46  ;;  %v12109_v46 = vcombine.high %v543_v32, %v547_v34  ;;  %v407_v30 = vld [vmem:[#allocation7 + $0x910] sm:$0xff] }
 0x412   :  { %v411_v50 = vld [vmem:[#allocation7 + $0x930] sm:$0xff] }
 0x413   :  { %9913 = vmatpush2.bf16.msra.mxu0 %v11756_v5  ;;  %v535_v51 = vld [vmem:[#allocation7 + $0xd10] sm:$0xff]  ;;  %v11973_v3 = vcombine.high %v407_v30, %v411_v50 }
 0x414   :  { %9954 = vmatpush2.bf16.msra.mxu1 %v11884_v56  ;;  %9914 = vmatprep.subr.bf16.mxu0 %v11749_v9  ;;  %v539_v55 = vld [vmem:[#allocation7 + $0xd30] sm:$0xff]  ;;  %v11980_v9 = vcombine.low %v415_v63, %v419_v43 }
 0x415   :  { %9955 = vmatprep.subr.bf16.mxu1 %v11877_v18  ;;  %v12101_v24 = vcombine.high %v535_v51, %v539_v55  ;;  %v399_v59 = vld [vmem:[#allocation7 + $0x8d0] sm:$0xff]  ;;  %v12100_v21 = vcombine.low %v535_v51, %v539_v55 }
 0x416   :  { %v391_v35 = vld [vmem:[#allocation7 + $0x890] sm:$0xff] }
 0x417   :  { %9915 = vmatpush2.bf16.msra.mxu0 %v11748_v62  ;;  %v403_v62 = vld [vmem:[#allocation7 + $0x8f0] sm:$0xff] }
 0x418   :  { %9956 = vmatpush2.bf16.msra.mxu1 %v11876_v14  ;;  %9966 = vmatprep.subr.bf16.mxu0 %v11997_v17  ;;  %v527_v14 = vld [vmem:[#allocation7 + $0xcd0] sm:$0xff]  ;;  %v11965_v22 = vcombine.high %v399_v59, %v403_v62 }
 0x419   :  { %10007 = vmatprep.subr.bf16.mxu1 %v12125_v36  ;;  %v531_v17 = vld [vmem:[#allocation7 + $0xcf0] sm:$0xff]  ;;  %v11972_v36 = vcombine.low %v407_v30, %v411_v50 }
 0x41a   :  { %v9672_v31 = vpop.f32.mrf.mxu0  ;;  %9917 = vmatmul.mubr.bf16.vlgmr.msra.gmra.mxu0 %v13299_v47  ;;  %v12093_v20 = vcombine.high %v527_v14, %v531_v17  ;;  %v12092_v63 = vcombine.low %v527_v14, %v531_v17  ;;  %v507_v30 = vld [vmem:[#allocation7 + $0xc30] sm:$0xff] }
 0x41b   :  { %v9673_v2 = vadd.f32 %v9672_v31, %v13440_v15  ;;  %v9713_v52 = vpop.f32.mrf.mxu1  ;;  %9958 = vmatmul.mubr.bf16.vlgmr.msra.gmra.mxu1 %v13306_v58  ;;  %9967 = vmatpush1.bf16.msra.mxu0 %v11996_v23  ;;  %v395_v23 = vld [vmem:[#allocation7 + $0x8b0] sm:$0xff] }
 0x41c   :  { %10008 = vmatpush1.bf16.msra.mxu1 %v12124_v38  ;;  %v9674_v39 = vpop.f32.mrf.mxu0  ;;  %9968 = vmatprep.subr.bf16.mxu0 %v11989_v25  ;;  %v519_v38 = vld [vmem:[#allocation7 + $0xc90] sm:$0xff]  ;;  %v11957_v43 = vcombine.high %v391_v35, %v395_v23 }
 0x41d   :  { %v13450_v41 = vadd.f32 %v9713_v52, %v9673_v2  ;;  %v9675_v45 = vadd.f32 %v9674_v39, %v13445_v11  ;;  %v9715_v12 = vpop.f32.mrf.mxu1  ;;  %10009 = vmatprep.subr.bf16.mxu1 %v12117_v26  ;;  %9998 = vmatprep.mubr.bf16.mxu0 %v13302_v57  ;;  %v12108_v11 = vcombine.low %v543_v32, %v547_v34  ;;  %v523_v25 = vld [vmem:[#allocation7 + $0xcb0] sm:$0xff] }
 0x41e   :  { %v9676_v15 = vpop.f32.mrf.mxu0  ;;  %10039 = vmatprep.mubr.bf16.mxu1 %v13311_v33  ;;  %v11964_v26 = vcombine.low %v399_v59, %v403_v62  ;;  %v12085_v31 = vcombine.high %v519_v38, %v523_v25  ;;  %v383_v32 = vld [vmem:[#allocation7 + $0x850] sm:$0xff]  ;;  %v12084_v39 = vcombine.low %v519_v38, %v523_v25 }
 0x41f   :  { %v13455_v5 = vadd.f32 %v9715_v12, %v9675_v45  ;;  %v9717_v56 = vpop.f32.mrf.mxu1  ;;  %9969 = vmatpush1.bf16.msra.mxu0 %v11988_v0  ;;  %v387_v34 = vld [vmem:[#allocation7 + $0x870] sm:$0xff]  ;;  %v11956_v0 = vcombine.low %v391_v35, %v395_v23 }
 0x420   :  { %10010 = vmatpush1.bf16.msra.mxu1 %v12116_v60  ;;  %v9677_v18 = vpop.f32.mrf.mxu0  ;;  %9970 = vmatprep.subr.bf16.mxu0 %v11981_v48  ;;  %v511_v2 = vld [vmem:[#allocation7 + $0xc50] sm:$0xff]  ;;  %v11949_v60 = vcombine.high %v383_v32, %v387_v34  ;;  %v11948_v50 = vcombine.low %v383_v32, %v387_v34 }
 0x421   :  { %v9718_v4 = vpop.f32.mrf.mxu1  ;;  %10011 = vmatprep.subr.bf16.mxu1 %v12109_v46  ;;  %v515_v52 = vld [vmem:[#allocation7 + $0xc70] sm:$0xff] }
 0x422   :  { %v12077_v48 = vcombine.high %v511_v2, %v515_v52  ;;  %v375_v45 = vld [vmem:[#allocation7 + $0x810] sm:$0xff]  ;;  %v12076_v15 = vcombine.low %v511_v2, %v515_v52 }
 0x423   :  { %9971 = vmatpush1.bf16.msra.mxu0 %v11980_v9  ;;  %v379_v12 = vld [vmem:[#allocation7 + $0x830] sm:$0xff] }
 0x424   :  { %10012 = vmatpush1.bf16.msra.mxu1 %v12108_v11  ;;  %9972 = vmatprep.subr.bf16.mxu0 %v11973_v3  ;;  %v503_v46 = vld [vmem:[#allocation7 + $0xc10] sm:$0xff]  ;;  %v11941_v51 = vcombine.high %v375_v45, %v379_v12  ;;  %v11940_v3 = vcombine.low %v375_v45, %v379_v12 }
 0x425   :  { %10013 = vmatprep.subr.bf16.mxu1 %v12101_v24  ;;  %v12069_v55 = vcombine.high %v503_v46, %v507_v30  ;;  %v495_v56 = vld [vmem:[#allocation7 + $0xbd0] sm:$0xff]  ;;  %v12068_v4 = vcombine.low %v503_v46, %v507_v30 }
 0x426   :  { %v499_v9 = vld [vmem:[#allocation7 + $0xbf0] sm:$0xff] }
 0x427   :  { %9973 = vmatpush1.bf16.msra.mxu0 %v11972_v36  ;;  %v623_v18 = vld [vmem:[#allocation7 + $0xfd0] sm:$0xff]  ;;  %v12061_v24 = vcombine.high %v495_v56, %v499_v9 }
 0x428   :  { %10014 = vmatpush1.bf16.msra.mxu1 %v12100_v21  ;;  %9974 = vmatprep.subr.bf16.mxu0 %v11965_v22  ;;  %v627_v11 = vld [vmem:[#allocation7 + $0xff0] sm:$0xff]  ;;  %v12060_v21 = vcombine.low %v495_v56, %v499_v9 }
 0x429   :  { %10015 = vmatprep.subr.bf16.mxu1 %v12093_v20  ;;  %v12189_v59 = vcombine.high %v623_v18, %v627_v11  ;;  %v487_v62 = vld [vmem:[#allocation7 + $0xb90] sm:$0xff]  ;;  %v12188_v22 = vcombine.low %v623_v18, %v627_v11 }
 0x42a   :  { %v491_v14 = vld [vmem:[#allocation7 + $0xbb0] sm:$0xff] }
 0x42b   :  { %9975 = vmatpush1.bf16.msra.mxu0 %v11964_v26  ;;  %v615_v17 = vld [vmem:[#allocation7 + $0xf90] sm:$0xff]  ;;  %v12053_v20 = vcombine.high %v487_v62, %v491_v14 }
 0x42c   :  { %10016 = vmatpush1.bf16.msra.mxu1 %v12092_v63  ;;  %9976 = vmatprep.subr.bf16.mxu0 %v11957_v43  ;;  %v619_v36 = vld [vmem:[#allocation7 + $0xfb0] sm:$0xff]  ;;  %v12052_v63 = vcombine.low %v487_v62, %v491_v14 }
 0x42d   :  { %10017 = vmatprep.subr.bf16.mxu1 %v12085_v31  ;;  %v12181_v35 = vcombine.high %v615_v17, %v619_v36  ;;  %v479_v23 = vld [vmem:[#allocation7 + $0xb50] sm:$0xff]  ;;  %v12180_v43 = vcombine.low %v615_v17, %v619_v36 }
 0x42e   :  { %v483_v38 = vld [vmem:[#allocation7 + $0xb70] sm:$0xff] }
 0x42f   :  { %9977 = vmatpush1.bf16.msra.mxu0 %v11956_v0  ;;  %v607_v25 = vld [vmem:[#allocation7 + $0xf50] sm:$0xff]  ;;  %v12045_v31 = vcombine.high %v479_v23, %v483_v38 }
 0x430   :  { %10018 = vmatpush1.bf16.msra.mxu1 %v12084_v39  ;;  %9978 = vmatprep.subr.bf16.mxu0 %v11949_v60  ;;  %v611_v26 = vld [vmem:[#allocation7 + $0xf70] sm:$0xff]  ;;  %v12044_v39 = vcombine.low %v479_v23, %v483_v38 }
 0x431   :  { %10019 = vmatprep.subr.bf16.mxu1 %v12077_v48  ;;  %v12173_v32 = vcombine.high %v607_v25, %v611_v26  ;;  %v471_v34 = vld [vmem:[#allocation7 + $0xb10] sm:$0xff]  ;;  %v12172_v60 = vcombine.low %v607_v25, %v611_v26 }
 0x432   :  { %v475_v2 = vld [vmem:[#allocation7 + $0xb30] sm:$0xff] }
 0x433   :  { %9979 = vmatpush1.bf16.msra.mxu0 %v11948_v50  ;;  %v599_v52 = vld [vmem:[#allocation7 + $0xf10] sm:$0xff]  ;;  %v12037_v48 = vcombine.high %v471_v34, %v475_v2 }
 0x434   :  { %10020 = vmatpush1.bf16.msra.mxu1 %v12076_v15  ;;  %9980 = vmatprep.subr.bf16.mxu0 %v11941_v51  ;;  %v603_v0 = vld [vmem:[#allocation7 + $0xf30] sm:$0xff]  ;;  %v12036_v15 = vcombine.low %v471_v34, %v475_v2 }
 0x435   :  { %10021 = vmatprep.subr.bf16.mxu1 %v12069_v55  ;;  %v12165_v45 = vcombine.high %v599_v52, %v603_v0  ;;  %v463_v12 = vld [vmem:[#allocation7 + $0xad0] sm:$0xff]  ;;  %v12164_v51 = vcombine.low %v599_v52, %v603_v0 }
 0x436   :  { %v467_v46 = vld [vmem:[#allocation7 + $0xaf0] sm:$0xff] }
 0x437   :  { %9981 = vmatpush1.bf16.msra.mxu0 %v11940_v3  ;;  %v591_v30 = vld [vmem:[#allocation7 + $0xed0] sm:$0xff]  ;;  %v12029_v55 = vcombine.high %v463_v12, %v467_v46 }
 0x438   :  { %10022 = vmatpush1.bf16.msra.mxu1 %v12068_v4  ;;  %9982 = vmatprep.subr.bf16.mxu0 %v12061_v24  ;;  %v595_v50 = vld [vmem:[#allocation7 + $0xef0] sm:$0xff]  ;;  %v12028_v4 = vcombine.low %v463_v12, %v467_v46 }
 0x439   :  { %10023 = vmatprep.subr.bf16.mxu1 %v12189_v59  ;;  %v12157_v56 = vcombine.high %v591_v30, %v595_v50  ;;  %v455_v9 = vld [vmem:[#allocation7 + $0xa90] sm:$0xff]  ;;  %v12156_v24 = vcombine.low %v591_v30, %v595_v50 }
 0x43a   :  { %v459_v18 = vld [vmem:[#allocation7 + $0xab0] sm:$0xff] }
 0x43b   :  { %9983 = vmatpush2.bf16.msra.mxu0 %v12060_v21  ;;  %v583_v11 = vld [vmem:[#allocation7 + $0xe90] sm:$0xff]  ;;  %v12021_v59 = vcombine.high %v455_v9, %v459_v18 }
 0x43c   :  { %10024 = vmatpush2.bf16.msra.mxu1 %v12188_v22  ;;  %9984 = vmatprep.subr.bf16.mxu0 %v12053_v20  ;;  %v587_v3 = vld [vmem:[#allocation7 + $0xeb0] sm:$0xff]  ;;  %v12020_v22 = vcombine.low %v455_v9, %v459_v18 }
 0x43d   :  { %10025 = vmatprep.subr.bf16.mxu1 %v12181_v35  ;;  %v12149_v62 = vcombine.high %v583_v11, %v587_v3  ;;  %v447_v14 = vld [vmem:[#allocation7 + $0xa50] sm:$0xff]  ;;  %v12148_v20 = vcombine.low %v583_v11, %v587_v3 }
 0x43e   :  { %v451_v17 = vld [vmem:[#allocation7 + $0xa70] sm:$0xff] }
 0x43f   :  { %9985 = vmatpush2.bf16.msra.mxu0 %v12052_v63  ;;  %v575_v36 = vld [vmem:[#allocation7 + $0xe50] sm:$0xff]  ;;  %v12013_v35 = vcombine.high %v447_v14, %v451_v17 }
 0x440   :  { %10026 = vmatpush2.bf16.msra.mxu1 %v12180_v43  ;;  %9986 = vmatprep.subr.bf16.mxu0 %v12045_v31  ;;  %v579_v21 = vld [vmem:[#allocation7 + $0xe70] sm:$0xff]  ;;  %v12012_v43 = vcombine.low %v447_v14, %v451_v17 }
 0x441   :  { %10027 = vmatprep.subr.bf16.mxu1 %v12173_v32  ;;  %v12141_v23 = vcombine.high %v575_v36, %v579_v21  ;;  %v439_v38 = vld [vmem:[#allocation7 + $0xa10] sm:$0xff]  ;;  %v12140_v31 = vcombine.low %v575_v36, %v579_v21 }
 0x442   :  { %v443_v25 = vld [vmem:[#allocation7 + $0xa30] sm:$0xff] }
 0x443   :  { %9987 = vmatpush2.bf16.msra.mxu0 %v12044_v39  ;;  %v567_v26 = vld [vmem:[#allocation7 + $0xe10] sm:$0xff]  ;;  %v12005_v32 = vcombine.high %v439_v38, %v443_v25 }
 0x444   :  { %10028 = vmatpush2.bf16.msra.mxu1 %v12172_v60  ;;  %9988 = vmatprep.subr.bf16.mxu0 %v12037_v48  ;;  %v571_v63 = vld [vmem:[#allocation7 + $0xe30] sm:$0xff]  ;;  %v12004_v60 = vcombine.low %v439_v38, %v443_v25 }
 0x445   :  { %10029 = vmatprep.subr.bf16.mxu1 %v12165_v45  ;;  %v12133_v34 = vcombine.high %v567_v26, %v571_v63  ;;  %v687_v2 = vld [vmem:[#allocation7 + $0x11d0] sm:$0xff]  ;;  %v12132_v48 = vcombine.low %v567_v26, %v571_v63 }
 0x446   :  { %v691_v52 = vld [vmem:[#allocation7 + $0x11f0] sm:$0xff] }
 0x447   :  { %9989 = vmatpush2.bf16.msra.mxu0 %v12036_v15  ;;  %v815_v0 = vld [vmem:[#allocation7 + $0x15d0] sm:$0xff]  ;;  %v12253_v45 = vcombine.high %v687_v2, %v691_v52 }
 0x448   :  { %10030 = vmatpush2.bf16.msra.mxu1 %v12164_v51  ;;  %9990 = vmatprep.subr.bf16.mxu0 %v12029_v55  ;;  %v819_v39 = vld [vmem:[#allocation7 + $0x15f0] sm:$0xff]  ;;  %v12252_v51 = vcombine.low %v687_v2, %v691_v52 }
 0x449   :  { %10031 = vmatprep.subr.bf16.mxu1 %v12157_v56  ;;  %v12381_v12 = vcombine.high %v815_v0, %v819_v39  ;;  %v679_v46 = vld [vmem:[#allocation7 + $0x1190] sm:$0xff]  ;;  %v12380_v55 = vcombine.low %v815_v0, %v819_v39 }
 0x44a   :  { %v683_v30 = vld [vmem:[#allocation7 + $0x11b0] sm:$0xff] }
 0x44b   :  { %9991 = vmatpush2.bf16.msra.mxu0 %v12028_v4  ;;  %v807_v50 = vld [vmem:[#allocation7 + $0x1590] sm:$0xff]  ;;  %v12245_v56 = vcombine.high %v679_v46, %v683_v30  ;;  %v12244_v14 = vcombine.low %v679_v46, %v683_v30 }
 0x44c   :  { %10032 = vmatpush2.bf16.msra.mxu1 %v12156_v24  ;;  %9992 = vmatprep.subr.bf16.mxu0 %v12021_v59  ;;  %v811_v15 = vld [vmem:[#allocation7 + $0x15b0] sm:$0xff] }
 0x44d   :  { %10033 = vmatprep.subr.bf16.mxu1 %v12149_v62  ;;  %v12373_v9 = vcombine.high %v807_v50, %v811_v15  ;;  %v671_v18 = vld [vmem:[#allocation7 + $0x1150] sm:$0xff]  ;;  %v12372_v36 = vcombine.low %v807_v50, %v811_v15 }
 0x44e   :  { %v675_v11 = vld [vmem:[#allocation7 + $0x1170] sm:$0xff] }
 0x44f   :  { %9993 = vmatpush2.bf16.msra.mxu0 %v12020_v22  ;;  %v799_v4 = vld [vmem:[#allocation7 + $0x1550] sm:$0xff]  ;;  %v12237_v21 = vcombine.high %v671_v18, %v675_v11 }
 0x450   :  { %10034 = vmatpush2.bf16.msra.mxu1 %v12148_v20  ;;  %9994 = vmatprep.subr.bf16.mxu0 %v12013_v35  ;;  %v803_v24 = vld [vmem:[#allocation7 + $0x1570] sm:$0xff] }
 0x451   :  { %10035 = vmatprep.subr.bf16.mxu1 %v12141_v23  ;;  %v12365_v23 = vcombine.high %v799_v4, %v803_v24  ;;  %v663_v38 = vld [vmem:[#allocation7 + $0x1110] sm:$0xff] }
 0x452   :  { %v667_v25 = vld [vmem:[#allocation7 + $0x1130] sm:$0xff] }
 0x453   :  { %9995 = vmatpush2.bf16.msra.mxu0 %v12012_v43  ;;  %v791_v26 = vld [vmem:[#allocation7 + $0x1510] sm:$0xff]  ;;  %v12229_v2 = vcombine.high %v663_v38, %v667_v25 }
 0x454   :  { %10036 = vmatpush2.bf16.msra.mxu1 %v12140_v31  ;;  %9996 = vmatprep.subr.bf16.mxu0 %v12005_v32  ;;  %v795_v63 = vld [vmem:[#allocation7 + $0x1530] sm:$0xff]  ;;  %v12236_v32 = vcombine.low %v671_v18, %v675_v11 }
 0x455   :  { %10037 = vmatprep.subr.bf16.mxu1 %v12133_v34  ;;  %v12357_v0 = vcombine.high %v791_v26, %v795_v63  ;;  %v655_v39 = vld [vmem:[#allocation7 + $0x10d0] sm:$0xff]  ;;  %v12356_v46 = vcombine.low %v791_v26, %v795_v63 }
 0x456   :  { %v647_v15 = vld [vmem:[#allocation7 + $0x1090] sm:$0xff] }
 0x457   :  { %9997 = vmatpush2.bf16.msra.mxu0 %v12004_v60  ;;  %v659_v60 = vld [vmem:[#allocation7 + $0x10f0] sm:$0xff] }
 0x458   :  { %10038 = vmatpush2.bf16.msra.mxu1 %v12132_v48  ;;  %10048 = vmatprep.subr.bf16.mxu0 %v12253_v45  ;;  %v783_v48 = vld [vmem:[#allocation7 + $0x14d0] sm:$0xff]  ;;  %v12221_v30 = vcombine.high %v655_v39, %v659_v60 }
 0x459   :  { %10089 = vmatprep.subr.bf16.mxu1 %v12381_v12  ;;  %v787_v45 = vld [vmem:[#allocation7 + $0x14f0] sm:$0xff]  ;;  %v12228_v12 = vcombine.low %v663_v38, %v667_v25 }
 0x45a   :  { %v9754_v3 = vpop.f32.mrf.mxu0  ;;  %9999 = vmatmul.mubr.bf16.vlgmr.msra.gmra.mxu0 %v13330_v37  ;;  %v12349_v50 = vcombine.high %v783_v48, %v787_v45  ;;  %v12348_v18 = vcombine.low %v783_v48, %v787_v45  ;;  %v763_v38 = vld [vmem:[#allocation7 + $0x1430] sm:$0xff] }
 0x45b   :  { %v9755_v59 = vadd.f32 %v9754_v3, %v13450_v41  ;;  %v9795_v62 = vpop.f32.mrf.mxu1  ;;  %10040 = vmatmul.mubr.bf16.vlgmr.msra.gmra.mxu1 %v13337_v49  ;;  %10049 = vmatpush1.bf16.msra.mxu0 %v12252_v51  ;;  %v651_v51 = vld [vmem:[#allocation7 + $0x10b0] sm:$0xff] }
 0x45c   :  { %10090 = vmatpush1.bf16.msra.mxu1 %v12380_v55  ;;  %v9756_v17 = vpop.f32.mrf.mxu0  ;;  %10050 = vmatprep.subr.bf16.mxu0 %v12245_v56  ;;  %v775_v55 = vld [vmem:[#allocation7 + $0x1490] sm:$0xff]  ;;  %v12213_v11 = vcombine.high %v647_v15, %v651_v51 }
 0x45d   :  { %v13460_v22 = vadd.f32 %v9795_v62, %v9755_v59  ;;  %v9757_v20 = vadd.f32 %v9756_v17, %v13455_v5  ;;  %v9797_v35 = vpop.f32.mrf.mxu1  ;;  %10091 = vmatprep.subr.bf16.mxu1 %v12373_v9  ;;  %10080 = vmatprep.mubr.bf16.mxu0 %v13333_v6  ;;  %v12364_v5 = vcombine.low %v799_v4, %v803_v24  ;;  %v779_v56 = vld [vmem:[#allocation7 + $0x14b0] sm:$0xff] }
 0x45e   :  { %v9758_v41 = vpop.f32.mrf.mxu0  ;;  %10121 = vmatprep.mubr.bf16.mxu1 %v13342_v61  ;;  %v12220_v9 = vcombine.low %v655_v39, %v659_v60  ;;  %v12341_v3 = vcombine.high %v775_v55, %v779_v56  ;;  %v639_v4 = vld [vmem:[#allocation7 + $0x1050] sm:$0xff]  ;;  %v12340_v17 = vcombine.low %v775_v55, %v779_v56 }
 0x45f   :  { %v13465_v43 = vadd.f32 %v9797_v35, %v9757_v20  ;;  %v9799_v31 = vpop.f32.mrf.mxu1  ;;  %10051 = vmatpush1.bf16.msra.mxu0 %v12244_v14  ;;  %v643_v24 = vld [vmem:[#allocation7 + $0x1070] sm:$0xff]  ;;  %v12212_v14 = vcombine.low %v647_v15, %v651_v51 }
 0x460   :  { %10092 = vmatpush1.bf16.msra.mxu1 %v12372_v36  ;;  %v9759_v34 = vpop.f32.mrf.mxu0  ;;  %10052 = vmatprep.subr.bf16.mxu0 %v12237_v21  ;;  %v767_v59 = vld [vmem:[#allocation7 + $0x1450] sm:$0xff]  ;;  %v12205_v36 = vcombine.high %v639_v4, %v643_v24  ;;  %v12204_v25 = vcombine.low %v639_v4, %v643_v24 }
 0x461   :  { %v9800_v52 = vpop.f32.mrf.mxu1  ;;  %10093 = vmatprep.subr.bf16.mxu1 %v12365_v23  ;;  %v771_v62 = vld [vmem:[#allocation7 + $0x1470] sm:$0xff] }
 0x462   :  { %v12333_v21 = vcombine.high %v767_v59, %v771_v62  ;;  %v631_v20 = vld [vmem:[#allocation7 + $0x1010] sm:$0xff]  ;;  %v12332_v41 = vcombine.low %v767_v59, %v771_v62 }
 0x463   :  { %10053 = vmatpush1.bf16.msra.mxu0 %v12236_v32  ;;  %v635_v35 = vld [vmem:[#allocation7 + $0x1030] sm:$0xff] }
 0x464   :  { %10094 = vmatpush1.bf16.msra.mxu1 %v12364_v5  ;;  %10054 = vmatprep.subr.bf16.mxu0 %v12229_v2  ;;  %v759_v23 = vld [vmem:[#allocation7 + $0x1410] sm:$0xff]  ;;  %v12197_v26 = vcombine.high %v631_v20, %v635_v35  ;;  %v12196_v2 = vcombine.low %v631_v20, %v635_v35 }
 0x465   :  { %10095 = vmatprep.subr.bf16.mxu1 %v12357_v0  ;;  %v12325_v63 = vcombine.high %v759_v23, %v763_v38  ;;  %v751_v31 = vld [vmem:[#allocation7 + $0x13d0] sm:$0xff]  ;;  %v12324_v52 = vcombine.low %v759_v23, %v763_v38 }
 0x466   :  { %v755_v32 = vld [vmem:[#allocation7 + $0x13f0] sm:$0xff] }
 0x467   :  { %10055 = vmatpush1.bf16.msra.mxu0 %v12228_v12  ;;  %v879_v34 = vld [vmem:[#allocation7 + $0x17d0] sm:$0xff]  ;;  %v12317_v0 = vcombine.high %v751_v31, %v755_v32 }
 0x468   :  { %10096 = vmatpush1.bf16.msra.mxu1 %v12356_v46  ;;  %10056 = vmatprep.subr.bf16.mxu0 %v12221_v30  ;;  %v883_v5 = vld [vmem:[#allocation7 + $0x17f0] sm:$0xff]  ;;  %v12316_v46 = vcombine.low %v751_v31, %v755_v32 }
 0x469   :  { %10097 = vmatprep.subr.bf16.mxu1 %v12349_v50  ;;  %v12445_v39 = vcombine.high %v879_v34, %v883_v5  ;;  %v743_v60 = vld [vmem:[#allocation7 + $0x1390] sm:$0xff]  ;;  %v12444_v30 = vcombine.low %v879_v34, %v883_v5 }
 0x46a   :  { %v747_v48 = vld [vmem:[#allocation7 + $0x13b0] sm:$0xff] }
 0x46b   :  { %10057 = vmatpush1.bf16.msra.mxu0 %v12220_v9  ;;  %v871_v45 = vld [vmem:[#allocation7 + $0x1790] sm:$0xff]  ;;  %v12309_v50 = vcombine.high %v743_v60, %v747_v48 }
 0x46c   :  { %10098 = vmatpush1.bf16.msra.mxu1 %v12348_v18  ;;  %10058 = vmatprep.subr.bf16.mxu0 %v12213_v11  ;;  %v875_v12 = vld [vmem:[#allocation7 + $0x17b0] sm:$0xff]  ;;  %v12308_v18 = vcombine.low %v743_v60, %v747_v48 }
 0x46d   :  { %10099 = vmatprep.subr.bf16.mxu1 %v12341_v3  ;;  %v12437_v15 = vcombine.high %v871_v45, %v875_v12  ;;  %v735_v51 = vld [vmem:[#allocation7 + $0x1350] sm:$0xff]  ;;  %v12436_v11 = vcombine.low %v871_v45, %v875_v12 }
 0x46e   :  { %v739_v55 = vld [vmem:[#allocation7 + $0x1370] sm:$0xff] }
 0x46f   :  { %10059 = vmatpush1.bf16.msra.mxu0 %v12212_v14  ;;  %v863_v56 = vld [vmem:[#allocation7 + $0x1750] sm:$0xff]  ;;  %v12301_v3 = vcombine.high %v735_v51, %v739_v55 }
 0x470   :  { %10100 = vmatpush1.bf16.msra.mxu1 %v12340_v17  ;;  %10060 = vmatprep.subr.bf16.mxu0 %v12205_v36  ;;  %v867_v9 = vld [vmem:[#allocation7 + $0x1770] sm:$0xff]  ;;  %v12300_v17 = vcombine.low %v735_v51, %v739_v55 }
 0x471   :  { %10101 = vmatprep.subr.bf16.mxu1 %v12333_v21  ;;  %v12429_v4 = vcombine.high %v863_v56, %v867_v9  ;;  %v727_v24 = vld [vmem:[#allocation7 + $0x1310] sm:$0xff]  ;;  %v12428_v36 = vcombine.low %v863_v56, %v867_v9 }
 0x472   :  { %v731_v59 = vld [vmem:[#allocation7 + $0x1330] sm:$0xff] }
 0x473   :  { %10061 = vmatpush1.bf16.msra.mxu0 %v12204_v25  ;;  %v855_v62 = vld [vmem:[#allocation7 + $0x1710] sm:$0xff]  ;;  %v12293_v21 = vcombine.high %v727_v24, %v731_v59 }
 0x474   :  { %10102 = vmatpush1.bf16.msra.mxu1 %v12332_v41  ;;  %10062 = vmatprep.subr.bf16.mxu0 %v12197_v26  ;;  %v859_v14 = vld [vmem:[#allocation7 + $0x1730] sm:$0xff]  ;;  %v12292_v41 = vcombine.low %v727_v24, %v731_v59 }
 0x475   :  { %10103 = vmatprep.subr.bf16.mxu1 %v12325_v63  ;;  %v12421_v20 = vcombine.high %v855_v62, %v859_v14  ;;  %v719_v35 = vld [vmem:[#allocation7 + $0x12d0] sm:$0xff]  ;;  %v12420_v26 = vcombine.low %v855_v62, %v859_v14 }
 0x476   :  { %v723_v23 = vld [vmem:[#allocation7 + $0x12f0] sm:$0xff] }
 0x477   :  { %10063 = vmatpush1.bf16.msra.mxu0 %v12196_v2  ;;  %v847_v38 = vld [vmem:[#allocation7 + $0x16d0] sm:$0xff]  ;;  %v12285_v63 = vcombine.high %v719_v35, %v723_v23 }
 0x478   :  { %10104 = vmatpush1.bf16.msra.mxu1 %v12324_v52  ;;  %10064 = vmatprep.subr.bf16.mxu0 %v12317_v0  ;;  %v851_v25 = vld [vmem:[#allocation7 + $0x16f0] sm:$0xff]  ;;  %v12284_v52 = vcombine.low %v719_v35, %v723_v23 }
 0x479   :  { %10105 = vmatprep.subr.bf16.mxu1 %v12445_v39  ;;  %v12413_v31 = vcombine.high %v847_v38, %v851_v25  ;;  %v711_v32 = vld [vmem:[#allocation7 + $0x1290] sm:$0xff]  ;;  %v12412_v0 = vcombine.low %v847_v38, %v851_v25 }
 0x47a   :  { %v715_v34 = vld [vmem:[#allocation7 + $0x12b0] sm:$0xff] }
 0x47b   :  { %10065 = vmatpush2.bf16.msra.mxu0 %v12316_v46  ;;  %v839_v5 = vld [vmem:[#allocation7 + $0x1690] sm:$0xff]  ;;  %v12277_v39 = vcombine.high %v711_v32, %v715_v34 }
 0x47c   :  { %10106 = vmatpush2.bf16.msra.mxu1 %v12444_v30  ;;  %10066 = vmatprep.subr.bf16.mxu0 %v12309_v50  ;;  %v843_v2 = vld [vmem:[#allocation7 + $0x16b0] sm:$0xff]  ;;  %v12276_v30 = vcombine.low %v711_v32, %v715_v34 }
 0x47d   :  { %10107 = vmatprep.subr.bf16.mxu1 %v12437_v15  ;;  %v12405_v60 = vcombine.high %v839_v5, %v843_v2  ;;  %v703_v48 = vld [vmem:[#allocation7 + $0x1250] sm:$0xff]  ;;  %v12404_v50 = vcombine.low %v839_v5, %v843_v2 }
 0x47e   :  { %v707_v45 = vld [vmem:[#allocation7 + $0x1270] sm:$0xff] }
 0x47f   :  { %10067 = vmatpush2.bf16.msra.mxu0 %v12308_v18  ;;  %v831_v12 = vld [vmem:[#allocation7 + $0x1650] sm:$0xff]  ;;  %v12269_v15 = vcombine.high %v703_v48, %v707_v45 }
 0x480   :  { %10108 = vmatpush2.bf16.msra.mxu1 %v12436_v11  ;;  %10068 = vmatprep.subr.bf16.mxu0 %v12301_v3  ;;  %v835_v46 = vld [vmem:[#allocation7 + $0x1670] sm:$0xff]  ;;  %v12268_v11 = vcombine.low %v703_v48, %v707_v45 }
 0x481   :  { %10109 = vmatprep.subr.bf16.mxu1 %v12429_v4  ;;  %v12397_v51 = vcombine.high %v831_v12, %v835_v46  ;;  %v695_v55 = vld [vmem:[#allocation7 + $0x1210] sm:$0xff]  ;;  %v12396_v3 = vcombine.low %v831_v12, %v835_v46 }
 0x482   :  { %v699_v56 = vld [vmem:[#allocation7 + $0x1230] sm:$0xff] }
 0x483   :  { %10069 = vmatpush2.bf16.msra.mxu0 %v12300_v17  ;;  %v823_v9 = vld [vmem:[#allocation7 + $0x1610] sm:$0xff]  ;;  %v12261_v4 = vcombine.high %v695_v55, %v699_v56 }
 0x484   :  { %10110 = vmatpush2.bf16.msra.mxu1 %v12428_v36  ;;  %10070 = vmatprep.subr.bf16.mxu0 %v12293_v21  ;;  %v827_v18 = vld [vmem:[#allocation7 + $0x1630] sm:$0xff]  ;;  %v12260_v36 = vcombine.low %v695_v55, %v699_v56 }
 0x485   :  { %10111 = vmatprep.subr.bf16.mxu1 %v12421_v20  ;;  %v12389_v24 = vcombine.high %v823_v9, %v827_v18  ;;  %v943_v59 = vld [vmem:[#allocation7 + $0x19d0] sm:$0xff]  ;;  %v12388_v21 = vcombine.low %v823_v9, %v827_v18 }
 0x486   :  { %v947_v62 = vld [vmem:[#allocation7 + $0x19f0] sm:$0xff] }
 0x487   :  { %10071 = vmatpush2.bf16.msra.mxu0 %v12292_v41  ;;  %v1071_v14 = vld [vmem:[#allocation7 + $0x1dd0] sm:$0xff]  ;;  %v12509_v20 = vcombine.high %v943_v59, %v947_v62 }
 0x488   :  { %10112 = vmatpush2.bf16.msra.mxu1 %v12420_v26  ;;  %10072 = vmatprep.subr.bf16.mxu0 %v12285_v63  ;;  %v1075_v17 = vld [vmem:[#allocation7 + $0x1df0] sm:$0xff]  ;;  %v12508_v26 = vcombine.low %v943_v59, %v947_v62 }
 0x489   :  { %10113 = vmatprep.subr.bf16.mxu1 %v12413_v31  ;;  %v12637_v35 = vcombine.high %v1071_v14, %v1075_v17  ;;  %v935_v23 = vld [vmem:[#allocation7 + $0x1990] sm:$0xff]  ;;  %v12636_v63 = vcombine.low %v1071_v14, %v1075_v17 }
 0x48a   :  { %v939_v38 = vld [vmem:[#allocation7 + $0x19b0] sm:$0xff] }
 0x48b   :  { %10073 = vmatpush2.bf16.msra.mxu0 %v12284_v52  ;;  %v1063_v25 = vld [vmem:[#allocation7 + $0x1d90] sm:$0xff]  ;;  %v12501_v31 = vcombine.high %v935_v23, %v939_v38  ;;  %v12500_v48 = vcombine.low %v935_v23, %v939_v38 }
 0x48c   :  { %10114 = vmatpush2.bf16.msra.mxu1 %v12412_v0  ;;  %10074 = vmatprep.subr.bf16.mxu0 %v12277_v39  ;;  %v1067_v41 = vld [vmem:[#allocation7 + $0x1db0] sm:$0xff] }
 0x48d   :  { %10115 = vmatprep.subr.bf16.mxu1 %v12405_v60  ;;  %v12629_v32 = vcombine.high %v1063_v25, %v1067_v41  ;;  %v927_v34 = vld [vmem:[#allocation7 + $0x1950] sm:$0xff]  ;;  %v12628_v12 = vcombine.low %v1063_v25, %v1067_v41 }
 0x48e   :  { %v931_v5 = vld [vmem:[#allocation7 + $0x1970] sm:$0xff] }
 0x48f   :  { %10075 = vmatpush2.bf16.msra.mxu0 %v12276_v30  ;;  %v1055_v52 = vld [vmem:[#allocation7 + $0x1d50] sm:$0xff]  ;;  %v12493_v46 = vcombine.high %v927_v34, %v931_v5 }
 0x490   :  { %10116 = vmatpush2.bf16.msra.mxu1 %v12404_v50  ;;  %10076 = vmatprep.subr.bf16.mxu0 %v12269_v15  ;;  %v1059_v0 = vld [vmem:[#allocation7 + $0x1d70] sm:$0xff] }
 0x491   :  { %10117 = vmatprep.subr.bf16.mxu1 %v12397_v51  ;;  %v12621_v51 = vcombine.high %v1055_v52, %v1059_v0  ;;  %v919_v55 = vld [vmem:[#allocation7 + $0x1910] sm:$0xff] }
 0x492   :  { %v923_v56 = vld [vmem:[#allocation7 + $0x1930] sm:$0xff] }
 0x493   :  { %10077 = vmatpush2.bf16.msra.mxu0 %v12268_v11  ;;  %v1047_v9 = vld [vmem:[#allocation7 + $0x1d10] sm:$0xff]  ;;  %v12485_v59 = vcombine.high %v919_v55, %v923_v56 }
 0x494   :  { %10118 = vmatpush2.bf16.msra.mxu1 %v12396_v3  ;;  %10078 = vmatprep.subr.bf16.mxu0 %v12261_v4  ;;  %v1051_v18 = vld [vmem:[#allocation7 + $0x1d30] sm:$0xff]  ;;  %v12492_v4 = vcombine.low %v927_v34, %v931_v5 }
 0x495   :  { %10119 = vmatprep.subr.bf16.mxu1 %v12389_v24  ;;  %v12613_v14 = vcombine.high %v1047_v9, %v1051_v18  ;;  %v911_v17 = vld [vmem:[#allocation7 + $0x18d0] sm:$0xff]  ;;  %v12612_v23 = vcombine.low %v1047_v9, %v1051_v18 }
 0x496   :  { %v903_v41 = vld [vmem:[#allocation7 + $0x1890] sm:$0xff] }
 0x497   :  { %10079 = vmatpush2.bf16.msra.mxu0 %v12260_v36  ;;  %v915_v36 = vld [vmem:[#allocation7 + $0x18f0] sm:$0xff] }
 0x498   :  { %10120 = vmatpush2.bf16.msra.mxu1 %v12388_v21  ;;  %10130 = vmatprep.subr.bf16.mxu0 %v12509_v20  ;;  %v1039_v21 = vld [vmem:[#allocation7 + $0x1cd0] sm:$0xff]  ;;  %v12477_v38 = vcombine.high %v911_v17, %v915_v36 }
 0x499   :  { %10171 = vmatprep.subr.bf16.mxu1 %v12637_v35  ;;  %v1043_v20 = vld [vmem:[#allocation7 + $0x1cf0] sm:$0xff]  ;;  %v12484_v35 = vcombine.low %v919_v55, %v923_v56 }
 0x49a   :  { %v9836_v2 = vpop.f32.mrf.mxu0  ;;  %10081 = vmatmul.mubr.bf16.vlgmr.msra.gmra.mxu0 %v13366_v54  ;;  %v12605_v25 = vcombine.high %v1039_v21, %v1043_v20  ;;  %v12604_v34 = vcombine.low %v1039_v21, %v1043_v20  ;;  %v1019_v55 = vld [vmem:[#allocation7 + $0x1c30] sm:$0xff] }
 0x49b   :  { %v9837_v39 = vadd.f32 %v9836_v2, %v13460_v22  ;;  %v9877_v60 = vpop.f32.mrf.mxu1  ;;  %10122 = vmatmul.mubr.bf16.vlgmr.msra.gmra.mxu1 %v13373_v8  ;;  %10131 = vmatpush1.bf16.msra.mxu0 %v12508_v26  ;;  %v907_v26 = vld [vmem:[#allocation7 + $0x18b0] sm:$0xff] }
 0x49c   :  { %10172 = vmatpush1.bf16.msra.mxu1 %v12636_v63  ;;  %v9838_v45 = vpop.f32.mrf.mxu0  ;;  %10132 = vmatprep.subr.bf16.mxu0 %v12501_v31  ;;  %v1031_v63 = vld [vmem:[#allocation7 + $0x1c90] sm:$0xff]  ;;  %v12469_v5 = vcombine.high %v903_v41, %v907_v26 }
 0x49d   :  { %v13470_v30 = vadd.f32 %v9877_v60, %v9837_v39  ;;  %v9839_v50 = vadd.f32 %v9838_v45, %v13465_v43  ;;  %v9879_v15 = vpop.f32.mrf.mxu1  ;;  %10173 = vmatprep.subr.bf16.mxu1 %v12629_v32  ;;  %10162 = vmatprep.mubr.bf16.mxu0 %v13369_v7  ;;  %v12620_v43 = vcombine.low %v1055_v52, %v1059_v0  ;;  %v1035_v31 = vld [vmem:[#allocation7 + $0x1cb0] sm:$0xff] }
 0x49e   :  { %v9840_v22 = vpop.f32.mrf.mxu0  ;;  %10203 = vmatprep.mubr.bf16.mxu1 %v13378_v13  ;;  %v12476_v32 = vcombine.low %v911_v17, %v915_v36  ;;  %v12597_v2 = vcombine.high %v1031_v63, %v1035_v31  ;;  %v895_v52 = vld [vmem:[#allocation7 + $0x1850] sm:$0xff]  ;;  %v12596_v45 = vcombine.low %v1031_v63, %v1035_v31 }
 0x49f   :  { %v13475_v11 = vadd.f32 %v9879_v15, %v9839_v50  ;;  %v9881_v3 = vpop.f32.mrf.mxu1  ;;  %10133 = vmatpush1.bf16.msra.mxu0 %v12500_v48  ;;  %v899_v0 = vld [vmem:[#allocation7 + $0x1870] sm:$0xff]  ;;  %v12468_v48 = vcombine.low %v903_v41, %v907_v26 }
 0x4a0   :  { %10174 = vmatpush1.bf16.msra.mxu1 %v12628_v12  ;;  %v9841_v24 = vpop.f32.mrf.mxu0  ;;  %10134 = vmatprep.subr.bf16.mxu0 %v12493_v46  ;;  %v1023_v39 = vld [vmem:[#allocation7 + $0x1c50] sm:$0xff]  ;;  %v12461_v12 = vcombine.high %v895_v52, %v899_v0  ;;  %v12460_v56 = vcombine.low %v895_v52, %v899_v0 }
 0x4a1   :  { %v9882_v62 = vpop.f32.mrf.mxu1  ;;  %10175 = vmatprep.subr.bf16.mxu1 %v12621_v51  ;;  %v1027_v60 = vld [vmem:[#allocation7 + $0x1c70] sm:$0xff] }
 0x4a2   :  { %v12589_v46 = vcombine.high %v1023_v39, %v1027_v60  ;;  %v887_v50 = vld [vmem:[#allocation7 + $0x1810] sm:$0xff]  ;;  %v12588_v22 = vcombine.low %v1023_v39, %v1027_v60 }
 0x4a3   :  { %10135 = vmatpush1.bf16.msra.mxu0 %v12492_v4  ;;  %v891_v15 = vld [vmem:[#allocation7 + $0x1830] sm:$0xff] }
 0x4a4   :  { %10176 = vmatpush1.bf16.msra.mxu1 %v12620_v43  ;;  %10136 = vmatprep.subr.bf16.mxu0 %v12485_v59  ;;  %v1015_v51 = vld [vmem:[#allocation7 + $0x1c10] sm:$0xff]  ;;  %v12453_v9 = vcombine.high %v887_v50, %v891_v15  ;;  %v12452_v59 = vcombine.low %v887_v50, %v891_v15 }
 0x4a5   :  { %10177 = vmatprep.subr.bf16.mxu1 %v12613_v14  ;;  %v12581_v18 = vcombine.high %v1015_v51, %v1019_v55  ;;  %v1007_v3 = vld [vmem:[#allocation7 + $0x1bd0] sm:$0xff]  ;;  %v12580_v62 = vcombine.low %v1015_v51, %v1019_v55 }
 0x4a6   :  { %v1011_v4 = vld [vmem:[#allocation7 + $0x1bf0] sm:$0xff] }
 0x4a7   :  { %10137 = vmatpush1.bf16.msra.mxu0 %v12484_v35  ;;  %v1135_v24 = vld [vmem:[#allocation7 + $0x1fd0] sm:$0xff]  ;;  %v12573_v14 = vcombine.high %v1007_v3, %v1011_v4 }
 0x4a8   :  { %10178 = vmatpush1.bf16.msra.mxu1 %v12612_v23  ;;  %10138 = vmatprep.subr.bf16.mxu0 %v12477_v38  ;;  %v1139_v43 = vld [vmem:[#allocation7 + $0x1ff0] sm:$0xff]  ;;  %v12572_v23 = vcombine.low %v1007_v3, %v1011_v4 }
 0x4a9   :  { %10179 = vmatprep.subr.bf16.mxu1 %v12605_v25  ;;  %v12701_v17 = vcombine.high %v1135_v24, %v1139_v43  ;;  %v999_v36 = vld [vmem:[#allocation7 + $0x1b90] sm:$0xff]  ;;  %v12700_v38 = vcombine.low %v1135_v24, %v1139_v43 }
 0x4aa   :  { %v1003_v21 = vld [vmem:[#allocation7 + $0x1bb0] sm:$0xff] }
 0x4ab   :  { %10139 = vmatpush1.bf16.msra.mxu0 %v12476_v32  ;;  %v1127_v20 = vld [vmem:[#allocation7 + $0x1f90] sm:$0xff]  ;;  %v12565_v25 = vcombine.high %v999_v36, %v1003_v21 }
 0x4ac   :  { %10180 = vmatpush1.bf16.msra.mxu1 %v12604_v34  ;;  %10140 = vmatprep.subr.bf16.mxu0 %v12469_v5  ;;  %v1131_v35 = vld [vmem:[#allocation7 + $0x1fb0] sm:$0xff]  ;;  %v12564_v34 = vcombine.low %v999_v36, %v1003_v21 }
 0x4ad   :  { %10181 = vmatprep.subr.bf16.mxu1 %v12597_v2  ;;  %v12693_v41 = vcombine.high %v1127_v20, %v1131_v35  ;;  %v991_v26 = vld [vmem:[#allocation7 + $0x1b50] sm:$0xff]  ;;  %v12692_v5 = vcombine.low %v1127_v20, %v1131_v35 }
 0x4ae   :  { %v995_v63 = vld [vmem:[#allocation7 + $0x1b70] sm:$0xff] }
 0x4af   :  { %10141 = vmatpush1.bf16.msra.mxu0 %v12468_v48  ;;  %v1119_v31 = vld [vmem:[#allocation7 + $0x1f50] sm:$0xff]  ;;  %v12557_v2 = vcombine.high %v991_v26, %v995_v63 }
 0x4b0   :  { %10182 = vmatpush1.bf16.msra.mxu1 %v12596_v45  ;;  %10142 = vmatprep.subr.bf16.mxu0 %v12461_v12  ;;  %v1123_v32 = vld [vmem:[#allocation7 + $0x1f70] sm:$0xff]  ;;  %v12556_v45 = vcombine.low %v991_v26, %v995_v63 }
 0x4b1   :  { %10183 = vmatprep.subr.bf16.mxu1 %v12589_v46  ;;  %v12685_v52 = vcombine.high %v1119_v31, %v1123_v32  ;;  %v983_v0 = vld [vmem:[#allocation7 + $0x1b10] sm:$0xff]  ;;  %v12684_v12 = vcombine.low %v1119_v31, %v1123_v32 }
 0x4b2   :  { %v987_v39 = vld [vmem:[#allocation7 + $0x1b30] sm:$0xff] }
 0x4b3   :  { %10143 = vmatpush1.bf16.msra.mxu0 %v12460_v56  ;;  %v1111_v60 = vld [vmem:[#allocation7 + $0x1f10] sm:$0xff]  ;;  %v12549_v46 = vcombine.high %v983_v0, %v987_v39 }
 0x4b4   :  { %10184 = vmatpush1.bf16.msra.mxu1 %v12588_v22  ;;  %10144 = vmatprep.subr.bf16.mxu0 %v12453_v9  ;;  %v1115_v48 = vld [vmem:[#allocation7 + $0x1f30] sm:$0xff]  ;;  %v12548_v22 = vcombine.low %v983_v0, %v987_v39  ;;  %v176_v39 = vld [vmem:[#allocation7 + $0x1d8] sm:$0xff] }
 0x4b5   :  { %10185 = vmatprep.subr.bf16.mxu1 %v12581_v18  ;;  %v12677_v50 = vcombine.high %v1111_v60, %v1115_v48  ;;  %v975_v15 = vld [vmem:[#allocation7 + $0x1ad0] sm:$0xff]  ;;  %v12676_v9 = vcombine.low %v1111_v60, %v1115_v48  ;;  %v180_v60 = vld [vmem:[#allocation7 + $0x1f8] sm:$0xff] }
 0x4b6   :  { %v979_v51 = vld [vmem:[#allocation7 + $0x1af0] sm:$0xff]  ;;  %v304_v48 = vld [vmem:[#allocation7 + $0x5d8] sm:$0xff] }
 0x4b7   :  { %10145 = vmatpush1.bf16.msra.mxu0 %v12452_v59  ;;  %v1103_v55 = vld [vmem:[#allocation7 + $0x1ed0] sm:$0xff]  ;;  %v12541_v18 = vcombine.high %v975_v15, %v979_v51 }
 0x4b8   :  { %10186 = vmatpush1.bf16.msra.mxu1 %v12580_v62  ;;  %10146 = vmatprep.subr.bf16.mxu0 %v12573_v14  ;;  %v1107_v56 = vld [vmem:[#allocation7 + $0x1ef0] sm:$0xff]  ;;  %v12540_v62 = vcombine.low %v975_v15, %v979_v51  ;;  %v168_v51 = vld [vmem:[#allocation7 + $0x198] sm:$0xff] }
 0x4b9   :  { %10187 = vmatprep.subr.bf16.mxu1 %v12701_v17  ;;  %v12669_v3 = vcombine.high %v1103_v55, %v1107_v56  ;;  %v967_v4 = vld [vmem:[#allocation7 + $0x1a90] sm:$0xff]  ;;  %v12668_v14 = vcombine.low %v1103_v55, %v1107_v56  ;;  %v172_v55 = vld [vmem:[#allocation7 + $0x1b8] sm:$0xff] }
 0x4ba   :  { %v971_v24 = vld [vmem:[#allocation7 + $0x1ab0] sm:$0xff]  ;;  %v296_v56 = vld [vmem:[#allocation7 + $0x598] sm:$0xff] }
 0x4bb   :  { %10147 = vmatpush2.bf16.msra.mxu0 %v12572_v23  ;;  %v1095_v43 = vld [vmem:[#allocation7 + $0x1e90] sm:$0xff]  ;;  %v12533_v17 = vcombine.high %v967_v4, %v971_v24 }
 0x4bc   :  { %10188 = vmatpush2.bf16.msra.mxu1 %v12700_v38  ;;  %10148 = vmatprep.subr.bf16.mxu0 %v12565_v25  ;;  %v1099_v59 = vld [vmem:[#allocation7 + $0x1eb0] sm:$0xff]  ;;  %v12532_v38 = vcombine.low %v967_v4, %v971_v24  ;;  %v160_v24 = vld [vmem:[#allocation7 + $0x158] sm:$0xff] }
 0x4bd   :  { %10189 = vmatprep.subr.bf16.mxu1 %v12693_v41  ;;  %v12661_v36 = vcombine.high %v1095_v43, %v1099_v59  ;;  %v959_v21 = vld [vmem:[#allocation7 + $0x1a50] sm:$0xff]  ;;  %v12660_v25 = vcombine.low %v1095_v43, %v1099_v59  ;;  %v164_v43 = vld [vmem:[#allocation7 + $0x178] sm:$0xff] }
 0x4be   :  { %v963_v20 = vld [vmem:[#allocation7 + $0x1a70] sm:$0xff] }
 0x4bf   :  { %10149 = vmatpush2.bf16.msra.mxu0 %v12564_v34  ;;  %v1087_v35 = vld [vmem:[#allocation7 + $0x1e50] sm:$0xff]  ;;  %v12525_v41 = vcombine.high %v959_v21, %v963_v20 }
 0x4c0   :  { %10190 = vmatpush2.bf16.msra.mxu1 %v12692_v5  ;;  %10150 = vmatprep.subr.bf16.mxu0 %v12557_v2  ;;  %v1091_v23 = vld [vmem:[#allocation7 + $0x1e70] sm:$0xff]  ;;  %v12524_v5 = vcombine.low %v959_v21, %v963_v20  ;;  %v11734_v21 = vcombine.low %v168_v51, %v172_v55 }
 0x4c1   :  { %10191 = vmatprep.subr.bf16.mxu1 %v12685_v52  ;;  %v12653_v26 = vcombine.high %v1087_v35, %v1091_v23  ;;  %v951_v63 = vld [vmem:[#allocation7 + $0x1a10] sm:$0xff]  ;;  %v12652_v2 = vcombine.low %v1087_v35, %v1091_v23  ;;  %v11727_v23 = vcombine.high %v160_v24, %v164_v43 }
 0x4c2   :  { %v955_v31 = vld [vmem:[#allocation7 + $0x1a30] sm:$0xff] }
 0x4c3   :  { %10151 = vmatpush2.bf16.msra.mxu0 %v12556_v45  ;;  %v1079_v32 = vld [vmem:[#allocation7 + $0x1e10] sm:$0xff]  ;;  %v12517_v52 = vcombine.high %v951_v63, %v955_v31  ;;  %v308_v45 = vld [vmem:[#allocation7 + $0x5f8] sm:$0xff] }
 0x4c4   :  { %10192 = vmatpush2.bf16.msra.mxu1 %v12684_v12  ;;  %10152 = vmatprep.subr.bf16.mxu0 %v12549_v46  ;;  %v1083_v34 = vld [vmem:[#allocation7 + $0x1e30] sm:$0xff]  ;;  %v12516_v12 = vcombine.low %v951_v63, %v955_v31  ;;  %v11871_v15 = vcombine.high %v304_v48, %v308_v45  ;;  %v152_v63 = vld [vmem:[#allocation7 + $0x118] sm:$0xff] }
 0x4c5   :  { %10193 = vmatprep.subr.bf16.mxu1 %v12677_v50  ;;  %v12645_v0 = vcombine.high %v1079_v32, %v1083_v34  ;;  %v12644_v46 = vcombine.low %v1079_v32, %v1083_v34  ;;  %v11743_v50 = vcombine.high %v176_v39, %v180_v60  ;;  %v156_v31 = vld [vmem:[#allocation7 + $0x138] sm:$0xff] }
 0x4c6   :  { %v280_v32 = vld [vmem:[#allocation7 + $0x518] sm:$0xff] }
 0x4c7   :  { %10153 = vmatpush2.bf16.msra.mxu0 %v12548_v22  ;;  %v300_v22 = vld [vmem:[#allocation7 + $0x5b8] sm:$0xff] }
 0x4c8   :  { %10194 = vmatpush2.bf16.msra.mxu1 %v12676_v9  ;;  %10154 = vmatprep.subr.bf16.mxu0 %v12541_v18  ;;  %v11742_v9 = vcombine.low %v176_v39, %v180_v60  ;;  %v11870_v18 = vcombine.low %v304_v48, %v308_v45  ;;  %v11863_v4 = vcombine.high %v296_v56, %v300_v22  ;;  %v284_v34 = vld [vmem:[#allocation7 + $0x538] sm:$0xff] }
 0x4c9   :  { %10195 = vmatprep.subr.bf16.mxu1 %v12669_v3  ;;  %v11735_v3 = vcombine.high %v168_v51, %v172_v55  ;;  %v11862_v35 = vcombine.low %v296_v56, %v300_v22  ;;  %v11719_v39 = vcombine.high %v152_v63, %v156_v31  ;;  %v11847_v48 = vcombine.high %v280_v32, %v284_v34  ;;  %v144_v45 = vld [vmem:[#allocation7 + $0xd8] sm:$0xff] }
 0x4ca   :  { %v136_v55 = vld [vmem:[#allocation7 + $0x98] sm:$0xff] }
 0x4cb   :  { %10155 = vmatpush2.bf16.msra.mxu0 %v12540_v62  ;;  %v288_v62 = vld [vmem:[#allocation7 + $0x558] sm:$0xff] }
 0x4cc   :  { %10196 = vmatpush2.bf16.msra.mxu1 %v12668_v14  ;;  %10156 = vmatprep.subr.bf16.mxu0 %v12533_v17  ;;  %v292_v14 = vld [vmem:[#allocation7 + $0x578] sm:$0xff] }
 0x4cd   :  { %10197 = vmatprep.subr.bf16.mxu1 %v12661_v36  ;;  %v140_v56 = vld [vmem:[#allocation7 + $0xb8] sm:$0xff] }
 0x4ce   :  { %v264_v22 = vld [vmem:[#allocation7 + $0x498] sm:$0xff] }
 0x4cf   :  { %10157 = vmatpush2.bf16.msra.mxu0 %v12532_v38 }
 0x4d0   :  { %10198 = vmatpush2.bf16.msra.mxu1 %v12660_v25  ;;  %10158 = vmatprep.subr.bf16.mxu0 %v12525_v41 }
 0x4d1   :  { %10199 = vmatprep.subr.bf16.mxu1 %v12653_v26  ;;  %v11855_v26 = vcombine.high %v288_v62, %v292_v14 }
 0x4d3   :  { %10159 = vmatpush2.bf16.msra.mxu0 %v12524_v5 }
 0x4d4   :  { %10200 = vmatpush2.bf16.msra.mxu1 %v12652_v2  ;;  %10160 = vmatprep.subr.bf16.mxu0 %v12517_v52  ;;  %v11726_v52 = vcombine.low %v160_v24, %v164_v43  ;;  %v128_v43 = vld [vmem:[#allocation7 + $0x58] sm:$0xff] }
 0x4d5   :  { %10201 = vmatprep.subr.bf16.mxu1 %v12645_v0 }
 0x4d7   :  { %10161 = vmatpush2.bf16.msra.mxu0 %v12516_v12  ;;  %v272_v12 = vld [vmem:[#allocation7 + $0x4d8] sm:$0xff] }
 0x4d8   :  { %10202 = vmatpush2.bf16.msra.mxu1 %v12644_v46  ;;  %10212 = vmatprep.subr.bf16.mxu0 %v11743_v50  ;;  %v276_v46 = vld [vmem:[#allocation7 + $0x4f8] sm:$0xff]  ;;  %v11718_v50 = vcombine.low %v152_v63, %v156_v31 }
 0x4d9   :  { %10253 = vmatprep.subr.bf16.mxu1 %v11871_v15  ;;  %v11839_v51 = vcombine.high %v272_v12, %v276_v46 }
 0x4da   :  { %v9918_v59 = vpop.f32.mrf.mxu0  ;;  %10163 = vmatmul.mubr.bf16.vlgmr.msra.gmra.mxu0 %v13391_v28 }
 0x4db   :  { %v9919_v17 = vadd.f32 %v9918_v59, %v13345_v1  ;;  %v9959_v36 = vpop.f32.mrf.mxu1  ;;  %10204 = vmatmul.mubr.bf16.vlgmr.msra.gmra.mxu1 %v13395_v40  ;;  %10213 = vmatpush1.bf16.msra.mxu0 %v11742_v9  ;;  %v268_v9 = vld [vmem:[#allocation7 + $0x4b8] sm:$0xff] }
 0x4dc   :  { %10254 = vmatpush1.bf16.msra.mxu1 %v11870_v18  ;;  %v9920_v20 = vpop.f32.mrf.mxu0  ;;  %10214 = vmatprep.subr.bf16.mxu0 %v11735_v3  ;;  %v11838_v3 = vcombine.low %v272_v12, %v276_v46  ;;  %v11831_v24 = vcombine.high %v264_v22, %v268_v9  ;;  %v132_v59 = vld [vmem:[#allocation7 + $0x78] sm:$0xff] }
 0x4dd   :  { %v13480_v38 = vadd.f32 %v9959_v36, %v9919_v17  ;;  %v9921_v25 = vadd.f32 %v9920_v20, %v13351_v10  ;;  %v9961_v41 = vpop.f32.mrf.mxu1  ;;  %10255 = vmatprep.subr.bf16.mxu1 %v11863_v4  ;;  %10244 = vmatprep.mubr.bf16.mxu0 %v13274_v19  ;;  %v11854_v10 = vcombine.low %v288_v62, %v292_v14  ;;  %v148_v19 = vld [vmem:[#allocation7 + $0xf8] sm:$0xff] }
 0x4de   :  { %v9922_v1 = vpop.f32.mrf.mxu0  ;;  %10285 = vmatprep.mubr.bf16.mxu1 %v13279_v27  ;;  %v11846_v27 = vcombine.low %v280_v32, %v284_v34  ;;  %v11711_v15 = vcombine.high %v144_v45, %v148_v19  ;;  %v11710_v18 = vcombine.low %v144_v45, %v148_v19  ;;  %v11703_v4 = vcombine.high %v136_v55, %v140_v56  ;;  %v256_v62 = vld [vmem:[#allocation7 + $0x458] sm:$0xff] }
 0x4df   :  { %v13485_v5 = vadd.f32 %v9961_v41, %v9921_v25  ;;  %v9963_v2 = vpop.f32.mrf.mxu1  ;;  %10215 = vmatpush1.bf16.msra.mxu0 %v11734_v21  ;;  %v260_v14 = vld [vmem:[#allocation7 + $0x478] sm:$0xff]  ;;  %v11702_v17 = vcombine.low %v136_v55, %v140_v56  ;;  %v11830_v36 = vcombine.low %v264_v22, %v268_v9  ;;  %v11695_v21 = vcombine.high %v128_v43, %v132_v59 }
 0x4e0   :  { %10256 = vmatpush1.bf16.msra.mxu1 %v11862_v35  ;;  %v9923_v0 = vpop.f32.mrf.mxu0  ;;  %10216 = vmatprep.subr.bf16.mxu0 %v11727_v23  ;;  %v11823_v20 = vcombine.high %v256_v62, %v260_v14  ;;  %v120_v35 = vld [vmem:[#allocation7 + $0x18] sm:$0xff]  ;;  %v11822_v63 = vcombine.low %v256_v62, %v260_v14 }
 0x4e1   :  { %v9964_v60 = vpop.f32.mrf.mxu1  ;;  %10257 = vmatprep.subr.bf16.mxu1 %v11855_v26  ;;  %v124_v23 = vld [vmem:[#allocation7 + $0x38] sm:$0xff]  ;;  %v11694_v26 = vcombine.low %v128_v43, %v132_v59 }
 0x4e2   :  { %v248_v25 = vld [vmem:[#allocation7 + $0x418] sm:$0xff]  ;;  %v11687_v31 = vcombine.high %v120_v35, %v124_v23  ;;  %v11686_v0 = vcombine.low %v120_v35, %v124_v23 }
 0x4e3   :  { %10217 = vmatpush1.bf16.msra.mxu0 %v11726_v52  ;;  %v252_v41 = vld [vmem:[#allocation7 + $0x438] sm:$0xff] }
 0x4e4   :  { %10258 = vmatpush1.bf16.msra.mxu1 %v11854_v10  ;;  %10218 = vmatprep.subr.bf16.mxu0 %v11719_v39  ;;  %v11815_v1 = vcombine.high %v248_v25, %v252_v41  ;;  %v240_v32 = vld [vmem:[#allocation7 + $0x3d8] sm:$0xff]  ;;  %v11814_v10 = vcombine.low %v248_v25, %v252_v41 }
 0x4e5   :  { %10259 = vmatprep.subr.bf16.mxu1 %v11847_v48  ;;  %v244_v34 = vld [vmem:[#allocation7 + $0x3f8] sm:$0xff] }
 0x4e6   :  { %v368_v2 = vld [vmem:[#allocation7 + $0x7d8] sm:$0xff]  ;;  %v11807_v39 = vcombine.high %v240_v32, %v244_v34  ;;  %v11806_v46 = vcombine.low %v240_v32, %v244_v34 }
 0x4e7   :  { %10219 = vmatpush1.bf16.msra.mxu0 %v11718_v50  ;;  %v372_v52 = vld [vmem:[#allocation7 + $0x7f8] sm:$0xff] }
 0x4e8   :  { %10260 = vmatpush1.bf16.msra.mxu1 %v11846_v27  ;;  %10220 = vmatprep.subr.bf16.mxu0 %v11711_v15  ;;  %v11935_v60 = vcombine.high %v368_v2, %v372_v52  ;;  %v232_v48 = vld [vmem:[#allocation7 + $0x398] sm:$0xff]  ;;  %v11934_v50 = vcombine.low %v368_v2, %v372_v52 }
 0x4e9   :  { %10261 = vmatprep.subr.bf16.mxu1 %v11839_v51  ;;  %v236_v45 = vld [vmem:[#allocation7 + $0x3b8] sm:$0xff] }
 0x4ea   :  { %v360_v19 = vld [vmem:[#allocation7 + $0x798] sm:$0xff]  ;;  %v11799_v27 = vcombine.high %v232_v48, %v236_v45  ;;  %v11798_v9 = vcombine.low %v232_v48, %v236_v45 }
 0x4eb   :  { %10221 = vmatpush1.bf16.msra.mxu0 %v11710_v18  ;;  %v364_v12 = vld [vmem:[#allocation7 + $0x7b8] sm:$0xff] }
 0x4ec   :  { %10262 = vmatpush1.bf16.msra.mxu1 %v11838_v3  ;;  %10222 = vmatprep.subr.bf16.mxu0 %v11703_v4  ;;  %v11927_v15 = vcombine.high %v360_v19, %v364_v12  ;;  %v224_v51 = vld [vmem:[#allocation7 + $0x358] sm:$0xff]  ;;  %v11926_v18 = vcombine.low %v360_v19, %v364_v12 }
 0x4ed   :  { %10263 = vmatprep.subr.bf16.mxu1 %v11831_v24  ;;  %v228_v55 = vld [vmem:[#allocation7 + $0x378] sm:$0xff] }
 0x4ee   :  { %v352_v56 = vld [vmem:[#allocation7 + $0x758] sm:$0xff]  ;;  %v11791_v3 = vcombine.high %v224_v51, %v228_v55  ;;  %v11790_v14 = vcombine.low %v224_v51, %v228_v55 }
 0x4ef   :  { %10223 = vmatpush1.bf16.msra.mxu0 %v11702_v17  ;;  %v356_v22 = vld [vmem:[#allocation7 + $0x778] sm:$0xff] }
 0x4f0   :  { %10264 = vmatpush1.bf16.msra.mxu1 %v11830_v36  ;;  %10224 = vmatprep.subr.bf16.mxu0 %v11695_v21  ;;  %v11919_v4 = vcombine.high %v352_v56, %v356_v22  ;;  %v216_v24 = vld [vmem:[#allocation7 + $0x318] sm:$0xff]  ;;  %v11918_v17 = vcombine.low %v352_v56, %v356_v22 }
 0x4f1   :  { %10265 = vmatprep.subr.bf16.mxu1 %v11823_v20  ;;  %v220_v43 = vld [vmem:[#allocation7 + $0x338] sm:$0xff] }
 0x4f2   :  { %v344_v59 = vld [vmem:[#allocation7 + $0x718] sm:$0xff]  ;;  %v11783_v36 = vcombine.high %v216_v24, %v220_v43  ;;  %v11782_v41 = vcombine.low %v216_v24, %v220_v43 }
 0x4f3   :  { %10225 = vmatpush1.bf16.msra.mxu0 %v11694_v26  ;;  %v348_v62 = vld [vmem:[#allocation7 + $0x738] sm:$0xff] }
 0x4f4   :  { %10266 = vmatpush1.bf16.msra.mxu1 %v11822_v63  ;;  %10226 = vmatprep.subr.bf16.mxu0 %v11687_v31  ;;  %v11911_v21 = vcombine.high %v344_v59, %v348_v62  ;;  %v208_v20 = vld [vmem:[#allocation7 + $0x2d8] sm:$0xff]  ;;  %v11910_v26 = vcombine.low %v344_v59, %v348_v62 }
 0x4f5   :  { %10267 = vmatprep.subr.bf16.mxu1 %v11815_v1  ;;  %v212_v35 = vld [vmem:[#allocation7 + $0x2f8] sm:$0xff] }
 0x4f6   :  { %v336_v23 = vld [vmem:[#allocation7 + $0x6d8] sm:$0xff]  ;;  %v11775_v63 = vcombine.high %v208_v20, %v212_v35  ;;  %v11774_v52 = vcombine.low %v208_v20, %v212_v35 }
 0x4f7   :  { %10227 = vmatpush1.bf16.msra.mxu0 %v11686_v0  ;;  %v340_v25 = vld [vmem:[#allocation7 + $0x6f8] sm:$0xff] }
 0x4f8   :  { %10268 = vmatpush1.bf16.msra.mxu1 %v11814_v10  ;;  %10228 = vmatprep.subr.bf16.mxu0 %v11807_v39  ;;  %v11903_v31 = vcombine.high %v336_v23, %v340_v25  ;;  %v200_v1 = vld [vmem:[#allocation7 + $0x298] sm:$0xff]  ;;  %v11902_v0 = vcombine.low %v336_v23, %v340_v25 }
 0x4f9   :  { %10269 = vmatprep.subr.bf16.mxu1 %v11935_v60  ;;  %v204_v32 = vld [vmem:[#allocation7 + $0x2b8] sm:$0xff] }
 0x4fa   :  { %v328_v34 = vld [vmem:[#allocation7 + $0x698] sm:$0xff]  ;;  %v11767_v10 = vcombine.high %v200_v1, %v204_v32  ;;  %v11766_v12 = vcombine.low %v200_v1, %v204_v32 }
 0x4fb   :  { %10229 = vmatpush2.bf16.msra.mxu0 %v11806_v46  ;;  %v332_v2 = vld [vmem:[#allocation7 + $0x6b8] sm:$0xff] }
 0x4fc   :  { %10270 = vmatpush2.bf16.msra.mxu1 %v11934_v50  ;;  %10230 = vmatprep.subr.bf16.mxu0 %v11799_v27  ;;  %v11895_v39 = vcombine.high %v328_v34, %v332_v2  ;;  %v192_v60 = vld [vmem:[#allocation7 + $0x258] sm:$0xff]  ;;  %v11894_v46 = vcombine.low %v328_v34, %v332_v2 }
 0x4fd   :  { %10271 = vmatprep.subr.bf16.mxu1 %v11927_v15  ;;  %v196_v48 = vld [vmem:[#allocation7 + $0x278] sm:$0xff] }
 0x4fe   :  { %v320_v45 = vld [vmem:[#allocation7 + $0x658] sm:$0xff]  ;;  %v11759_v50 = vcombine.high %v192_v60, %v196_v48  ;;  %v11758_v22 = vcombine.low %v192_v60, %v196_v48 }
 0x4ff   :  { %10231 = vmatpush2.bf16.msra.mxu0 %v11798_v9  ;;  %v324_v19 = vld [vmem:[#allocation7 + $0x678] sm:$0xff] }
 0x500   :  { %10272 = vmatpush2.bf16.msra.mxu1 %v11926_v18  ;;  %10232 = vmatprep.subr.bf16.mxu0 %v11791_v3  ;;  %v11887_v27 = vcombine.high %v320_v45, %v324_v19  ;;  %v184_v15 = vld [vmem:[#allocation7 + $0x218] sm:$0xff]  ;;  %v11886_v9 = vcombine.low %v320_v45, %v324_v19 }
 0x501   :  { %10273 = vmatprep.subr.bf16.mxu1 %v11919_v4  ;;  %v188_v51 = vld [vmem:[#allocation7 + $0x238] sm:$0xff] }
 0x502   :  { %v312_v55 = vld [vmem:[#allocation7 + $0x618] sm:$0xff]  ;;  %v11751_v18 = vcombine.high %v184_v15, %v188_v51  ;;  %v11750_v62 = vcombine.low %v184_v15, %v188_v51 }
 0x503   :  { %10233 = vmatpush2.bf16.msra.mxu0 %v11790_v14  ;;  %v316_v56 = vld [vmem:[#allocation7 + $0x638] sm:$0xff] }
 0x504   :  { %10274 = vmatpush2.bf16.msra.mxu1 %v11918_v17  ;;  %10234 = vmatprep.subr.bf16.mxu0 %v11783_v36  ;;  %v11879_v3 = vcombine.high %v312_v55, %v316_v56  ;;  %v432_v4 = vld [vmem:[#allocation7 + $0x9d8] sm:$0xff]  ;;  %v11878_v14 = vcombine.low %v312_v55, %v316_v56 }
 0x505   :  { %10275 = vmatprep.subr.bf16.mxu1 %v11911_v21  ;;  %v436_v24 = vld [vmem:[#allocation7 + $0x9f8] sm:$0xff] }
 0x506   :  { %v560_v43 = vld [vmem:[#allocation7 + $0xdd8] sm:$0xff]  ;;  %v11999_v17 = vcombine.high %v432_v4, %v436_v24  ;;  %v11998_v25 = vcombine.low %v432_v4, %v436_v24 }
 0x507   :  { %10235 = vmatpush2.bf16.msra.mxu0 %v11782_v41  ;;  %v564_v59 = vld [vmem:[#allocation7 + $0xdf8] sm:$0xff] }
 0x508   :  { %10276 = vmatpush2.bf16.msra.mxu1 %v11910_v26  ;;  %10236 = vmatprep.subr.bf16.mxu0 %v11775_v63  ;;  %v12127_v36 = vcombine.high %v560_v43, %v564_v59  ;;  %v424_v21 = vld [vmem:[#allocation7 + $0x998] sm:$0xff]  ;;  %v12126_v41 = vcombine.low %v560_v43, %v564_v59 }
 0x509   :  { %10277 = vmatprep.subr.bf16.mxu1 %v11903_v31  ;;  %v428_v20 = vld [vmem:[#allocation7 + $0x9b8] sm:$0xff] }
 0x50a   :  { %v552_v35 = vld [vmem:[#allocation7 + $0xd98] sm:$0xff]  ;;  %v11991_v26 = vcombine.high %v424_v21, %v428_v20 }
 0x50b   :  { %10237 = vmatpush2.bf16.msra.mxu0 %v11774_v52  ;;  %v556_v23 = vld [vmem:[#allocation7 + $0xdb8] sm:$0xff] }
 0x50c   :  { %10278 = vmatpush2.bf16.msra.mxu1 %v11902_v0  ;;  %10238 = vmatprep.subr.bf16.mxu0 %v11767_v10  ;;  %v12119_v63 = vcombine.high %v552_v35, %v556_v23  ;;  %v416_v31 = vld [vmem:[#allocation7 + $0x958] sm:$0xff]  ;;  %v11990_v10 = vcombine.low %v424_v21, %v428_v20  ;;  %v12118_v60 = vcombine.low %v552_v35, %v556_v23 }
 0x50d   :  { %10279 = vmatprep.subr.bf16.mxu1 %v11895_v39  ;;  %v420_v1 = vld [vmem:[#allocation7 + $0x978] sm:$0xff] }
 0x50e   :  { %v544_v34 = vld [vmem:[#allocation7 + $0xd58] sm:$0xff]  ;;  %v11983_v48 = vcombine.high %v416_v31, %v420_v1  ;;  %v11982_v55 = vcombine.low %v416_v31, %v420_v1 }
 0x50f   :  { %10239 = vmatpush2.bf16.msra.mxu0 %v11766_v12  ;;  %v548_v2 = vld [vmem:[#allocation7 + $0xd78] sm:$0xff] }
 0x510   :  { %10280 = vmatpush2.bf16.msra.mxu1 %v11894_v46  ;;  %10240 = vmatprep.subr.bf16.mxu0 %v11759_v50  ;;  %v408_v46 = vld [vmem:[#allocation7 + $0x918] sm:$0xff] }
 0x511   :  { %10281 = vmatprep.subr.bf16.mxu1 %v11887_v27  ;;  %v412_v50 = vld [vmem:[#allocation7 + $0x938] sm:$0xff] }
 0x512   :  { %v540_v27 = vld [vmem:[#allocation7 + $0xd38] sm:$0xff]  ;;  %v11974_v43 = vcombine.low %v408_v46, %v412_v50 }
 0x513   :  { %10241 = vmatpush2.bf16.msra.mxu0 %v11758_v22  ;;  %v11975_v22 = vcombine.high %v408_v46, %v412_v50  ;;  %v528_v4 = vld [vmem:[#allocation7 + $0xcd8] sm:$0xff] }
 0x514   :  { %10282 = vmatpush2.bf16.msra.mxu1 %v11886_v9  ;;  %10242 = vmatprep.subr.bf16.mxu0 %v11751_v18  ;;  %v532_v24 = vld [vmem:[#allocation7 + $0xcf8] sm:$0xff] }
 0x515   :  { %10283 = vmatprep.subr.bf16.mxu1 %v11879_v3  ;;  %v400_v3 = vld [vmem:[#allocation7 + $0x8d8] sm:$0xff]  ;;  %v12094_v35 = vcombine.low %v528_v4, %v532_v24 }
 0x516   :  { %v524_v21 = vld [vmem:[#allocation7 + $0xcb8] sm:$0xff] }
 0x517   :  { %10243 = vmatpush2.bf16.msra.mxu0 %v11750_v62  ;;  %v12095_v62 = vcombine.high %v528_v4, %v532_v24  ;;  %v516_v31 = vld [vmem:[#allocation7 + $0xc78] sm:$0xff] }
 0x518   :  { %10284 = vmatpush2.bf16.msra.mxu1 %v11878_v14  ;;  %10294 = vmatprep.subr.bf16.mxu0 %v11999_v17  ;;  %v392_v14 = vld [vmem:[#allocation7 + $0x898] sm:$0xff] }
 0x519   :  { %10335 = vmatprep.subr.bf16.mxu1 %v12127_v36  ;;  %v396_v17 = vld [vmem:[#allocation7 + $0x8b8] sm:$0xff] }
 0x51a   :  { %v10000_v32 = vpop.f32.mrf.mxu0  ;;  %10245 = vmatmul.mubr.bf16.vlgmr.msra.gmra.mxu0 %v13299_v47  ;;  %v12111_v47 = vcombine.high %v544_v34, %v548_v2  ;;  %v520_v36 = vld [vmem:[#allocation7 + $0xc98] sm:$0xff]  ;;  %v11959_v23 = vcombine.high %v392_v14, %v396_v17  ;;  %v11958_v1 = vcombine.low %v392_v14, %v396_v17 }
 0x51b   :  { %v10001_v52 = vadd.f32 %v10000_v32, %v13480_v38  ;;  %v10041_v0 = vpop.f32.mrf.mxu1  ;;  %10286 = vmatmul.mubr.bf16.vlgmr.msra.gmra.mxu1 %v13306_v58  ;;  %10295 = vmatpush1.bf16.msra.mxu0 %v11998_v25  ;;  %v536_v58 = vld [vmem:[#allocation7 + $0xd18] sm:$0xff]  ;;  %v12087_v25 = vcombine.high %v520_v36, %v524_v21  ;;  %v12086_v32 = vcombine.low %v520_v36, %v524_v21 }
 0x51c   :  { %10336 = vmatpush1.bf16.msra.mxu1 %v12126_v41  ;;  %v10002_v39 = vpop.f32.mrf.mxu0  ;;  %10296 = vmatprep.subr.bf16.mxu0 %v11991_v26  ;;  %v12103_v18 = vcombine.high %v536_v58, %v540_v27  ;;  %v384_v41 = vld [vmem:[#allocation7 + $0x858] sm:$0xff] }
 0x51d   :  { %v13490_v45 = vadd.f32 %v10041_v0, %v10001_v52  ;;  %v10003_v19 = vadd.f32 %v10002_v39, %v13485_v5  ;;  %v10043_v12 = vpop.f32.mrf.mxu1  ;;  %10337 = vmatprep.subr.bf16.mxu1 %v12119_v63  ;;  %10326 = vmatprep.mubr.bf16.mxu0 %v13302_v57  ;;  %v12110_v5 = vcombine.low %v544_v34, %v548_v2  ;;  %v404_v57 = vld [vmem:[#allocation7 + $0x8f8] sm:$0xff] }
 0x51e   :  { %v10004_v38 = vpop.f32.mrf.mxu0  ;;  %10367 = vmatprep.mubr.bf16.mxu1 %v13311_v33  ;;  %v12102_v33 = vcombine.low %v536_v58, %v540_v27  ;;  %v11967_v59 = vcombine.high %v400_v3, %v404_v57  ;;  %v11966_v20 = vcombine.low %v400_v3, %v404_v57  ;;  %v388_v26 = vld [vmem:[#allocation7 + $0x878] sm:$0xff] }
 0x51f   :  { %v13495_v15 = vadd.f32 %v10043_v12, %v10003_v19  ;;  %v10045_v51 = vpop.f32.mrf.mxu1  ;;  %10297 = vmatpush1.bf16.msra.mxu0 %v11990_v10  ;;  %v512_v63 = vld [vmem:[#allocation7 + $0xc58] sm:$0xff]  ;;  %v11951_v34 = vcombine.high %v384_v41, %v388_v26 }
 0x520   :  { %10338 = vmatpush1.bf16.msra.mxu1 %v12118_v60  ;;  %v10005_v56 = vpop.f32.mrf.mxu0  ;;  %10298 = vmatprep.subr.bf16.mxu0 %v11983_v48  ;;  %v12079_v2 = vcombine.high %v512_v63, %v516_v31  ;;  %v376_v52 = vld [vmem:[#allocation7 + $0x818] sm:$0xff]  ;;  %v11950_v60 = vcombine.low %v384_v41, %v388_v26  ;;  %v12078_v48 = vcombine.low %v512_v63, %v516_v31 }
 0x521   :  { %v10046_v9 = vpop.f32.mrf.mxu1  ;;  %10339 = vmatprep.subr.bf16.mxu1 %v12111_v47  ;;  %v380_v0 = vld [vmem:[#allocation7 + $0x838] sm:$0xff] }
 0x522   :  { %v504_v10 = vld [vmem:[#allocation7 + $0xc18] sm:$0xff]  ;;  %v11943_v19 = vcombine.high %v376_v52, %v380_v0  ;;  %v11942_v58 = vcombine.low %v376_v52, %v380_v0 }
 0x523   :  { %10299 = vmatpush1.bf16.msra.mxu0 %v11982_v55  ;;  %v508_v39 = vld [vmem:[#allocation7 + $0xc38] sm:$0xff] }
 0x524   :  { %10340 = vmatpush1.bf16.msra.mxu1 %v12110_v5  ;;  %10300 = vmatprep.subr.bf16.mxu0 %v11975_v22  ;;  %v12071_v12 = vcombine.high %v504_v10, %v508_v39  ;;  %v496_v47 = vld [vmem:[#allocation7 + $0xbd8] sm:$0xff]  ;;  %v12070_v27 = vcombine.low %v504_v10, %v508_v39 }
 0x525   :  { %10341 = vmatprep.subr.bf16.mxu1 %v12103_v18  ;;  %v500_v46 = vld [vmem:[#allocation7 + $0xbf8] sm:$0xff] }
 0x526   :  { %v624_v50 = vld [vmem:[#allocation7 + $0xfd8] sm:$0xff]  ;;  %v12063_v51 = vcombine.high %v496_v47, %v500_v46  ;;  %v12062_v18 = vcombine.low %v496_v47, %v500_v46 }
 0x527   :  { %10301 = vmatpush1.bf16.msra.mxu0 %v11974_v43  ;;  %v628_v38 = vld [vmem:[#allocation7 + $0xff8] sm:$0xff] }
 0x528   :  { %10342 = vmatpush1.bf16.msra.mxu1 %v12102_v33  ;;  %10302 = vmatprep.subr.bf16.mxu0 %v11967_v59  ;;  %v12191_v55 = vcombine.high %v624_v50, %v628_v38  ;;  %v488_v56 = vld [vmem:[#allocation7 + $0xb98] sm:$0xff]  ;;  %v12190_v3 = vcombine.low %v624_v50, %v628_v38 }
 0x529   :  { %10343 = vmatprep.subr.bf16.mxu1 %v12095_v62  ;;  %v492_v5 = vld [vmem:[#allocation7 + $0xbb8] sm:$0xff] }
 0x52a   :  { %v616_v22 = vld [vmem:[#allocation7 + $0xf98] sm:$0xff]  ;;  %v12055_v57 = vcombine.high %v488_v56, %v492_v5  ;;  %v12054_v62 = vcombine.low %v488_v56, %v492_v5 }
 0x52b   :  { %10303 = vmatpush1.bf16.msra.mxu0 %v11966_v20  ;;  %v620_v9 = vld [vmem:[#allocation7 + $0xfb8] sm:$0xff] }
 0x52c   :  { %10344 = vmatpush1.bf16.msra.mxu1 %v12094_v35  ;;  %10304 = vmatprep.subr.bf16.mxu0 %v11959_v23  ;;  %v12183_v4 = vcombine.high %v616_v22, %v620_v9  ;;  %v480_v24 = vld [vmem:[#allocation7 + $0xb58] sm:$0xff]  ;;  %v12182_v14 = vcombine.low %v616_v22, %v620_v9 }
 0x52d   :  { %10345 = vmatprep.subr.bf16.mxu1 %v12087_v25  ;;  %v484_v43 = vld [vmem:[#allocation7 + $0xb78] sm:$0xff] }
 0x52e   :  { %v608_v33 = vld [vmem:[#allocation7 + $0xf58] sm:$0xff]  ;;  %v12047_v17 = vcombine.high %v480_v24, %v484_v43  ;;  %v12046_v25 = vcombine.low %v480_v24, %v484_v43 }
 0x52f   :  { %10305 = vmatpush1.bf16.msra.mxu0 %v11958_v1  ;;  %v612_v59 = vld [vmem:[#allocation7 + $0xf78] sm:$0xff] }
 0x530   :  { %10346 = vmatpush1.bf16.msra.mxu1 %v12086_v32  ;;  %10306 = vmatprep.subr.bf16.mxu0 %v11951_v34  ;;  %v12175_v36 = vcombine.high %v608_v33, %v612_v59  ;;  %v472_v21 = vld [vmem:[#allocation7 + $0xb18] sm:$0xff]  ;;  %v12174_v41 = vcombine.low %v608_v33, %v612_v59 }
 0x531   :  { %10347 = vmatprep.subr.bf16.mxu1 %v12079_v2  ;;  %v476_v20 = vld [vmem:[#allocation7 + $0xb38] sm:$0xff] }
 0x532   :  { %v600_v35 = vld [vmem:[#allocation7 + $0xf18] sm:$0xff]  ;;  %v12039_v26 = vcombine.high %v472_v21, %v476_v20  ;;  %v12038_v2 = vcombine.low %v472_v21, %v476_v20 }
 0x533   :  { %10307 = vmatpush1.bf16.msra.mxu0 %v11950_v60  ;;  %v604_v23 = vld [vmem:[#allocation7 + $0xf38] sm:$0xff] }
 0x534   :  { %10348 = vmatpush1.bf16.msra.mxu1 %v12078_v48  ;;  %10308 = vmatprep.subr.bf16.mxu0 %v11943_v19  ;;  %v12167_v63 = vcombine.high %v600_v35, %v604_v23  ;;  %v464_v31 = vld [vmem:[#allocation7 + $0xad8] sm:$0xff]  ;;  %v12166_v52 = vcombine.low %v600_v35, %v604_v23 }
 0x535   :  { %10349 = vmatprep.subr.bf16.mxu1 %v12071_v12  ;;  %v468_v1 = vld [vmem:[#allocation7 + $0xaf8] sm:$0xff] }
 0x536   :  { %v592_v32 = vld [vmem:[#allocation7 + $0xed8] sm:$0xff]  ;;  %v12031_v0 = vcombine.high %v464_v31, %v468_v1  ;;  %v12030_v12 = vcombine.low %v464_v31, %v468_v1 }
 0x537   :  { %10309 = vmatpush1.bf16.msra.mxu0 %v11942_v58  ;;  %v596_v34 = vld [vmem:[#allocation7 + $0xef8] sm:$0xff] }
 0x538   :  { %10350 = vmatpush1.bf16.msra.mxu1 %v12070_v27  ;;  %10310 = vmatprep.subr.bf16.mxu0 %v12063_v51  ;;  %v12159_v10 = vcombine.high %v592_v32, %v596_v34  ;;  %v456_v39 = vld [vmem:[#allocation7 + $0xa98] sm:$0xff]  ;;  %v12158_v47 = vcombine.low %v592_v32, %v596_v34 }
 0x539   :  { %10351 = vmatprep.subr.bf16.mxu1 %v12191_v55  ;;  %v460_v60 = vld [vmem:[#allocation7 + $0xab8] sm:$0xff] }
 0x53a   :  { %v584_v48 = vld [vmem:[#allocation7 + $0xe98] sm:$0xff]  ;;  %v12023_v46 = vcombine.high %v456_v39, %v460_v60  ;;  %v12022_v55 = vcombine.low %v456_v39, %v460_v60 }
 0x53b   :  { %10311 = vmatpush2.bf16.msra.mxu0 %v12062_v18  ;;  %v588_v19 = vld [vmem:[#allocation7 + $0xeb8] sm:$0xff] }
 0x53c   :  { %10352 = vmatpush2.bf16.msra.mxu1 %v12190_v3  ;;  %10312 = vmatprep.subr.bf16.mxu0 %v12055_v57  ;;  %v12151_v50 = vcombine.high %v584_v48, %v588_v19  ;;  %v448_v38 = vld [vmem:[#allocation7 + $0xa58] sm:$0xff]  ;;  %v12150_v56 = vcombine.low %v584_v48, %v588_v19 }
 0x53d   :  { %10353 = vmatprep.subr.bf16.mxu1 %v12183_v4  ;;  %v452_v58 = vld [vmem:[#allocation7 + $0xa78] sm:$0xff] }
 0x53e   :  { %v576_v27 = vld [vmem:[#allocation7 + $0xe58] sm:$0xff]  ;;  %v12015_v5 = vcombine.high %v448_v38, %v452_v58  ;;  %v12014_v4 = vcombine.low %v448_v38, %v452_v58 }
 0x53f   :  { %10313 = vmatpush2.bf16.msra.mxu0 %v12054_v62  ;;  %v580_v51 = vld [vmem:[#allocation7 + $0xe78] sm:$0xff] }
 0x540   :  { %10354 = vmatpush2.bf16.msra.mxu1 %v12182_v14  ;;  %10314 = vmatprep.subr.bf16.mxu0 %v12047_v17  ;;  %v12143_v22 = vcombine.high %v576_v27, %v580_v51  ;;  %v440_v9 = vld [vmem:[#allocation7 + $0xa18] sm:$0xff]  ;;  %v12142_v24 = vcombine.low %v576_v27, %v580_v51 }
 0x541   :  { %10355 = vmatprep.subr.bf16.mxu1 %v12175_v36  ;;  %v444_v18 = vld [vmem:[#allocation7 + $0xa38] sm:$0xff] }
 0x542   :  { %v568_v3 = vld [vmem:[#allocation7 + $0xe18] sm:$0xff]  ;;  %v12007_v43 = vcombine.high %v440_v9, %v444_v18  ;;  %v12006_v36 = vcombine.low %v440_v9, %v444_v18 }
 0x543   :  { %10315 = vmatpush2.bf16.msra.mxu0 %v12046_v25  ;;  %v572_v57 = vld [vmem:[#allocation7 + $0xe38] sm:$0xff] }
 0x544   :  { %10356 = vmatpush2.bf16.msra.mxu1 %v12174_v41  ;;  %10316 = vmatprep.subr.bf16.mxu0 %v12039_v26  ;;  %v12135_v33 = vcombine.high %v568_v3, %v572_v57  ;;  %v688_v59 = vld [vmem:[#allocation7 + $0x11d8] sm:$0xff]  ;;  %v12134_v21 = vcombine.low %v568_v3, %v572_v57 }
 0x545   :  { %10357 = vmatprep.subr.bf16.mxu1 %v12167_v63  ;;  %v692_v62 = vld [vmem:[#allocation7 + $0x11f8] sm:$0xff] }
 0x546   :  { %v816_v14 = vld [vmem:[#allocation7 + $0x15d8] sm:$0xff]  ;;  %v12255_v20 = vcombine.high %v688_v59, %v692_v62  ;;  %v12254_v63 = vcombine.low %v688_v59, %v692_v62 }
 0x547   :  { %10317 = vmatpush2.bf16.msra.mxu0 %v12038_v2  ;;  %v820_v17 = vld [vmem:[#allocation7 + $0x15f8] sm:$0xff] }
 0x548   :  { %10358 = vmatpush2.bf16.msra.mxu1 %v12166_v52  ;;  %10318 = vmatprep.subr.bf16.mxu0 %v12031_v0  ;;  %v12383_v35 = vcombine.high %v816_v14, %v820_v17  ;;  %v680_v23 = vld [vmem:[#allocation7 + $0x1198] sm:$0xff]  ;;  %v12382_v31 = vcombine.low %v816_v14, %v820_v17 }
 0x549   :  { %10359 = vmatprep.subr.bf16.mxu1 %v12159_v10  ;;  %v684_v25 = vld [vmem:[#allocation7 + $0x11b8] sm:$0xff] }
 0x54a   :  { %v808_v41 = vld [vmem:[#allocation7 + $0x1598] sm:$0xff]  ;;  %v12247_v1 = vcombine.high %v680_v23, %v684_v25  ;;  %v12246_v48 = vcombine.low %v680_v23, %v684_v25 }
 0x54b   :  { %10319 = vmatpush2.bf16.msra.mxu0 %v12030_v12  ;;  %v812_v26 = vld [vmem:[#allocation7 + $0x15b8] sm:$0xff] }
 0x54c   :  { %10360 = vmatpush2.bf16.msra.mxu1 %v12158_v47  ;;  %10320 = vmatprep.subr.bf16.mxu0 %v12023_v46  ;;  %v12375_v32 = vcombine.high %v808_v41, %v812_v26  ;;  %v672_v34 = vld [vmem:[#allocation7 + $0x1158] sm:$0xff]  ;;  %v12374_v12 = vcombine.low %v808_v41, %v812_v26 }
 0x54d   :  { %10361 = vmatprep.subr.bf16.mxu1 %v12151_v50  ;;  %v676_v2 = vld [vmem:[#allocation7 + $0x1178] sm:$0xff] }
 0x54e   :  { %v800_v0 = vld [vmem:[#allocation7 + $0x1558] sm:$0xff]  ;;  %v12239_v47 = vcombine.high %v672_v34, %v676_v2 }
 0x54f   :  { %10321 = vmatpush2.bf16.msra.mxu0 %v12022_v55  ;;  %v804_v10 = vld [vmem:[#allocation7 + $0x1578] sm:$0xff] }
 0x550   :  { %10362 = vmatpush2.bf16.msra.mxu1 %v12150_v56  ;;  %10322 = vmatprep.subr.bf16.mxu0 %v12015_v5  ;;  %v664_v58 = vld [vmem:[#allocation7 + $0x1118] sm:$0xff]  ;;  %v12238_v5 = vcombine.low %v672_v34, %v676_v2 }
 0x551   :  { %10363 = vmatprep.subr.bf16.mxu1 %v12143_v22  ;;  %v668_v27 = vld [vmem:[#allocation7 + $0x1138] sm:$0xff] }
 0x552   :  { %v796_v51 = vld [vmem:[#allocation7 + $0x1538] sm:$0xff]  ;;  %v12231_v9 = vcombine.high %v664_v58, %v668_v27 }
 0x553   :  { %10323 = vmatpush2.bf16.msra.mxu0 %v12014_v4  ;;  %v656_v57 = vld [vmem:[#allocation7 + $0x10d8] sm:$0xff] }
 0x554   :  { %10364 = vmatpush2.bf16.msra.mxu1 %v12142_v24  ;;  %10324 = vmatprep.subr.bf16.mxu0 %v12007_v43  ;;  %v784_v4 = vld [vmem:[#allocation7 + $0x14d8] sm:$0xff]  ;;  %v12230_v43 = vcombine.low %v664_v58, %v668_v27 }
 0x555   :  { %10365 = vmatprep.subr.bf16.mxu1 %v12135_v33  ;;  %v788_v24 = vld [vmem:[#allocation7 + $0x14f8] sm:$0xff] }
 0x556   :  { %v12351_v59 = vcombine.high %v784_v4, %v788_v24  ;;  %v648_v62 = vld [vmem:[#allocation7 + $0x1098] sm:$0xff] }
 0x557   :  { %10325 = vmatpush2.bf16.msra.mxu0 %v12006_v36  ;;  %v652_v14 = vld [vmem:[#allocation7 + $0x10b8] sm:$0xff] }
 0x558   :  { %10366 = vmatpush2.bf16.msra.mxu1 %v12134_v21  ;;  %10376 = vmatprep.subr.bf16.mxu0 %v12255_v20  ;;  %v776_v17 = vld [vmem:[#allocation7 + $0x1498] sm:$0xff]  ;;  %v12350_v20 = vcombine.low %v784_v4, %v788_v24 }
 0x559   :  { %10417 = vmatprep.subr.bf16.mxu1 %v12383_v35  ;;  %v780_v36 = vld [vmem:[#allocation7 + $0x14b8] sm:$0xff]  ;;  %v12215_v35 = vcombine.high %v648_v62, %v652_v14 }
 0x55a   :  { %v10082_v52 = vpop.f32.mrf.mxu0  ;;  %10327 = vmatmul.mubr.bf16.vlgmr.msra.gmra.mxu0 %v13330_v37  ;;  %v12367_v37 = vcombine.high %v800_v0, %v804_v10  ;;  %v12343_v23 = vcombine.high %v776_v17, %v780_v36  ;;  %v640_v25 = vld [vmem:[#allocation7 + $0x1058] sm:$0xff] }
 0x55b   :  { %v10083_v39 = vadd.f32 %v10082_v52, %v13490_v45  ;;  %v10123_v60 = vpop.f32.mrf.mxu1  ;;  %10368 = vmatmul.mubr.bf16.vlgmr.msra.gmra.mxu1 %v13337_v49  ;;  %10377 = vmatpush1.bf16.msra.mxu0 %v12254_v63  ;;  %v792_v49 = vld [vmem:[#allocation7 + $0x1518] sm:$0xff] }
 0x55c   :  { %10418 = vmatpush1.bf16.msra.mxu1 %v12382_v31  ;;  %v10084_v19 = vpop.f32.mrf.mxu0  ;;  %10378 = vmatprep.subr.bf16.mxu0 %v12247_v1  ;;  %v12359_v3 = vcombine.high %v792_v49, %v796_v51  ;;  %v644_v41 = vld [vmem:[#allocation7 + $0x1078] sm:$0xff]  ;;  %v12214_v31 = vcombine.low %v648_v62, %v652_v14  ;;  %v12342_v1 = vcombine.low %v776_v17, %v780_v36 }
 0x55d   :  { %v13500_v46 = vadd.f32 %v10123_v60, %v10083_v39  ;;  %v10085_v50 = vadd.f32 %v10084_v19, %v13495_v15  ;;  %v10125_v38 = vpop.f32.mrf.mxu1  ;;  %10419 = vmatprep.subr.bf16.mxu1 %v12375_v32  ;;  %10408 = vmatprep.mubr.bf16.mxu0 %v13333_v6  ;;  %v12366_v15 = vcombine.low %v800_v0, %v804_v10  ;;  %v660_v6 = vld [vmem:[#allocation7 + $0x10f8] sm:$0xff] }
 0x55e   :  { %v10086_v45 = vpop.f32.mrf.mxu0  ;;  %10449 = vmatprep.mubr.bf16.mxu1 %v13342_v61  ;;  %v12358_v61 = vcombine.low %v792_v49, %v796_v51  ;;  %v12223_v33 = vcombine.high %v656_v57, %v660_v6  ;;  %v12222_v21 = vcombine.low %v656_v57, %v660_v6  ;;  %v768_v26 = vld [vmem:[#allocation7 + $0x1458] sm:$0xff]  ;;  %v12207_v32 = vcombine.high %v640_v25, %v644_v41 }
 0x55f   :  { %v13505_v55 = vadd.f32 %v10125_v38, %v10085_v50  ;;  %v10127_v56 = vpop.f32.mrf.mxu1  ;;  %10379 = vmatpush1.bf16.msra.mxu0 %v12246_v48  ;;  %v772_v63 = vld [vmem:[#allocation7 + $0x1478] sm:$0xff]  ;;  %v12206_v39 = vcombine.low %v640_v25, %v644_v41 }
 0x560   :  { %10420 = vmatpush1.bf16.msra.mxu1 %v12374_v12  ;;  %v10087_v22 = vpop.f32.mrf.mxu0  ;;  %10380 = vmatprep.subr.bf16.mxu0 %v12239_v47  ;;  %v12335_v34 = vcombine.high %v768_v26, %v772_v63  ;;  %v632_v2 = vld [vmem:[#allocation7 + $0x1018] sm:$0xff]  ;;  %v12334_v60 = vcombine.low %v768_v26, %v772_v63 }
 0x561   :  { %v10128_v18 = vpop.f32.mrf.mxu1  ;;  %10421 = vmatprep.subr.bf16.mxu1 %v12367_v37  ;;  %v636_v52 = vld [vmem:[#allocation7 + $0x1038] sm:$0xff] }
 0x562   :  { %v760_v0 = vld [vmem:[#allocation7 + $0x1418] sm:$0xff]  ;;  %v12199_v48 = vcombine.high %v632_v2, %v636_v52  ;;  %v12198_v37 = vcombine.low %v632_v2, %v636_v52 }
 0x563   :  { %10381 = vmatpush1.bf16.msra.mxu0 %v12238_v5  ;;  %v764_v10 = vld [vmem:[#allocation7 + $0x1438] sm:$0xff] }
 0x564   :  { %10422 = vmatpush1.bf16.msra.mxu1 %v12366_v15  ;;  %10382 = vmatprep.subr.bf16.mxu0 %v12231_v9  ;;  %v12327_v19 = vcombine.high %v760_v0, %v764_v10  ;;  %v752_v12 = vld [vmem:[#allocation7 + $0x13d8] sm:$0xff]  ;;  %v12326_v58 = vcombine.low %v760_v0, %v764_v10 }
 0x565   :  { %10423 = vmatprep.subr.bf16.mxu1 %v12359_v3  ;;  %v756_v47 = vld [vmem:[#allocation7 + $0x13f8] sm:$0xff] }
 0x566   :  { %v880_v50 = vld [vmem:[#allocation7 + $0x17d8] sm:$0xff]  ;;  %v12319_v27 = vcombine.high %v752_v12, %v756_v47  ;;  %v12318_v22 = vcombine.low %v752_v12, %v756_v47 }
 0x567   :  { %10383 = vmatpush1.bf16.msra.mxu0 %v12230_v43  ;;  %v884_v38 = vld [vmem:[#allocation7 + $0x17f8] sm:$0xff] }
 0x568   :  { %10424 = vmatpush1.bf16.msra.mxu1 %v12358_v61  ;;  %10384 = vmatprep.subr.bf16.mxu0 %v12223_v33  ;;  %v12447_v45 = vcombine.high %v880_v50, %v884_v38  ;;  %v744_v49 = vld [vmem:[#allocation7 + $0x1398] sm:$0xff]  ;;  %v12446_v15 = vcombine.low %v880_v50, %v884_v38 }
 0x569   :  { %10425 = vmatprep.subr.bf16.mxu1 %v12351_v59  ;;  %v748_v51 = vld [vmem:[#allocation7 + $0x13b8] sm:$0xff] }
 0x56a   :  { %v872_v56 = vld [vmem:[#allocation7 + $0x1798] sm:$0xff]  ;;  %v12311_v9 = vcombine.high %v744_v49, %v748_v51  ;;  %v12310_v24 = vcombine.low %v744_v49, %v748_v51 }
 0x56b   :  { %10385 = vmatpush1.bf16.msra.mxu0 %v12222_v21  ;;  %v876_v5 = vld [vmem:[#allocation7 + $0x17b8] sm:$0xff] }
 0x56c   :  { %10426 = vmatpush1.bf16.msra.mxu1 %v12350_v20  ;;  %10386 = vmatprep.subr.bf16.mxu0 %v12215_v35  ;;  %v12439_v18 = vcombine.high %v872_v56, %v876_v5  ;;  %v736_v3 = vld [vmem:[#allocation7 + $0x1358] sm:$0xff]  ;;  %v12438_v43 = vcombine.low %v872_v56, %v876_v5 }
 0x56d   :  { %10427 = vmatprep.subr.bf16.mxu1 %v12343_v23  ;;  %v740_v57 = vld [vmem:[#allocation7 + $0x1378] sm:$0xff] }
 0x56e   :  { %v864_v6 = vld [vmem:[#allocation7 + $0x1758] sm:$0xff]  ;;  %v12303_v61 = vcombine.high %v736_v3, %v740_v57  ;;  %v12302_v36 = vcombine.low %v736_v3, %v740_v57 }
 0x56f   :  { %10387 = vmatpush1.bf16.msra.mxu0 %v12214_v31  ;;  %v868_v4 = vld [vmem:[#allocation7 + $0x1778] sm:$0xff] }
 0x570   :  { %10428 = vmatpush1.bf16.msra.mxu1 %v12342_v1  ;;  %10388 = vmatprep.subr.bf16.mxu0 %v12207_v32  ;;  %v12431_v33 = vcombine.high %v864_v6, %v868_v4  ;;  %v728_v59 = vld [vmem:[#allocation7 + $0x1318] sm:$0xff]  ;;  %v12430_v21 = vcombine.low %v864_v6, %v868_v4 }
 0x571   :  { %10429 = vmatprep.subr.bf16.mxu1 %v12335_v34  ;;  %v732_v62 = vld [vmem:[#allocation7 + $0x1338] sm:$0xff] }
 0x572   :  { %v856_v14 = vld [vmem:[#allocation7 + $0x1718] sm:$0xff]  ;;  %v12295_v20 = vcombine.high %v728_v59, %v732_v62  ;;  %v12294_v63 = vcombine.low %v728_v59, %v732_v62 }
 0x573   :  { %10389 = vmatpush1.bf16.msra.mxu0 %v12206_v39  ;;  %v860_v17 = vld [vmem:[#allocation7 + $0x1738] sm:$0xff] }
 0x574   :  { %10430 = vmatpush1.bf16.msra.mxu1 %v12334_v60  ;;  %10390 = vmatprep.subr.bf16.mxu0 %v12199_v48  ;;  %v12423_v35 = vcombine.high %v856_v14, %v860_v17  ;;  %v720_v23 = vld [vmem:[#allocation7 + $0x12d8] sm:$0xff]  ;;  %v12422_v31 = vcombine.low %v856_v14, %v860_v17 }
 0x575   :  { %10431 = vmatprep.subr.bf16.mxu1 %v12327_v19  ;;  %v724_v25 = vld [vmem:[#allocation7 + $0x12f8] sm:$0xff] }
 0x576   :  { %v848_v41 = vld [vmem:[#allocation7 + $0x16d8] sm:$0xff]  ;;  %v12287_v1 = vcombine.high %v720_v23, %v724_v25  ;;  %v12286_v10 = vcombine.low %v720_v23, %v724_v25 }
 0x577   :  { %10391 = vmatpush1.bf16.msra.mxu0 %v12198_v37  ;;  %v852_v26 = vld [vmem:[#allocation7 + $0x16f8] sm:$0xff] }
 0x578   :  { %10432 = vmatpush1.bf16.msra.mxu1 %v12326_v58  ;;  %10392 = vmatprep.subr.bf16.mxu0 %v12319_v27  ;;  %v12415_v32 = vcombine.high %v848_v41, %v852_v26  ;;  %v712_v34 = vld [vmem:[#allocation7 + $0x1298] sm:$0xff]  ;;  %v12414_v39 = vcombine.low %v848_v41, %v852_v26 }
 0x579   :  { %10433 = vmatprep.subr.bf16.mxu1 %v12447_v45  ;;  %v716_v2 = vld [vmem:[#allocation7 + $0x12b8] sm:$0xff] }
 0x57a   :  { %v840_v52 = vld [vmem:[#allocation7 + $0x1698] sm:$0xff]  ;;  %v12279_v60 = vcombine.high %v712_v34, %v716_v2  ;;  %v12278_v38 = vcombine.low %v712_v34, %v716_v2 }
 0x57b   :  { %10393 = vmatpush2.bf16.msra.mxu0 %v12318_v22  ;;  %v844_v0 = vld [vmem:[#allocation7 + $0x16b8] sm:$0xff] }
 0x57c   :  { %10434 = vmatpush2.bf16.msra.mxu1 %v12446_v15  ;;  %10394 = vmatprep.subr.bf16.mxu0 %v12311_v9  ;;  %v12407_v48 = vcombine.high %v840_v52, %v844_v0  ;;  %v704_v19 = vld [vmem:[#allocation7 + $0x1258] sm:$0xff]  ;;  %v12406_v37 = vcombine.low %v840_v52, %v844_v0 }
 0x57d   :  { %10435 = vmatprep.subr.bf16.mxu1 %v12439_v18  ;;  %v708_v12 = vld [vmem:[#allocation7 + $0x1278] sm:$0xff] }
 0x57e   :  { %v832_v47 = vld [vmem:[#allocation7 + $0x1658] sm:$0xff]  ;;  %v12271_v58 = vcombine.high %v704_v19, %v708_v12  ;;  %v12270_v5 = vcombine.low %v704_v19, %v708_v12 }
 0x57f   :  { %10395 = vmatpush2.bf16.msra.mxu0 %v12310_v24  ;;  %v836_v50 = vld [vmem:[#allocation7 + $0x1678] sm:$0xff] }
 0x580   :  { %10436 = vmatpush2.bf16.msra.mxu1 %v12438_v43  ;;  %10396 = vmatprep.subr.bf16.mxu0 %v12303_v61  ;;  %v12399_v27 = vcombine.high %v832_v47, %v836_v50  ;;  %v696_v45 = vld [vmem:[#allocation7 + $0x1218] sm:$0xff]  ;;  %v12398_v22 = vcombine.low %v832_v47, %v836_v50 }
 0x581   :  { %10437 = vmatprep.subr.bf16.mxu1 %v12431_v33  ;;  %v700_v49 = vld [vmem:[#allocation7 + $0x1238] sm:$0xff] }
 0x582   :  { %v824_v51 = vld [vmem:[#allocation7 + $0x1618] sm:$0xff]  ;;  %v12263_v15 = vcombine.high %v696_v45, %v700_v49  ;;  %v12262_v4 = vcombine.low %v696_v45, %v700_v49 }
 0x583   :  { %10397 = vmatpush2.bf16.msra.mxu0 %v12302_v36  ;;  %v828_v56 = vld [vmem:[#allocation7 + $0x1638] sm:$0xff] }
 0x584   :  { %10438 = vmatpush2.bf16.msra.mxu1 %v12430_v21  ;;  %10398 = vmatprep.subr.bf16.mxu0 %v12295_v20  ;;  %v12391_v9 = vcombine.high %v824_v51, %v828_v56  ;;  %v944_v18 = vld [vmem:[#allocation7 + $0x19d8] sm:$0xff]  ;;  %v12390_v24 = vcombine.low %v824_v51, %v828_v56 }
 0x585   :  { %10439 = vmatprep.subr.bf16.mxu1 %v12423_v35  ;;  %v948_v3 = vld [vmem:[#allocation7 + $0x19f8] sm:$0xff] }
 0x586   :  { %v1072_v57 = vld [vmem:[#allocation7 + $0x1dd8] sm:$0xff]  ;;  %v12511_v43 = vcombine.high %v944_v18, %v948_v3  ;;  %v12510_v17 = vcombine.low %v944_v18, %v948_v3 }
 0x587   :  { %10399 = vmatpush2.bf16.msra.mxu0 %v12294_v63  ;;  %v1076_v6 = vld [vmem:[#allocation7 + $0x1df8] sm:$0xff] }
 0x588   :  { %10440 = vmatpush2.bf16.msra.mxu1 %v12422_v31  ;;  %10400 = vmatprep.subr.bf16.mxu0 %v12287_v1  ;;  %v12639_v61 = vcombine.high %v1072_v57, %v1076_v6  ;;  %v936_v33 = vld [vmem:[#allocation7 + $0x1998] sm:$0xff]  ;;  %v12638_v36 = vcombine.low %v1072_v57, %v1076_v6 }
 0x589   :  { %10441 = vmatprep.subr.bf16.mxu1 %v12415_v32  ;;  %v940_v59 = vld [vmem:[#allocation7 + $0x19b8] sm:$0xff] }
 0x58a   :  { %v1064_v62 = vld [vmem:[#allocation7 + $0x1d98] sm:$0xff]  ;;  %v12503_v21 = vcombine.high %v936_v33, %v940_v59  ;;  %v12502_v1 = vcombine.low %v936_v33, %v940_v59 }
 0x58b   :  { %10401 = vmatpush2.bf16.msra.mxu0 %v12286_v10  ;;  %v1068_v14 = vld [vmem:[#allocation7 + $0x1db8] sm:$0xff] }
 0x58c   :  { %10442 = vmatpush2.bf16.msra.mxu1 %v12414_v39  ;;  %10402 = vmatprep.subr.bf16.mxu0 %v12279_v60  ;;  %v12631_v20 = vcombine.high %v1064_v62, %v1068_v14  ;;  %v928_v35 = vld [vmem:[#allocation7 + $0x1958] sm:$0xff]  ;;  %v12630_v34 = vcombine.low %v1064_v62, %v1068_v14 }
 0x58d   :  { %10443 = vmatprep.subr.bf16.mxu1 %v12407_v48  ;;  %v932_v23 = vld [vmem:[#allocation7 + $0x1978] sm:$0xff] }
 0x58e   :  { %v1056_v41 = vld [vmem:[#allocation7 + $0x1d58] sm:$0xff]  ;;  %v12495_v2 = vcombine.high %v928_v35, %v932_v23  ;;  %v12494_v47 = vcombine.low %v928_v35, %v932_v23 }
 0x58f   :  { %10403 = vmatpush2.bf16.msra.mxu0 %v12278_v38  ;;  %v1060_v26 = vld [vmem:[#allocation7 + $0x1d78] sm:$0xff] }
 0x590   :  { %10444 = vmatpush2.bf16.msra.mxu1 %v12406_v37  ;;  %10404 = vmatprep.subr.bf16.mxu0 %v12271_v58  ;;  %v920_v39 = vld [vmem:[#allocation7 + $0x1918] sm:$0xff] }
 0x591   :  { %10445 = vmatprep.subr.bf16.mxu1 %v12399_v27  ;;  %v924_v60 = vld [vmem:[#allocation7 + $0x1938] sm:$0xff] }
 0x592   :  { %v1052_v48 = vld [vmem:[#allocation7 + $0x1d38] sm:$0xff]  ;;  %v12487_v38 = vcombine.high %v920_v39, %v924_v60  ;;  %v12486_v51 = vcombine.low %v920_v39, %v924_v60 }
 0x593   :  { %10405 = vmatpush2.bf16.msra.mxu0 %v12270_v5  ;;  %v912_v27 = vld [vmem:[#allocation7 + $0x18d8] sm:$0xff] }
 0x594   :  { %10446 = vmatpush2.bf16.msra.mxu1 %v12398_v22  ;;  %10406 = vmatprep.subr.bf16.mxu0 %v12263_v15  ;;  %v1040_v45 = vld [vmem:[#allocation7 + $0x1cd8] sm:$0xff] }
 0x595   :  { %10447 = vmatprep.subr.bf16.mxu1 %v12391_v9  ;;  %v1044_v49 = vld [vmem:[#allocation7 + $0x1cf8] sm:$0xff] }
 0x596   :  { %v12607_v5 = vcombine.high %v1040_v45, %v1044_v49  ;;  %v904_v22 = vld [vmem:[#allocation7 + $0x1898] sm:$0xff]  ;;  %v12606_v57 = vcombine.low %v1040_v45, %v1044_v49 }
 0x597   :  { %10407 = vmatpush2.bf16.msra.mxu0 %v12262_v4  ;;  %v908_v15 = vld [vmem:[#allocation7 + $0x18b8] sm:$0xff] }
 0x598   :  { %10448 = vmatpush2.bf16.msra.mxu1 %v12390_v24  ;;  %10458 = vmatprep.subr.bf16.mxu0 %v12511_v43  ;;  %v1032_v9 = vld [vmem:[#allocation7 + $0x1c98] sm:$0xff]  ;;  %v12471_v6 = vcombine.high %v904_v22, %v908_v15  ;;  %v12470_v59 = vcombine.low %v904_v22, %v908_v15 }
 0x599   :  { %10499 = vmatprep.subr.bf16.mxu1 %v12639_v61  ;;  %v1036_v18 = vld [vmem:[#allocation7 + $0x1cb8] sm:$0xff] }
 0x59a   :  { %v10164_v25 = vpop.f32.mrf.mxu0  ;;  %10409 = vmatmul.mubr.bf16.vlgmr.msra.gmra.mxu0 %v13366_v54  ;;  %v12623_v54 = vcombine.high %v1056_v41, %v1060_v26  ;;  %v12599_v4 = vcombine.high %v1032_v9, %v1036_v18  ;;  %v896_v24 = vld [vmem:[#allocation7 + $0x1858] sm:$0xff]  ;;  %v12598_v62 = vcombine.low %v1032_v9, %v1036_v18 }
 0x59b   :  { %v10165_v63 = vadd.f32 %v10164_v25, %v13500_v46  ;;  %v10205_v31 = vpop.f32.mrf.mxu1  ;;  %10450 = vmatmul.mubr.bf16.vlgmr.msra.gmra.mxu1 %v13373_v8  ;;  %10459 = vmatpush1.bf16.msra.mxu0 %v12510_v17  ;;  %v1048_v8 = vld [vmem:[#allocation7 + $0x1d18] sm:$0xff] }
 0x59c   :  { %10500 = vmatpush1.bf16.msra.mxu1 %v12638_v36  ;;  %v10166_v32 = vpop.f32.mrf.mxu0  ;;  %10460 = vmatprep.subr.bf16.mxu0 %v12503_v21  ;;  %v12615_v58 = vcombine.high %v1048_v8, %v1052_v48  ;;  %v900_v43 = vld [vmem:[#allocation7 + $0x1878] sm:$0xff] }
 0x59d   :  { %v13510_v52 = vadd.f32 %v10205_v31, %v10165_v63  ;;  %v10167_v0 = vadd.f32 %v10166_v32, %v13505_v55  ;;  %v10207_v10 = vpop.f32.mrf.mxu1  ;;  %10501 = vmatprep.subr.bf16.mxu1 %v12631_v20  ;;  %10490 = vmatprep.mubr.bf16.mxu0 %v13369_v7  ;;  %v12622_v55 = vcombine.low %v1056_v41, %v1060_v26  ;;  %v916_v7 = vld [vmem:[#allocation7 + $0x18f8] sm:$0xff] }
 0x59e   :  { %v10168_v46 = vpop.f32.mrf.mxu0  ;;  %10531 = vmatprep.mubr.bf16.mxu1 %v13378_v13  ;;  %v12614_v13 = vcombine.low %v1048_v8, %v1052_v48  ;;  %v12479_v56 = vcombine.high %v912_v27, %v916_v7  ;;  %v12478_v3 = vcombine.low %v912_v27, %v916_v7  ;;  %v1024_v61 = vld [vmem:[#allocation7 + $0x1c58] sm:$0xff]  ;;  %v12463_v14 = vcombine.high %v896_v24, %v900_v43 }
 0x59f   :  { %v13515_v19 = vadd.f32 %v10207_v10, %v10167_v0  ;;  %v10209_v12 = vpop.f32.mrf.mxu1  ;;  %10461 = vmatpush1.bf16.msra.mxu0 %v12502_v1  ;;  %v1028_v33 = vld [vmem:[#allocation7 + $0x1c78] sm:$0xff]  ;;  %v12462_v23 = vcombine.low %v896_v24, %v900_v43 }
 0x5a0   :  { %10502 = vmatpush1.bf16.msra.mxu1 %v12630_v34  ;;  %v10169_v50 = vpop.f32.mrf.mxu0  ;;  %10462 = vmatprep.subr.bf16.mxu0 %v12495_v2  ;;  %v12591_v17 = vcombine.high %v1024_v61, %v1028_v33  ;;  %v888_v36 = vld [vmem:[#allocation7 + $0x1818] sm:$0xff]  ;;  %v12590_v25 = vcombine.low %v1024_v61, %v1028_v33 }
 0x5a1   :  { %v10210_v37 = vpop.f32.mrf.mxu1  ;;  %10503 = vmatprep.subr.bf16.mxu1 %v12623_v54  ;;  %v892_v21 = vld [vmem:[#allocation7 + $0x1838] sm:$0xff] }
 0x5a2   :  { %v1016_v20 = vld [vmem:[#allocation7 + $0x1c18] sm:$0xff]  ;;  %v12455_v41 = vcombine.high %v888_v36, %v892_v21  ;;  %v12454_v34 = vcombine.low %v888_v36, %v892_v21 }
 0x5a3   :  { %10463 = vmatpush1.bf16.msra.mxu0 %v12494_v47  ;;  %v1020_v35 = vld [vmem:[#allocation7 + $0x1c38] sm:$0xff] }
 0x5a4   :  { %10504 = vmatpush1.bf16.msra.mxu1 %v12622_v55  ;;  %10464 = vmatprep.subr.bf16.mxu0 %v12487_v38  ;;  %v12583_v26 = vcombine.high %v1016_v20, %v1020_v35  ;;  %v1008_v63 = vld [vmem:[#allocation7 + $0x1bd8] sm:$0xff]  ;;  %v12582_v2 = vcombine.low %v1016_v20, %v1020_v35 }
 0x5a5   :  { %10505 = vmatprep.subr.bf16.mxu1 %v12615_v58  ;;  %v1012_v31 = vld [vmem:[#allocation7 + $0x1bf8] sm:$0xff] }
 0x5a6   :  { %v1136_v1 = vld [vmem:[#allocation7 + $0x1fd8] sm:$0xff]  ;;  %v12575_v0 = vcombine.high %v1008_v63, %v1012_v31  ;;  %v12574_v8 = vcombine.low %v1008_v63, %v1012_v31 }
 0x5a7   :  { %10465 = vmatpush1.bf16.msra.mxu0 %v12486_v51  ;;  %v1140_v32 = vld [vmem:[#allocation7 + $0x1ff8] sm:$0xff] }
 0x5a8   :  { %10506 = vmatpush1.bf16.msra.mxu1 %v12614_v13  ;;  %10466 = vmatprep.subr.bf16.mxu0 %v12479_v56  ;;  %v12703_v10 = vcombine.high %v1136_v1, %v1140_v32  ;;  %v1000_v54 = vld [vmem:[#allocation7 + $0x1b98] sm:$0xff]  ;;  %v12702_v48 = vcombine.low %v1136_v1, %v1140_v32 }
 0x5a9   :  { %10507 = vmatprep.subr.bf16.mxu1 %v12607_v5  ;;  %v1004_v39 = vld [vmem:[#allocation7 + $0x1bb8] sm:$0xff] }
 0x5aa   :  { %v1128_v60 = vld [vmem:[#allocation7 + $0x1f98] sm:$0xff]  ;;  %v12567_v12 = vcombine.high %v1000_v54, %v1004_v39  ;;  %v12566_v58 = vcombine.low %v1000_v54, %v1004_v39  ;;  %v10556_v54 = vsub.s32 3, %v13187_v44 }
 0x5ab   :  { %10467 = vmatpush1.bf16.msra.mxu0 %v12478_v3  ;;  %v1132_v46 = vld [vmem:[#allocation7 + $0x1fb8] sm:$0xff] }
 0x5ac   :  { %10508 = vmatpush1.bf16.msra.mxu1 %v12606_v57  ;;  %10468 = vmatprep.subr.bf16.mxu0 %v12471_v6  ;;  %v12695_v47 = vcombine.high %v1128_v60, %v1132_v46  ;;  %v992_v50 = vld [vmem:[#allocation7 + $0x1b58] sm:$0xff]  ;;  %v12694_v27 = vcombine.low %v1128_v60, %v1132_v46 }
 0x5ad   :  { %10509 = vmatprep.subr.bf16.mxu1 %v12599_v4  ;;  %v996_v55 = vld [vmem:[#allocation7 + $0x1b78] sm:$0xff] }
 0x5ae   :  { %v1120_v38 = vld [vmem:[#allocation7 + $0x1f58] sm:$0xff]  ;;  %v12559_v7 = vcombine.high %v992_v50, %v996_v55  ;;  %v12558_v5 = vcombine.low %v992_v50, %v996_v55 }
 0x5af   :  { %10469 = vmatpush1.bf16.msra.mxu0 %v12470_v59  ;;  %v1124_v37 = vld [vmem:[#allocation7 + $0x1f78] sm:$0xff] }
 0x5b0   :  { %10510 = vmatpush1.bf16.msra.mxu1 %v12598_v62  ;;  %10470 = vmatprep.subr.bf16.mxu0 %v12463_v14  ;;  %v12687_v45 = vcombine.high %v1120_v38, %v1124_v37  ;;  %v984_v49 = vld [vmem:[#allocation7 + $0x1b18] sm:$0xff]  ;;  %v12686_v22 = vcombine.low %v1120_v38, %v1124_v37  ;;  %v12873_v38 = vld [vmem:[#allocation11 + $0x78] sm:$0xff]  }
 0x5b1   :  { %10511 = vmatprep.subr.bf16.mxu1 %v12591_v17  ;;  %v988_v51 = vld [vmem:[#allocation7 + $0x1b38] sm:$0xff]  ;;  %v12874_v37 = vld [vmem:[#allocation11 + $0xf8] sm:$0xff]  }
 0x5b2   :  { %v1112_v13 = vld [vmem:[#allocation7 + $0x1f18] sm:$0xff]  ;;  %v12551_v15 = vcombine.high %v984_v49, %v988_v51  ;;  %v12550_v4 = vcombine.low %v984_v49, %v988_v51 }
 0x5b3   :  { %10471 = vmatpush1.bf16.msra.mxu0 %v12462_v23  ;;  %v1116_v56 = vld [vmem:[#allocation7 + $0x1f38] sm:$0xff] }
 0x5b4   :  { %10512 = vmatpush1.bf16.msra.mxu1 %v12590_v25  ;;  %10472 = vmatprep.subr.bf16.mxu0 %v12455_v41  ;;  %v12679_v9 = vcombine.high %v1112_v13, %v1116_v56  ;;  %v976_v18 = vld [vmem:[#allocation7 + $0x1ad8] sm:$0xff]  ;;  %v12678_v24 = vcombine.low %v1112_v13, %v1116_v56 }
 0x5b5   :  { %10513 = vmatprep.subr.bf16.mxu1 %v12583_v26  ;;  %v980_v3 = vld [vmem:[#allocation7 + $0x1af8] sm:$0xff] }
 0x5b6   :  { %v1104_v57 = vld [vmem:[#allocation7 + $0x1ed8] sm:$0xff]  ;;  %v12543_v43 = vcombine.high %v976_v18, %v980_v3  ;;  %v12542_v17 = vcombine.low %v976_v18, %v980_v3  ;;  %v12881_v18 = vld [vmem:[#allocation11 + $0x68] sm:$0xff]  }
 0x5b7   :  { %10473 = vmatpush1.bf16.msra.mxu0 %v12454_v34  ;;  %v1108_v6 = vld [vmem:[#allocation7 + $0x1ef8] sm:$0xff] }
 0x5b8   :  { %10514 = vmatpush1.bf16.msra.mxu1 %v12582_v2  ;;  %10474 = vmatprep.subr.bf16.mxu0 %v12575_v0  ;;  %v12671_v61 = vcombine.high %v1104_v57, %v1108_v6  ;;  %v968_v33 = vld [vmem:[#allocation7 + $0x1a98] sm:$0xff]  ;;  %v12670_v36 = vcombine.low %v1104_v57, %v1108_v6  ;;  %v10548_v2 = vsub.s32 1, %v13187_v44  ;;  %v12882_v6 = vld [vmem:[#allocation11 + $0xe8] sm:$0xff]  }
 0x5b9   :  { %10515 = vmatprep.subr.bf16.mxu1 %v12703_v10  ;;  %v972_v59 = vld [vmem:[#allocation7 + $0x1ab8] sm:$0xff] }
 0x5ba   :  { %v1096_v62 = vld [vmem:[#allocation7 + $0x1e98] sm:$0xff]  ;;  %v12535_v21 = vcombine.high %v968_v33, %v972_v59  ;;  %v12534_v26 = vcombine.low %v968_v33, %v972_v59  ;;  %v12885_v33 = vld [vmem:[#allocation11 + $0x60] sm:$0xff]  }
 0x5bb   :  { %10475 = vmatpush2.bf16.msra.mxu0 %v12574_v8  ;;  %v1100_v14 = vld [vmem:[#allocation7 + $0x1eb8] sm:$0xff]  ;;  %v13519_v8 = vld [vmem:[#allocation10] sm:$0xff] }
 0x5bc   :  { %10516 = vmatpush2.bf16.msra.mxu1 %v12702_v48  ;;  %10476 = vmatprep.subr.bf16.mxu0 %v12567_v12  ;;  %v12663_v20 = vcombine.high %v1096_v62, %v1100_v14  ;;  %v960_v35 = vld [vmem:[#allocation7 + $0x1a58] sm:$0xff]  ;;  %v12662_v63 = vcombine.low %v1096_v62, %v1100_v14  ;;  %v10549_v12 = vrot.slane %v13519_v8, %v10548_v2  ;;  %v12886_v62 = vld [vmem:[#allocation11 + $0xe0] sm:$0xff]  }
 0x5bd   :  { %10517 = vmatprep.subr.bf16.mxu1 %v12695_v47  ;;  %v964_v23 = vld [vmem:[#allocation7 + $0x1a78] sm:$0xff]  ;;  %v10557_v47 = vrot.slane %v13519_v8, %v10556_v54  ;;  %v12888_v14 = vld [vmem:[#allocation11 + $0xa0] sm:$0xff]  }
 0x5be   :  { %v1088_v25 = vld [vmem:[#allocation7 + $0x1e58] sm:$0xff]  ;;  %v12527_v31 = vcombine.high %v960_v35, %v964_v23  ;;  %v12526_v39 = vcombine.low %v960_v35, %v964_v23 }
 0x5bf   :  { %10477 = vmatpush2.bf16.msra.mxu0 %v12566_v58  ;;  %v1092_v41 = vld [vmem:[#allocation7 + $0x1e78] sm:$0xff]  ;;  %v10583_v58 = vadd.f32 %v10549_v12, %v13435_v16  ;;  %v12904_v12 = vld [vmem:[#allocation11 + $0x80] sm:$0xff]  }
 0x5c0   :  { %10518 = vmatpush2.bf16.msra.mxu1 %v12694_v27  ;;  %10478 = vmatprep.subr.bf16.mxu0 %v12559_v7  ;;  %v12655_v1 = vcombine.high %v1088_v25, %v1092_v41  ;;  %v952_v32 = vld [vmem:[#allocation7 + $0x1a18] sm:$0xff]  ;;  %v12654_v60 = vcombine.low %v1088_v25, %v1092_v41  ;;  %v10585_v27 = vadd.f32 %v10557_v47, %v13475_v11  ;;  %v12875_v7 = vld [vmem:[#allocation11 + $0x38] sm:$0xff]   ;;  %v10544_v41 = vsub.s32 0, %v13187_v44 }
 0x5c1   :  { %10519 = vmatprep.subr.bf16.mxu1 %v12687_v45  ;;  %v956_v34 = vld [vmem:[#allocation7 + $0x1a38] sm:$0xff]  ;;  %v12876_v45 = vld [vmem:[#allocation11 + $0xb8] sm:$0xff]   ;;  %v10591_v51 = vpack.c.bf16 %v10583_v58, %v10583_v58 }
 0x5c2   :  { %v1080_v0 = vld [vmem:[#allocation7 + $0x1e18] sm:$0xff]  ;;  %v12519_v46 = vcombine.high %v952_v32, %v956_v34  ;;  %v12518_v50 = vcombine.low %v952_v32, %v956_v34  ;;  %v10564_v32 = vsub.s32 5, %v13187_v44  ;;  %v12899_v34 = vld [vmem:[#allocation11 + $0x8] sm:$0xff]   ;;  %v10545_v2 = vrot.slane %v13519_v8, %v10544_v41  ;;  %v12905_v47 = vld [vmem:[#allocation11 + $0x178] sm:$0xff]  }
 0x5c3   :  { %10479 = vmatpush2.bf16.msra.mxu0 %v12558_v5  ;;  %v1084_v10 = vld [vmem:[#allocation7 + $0x1e38] sm:$0xff]  ;;  %v10593_v5 = vpack.c.bf16 %v10585_v27, %v10585_v27 }
 0x5c4   :  { %10520 = vmatpush2.bf16.msra.mxu1 %v12686_v22  ;;  %10480 = vmatprep.subr.bf16.mxu0 %v12551_v15  ;;  %v12647_v48 = vcombine.high %v1080_v0, %v1084_v10  ;;  %v12646_v55 = vcombine.low %v1080_v0, %v1084_v10  ;;  %v12877_v49 = vld [vmem:[#allocation11 + $0x70] sm:$0xff]   ;;  %v12900_v0 = vld [vmem:[#allocation11 + $0x88] sm:$0xff]   ;;  %v12901_v10 = vld [vmem:[#allocation11 + $0x40] sm:$0xff]  }
 0x5c5   :  { %10521 = vmatprep.subr.bf16.mxu1 %v12679_v9  ;;  %v12878_v56 = vld [vmem:[#allocation11 + $0xf0] sm:$0xff]  }
 0x5c6   :  { %v12879_v16 = vld [vmem:[#allocation11 + $0x30] sm:$0xff]  }
 0x5c7   :  { %10481 = vmatpush2.bf16.msra.mxu0 %v12550_v4  ;;  %v12880_v9 = vld [vmem:[#allocation11 + $0xb0] sm:$0xff]  }
 0x5c8   :  { %10522 = vmatpush2.bf16.msra.mxu1 %v12678_v24  ;;  %10482 = vmatprep.subr.bf16.mxu0 %v12543_v43  ;;  %v12883_v24 = vld [vmem:[#allocation11 + $0x28] sm:$0xff]   ;;  %v12893_v35 = vld [vmem:[#allocation11 + $0x50] sm:$0xff]  }
 0x5c9   :  { %10523 = vmatprep.subr.bf16.mxu1 %v12671_v61  ;;  %v12884_v61 = vld [vmem:[#allocation11 + $0xa8] sm:$0xff]   ;;  %v12894_v23 = vld [vmem:[#allocation11 + $0xd0] sm:$0xff]  }
 0x5ca   :  { %v12895_v25 = vld [vmem:[#allocation11 + $0x10] sm:$0xff]  }
 0x5cb   :  { %10483 = vmatpush2.bf16.msra.mxu0 %v12542_v17  ;;  %v12889_v17 = vld [vmem:[#allocation11 + $0x58] sm:$0xff]   ;;  %v12907_v27 = vld [vmem:[#allocation11 + $0x170] sm:$0xff]  }
 0x5cc   :  { %10524 = vmatpush2.bf16.msra.mxu1 %v12670_v36  ;;  %10484 = vmatprep.subr.bf16.mxu0 %v12535_v21  ;;  %v12890_v36 = vld [vmem:[#allocation11 + $0xd8] sm:$0xff]  }
 0x5cd   :  { %10525 = vmatprep.subr.bf16.mxu1 %v12663_v20  ;;  %v12891_v21 = vld [vmem:[#allocation11 + $0x18] sm:$0xff]  }
 0x5ce   :  { %v12892_v20 = vld [vmem:[#allocation11 + $0x98] sm:$0xff]  }
 0x5cf   :  { %10485 = vmatpush2.bf16.msra.mxu0 %v12534_v26  ;;  %v12896_v26 = vld [vmem:[#allocation11 + $0x90] sm:$0xff]  }
 0x5d0   :  { %10526 = vmatpush2.bf16.msra.mxu1 %v12662_v63  ;;  %10486 = vmatprep.subr.bf16.mxu0 %v12527_v31  ;;  %v12897_v63 = vld [vmem:[#allocation11 + $0x48] sm:$0xff]   ;;  %v10552_v31 = vsub.s32 2, %v13187_v44 }
 0x5d1   :  { %10527 = vmatprep.subr.bf16.mxu1 %v12655_v1  ;;  %v12898_v1 = vld [vmem:[#allocation11 + $0xc8] sm:$0xff]  }
 0x5d2   :  { %v10553_v54 = vrot.slane %v13519_v8, %v10552_v31 }
 0x5d3   :  { %10487 = vmatpush2.bf16.msra.mxu0 %v12526_v39  ;;  %v12902_v39 = vld [vmem:[#allocation11 + $0xc0] sm:$0xff]  }
 0x5d4   :  { %10528 = vmatpush2.bf16.msra.mxu1 %v12654_v60  ;;  %10488 = vmatprep.subr.bf16.mxu0 %v12519_v46  ;;  %v10565_v60 = vrot.slane %v13519_v8, %v10564_v32  ;;  %v12903_v46 = vld [vmem:[#allocation11] sm:$0xff]  }
 0x5d5   :  { %10529 = vmatprep.subr.bf16.mxu1 %v12647_v48  ;;  %v10582_v48 = vadd.f32 %v10545_v2, %v13430_v53  ;;  %v12935_v2 = vld [vmem:[#allocation11 + $0x1c0] sm:$0xff]  }
 0x5d7   :  { %10489 = vmatpush2.bf16.msra.mxu0 %v12518_v50  ;;  %v10584_v50 = vadd.f32 %v10553_v54, %v13470_v30  ;;  %v10590_v58 = vpack.c.bf16 %v10582_v48, %v10582_v48  ;;  %v12909_v30 = vld [vmem:[#allocation11 + $0x168] sm:$0xff]  }
 0x5d8   :  { %10530 = vmatpush2.bf16.msra.mxu1 %v12646_v55  ;;  %12769 = vmatprep.subr.bf16.mxu0 %v12873_v38  ;;  %v12921_v55 = vld [vmem:[#allocation11 + $0x1f8] sm:$0xff]   ;;  %v10587_v38 = vadd.f32 %v10565_v60, %v13515_v19  ;;  %v12924_v19 = vld [vmem:[#allocation11 + $0x1b0] sm:$0xff]  }
 0x5d9   :  { %12791 = vmatprep.subr.bf16.mxu1 %v12874_v37  ;;  %v12906_v37 = vld [vmem:[#allocation11 + $0x138] sm:$0xff]  }
 0x5da   :  { %v10246_v13 = vpop.f32.mrf.mxu0  ;;  %10491 = vmatmul.mubr.bf16.vlgmr.msra.gmra.mxu0 %v13391_v28  ;;  %v10595_v53 = vpack.c.bf16 %v10587_v38, %v10587_v38  ;;  %v10572_v38 = vsub.s32 7, %v13187_v44 }
 0x5db   :  { %v10247_v22 = vadd.f32 %v10246_v13, %v13382_v29  ;;  %v10287_v15 = vpop.f32.mrf.mxu1  ;;  %10532 = vmatmul.mubr.bf16.vlgmr.msra.gmra.mxu1 %v13395_v40  ;;  %12770 = vmatpush3.bf16.msra.mxu0 %v12875_v7  ;;  %v10592_v7 = vpack.c.bf16 %v10584_v50, %v10584_v50  ;;  %v12925_v13 = vld [vmem:[#allocation11 + $0x1e8] sm:$0xff]  }
 0x5dc   :  { %11149 = vmatprep.mubr.bf16.mxu0 %v10591_v51  ;;  %12792 = vmatpush3.bf16.msra.mxu1 %v12876_v45  ;;  %v10248_v11 = vpop.f32.mrf.mxu0  ;;  %v12922_v45 = vld [vmem:[#allocation11 + $0x1b8] sm:$0xff]   ;;  %v12908_v51 = vld [vmem:[#allocation11 + $0x130] sm:$0xff]  }
 0x5dd   :  { %v13528_v3 = vadd.f32 %v10287_v15, %v10247_v22  ;;  %11189 = vmatprep.mubr.bf16.mxu1 %v10593_v5  ;;  %v10249_v57 = vadd.f32 %v10248_v11, %v13387_v42  ;;  %v10289_v28 = vpop.f32.mrf.mxu1  ;;  %12771 = vmatprep.subr.bf16.mxu0 %v12877_v49  ;;  %v12887_v42 = vld [vmem:[#allocation11 + $0x20] sm:$0xff]   ;;  %v12923_v49 = vld [vmem:[#allocation11 + $0x1f0] sm:$0xff]   ;;  %v12926_v22 = vld [vmem:[#allocation11 + $0x1a8] sm:$0xff]  }
 0x5de   :  { %v10250_v4 = vpop.f32.mrf.mxu0  ;;  %12793 = vmatprep.subr.bf16.mxu1 %v12878_v56  ;;  %v12910_v56 = vld [vmem:[#allocation11 + $0x128] sm:$0xff]   ;;  %v12911_v5 = vld [vmem:[#allocation11 + $0x160] sm:$0xff]   ;;  %v12913_v11 = vld [vmem:[#allocation11 + $0x158] sm:$0xff]  }
 0x5df   :  { %v13531_v29 = vadd.f32 %v10289_v28, %v10249_v57  ;;  %v10291_v40 = vpop.f32.mrf.mxu1  ;;  %12772 = vmatpush3.bf16.msra.mxu0 %v12879_v16  ;;  %v12927_v15 = vld [vmem:[#allocation11 + $0x1e0] sm:$0xff]   ;;  %v12914_v57 = vld [vmem:[#allocation11 + $0x118] sm:$0xff]   ;;  %v12915_v28 = vld [vmem:[#allocation11 + $0x150] sm:$0xff]  }
 0x5e0   :  { %12794 = vmatpush3.bf16.msra.mxu1 %v12880_v9  ;;  %v10251_v43 = vpop.f32.mrf.mxu0  ;;  %12773 = vmatprep.subr.bf16.mxu0 %v12881_v18  ;;  %v12912_v16 = vld [vmem:[#allocation11 + $0x120] sm:$0xff]   ;;  %v12929_v18 = vld [vmem:[#allocation11 + $0x1d8] sm:$0xff]   ;;  %v12916_v4 = vld [vmem:[#allocation11 + $0x110] sm:$0xff]   ;;  %v10560_v40 = vsub.s32 4, %v13187_v44 }
 0x5e1   :  { %v10292_v59 = vpop.f32.mrf.mxu1  ;;  %12795 = vmatprep.subr.bf16.mxu1 %v12882_v6  ;;  %v12928_v9 = vld [vmem:[#allocation11 + $0x1a0] sm:$0xff]   ;;  %v12930_v6 = vld [vmem:[#allocation11 + $0x198] sm:$0xff]   ;;  %v12918_v43 = vld [vmem:[#allocation11 + $0x108] sm:$0xff]  }
 0x5e2   :  { %v12920_v59 = vld [vmem:[#allocation11 + $0x100] sm:$0xff]  }
 0x5e3   :  { %12774 = vmatpush3.bf16.msra.mxu0 %v12883_v24  ;;  %v12917_v24 = vld [vmem:[#allocation11 + $0x148] sm:$0xff]  }
 0x5e4   :  { %12796 = vmatpush3.bf16.msra.mxu1 %v12884_v61  ;;  %12775 = vmatprep.subr.bf16.mxu0 %v12885_v33  ;;  %v10561_v61 = vrot.slane %v13519_v8, %v10560_v40  ;;  %v12919_v33 = vld [vmem:[#allocation11 + $0x140] sm:$0xff]  }
 0x5e5   :  { %12797 = vmatprep.subr.bf16.mxu1 %v12886_v62 }
 0x5e6   :  { %v10586_v62 = vadd.f32 %v10561_v61, %v13510_v52 }
 0x5e7   :  { %12776 = vmatpush3.bf16.msra.mxu0 %v12887_v42 }
 0x5e8   :  { %12798 = vmatpush3.bf16.msra.mxu1 %v12888_v14  ;;  %12777 = vmatprep.subr.bf16.mxu0 %v12889_v17  ;;  %v10594_v42 = vpack.c.bf16 %v10586_v62, %v10586_v62  ;;  %v12931_v17 = vld [vmem:[#allocation11 + $0x1d0] sm:$0xff]  }
 0x5e9   :  { %12799 = vmatprep.subr.bf16.mxu1 %v12890_v36 }
 0x5eb   :  { %12778 = vmatpush3.bf16.msra.mxu0 %v12891_v21 }
 0x5ec   :  { %12800 = vmatpush3.bf16.msra.mxu1 %v12892_v20  ;;  %12779 = vmatprep.subr.bf16.mxu0 %v12893_v35  ;;  %v12932_v20 = vld [vmem:[#allocation11 + $0x190] sm:$0xff]  }
 0x5ed   :  { %12801 = vmatprep.subr.bf16.mxu1 %v12894_v23 }
 0x5ef   :  { %12780 = vmatpush3.bf16.msra.mxu0 %v12895_v25 }
 0x5f0   :  { %12802 = vmatpush3.bf16.msra.mxu1 %v12896_v26  ;;  %12781 = vmatprep.subr.bf16.mxu0 %v12897_v63  ;;  %v12933_v63 = vld [vmem:[#allocation11 + $0x1c8] sm:$0xff]  }
 0x5f1   :  { %12803 = vmatprep.subr.bf16.mxu1 %v12898_v1  ;;  %v12934_v1 = vld [vmem:[#allocation11 + $0x188] sm:$0xff]  }
 0x5f3   :  { %12782 = vmatpush3.bf16.msra.mxu0 %v12899_v34 }
 0x5f4   :  { %12804 = vmatpush3.bf16.msra.mxu1 %v12900_v0  ;;  %12783 = vmatprep.subr.bf16.mxu0 %v12901_v10 }
 0x5f5   :  { %12805 = vmatprep.subr.bf16.mxu1 %v12902_v39 }
 0x5f7   :  { %12784 = vmatpush3.bf16.msra.mxu0 %v12903_v46 }
 0x5f8   :  { %12806 = vmatpush3.bf16.msra.mxu1 %v12904_v12  ;;  %12813 = vmatprep.subr.bf16.mxu0 %v12905_v47 }
 0x5f9   :  { %12835 = vmatprep.subr.bf16.mxu1 %v12921_v55  ;;  %v10568_v55 = vsub.s32 6, %v13187_v44 }
 0x5fa   :  { %11150 = vmatmul.mubr.bf16.vlgmr.msra.gmra.mxu0 %v10590_v58 }
 0x5fb   :  { %11190 = vmatmul.mubr.bf16.vlgmr.msra.gmra.mxu1 %v10592_v7  ;;  %12814 = vmatpush3.bf16.msra.mxu0 %v12906_v37 }
 0x5fc   :  { %11229 = vmatprep.mubr.bf16.mxu0 %v10595_v53  ;;  %12815 = vmatprep.subr.bf16.mxu0 %v12907_v27 }
 0x5fd   :  { %12836 = vmatpush3.bf16.msra.mxu1 %v12922_v45  ;;  %v10569_v45 = vrot.slane %v13519_v8, %v10568_v55 }
 0x5fe   :  { %12837 = vmatprep.subr.bf16.mxu1 %v12923_v49 }
 0x5ff   :  { %12816 = vmatpush3.bf16.msra.mxu0 %v12908_v51 }
 0x600   :  { %12817 = vmatprep.subr.bf16.mxu0 %v12909_v30 }
 0x601   :  { %12838 = vmatpush3.bf16.msra.mxu1 %v12924_v19  ;;  %v10573_v19 = vrot.slane %v13519_v8, %v10572_v38 }
 0x602   :  { %12839 = vmatprep.subr.bf16.mxu1 %v12925_v13 }
 0x603   :  { %12818 = vmatpush3.bf16.msra.mxu0 %v12910_v56 }
 0x604   :  { %12819 = vmatprep.subr.bf16.mxu0 %v12911_v5 }
 0x605   :  { %12840 = vmatpush3.bf16.msra.mxu1 %v12926_v22 }
 0x606   :  { %12841 = vmatprep.subr.bf16.mxu1 %v12927_v15 }
 0x607   :  { %12820 = vmatpush3.bf16.msra.mxu0 %v12912_v16 }
 0x608   :  { %12821 = vmatprep.subr.bf16.mxu0 %v12913_v11 }
 0x609   :  { %12842 = vmatpush3.bf16.msra.mxu1 %v12928_v9 }
 0x60a   :  { %12843 = vmatprep.subr.bf16.mxu1 %v12929_v18 }
 0x60b   :  { %12822 = vmatpush3.bf16.msra.mxu0 %v12914_v57 }
 0x60c   :  { %12823 = vmatprep.subr.bf16.mxu0 %v12915_v28  ;;  %v12704_v28 = vld [vmem:[#allocation13] ss:$0 sm:$0xff] }
 0x60d   :  { %12844 = vmatpush3.bf16.msra.mxu1 %v12930_v6 }
 0x60e   :  { %12845 = vmatprep.subr.bf16.mxu1 %v12931_v17 }
 0x60f   :  { %12824 = vmatpush3.bf16.msra.mxu0 %v12916_v4 }
 0x610   :  { %12825 = vmatprep.subr.bf16.mxu0 %v12917_v24 }
 0x611   :  { %12846 = vmatpush3.bf16.msra.mxu1 %v12932_v20 }
 0x612   :  { %12847 = vmatprep.subr.bf16.mxu1 %v12933_v63 }
 0x613   :  { %12826 = vmatpush3.bf16.msra.mxu0 %v12918_v43 }
 0x614   :  { %12827 = vmatprep.subr.bf16.mxu0 %v12919_v33 }
 0x615   :  { %12848 = vmatpush3.bf16.msra.mxu1 %v12934_v1 }
 0x616   :  { %12849 = vmatprep.subr.bf16.mxu1 %v12935_v2 }
 0x617   :  { %12828 = vmatpush3.bf16.msra.mxu0 %v12920_v59 }
 0x61a   :  { %v10328_v14 = vpop.f32.mrf.mxu0  ;;  %11230 = vmatmul.mubr.bf16.vlgmr.msra.gmra.mxu0 %v10594_v42 }
 0x61b   :  { %v10329_v36 = vadd.f32 %v10328_v14, %v13528_v3  ;;  %v10369_v21 = vpop.f32.mrf.mxu1  ;;  %v12936_v3 = vld [vmem:[#allocation11 + $0x180] sm:$0xff]  }
 0x61c   :  { %v10330_v35 = vpop.f32.mrf.mxu0  ;;  %12850 = vmatpush3.bf16.msra.mxu1 %v12936_v3 }
 0x61d   :  { %v10370_v23 = vadd.f32 %v10369_v21, %v10329_v36  ;;  %v10331_v25 = vadd.f32 %v10330_v35, %v13531_v29  ;;  %v10371_v41 = vpop.f32.mrf.mxu1 }
 0x61e   :  { %v10332_v26 = vpop.f32.mrf.mxu0 }
 0x61f   :  { %v10372_v52 = vadd.f32 %v10371_v41, %v10331_v25  ;;  %v10373_v31 = vpop.f32.mrf.mxu1 }
 0x620   :  { %v10333_v32 = vpop.f32.mrf.mxu0 }
 0x621   :  { %v10374_v34 = vpop.f32.mrf.mxu1 }
 0x65a   :  { %v10410_v0 = vpop.f32.mrf.mxu0 }
 0x65b   :  { %v10411_v10 = vadd.f32 %v10410_v0, %v10370_v23  ;;  %v10451_v54 = vpop.f32.mrf.mxu1 }
 0x65c   :  { %v10412_v39 = vpop.f32.mrf.mxu0 }
 0x65d   :  { %v10452_v29 = vadd.f32 %v10451_v54, %v10411_v10  ;;  %v10453_v60 = vpop.f32.mrf.mxu1  ;;  %v10413_v50 = vadd.f32 %v10412_v39, %v10372_v52 }
 0x65e   :  { %v10414_v46 = vpop.f32.mrf.mxu0 }
 0x65f   :  { %v10455_v48 = vpop.f32.mrf.mxu1  ;;  %v10454_v58 = vadd.f32 %v10453_v60, %v10413_v50 }
 0x660   :  { %v10415_v12 = vpop.f32.mrf.mxu0 }
 0x661   :  { %v10456_v47 = vpop.f32.mrf.mxu1 }
 0x69a   :  { %v10492_v37 = vpop.f32.mrf.mxu0 }
 0x69b   :  { %v10493_v27 = vadd.f32 %v10492_v37, %v10452_v29  ;;  %v10533_v7 = vpop.f32.mrf.mxu1 }
 0x69c   :  { %v10494_v53 = vpop.f32.mrf.mxu0 }
 0x69d   :  { %v10534_v49 = vadd.f32 %v10533_v7, %v10493_v27  ;;  %v10495_v51 = vadd.f32 %v10494_v53, %v10454_v58  ;;  %v10535_v30 = vpop.f32.mrf.mxu1 }
 0x69e   :  { %v10496_v13 = vpop.f32.mrf.mxu0 }
 0x69f   :  { %v10536_v56 = vadd.f32 %v10535_v30, %v10495_v51  ;;  %v10537_v5 = vpop.f32.mrf.mxu1  ;;  %v10588_v22 = vadd.f32 %v10569_v45, %v10534_v49 }
 0x6a0   :  { %v10497_v15 = vpop.f32.mrf.mxu0 }
 0x6a1   :  { %v10589_v16 = vadd.f32 %v10573_v19, %v10536_v56  ;;  %v10538_v11 = vpop.f32.mrf.mxu1  ;;  %v10596_v9 = vpack.c.bf16 %v10588_v22, %v10588_v22 }
 0x6a3   :  { %v10597_v44 = vpack.c.bf16 %v10589_v16, %v10589_v16 }
 0x6a5   :  { %11269 = vmatprep.mubr.bf16.mxu1 %v10597_v44 }
 0x6a6   :  { %11270 = vmatmul.mubr.bf16.vlgmr.msra.gmra.mxu1 %v10596_v9 }
 0x6ba   :  { %v12785_v18 = vpop.f32.mrf.mxu0 }
 0x6bb   :  { %v12807_v57 = vpop.f32.mrf.mxu1 }
 0x6bc   :  { %v12786_v6 = vpop.f32.mrf.mxu0 }
 0x6bd   :  { %v12787_v4 = vadd.f32 %v12786_v6, %v12785_v18  ;;  %v12808_v40 = vpop.f32.mrf.mxu1 }
 0x6be   :  { %v12809_v24 = vadd.f32 %v12808_v40, %v12807_v57  ;;  %v12788_v43 = vpop.f32.mrf.mxu0 }
 0x6bf   :  { %v11152_v8 = vadd.f32 %v12787_v4, %v12704_v28  ;;  %v12810_v61 = vpop.f32.mrf.mxu1 }
 0x6c0   :  { %v12789_v33 = vpop.f32.mrf.mxu0 }
 0x6c1   :  { %v11192_v59 = vadd.f32 %v12809_v24, %v11152_v8  ;;  %v12811_v62 = vpop.f32.mrf.mxu1 }
 0x6da   :  { %v12829_v42 = vpop.f32.mrf.mxu0 }
 0x6dc   :  { %v12830_v14 = vpop.f32.mrf.mxu0 }
 0x6dd   :  { %v12831_v17 = vadd.f32 %v12830_v14, %v12829_v42 }
 0x6de   :  { %v12832_v36 = vpop.f32.mrf.mxu0 }
 0x6df   :  { %v11232_v21 = vadd.f32 %v12831_v17, %v11192_v59 }
 0x6e0   :  { %v12833_v20 = vpop.f32.mrf.mxu0 }
 0x766   :  { %v12851_v35 = vpop.f32.mrf.mxu1 }
 0x768   :  { %v12852_v23 = vpop.f32.mrf.mxu1 }
 0x769   :  { %v12853_v25 = vadd.f32 %v12852_v23, %v12851_v35 }
 0x76a   :  { %v12854_v41 = vpop.f32.mrf.mxu1 }
 0x76b   :  { %v11272_v26 = vadd.f32 %v12853_v25, %v11232_v21 }
 0x76c   :  { %v12855_v63 = vpop.f32.mrf.mxu1 }
 0x76d   :  { %11277 = vst [vmem:[#allocation14] sm:$0x3] %v11272_v26 }
 0x76e   :  { %13088 = shalt.err (!%p13085_p11)
}
 0x76f   :  { %11287 = dma.vmem_to_hbm [thread:$0]  %s11285_s6, 32, %s13561_s7, [#allocation4]  }
 0x770   :  { %13105 = dma.done.wait [#allocation4], 32  }
 0x771   :  { %13106 = vsyncadd [#allocation4], 4294967264 }
 0x772   :  { %11291 = vsyncpa [#allocation3], 1 }
 0x773   :  { %11292 = vsyncpa [#allocation6], 1 }
 0x774   :  { %11293 = vsyncpa [#allocation9], 1 }
 0x775   :  { %11294 = vsyncpa [#allocation12], 1 }
 0x776   :  { %11295 = vsyncpa [#allocation4], 1 }

</bundles_post_ra>
